<compile_context>
chip_gen: v7x
topology: tpu7x:2x2x1
jax: 0.10.0
libtpu: 0.0.40
codegen_flags: <defaults>
</compile_context>

<pallas_src>
import numpy as np
import jax
import jax.numpy as jnp
from jax.experimental import pallas as pl
from jax.experimental.pallas import tpu as pltpu

# ------------------------------------------------------------- geometry
N_BATCH = 2
C0, C1, C2 = 3, 20, 40
H1 = W1 = 4                       # stage-1 spatial
K1, P1 = 5, 2
HP1, WP1 = H1 + 2 * P1, W1 + 2 * P1     # 8, 8
H2 = W2 = 2                       # stage-2 spatial (after 2x2 maxpool)
K2, P2 = 3, 1
HP2, WP2 = H2 + 2 * P2, W2 + 2 * P2     # 4, 4
EPS = 1e-5

STAGE1 = ["conv1", "conv1_1", "conv1_2", "conv1_3", "conv1_4", "conv1_5", "conv1_6"]
STAGE2 = ["conv2", "conv2_1", "conv2_2", "conv2_3", "conv2_4", "conv2_5", "conv2_6"]


# --------------------------------------------------------------- kernel
def _fused_forward_kernel(*refs):
    x_ref = refs[0]
    s1_w = refs[1:8]
    s1_b = refs[8:15]
    s2_w = refs[15:22]
    s2_b = refs[22:29]
    fc1_w, fc2_w, fc3_w, fc1_b, fc2_b, fc3_b = refs[29:35]
    out_ref = refs[35]
    pad1, pad2 = refs[36], refs[37]          # VMEM scratch, row-strip layout

    n = x_ref.shape[0]

    def conv_flat(pad_ref, w_ref, b_ref, k, hh, relu=False, res=None):
        # pad_ref: (n, hp, wp*c)   w_ref: (k, wp*c, ww*cout)   b_ref: (1, ww*cout)
        wp_c = pad_ref.shape[2]
        out_w = w_ref.shape[2]
        acc = jnp.zeros((n * hh, out_w), jnp.float32) + b_ref[...]
        for kh in range(k):                   # K matmuls; kw is banded in w_ref
            strip = pad_ref[:, kh:kh + hh, :].reshape(n * hh, wp_c)
            acc = acc + jnp.dot(strip, w_ref[kh],
                                preferred_element_type=jnp.float32)
        if relu:
            acc = jnp.maximum(acc, 0.0)
        if res is not None:
            acc = acc + res
        return acc

    def store_interior(pad_ref, act, p, hh, ww, c):
        # write (n*hh, ww*c) activation back into the zero-padded strip buffer
        pad_ref[:, p:p + hh, p * c:(p + ww) * c] = act.reshape(n, hh, ww * c)

    # ---- InstanceNorm2d(3): affine=False, biased variance, eps=1e-5 -------
    x = x_ref[...]                                       # (n, H1, W1, C0) NHWC
    mean = jnp.mean(jnp.mean(x, axis=2, keepdims=True), axis=1, keepdims=True)
    sq = (x - mean) ** 2
    var = jnp.mean(jnp.mean(sq, axis=2, keepdims=True), axis=1, keepdims=True)
    xn = (x - mean) * jax.lax.rsqrt(var + EPS)

    # ---- stage 1: seven 5x5 convs, 4x4 spatial, 20 channels ---------------
    pad1[...] = jnp.zeros(pad1.shape, jnp.float32)
    for j in range(W1):                                  # scatter 3 input chans
        col = (P1 + j) * C1
        pad1[:, P1:P1 + H1, col:col + C0] = xn[:, :, j:j + 1, :].reshape(n, H1, C0)

    x1 = conv_flat(pad1, s1_w[0], s1_b[0], K1, H1, relu=True)
    store_interior(pad1, x1, P1, H1, W1, C1)
    xr = conv_flat(pad1, s1_w[1], s1_b[1], K1, H1, relu=True)
    store_interior(pad1, xr, P1, H1, W1, C1)
    xr = conv_flat(pad1, s1_w[2], s1_b[2], K1, H1, relu=True)
    store_interior(pad1, xr, P1, H1, W1, C1)
    x1_1 = conv_flat(pad1, s1_w[3], s1_b[3], K1, H1, res=x1)
    store_interior(pad1, x1_1, P1, H1, W1, C1)
    xr = conv_flat(pad1, s1_w[4], s1_b[4], K1, H1, relu=True)
    store_interior(pad1, xr, P1, H1, W1, C1)
    xr = conv_flat(pad1, s1_w[5], s1_b[5], K1, H1, relu=True)
    store_interior(pad1, xr, P1, H1, W1, C1)
    x1_2 = conv_flat(pad1, s1_w[6], s1_b[6], K1, H1, res=x1_1)
    store_interior(pad1, x1_2, P1, H1, W1, C1)

    # ---- 2x2 max pool (4x4 -> 2x2), feeds stage-2 padded buffer -----------
    pad2[...] = jnp.zeros(pad2.shape, jnp.float32)
    for ip in range(H2):
        for jp in range(W2):
            r = P1 + 2 * ip
            c = (P1 + 2 * jp) * C1
            win = pad1[:, r:r + 2, c:c + 2 * C1]          # (n, 2, 2*C1)
            rows = jnp.max(win, axis=1)                   # (n, 2*C1)
            pooled = jnp.maximum(rows[:, :C1], rows[:, C1:])
            dst = (P2 + jp) * C2
            pad2[:, P2 + ip:P2 + ip + 1, dst:dst + C1] = pooled.reshape(n, 1, C1)

    # ---- stage 2: seven 3x3 convs, 2x2 spatial, 40 channels ---------------
    x2 = conv_flat(pad2, s2_w[0], s2_b[0], K2, H2)               # no ReLU
    store_interior(pad2, x2, P2, H2, W2, C2)
    xr = conv_flat(pad2, s2_w[1], s2_b[1], K2, H2, relu=True)
    store_interior(pad2, xr, P2, H2, W2, C2)
    xr = conv_flat(pad2, s2_w[2], s2_b[2], K2, H2, relu=True)
    store_interior(pad2, xr, P2, H2, W2, C2)
    x2_1 = conv_flat(pad2, s2_w[3], s2_b[3], K2, H2, res=x2)
    store_interior(pad2, x2_1, P2, H2, W2, C2)
    xr = conv_flat(pad2, s2_w[4], s2_b[4], K2, H2, relu=True)
    store_interior(pad2, xr, P2, H2, W2, C2)
    xr = conv_flat(pad2, s2_w[5], s2_b[5], K2, H2, relu=True)
    store_interior(pad2, xr, P2, H2, W2, C2)
    x2_2 = conv_flat(pad2, s2_w[6], s2_b[6], K2, H2, res=x2_1)
    store_interior(pad2, x2_2, P2, H2, W2, C2)

    # ---- FC head (fc1 decomposed per spatial position so PyTorch's NCHW
    #      view(-1, 160) flatten needs no in-kernel transpose) --------------
    h1 = jnp.zeros((n, 120), jnp.float32) + fc1_b[...]
    for hh in range(H2):
        for ww in range(W2):
            col = (P2 + ww) * C2
            row = pad2[:, P2 + hh:P2 + hh + 1, col:col + C2].reshape(n, C2)
            h1 = h1 + jnp.dot(row, fc1_w[hh * W2 + ww],
                              preferred_element_type=jnp.float32)
    h1 = jnp.maximum(h1, 0.0)
    h2 = jnp.maximum(
        jnp.dot(h1, fc2_w[...], preferred_element_type=jnp.float32) + fc2_b[...],
        0.0)
    out_ref[...] = (jnp.dot(h2, fc3_w[...], preferred_element_type=jnp.float32)
                    + fc3_b[...])


# --------------------------------------------------- init-time weight layout
def _xavier_uniform(key, shape, fan_in, fan_out, gain=1.0):
    bound = gain * (6.0 / (fan_in + fan_out)) ** 0.5
    return jax.random.uniform(key, shape, jnp.float32, -bound, bound)


def _conv_weight_banded(w, cin_full, wp, wout):
    """(Cout, Cin, k, k) PyTorch conv weight -> (k, wp*cin_full, wout*Cout).

    B[kh, w'*cin_full + ci, j*Cout + co] = w[co, ci, kh, w'-j]  (0 <= w'-j < k),
    so with activations in row-strip layout (N*H, wp*cin_full) a KxK 'same'
    conv is  sum_kh  strip_kh @ B[kh].  Missing input channels (ci >= Cin) stay
    zero, matching the zero-initialized padded activation buffer.
    """
    w = np.asarray(w)
    cout, cin, k, _ = w.shape
    b = np.zeros((k, wp * cin_full, wout * cout), np.float32)
    for kh in range(k):
        for j in range(wout):
            for kw in range(k):
                wprime = j + kw
                b[kh,
                  wprime * cin_full:wprime * cin_full + cin,
                  j * cout:(j + 1) * cout] = w[:, :, kh, kw].T
    return jnp.asarray(b)


def _conv_bias_flat(bias, wout):
    # bias_flat[j*Cout + co] = b[co]
    return jnp.asarray(np.tile(np.asarray(bias, np.float32), wout).reshape(1, -1))


def init_params(key):
    """PyTorch-equivalent init (xavier_uniform, zero biases); all layout
    transforms happen once here, not per forward step."""
    p = {}
    conv_defs = ([("conv1", C0, C1, K1)] +
                 [(nm, C1, C1, K1) for nm in STAGE1[1:]] +
                 [("conv2", C1, C2, K2)] +
                 [(nm, C2, C2, K2) for nm in STAGE2[1:]])
    for name, cin, cout, k in conv_defs:
        key, sub = jax.random.split(key)
        w = _xavier_uniform(sub, (cout, cin, k, k), cin * k * k, cout * k * k)
        if k == K1:
            p[name + "_w"] = _conv_weight_banded(w, C1, WP1, W1)
            p[name + "_b"] = _conv_bias_flat(np.zeros((cout,)), W1)
        else:
            p[name + "_w"] = _conv_weight_banded(w, C2, WP2, W2)
            p[name + "_b"] = _conv_bias_flat(np.zeros((cout,)), W2)

    gain = 0.1 * (2.0 ** 0.5)          # 0.1 * calculate_gain('relu')
    key, k1, k2, k3 = jax.random.split(key, 4)
    w1 = _xavier_uniform(k1, (120, 160), 160, 120, gain)          # PyTorch (out,in)
    # fc1 reordered into per-spatial-position (40,120) blocks matching the
    # NCHW view(-1,160) flatten (input index = c*4 + h*2 + w).
    p["fc1_w"] = jnp.transpose(w1.reshape(120, C2, H2, W2),
                               (2, 3, 1, 0)).reshape(H2 * W2, C2, 120)
    p["fc1_b"] = jnp.zeros((1, 120), jnp.float32)
    p["fc2_w"] = _xavier_uniform(k2, (60, 120), 120, 60, gain).T  # (in, out)
    p["fc2_b"] = jnp.zeros((1, 60), jnp.float32)
    p["fc3_w"] = _xavier_uniform(k3, (1, 60), 60, 1, gain).T
    p["fc3_b"] = jnp.zeros((1, 1), jnp.float32)
    return p


# ------------------------------------------------------------------ forward
def model_residual_forward(x_nchw, p):
    n = x_nchw.shape[0]
    x_nhwc = jnp.transpose(x_nchw, (0, 2, 3, 1))    # tiny layout op; norm in-kernel

    args = [x_nhwc]
    args += [p[nm + "_w"] for nm in STAGE1]
    args += [p[nm + "_b"] for nm in STAGE1]
    args += [p[nm + "_w"] for nm in STAGE2]
    args += [p[nm + "_b"] for nm in STAGE2]
    args += [p["fc1_w"], p["fc2_w"], p["fc3_w"], p["fc1_b"], p["fc2_b"], p["fc3_b"]]

    vmem = pl.BlockSpec(memory_space=pltpu.MemorySpace.VMEM)
    return pl.pallas_call(
        _fused_forward_kernel,
        out_shape=jax.ShapeDtypeStruct((n, 1), jnp.float32),
        in_specs=[vmem] * len(args),
        out_specs=vmem,
        scratch_shapes=[
            pltpu.VMEM((n, HP1, WP1 * C1), jnp.float32),   # stage-1 padded strips
            pltpu.VMEM((n, HP2, WP2 * C2), jnp.float32),   # stage-2 padded strips
        ],
    )(*args)


if __name__ == "__main__":
    key = jax.random.PRNGKey(0)
    kx, kp = jax.random.split(key)
    # batch=2, channels=3, spatial=4x4 (required by fc1's 160-wide input).
    x = jax.random.normal(kx, (N_BATCH, C0, H1, W1), jnp.float32)
    params = init_params(kp)

    fwd = jax.jit(model_residual_forward)
    out = fwd(x, params)
    jax.block_until_ready(out)
    assert out.shape == (N_BATCH, 1) and out.dtype == jnp.float32
    print("KERNEL_OK")
</pallas_src>

<mosaic_0001>
module attributes {stable_mosaic.version = 11 : i64} {
  func.func @_fused_forward_kernel(%arg0: memref<2x4x4x3xf32, #tpu.memory_space<vmem>>, %arg1: memref<5x160x80xf32, #tpu.memory_space<vmem>>, %arg2: memref<5x160x80xf32, #tpu.memory_space<vmem>>, %arg3: memref<5x160x80xf32, #tpu.memory_space<vmem>>, %arg4: memref<5x160x80xf32, #tpu.memory_space<vmem>>, %arg5: memref<5x160x80xf32, #tpu.memory_space<vmem>>, %arg6: memref<5x160x80xf32, #tpu.memory_space<vmem>>, %arg7: memref<5x160x80xf32, #tpu.memory_space<vmem>>, %arg8: memref<1x80xf32, #tpu.memory_space<vmem>>, %arg9: memref<1x80xf32, #tpu.memory_space<vmem>>, %arg10: memref<1x80xf32, #tpu.memory_space<vmem>>, %arg11: memref<1x80xf32, #tpu.memory_space<vmem>>, %arg12: memref<1x80xf32, #tpu.memory_space<vmem>>, %arg13: memref<1x80xf32, #tpu.memory_space<vmem>>, %arg14: memref<1x80xf32, #tpu.memory_space<vmem>>, %arg15: memref<3x160x80xf32, #tpu.memory_space<vmem>>, %arg16: memref<3x160x80xf32, #tpu.memory_space<vmem>>, %arg17: memref<3x160x80xf32, #tpu.memory_space<vmem>>, %arg18: memref<3x160x80xf32, #tpu.memory_space<vmem>>, %arg19: memref<3x160x80xf32, #tpu.memory_space<vmem>>, %arg20: memref<3x160x80xf32, #tpu.memory_space<vmem>>, %arg21: memref<3x160x80xf32, #tpu.memory_space<vmem>>, %arg22: memref<1x80xf32, #tpu.memory_space<vmem>>, %arg23: memref<1x80xf32, #tpu.memory_space<vmem>>, %arg24: memref<1x80xf32, #tpu.memory_space<vmem>>, %arg25: memref<1x80xf32, #tpu.memory_space<vmem>>, %arg26: memref<1x80xf32, #tpu.memory_space<vmem>>, %arg27: memref<1x80xf32, #tpu.memory_space<vmem>>, %arg28: memref<1x80xf32, #tpu.memory_space<vmem>>, %arg29: memref<4x40x120xf32, #tpu.memory_space<vmem>>, %arg30: memref<120x60xf32, #tpu.memory_space<vmem>>, %arg31: memref<60x1xf32, #tpu.memory_space<vmem>>, %arg32: memref<1x120xf32, #tpu.memory_space<vmem>>, %arg33: memref<1x60xf32, #tpu.memory_space<vmem>>, %arg34: memref<1x1xf32, #tpu.memory_space<vmem>>, %arg35: memref<2x1xf32, #tpu.memory_space<vmem>>, %arg36: memref<2x8x160xf32, #tpu.memory_space<vmem>>, %arg37: memref<2x4x160xf32, #tpu.memory_space<vmem>>) attributes {dimension_semantics = [], scalar_prefetch = 0 : i64, scratch_operands = 2 : i64, tpu.core_type = #tpu.core_type<tc>} {
    %c0 = arith.constant 0 : index
    %c0_0 = arith.constant 0 : index
    %c0_1 = arith.constant 0 : index
    %c0_2 = arith.constant 0 : index
    %0 = vector.load %arg0[%c0, %c0_0, %c0_1, %c0_2] : memref<2x4x4x3xf32, #tpu.memory_space<vmem>>, vector<2x4x4x3xf32>
    %cst = arith.constant dense<0.000000e+00> : vector<2x4x3xf32>
    %1 = vector.multi_reduction <add>, %0, %cst [2] : vector<2x4x4x3xf32> to vector<2x4x3xf32>
    %2 = vector.shape_cast %1 : vector<2x4x3xf32> to vector<2x4x1x3xf32>
    %cst_3 = arith.constant 4.000000e+00 : f32
    %3 = vector.broadcast %cst_3 : f32 to vector<2x4x1x3xf32>
    %4 = arith.divf %2, %3 : vector<2x4x1x3xf32>
    %cst_4 = arith.constant dense<0.000000e+00> : vector<2x1x3xf32>
    %5 = vector.multi_reduction <add>, %4, %cst_4 [1] : vector<2x4x1x3xf32> to vector<2x1x3xf32>
    %6 = vector.shape_cast %5 : vector<2x1x3xf32> to vector<2x1x1x3xf32>
    %cst_5 = arith.constant 4.000000e+00 : f32
    %7 = vector.broadcast %cst_5 : f32 to vector<2x1x1x3xf32>
    %8 = arith.divf %6, %7 : vector<2x1x1x3xf32>
    %9 = vector.broadcast %8 : vector<2x1x1x3xf32> to vector<2x4x4x3xf32>
    %10 = arith.subf %0, %9 : vector<2x4x4x3xf32>
    %11 = arith.mulf %10, %10 : vector<2x4x4x3xf32>
    %cst_6 = arith.constant dense<0.000000e+00> : vector<2x4x3xf32>
    %12 = vector.multi_reduction <add>, %11, %cst_6 [2] : vector<2x4x4x3xf32> to vector<2x4x3xf32>
    %13 = vector.shape_cast %12 : vector<2x4x3xf32> to vector<2x4x1x3xf32>
    %cst_7 = arith.constant 4.000000e+00 : f32
    %14 = vector.broadcast %cst_7 : f32 to vector<2x4x1x3xf32>
    %15 = arith.divf %13, %14 : vector<2x4x1x3xf32>
    %cst_8 = arith.constant dense<0.000000e+00> : vector<2x1x3xf32>
    %16 = vector.multi_reduction <add>, %15, %cst_8 [1] : vector<2x4x1x3xf32> to vector<2x1x3xf32>
    %17 = vector.shape_cast %16 : vector<2x1x3xf32> to vector<2x1x1x3xf32>
    %cst_9 = arith.constant 4.000000e+00 : f32
    %18 = vector.broadcast %cst_9 : f32 to vector<2x1x1x3xf32>
    %19 = arith.divf %17, %18 : vector<2x1x1x3xf32>
    %20 = vector.broadcast %8 : vector<2x1x1x3xf32> to vector<2x4x4x3xf32>
    %21 = arith.subf %0, %20 : vector<2x4x4x3xf32>
    %cst_10 = arith.constant 9.99999974E-6 : f32
    %22 = vector.broadcast %cst_10 : f32 to vector<2x1x1x3xf32>
    %23 = arith.addf %19, %22 : vector<2x1x1x3xf32>
    %24 = math.rsqrt %23 : vector<2x1x1x3xf32>
    %25 = vector.broadcast %24 : vector<2x1x1x3xf32> to vector<2x4x4x3xf32>
    %26 = arith.mulf %21, %25 : vector<2x4x4x3xf32>
    %cst_11 = arith.constant 0.000000e+00 : f32
    %27 = vector.broadcast %cst_11 : f32 to vector<2x8x160xf32>
    %c0_12 = arith.constant 0 : index
    %c0_13 = arith.constant 0 : index
    %c0_14 = arith.constant 0 : index
    %28 = vector.load %arg36[%c0_12, %c0_13, %c0_14] : memref<2x8x160xf32, #tpu.memory_space<vmem>>, vector<2x8x160xf32>
    tpu.vector_store %arg36[%c0_12, %c0_13, %c0_14], %27 {strides = array<i32>} : memref<2x8x160xf32, #tpu.memory_space<vmem>>, vector<2x8x160xf32>,
    %29 = vector.extract_strided_slice %26 {offsets = [0, 0, 0, 0], sizes = [2, 4, 1, 3], strides = [1, 1, 1, 1]} : vector<2x4x4x3xf32> to vector<2x4x1x3xf32>
    %30 = vector.shape_cast %29 : vector<2x4x1x3xf32> to vector<2x4x3xf32>
    %c0_15 = arith.constant 0 : index
    %c2 = arith.constant 2 : index
    %c40 = arith.constant 40 : index
    %31 = vector.load %arg36[%c0_15, %c2, %c40] : memref<2x8x160xf32, #tpu.memory_space<vmem>>, vector<2x4x3xf32>
    tpu.vector_store %arg36[%c0_15, %c2, %c40], %30 {strides = array<i32>} : memref<2x8x160xf32, #tpu.memory_space<vmem>>, vector<2x4x3xf32>,
    %32 = vector.extract_strided_slice %26 {offsets = [0, 0, 1, 0], sizes = [2, 4, 1, 3], strides = [1, 1, 1, 1]} : vector<2x4x4x3xf32> to vector<2x4x1x3xf32>
    %33 = vector.shape_cast %32 : vector<2x4x1x3xf32> to vector<2x4x3xf32>
    %c0_16 = arith.constant 0 : index
    %c2_17 = arith.constant 2 : index
    %c60 = arith.constant 60 : index
    %34 = vector.load %arg36[%c0_16, %c2_17, %c60] : memref<2x8x160xf32, #tpu.memory_space<vmem>>, vector<2x4x3xf32>
    tpu.vector_store %arg36[%c0_16, %c2_17, %c60], %33 {strides = array<i32>} : memref<2x8x160xf32, #tpu.memory_space<vmem>>, vector<2x4x3xf32>,
    %35 = vector.extract_strided_slice %26 {offsets = [0, 0, 2, 0], sizes = [2, 4, 1, 3], strides = [1, 1, 1, 1]} : vector<2x4x4x3xf32> to vector<2x4x1x3xf32>
    %36 = vector.shape_cast %35 : vector<2x4x1x3xf32> to vector<2x4x3xf32>
    %c0_18 = arith.constant 0 : index
    %c2_19 = arith.constant 2 : index
    %c80 = arith.constant 80 : index
    %37 = vector.load %arg36[%c0_18, %c2_19, %c80] : memref<2x8x160xf32, #tpu.memory_space<vmem>>, vector<2x4x3xf32>
    tpu.vector_store %arg36[%c0_18, %c2_19, %c80], %36 {strides = array<i32>} : memref<2x8x160xf32, #tpu.memory_space<vmem>>, vector<2x4x3xf32>,
    %38 = vector.extract_strided_slice %26 {offsets = [0, 0, 3, 0], sizes = [2, 4, 1, 3], strides = [1, 1, 1, 1]} : vector<2x4x4x3xf32> to vector<2x4x1x3xf32>
    %39 = vector.shape_cast %38 : vector<2x4x1x3xf32> to vector<2x4x3xf32>
    %c0_20 = arith.constant 0 : index
    %c2_21 = arith.constant 2 : index
    %c100 = arith.constant 100 : index
    %40 = vector.load %arg36[%c0_20, %c2_21, %c100] : memref<2x8x160xf32, #tpu.memory_space<vmem>>, vector<2x4x3xf32>
    tpu.vector_store %arg36[%c0_20, %c2_21, %c100], %39 {strides = array<i32>} : memref<2x8x160xf32, #tpu.memory_space<vmem>>, vector<2x4x3xf32>,
    %cst_22 = arith.constant 0.000000e+00 : f32
    %41 = vector.broadcast %cst_22 : f32 to vector<8x80xf32>
    %c0_23 = arith.constant 0 : index
    %c0_24 = arith.constant 0 : index
    %42 = vector.load %arg8[%c0_23, %c0_24] : memref<1x80xf32, #tpu.memory_space<vmem>>, vector<1x80xf32>
    %43 = vector.broadcast %42 : vector<1x80xf32> to vector<8x80xf32>
    %44 = arith.addf %41, %43 : vector<8x80xf32>
    %c0_25 = arith.constant 0 : index
    %c0_26 = arith.constant 0 : index
    %c0_27 = arith.constant 0 : index
    %45 = vector.load %arg36[%c0_25, %c0_26, %c0_27] : memref<2x8x160xf32, #tpu.memory_space<vmem>>, vector<2x4x160xf32>
    %46 = vector.shape_cast %45 : vector<2x4x160xf32> to vector<8x160xf32>
    %c0_28 = arith.constant 0 : index
    %c0_29 = arith.constant 0 : index
    %c0_30 = arith.constant 0 : index
    %47 = vector.load %arg1[%c0_28, %c0_29, %c0_30] : memref<5x160x80xf32, #tpu.memory_space<vmem>>, vector<1x160x80xf32>
    %48 = vector.shape_cast %47 : vector<1x160x80xf32> to vector<160x80xf32>
    %cst_31 = arith.constant dense<0.000000e+00> : vector<8x80xf32>
    %49 = tpu.matmul %46, %48, %cst_31 {dimension_numbers = #tpu.dot_dimension_numbers<[1], [0], [0], [1], [0, 0, 1, 1], [], []>} : vector<8x160xf32>, vector<160x80xf32>, vector<8x80xf32> -> vector<8x80xf32>
    %50 = arith.addf %44, %49 : vector<8x80xf32>
    %c0_32 = arith.constant 0 : index
    %c1 = arith.constant 1 : index
    %c0_33 = arith.constant 0 : index
    %51 = vector.load %arg36[%c0_32, %c1, %c0_33] : memref<2x8x160xf32, #tpu.memory_space<vmem>>, vector<2x4x160xf32>
    %52 = vector.shape_cast %51 : vector<2x4x160xf32> to vector<8x160xf32>
    %c1_34 = arith.constant 1 : index
    %c0_35 = arith.constant 0 : index
    %c0_36 = arith.constant 0 : index
    %53 = vector.load %arg1[%c1_34, %c0_35, %c0_36] : memref<5x160x80xf32, #tpu.memory_space<vmem>>, vector<1x160x80xf32>
    %54 = vector.shape_cast %53 : vector<1x160x80xf32> to vector<160x80xf32>
    %cst_37 = arith.constant dense<0.000000e+00> : vector<8x80xf32>
    %55 = tpu.matmul %52, %54, %cst_37 {dimension_numbers = #tpu.dot_dimension_numbers<[1], [0], [0], [1], [0, 0, 1, 1], [], []>} : vector<8x160xf32>, vector<160x80xf32>, vector<8x80xf32> -> vector<8x80xf32>
    %56 = arith.addf %50, %55 : vector<8x80xf32>
    %c0_38 = arith.constant 0 : index
    %c2_39 = arith.constant 2 : index
    %c0_40 = arith.constant 0 : index
    %57 = vector.load %arg36[%c0_38, %c2_39, %c0_40] : memref<2x8x160xf32, #tpu.memory_space<vmem>>, vector<2x4x160xf32>
    %58 = vector.shape_cast %57 : vector<2x4x160xf32> to vector<8x160xf32>
    %c2_41 = arith.constant 2 : index
    %c0_42 = arith.constant 0 : index
    %c0_43 = arith.constant 0 : index
    %59 = vector.load %arg1[%c2_41, %c0_42, %c0_43] : memref<5x160x80xf32, #tpu.memory_space<vmem>>, vector<1x160x80xf32>
    %60 = vector.shape_cast %59 : vector<1x160x80xf32> to vector<160x80xf32>
    %cst_44 = arith.constant dense<0.000000e+00> : vector<8x80xf32>
    %61 = tpu.matmul %58, %60, %cst_44 {dimension_numbers = #tpu.dot_dimension_numbers<[1], [0], [0], [1], [0, 0, 1, 1], [], []>} : vector<8x160xf32>, vector<160x80xf32>, vector<8x80xf32> -> vector<8x80xf32>
    %62 = arith.addf %56, %61 : vector<8x80xf32>
    %c0_45 = arith.constant 0 : index
    %c3 = arith.constant 3 : index
    %c0_46 = arith.constant 0 : index
    %63 = vector.load %arg36[%c0_45, %c3, %c0_46] : memref<2x8x160xf32, #tpu.memory_space<vmem>>, vector<2x4x160xf32>
    %64 = vector.shape_cast %63 : vector<2x4x160xf32> to vector<8x160xf32>
    %c3_47 = arith.constant 3 : index
    %c0_48 = arith.constant 0 : index
    %c0_49 = arith.constant 0 : index
    %65 = vector.load %arg1[%c3_47, %c0_48, %c0_49] : memref<5x160x80xf32, #tpu.memory_space<vmem>>, vector<1x160x80xf32>
    %66 = vector.shape_cast %65 : vector<1x160x80xf32> to vector<160x80xf32>
    %cst_50 = arith.constant dense<0.000000e+00> : vector<8x80xf32>
    %67 = tpu.matmul %64, %66, %cst_50 {dimension_numbers = #tpu.dot_dimension_numbers<[1], [0], [0], [1], [0, 0, 1, 1], [], []>} : vector<8x160xf32>, vector<160x80xf32>, vector<8x80xf32> -> vector<8x80xf32>
    %68 = arith.addf %62, %67 : vector<8x80xf32>
    %c0_51 = arith.constant 0 : index
    %c4 = arith.constant 4 : index
    %c0_52 = arith.constant 0 : index
    %69 = vector.load %arg36[%c0_51, %c4, %c0_52] : memref<2x8x160xf32, #tpu.memory_space<vmem>>, vector<2x4x160xf32>
    %70 = vector.shape_cast %69 : vector<2x4x160xf32> to vector<8x160xf32>
    %c4_53 = arith.constant 4 : index
    %c0_54 = arith.constant 0 : index
    %c0_55 = arith.constant 0 : index
    %71 = vector.load %arg1[%c4_53, %c0_54, %c0_55] : memref<5x160x80xf32, #tpu.memory_space<vmem>>, vector<1x160x80xf32>
    %72 = vector.shape_cast %71 : vector<1x160x80xf32> to vector<160x80xf32>
    %cst_56 = arith.constant dense<0.000000e+00> : vector<8x80xf32>
    %73 = tpu.matmul %70, %72, %cst_56 {dimension_numbers = #tpu.dot_dimension_numbers<[1], [0], [0], [1], [0, 0, 1, 1], [], []>} : vector<8x160xf32>, vector<160x80xf32>, vector<8x80xf32> -> vector<8x80xf32>
    %74 = arith.addf %68, %73 : vector<8x80xf32>
    %cst_57 = arith.constant 0.000000e+00 : f32
    %75 = vector.broadcast %cst_57 : f32 to vector<8x80xf32>
    %76 = arith.maximumf %74, %75 : vector<8x80xf32>
    %77 = vector.shape_cast %76 : vector<8x80xf32> to vector<2x4x80xf32>
    %c0_58 = arith.constant 0 : index
    %c2_59 = arith.constant 2 : index
    %c40_60 = arith.constant 40 : index
    %78 = vector.load %arg36[%c0_58, %c2_59, %c40_60] : memref<2x8x160xf32, #tpu.memory_space<vmem>>, vector<2x4x80xf32>
    tpu.vector_store %arg36[%c0_58, %c2_59, %c40_60], %77 {strides = array<i32>} : memref<2x8x160xf32, #tpu.memory_space<vmem>>, vector<2x4x80xf32>,
    %cst_61 = arith.constant 0.000000e+00 : f32
    %79 = vector.broadcast %cst_61 : f32 to vector<8x80xf32>
    %c0_62 = arith.constant 0 : index
    %c0_63 = arith.constant 0 : index
    %80 = vector.load %arg9[%c0_62, %c0_63] : memref<1x80xf32, #tpu.memory_space<vmem>>, vector<1x80xf32>
    %81 = vector.broadcast %80 : vector<1x80xf32> to vector<8x80xf32>
    %82 = arith.addf %79, %81 : vector<8x80xf32>
    %c0_64 = arith.constant 0 : index
    %c0_65 = arith.constant 0 : index
    %c0_66 = arith.constant 0 : index
    %83 = vector.load %arg36[%c0_64, %c0_65, %c0_66] : memref<2x8x160xf32, #tpu.memory_space<vmem>>, vector<2x4x160xf32>
    %84 = vector.shape_cast %83 : vector<2x4x160xf32> to vector<8x160xf32>
    %c0_67 = arith.constant 0 : index
    %c0_68 = arith.constant 0 : index
    %c0_69 = arith.constant 0 : index
    %85 = vector.load %arg2[%c0_67, %c0_68, %c0_69] : memref<5x160x80xf32, #tpu.memory_space<vmem>>, vector<1x160x80xf32>
    %86 = vector.shape_cast %85 : vector<1x160x80xf32> to vector<160x80xf32>
    %cst_70 = arith.constant dense<0.000000e+00> : vector<8x80xf32>
    %87 = tpu.matmul %84, %86, %cst_70 {dimension_numbers = #tpu.dot_dimension_numbers<[1], [0], [0], [1], [0, 0, 1, 1], [], []>} : vector<8x160xf32>, vector<160x80xf32>, vector<8x80xf32> -> vector<8x80xf32>
    %88 = arith.addf %82, %87 : vector<8x80xf32>
    %c0_71 = arith.constant 0 : index
    %c1_72 = arith.constant 1 : index
    %c0_73 = arith.constant 0 : index
    %89 = vector.load %arg36[%c0_71, %c1_72, %c0_73] : memref<2x8x160xf32, #tpu.memory_space<vmem>>, vector<2x4x160xf32>
    %90 = vector.shape_cast %89 : vector<2x4x160xf32> to vector<8x160xf32>
    %c1_74 = arith.constant 1 : index
    %c0_75 = arith.constant 0 : index
    %c0_76 = arith.constant 0 : index
    %91 = vector.load %arg2[%c1_74, %c0_75, %c0_76] : memref<5x160x80xf32, #tpu.memory_space<vmem>>, vector<1x160x80xf32>
    %92 = vector.shape_cast %91 : vector<1x160x80xf32> to vector<160x80xf32>
    %cst_77 = arith.constant dense<0.000000e+00> : vector<8x80xf32>
    %93 = tpu.matmul %90, %92, %cst_77 {dimension_numbers = #tpu.dot_dimension_numbers<[1], [0], [0], [1], [0, 0, 1, 1], [], []>} : vector<8x160xf32>, vector<160x80xf32>, vector<8x80xf32> -> vector<8x80xf32>
    %94 = arith.addf %88, %93 : vector<8x80xf32>
    %c0_78 = arith.constant 0 : index
    %c2_79 = arith.constant 2 : index
    %c0_80 = arith.constant 0 : index
    %95 = vector.load %arg36[%c0_78, %c2_79, %c0_80] : memref<2x8x160xf32, #tpu.memory_space<vmem>>, vector<2x4x160xf32>
    %96 = vector.shape_cast %95 : vector<2x4x160xf32> to vector<8x160xf32>
    %c2_81 = arith.constant 2 : index
    %c0_82 = arith.constant 0 : index
    %c0_83 = arith.constant 0 : index
    %97 = vector.load %arg2[%c2_81, %c0_82, %c0_83] : memref<5x160x80xf32, #tpu.memory_space<vmem>>, vector<1x160x80xf32>
    %98 = vector.shape_cast %97 : vector<1x160x80xf32> to vector<160x80xf32>
    %cst_84 = arith.constant dense<0.000000e+00> : vector<8x80xf32>
    %99 = tpu.matmul %96, %98, %cst_84 {dimension_numbers = #tpu.dot_dimension_numbers<[1], [0], [0], [1], [0, 0, 1, 1], [], []>} : vector<8x160xf32>, vector<160x80xf32>, vector<8x80xf32> -> vector<8x80xf32>
    %100 = arith.addf %94, %99 : vector<8x80xf32>
    %c0_85 = arith.constant 0 : index
    %c3_86 = arith.constant 3 : index
    %c0_87 = arith.constant 0 : index
    %101 = vector.load %arg36[%c0_85, %c3_86, %c0_87] : memref<2x8x160xf32, #tpu.memory_space<vmem>>, vector<2x4x160xf32>
    %102 = vector.shape_cast %101 : vector<2x4x160xf32> to vector<8x160xf32>
    %c3_88 = arith.constant 3 : index
    %c0_89 = arith.constant 0 : index
    %c0_90 = arith.constant 0 : index
    %103 = vector.load %arg2[%c3_88, %c0_89, %c0_90] : memref<5x160x80xf32, #tpu.memory_space<vmem>>, vector<1x160x80xf32>
    %104 = vector.shape_cast %103 : vector<1x160x80xf32> to vector<160x80xf32>
    %cst_91 = arith.constant dense<0.000000e+00> : vector<8x80xf32>
    %105 = tpu.matmul %102, %104, %cst_91 {dimension_numbers = #tpu.dot_dimension_numbers<[1], [0], [0], [1], [0, 0, 1, 1], [], []>} : vector<8x160xf32>, vector<160x80xf32>, vector<8x80xf32> -> vector<8x80xf32>
    %106 = arith.addf %100, %105 : vector<8x80xf32>
    %c0_92 = arith.constant 0 : index
    %c4_93 = arith.constant 4 : index
    %c0_94 = arith.constant 0 : index
    %107 = vector.load %arg36[%c0_92, %c4_93, %c0_94] : memref<2x8x160xf32, #tpu.memory_space<vmem>>, vector<2x4x160xf32>
    %108 = vector.shape_cast %107 : vector<2x4x160xf32> to vector<8x160xf32>
    %c4_95 = arith.constant 4 : index
    %c0_96 = arith.constant 0 : index
    %c0_97 = arith.constant 0 : index
    %109 = vector.load %arg2[%c4_95, %c0_96, %c0_97] : memref<5x160x80xf32, #tpu.memory_space<vmem>>, vector<1x160x80xf32>
    %110 = vector.shape_cast %109 : vector<1x160x80xf32> to vector<160x80xf32>
    %cst_98 = arith.constant dense<0.000000e+00> : vector<8x80xf32>
    %111 = tpu.matmul %108, %110, %cst_98 {dimension_numbers = #tpu.dot_dimension_numbers<[1], [0], [0], [1], [0, 0, 1, 1], [], []>} : vector<8x160xf32>, vector<160x80xf32>, vector<8x80xf32> -> vector<8x80xf32>
    %112 = arith.addf %106, %111 : vector<8x80xf32>
    %cst_99 = arith.constant 0.000000e+00 : f32
    %113 = vector.broadcast %cst_99 : f32 to vector<8x80xf32>
    %114 = arith.maximumf %112, %113 : vector<8x80xf32>
    %115 = vector.shape_cast %114 : vector<8x80xf32> to vector<2x4x80xf32>
    %c0_100 = arith.constant 0 : index
    %c2_101 = arith.constant 2 : index
    %c40_102 = arith.constant 40 : index
    %116 = vector.load %arg36[%c0_100, %c2_101, %c40_102] : memref<2x8x160xf32, #tpu.memory_space<vmem>>, vector<2x4x80xf32>
    tpu.vector_store %arg36[%c0_100, %c2_101, %c40_102], %115 {strides = array<i32>} : memref<2x8x160xf32, #tpu.memory_space<vmem>>, vector<2x4x80xf32>,
    %cst_103 = arith.constant 0.000000e+00 : f32
    %117 = vector.broadcast %cst_103 : f32 to vector<8x80xf32>
    %c0_104 = arith.constant 0 : index
    %c0_105 = arith.constant 0 : index
    %118 = vector.load %arg10[%c0_104, %c0_105] : memref<1x80xf32, #tpu.memory_space<vmem>>, vector<1x80xf32>
    %119 = vector.broadcast %118 : vector<1x80xf32> to vector<8x80xf32>
    %120 = arith.addf %117, %119 : vector<8x80xf32>
    %c0_106 = arith.constant 0 : index
    %c0_107 = arith.constant 0 : index
    %c0_108 = arith.constant 0 : index
    %121 = vector.load %arg36[%c0_106, %c0_107, %c0_108] : memref<2x8x160xf32, #tpu.memory_space<vmem>>, vector<2x4x160xf32>
    %122 = vector.shape_cast %121 : vector<2x4x160xf32> to vector<8x160xf32>
    %c0_109 = arith.constant 0 : index
    %c0_110 = arith.constant 0 : index
    %c0_111 = arith.constant 0 : index
    %123 = vector.load %arg3[%c0_109, %c0_110, %c0_111] : memref<5x160x80xf32, #tpu.memory_space<vmem>>, vector<1x160x80xf32>
    %124 = vector.shape_cast %123 : vector<1x160x80xf32> to vector<160x80xf32>
    %cst_112 = arith.constant dense<0.000000e+00> : vector<8x80xf32>
    %125 = tpu.matmul %122, %124, %cst_112 {dimension_numbers = #tpu.dot_dimension_numbers<[1], [0], [0], [1], [0, 0, 1, 1], [], []>} : vector<8x160xf32>, vector<160x80xf32>, vector<8x80xf32> -> vector<8x80xf32>
    %126 = arith.addf %120, %125 : vector<8x80xf32>
    %c0_113 = arith.constant 0 : index
    %c1_114 = arith.constant 1 : index
    %c0_115 = arith.constant 0 : index
    %127 = vector.load %arg36[%c0_113, %c1_114, %c0_115] : memref<2x8x160xf32, #tpu.memory_space<vmem>>, vector<2x4x160xf32>
    %128 = vector.shape_cast %127 : vector<2x4x160xf32> to vector<8x160xf32>
    %c1_116 = arith.constant 1 : index
    %c0_117 = arith.constant 0 : index
    %c0_118 = arith.constant 0 : index
    %129 = vector.load %arg3[%c1_116, %c0_117, %c0_118] : memref<5x160x80xf32, #tpu.memory_space<vmem>>, vector<1x160x80xf32>
    %130 = vector.shape_cast %129 : vector<1x160x80xf32> to vector<160x80xf32>
    %cst_119 = arith.constant dense<0.000000e+00> : vector<8x80xf32>
    %131 = tpu.matmul %128, %130, %cst_119 {dimension_numbers = #tpu.dot_dimension_numbers<[1], [0], [0], [1], [0, 0, 1, 1], [], []>} : vector<8x160xf32>, vector<160x80xf32>, vector<8x80xf32> -> vector<8x80xf32>
    %132 = arith.addf %126, %131 : vector<8x80xf32>
    %c0_120 = arith.constant 0 : index
    %c2_121 = arith.constant 2 : index
    %c0_122 = arith.constant 0 : index
    %133 = vector.load %arg36[%c0_120, %c2_121, %c0_122] : memref<2x8x160xf32, #tpu.memory_space<vmem>>, vector<2x4x160xf32>
    %134 = vector.shape_cast %133 : vector<2x4x160xf32> to vector<8x160xf32>
    %c2_123 = arith.constant 2 : index
    %c0_124 = arith.constant 0 : index
    %c0_125 = arith.constant 0 : index
    %135 = vector.load %arg3[%c2_123, %c0_124, %c0_125] : memref<5x160x80xf32, #tpu.memory_space<vmem>>, vector<1x160x80xf32>
    %136 = vector.shape_cast %135 : vector<1x160x80xf32> to vector<160x80xf32>
    %cst_126 = arith.constant dense<0.000000e+00> : vector<8x80xf32>
    %137 = tpu.matmul %134, %136, %cst_126 {dimension_numbers = #tpu.dot_dimension_numbers<[1], [0], [0], [1], [0, 0, 1, 1], [], []>} : vector<8x160xf32>, vector<160x80xf32>, vector<8x80xf32> -> vector<8x80xf32>
    %138 = arith.addf %132, %137 : vector<8x80xf32>
    %c0_127 = arith.constant 0 : index
    %c3_128 = arith.constant 3 : index
    %c0_129 = arith.constant 0 : index
    %139 = vector.load %arg36[%c0_127, %c3_128, %c0_129] : memref<2x8x160xf32, #tpu.memory_space<vmem>>, vector<2x4x160xf32>
    %140 = vector.shape_cast %139 : vector<2x4x160xf32> to vector<8x160xf32>
    %c3_130 = arith.constant 3 : index
    %c0_131 = arith.constant 0 : index
    %c0_132 = arith.constant 0 : index
    %141 = vector.load %arg3[%c3_130, %c0_131, %c0_132] : memref<5x160x80xf32, #tpu.memory_space<vmem>>, vector<1x160x80xf32>
    %142 = vector.shape_cast %141 : vector<1x160x80xf32> to vector<160x80xf32>
    %cst_133 = arith.constant dense<0.000000e+00> : vector<8x80xf32>
    %143 = tpu.matmul %140, %142, %cst_133 {dimension_numbers = #tpu.dot_dimension_numbers<[1], [0], [0], [1], [0, 0, 1, 1], [], []>} : vector<8x160xf32>, vector<160x80xf32>, vector<8x80xf32> -> vector<8x80xf32>
    %144 = arith.addf %138, %143 : vector<8x80xf32>
    %c0_134 = arith.constant 0 : index
    %c4_135 = arith.constant 4 : index
    %c0_136 = arith.constant 0 : index
    %145 = vector.load %arg36[%c0_134, %c4_135, %c0_136] : memref<2x8x160xf32, #tpu.memory_space<vmem>>, vector<2x4x160xf32>
    %146 = vector.shape_cast %145 : vector<2x4x160xf32> to vector<8x160xf32>
    %c4_137 = arith.constant 4 : index
    %c0_138 = arith.constant 0 : index
    %c0_139 = arith.constant 0 : index
    %147 = vector.load %arg3[%c4_137, %c0_138, %c0_139] : memref<5x160x80xf32, #tpu.memory_space<vmem>>, vector<1x160x80xf32>
    %148 = vector.shape_cast %147 : vector<1x160x80xf32> to vector<160x80xf32>
    %cst_140 = arith.constant dense<0.000000e+00> : vector<8x80xf32>
    %149 = tpu.matmul %146, %148, %cst_140 {dimension_numbers = #tpu.dot_dimension_numbers<[1], [0], [0], [1], [0, 0, 1, 1], [], []>} : vector<8x160xf32>, vector<160x80xf32>, vector<8x80xf32> -> vector<8x80xf32>
    %150 = arith.addf %144, %149 : vector<8x80xf32>
    %cst_141 = arith.constant 0.000000e+00 : f32
    %151 = vector.broadcast %cst_141 : f32 to vector<8x80xf32>
    %152 = arith.maximumf %150, %151 : vector<8x80xf32>
    %153 = vector.shape_cast %152 : vector<8x80xf32> to vector<2x4x80xf32>
    %c0_142 = arith.constant 0 : index
    %c2_143 = arith.constant 2 : index
    %c40_144 = arith.constant 40 : index
    %154 = vector.load %arg36[%c0_142, %c2_143, %c40_144] : memref<2x8x160xf32, #tpu.memory_space<vmem>>, vector<2x4x80xf32>
    tpu.vector_store %arg36[%c0_142, %c2_143, %c40_144], %153 {strides = array<i32>} : memref<2x8x160xf32, #tpu.memory_space<vmem>>, vector<2x4x80xf32>,
    %cst_145 = arith.constant 0.000000e+00 : f32
    %155 = vector.broadcast %cst_145 : f32 to vector<8x80xf32>
    %c0_146 = arith.constant 0 : index
    %c0_147 = arith.constant 0 : index
    %156 = vector.load %arg11[%c0_146, %c0_147] : memref<1x80xf32, #tpu.memory_space<vmem>>, vector<1x80xf32>
    %157 = vector.broadcast %156 : vector<1x80xf32> to vector<8x80xf32>
    %158 = arith.addf %155, %157 : vector<8x80xf32>
    %c0_148 = arith.constant 0 : index
    %c0_149 = arith.constant 0 : index
    %c0_150 = arith.constant 0 : index
    %159 = vector.load %arg36[%c0_148, %c0_149, %c0_150] : memref<2x8x160xf32, #tpu.memory_space<vmem>>, vector<2x4x160xf32>
    %160 = vector.shape_cast %159 : vector<2x4x160xf32> to vector<8x160xf32>
    %c0_151 = arith.constant 0 : index
    %c0_152 = arith.constant 0 : index
    %c0_153 = arith.constant 0 : index
    %161 = vector.load %arg4[%c0_151, %c0_152, %c0_153] : memref<5x160x80xf32, #tpu.memory_space<vmem>>, vector<1x160x80xf32>
    %162 = vector.shape_cast %161 : vector<1x160x80xf32> to vector<160x80xf32>
    %cst_154 = arith.constant dense<0.000000e+00> : vector<8x80xf32>
    %163 = tpu.matmul %160, %162, %cst_154 {dimension_numbers = #tpu.dot_dimension_numbers<[1], [0], [0], [1], [0, 0, 1, 1], [], []>} : vector<8x160xf32>, vector<160x80xf32>, vector<8x80xf32> -> vector<8x80xf32>
    %164 = arith.addf %158, %163 : vector<8x80xf32>
    %c0_155 = arith.constant 0 : index
    %c1_156 = arith.constant 1 : index
    %c0_157 = arith.constant 0 : index
    %165 = vector.load %arg36[%c0_155, %c1_156, %c0_157] : memref<2x8x160xf32, #tpu.memory_space<vmem>>, vector<2x4x160xf32>
    %166 = vector.shape_cast %165 : vector<2x4x160xf32> to vector<8x160xf32>
    %c1_158 = arith.constant 1 : index
    %c0_159 = arith.constant 0 : index
    %c0_160 = arith.constant 0 : index
    %167 = vector.load %arg4[%c1_158, %c0_159, %c0_160] : memref<5x160x80xf32, #tpu.memory_space<vmem>>, vector<1x160x80xf32>
    %168 = vector.shape_cast %167 : vector<1x160x80xf32> to vector<160x80xf32>
    %cst_161 = arith.constant dense<0.000000e+00> : vector<8x80xf32>
    %169 = tpu.matmul %166, %168, %cst_161 {dimension_numbers = #tpu.dot_dimension_numbers<[1], [0], [0], [1], [0, 0, 1, 1], [], []>} : vector<8x160xf32>, vector<160x80xf32>, vector<8x80xf32> -> vector<8x80xf32>
    %170 = arith.addf %164, %169 : vector<8x80xf32>
    %c0_162 = arith.constant 0 : index
    %c2_163 = arith.constant 2 : index
    %c0_164 = arith.constant 0 : index
    %171 = vector.load %arg36[%c0_162, %c2_163, %c0_164] : memref<2x8x160xf32, #tpu.memory_space<vmem>>, vector<2x4x160xf32>
    %172 = vector.shape_cast %171 : vector<2x4x160xf32> to vector<8x160xf32>
    %c2_165 = arith.constant 2 : index
    %c0_166 = arith.constant 0 : index
    %c0_167 = arith.constant 0 : index
    %173 = vector.load %arg4[%c2_165, %c0_166, %c0_167] : memref<5x160x80xf32, #tpu.memory_space<vmem>>, vector<1x160x80xf32>
    %174 = vector.shape_cast %173 : vector<1x160x80xf32> to vector<160x80xf32>
    %cst_168 = arith.constant dense<0.000000e+00> : vector<8x80xf32>
    %175 = tpu.matmul %172, %174, %cst_168 {dimension_numbers = #tpu.dot_dimension_numbers<[1], [0], [0], [1], [0, 0, 1, 1], [], []>} : vector<8x160xf32>, vector<160x80xf32>, vector<8x80xf32> -> vector<8x80xf32>
    %176 = arith.addf %170, %175 : vector<8x80xf32>
    %c0_169 = arith.constant 0 : index
    %c3_170 = arith.constant 3 : index
    %c0_171 = arith.constant 0 : index
    %177 = vector.load %arg36[%c0_169, %c3_170, %c0_171] : memref<2x8x160xf32, #tpu.memory_space<vmem>>, vector<2x4x160xf32>
    %178 = vector.shape_cast %177 : vector<2x4x160xf32> to vector<8x160xf32>
    %c3_172 = arith.constant 3 : index
    %c0_173 = arith.constant 0 : index
    %c0_174 = arith.constant 0 : index
    %179 = vector.load %arg4[%c3_172, %c0_173, %c0_174] : memref<5x160x80xf32, #tpu.memory_space<vmem>>, vector<1x160x80xf32>
    %180 = vector.shape_cast %179 : vector<1x160x80xf32> to vector<160x80xf32>
    %cst_175 = arith.constant dense<0.000000e+00> : vector<8x80xf32>
    %181 = tpu.matmul %178, %180, %cst_175 {dimension_numbers = #tpu.dot_dimension_numbers<[1], [0], [0], [1], [0, 0, 1, 1], [], []>} : vector<8x160xf32>, vector<160x80xf32>, vector<8x80xf32> -> vector<8x80xf32>
    %182 = arith.addf %176, %181 : vector<8x80xf32>
    %c0_176 = arith.constant 0 : index
    %c4_177 = arith.constant 4 : index
    %c0_178 = arith.constant 0 : index
    %183 = vector.load %arg36[%c0_176, %c4_177, %c0_178] : memref<2x8x160xf32, #tpu.memory_space<vmem>>, vector<2x4x160xf32>
    %184 = vector.shape_cast %183 : vector<2x4x160xf32> to vector<8x160xf32>
    %c4_179 = arith.constant 4 : index
    %c0_180 = arith.constant 0 : index
    %c0_181 = arith.constant 0 : index
    %185 = vector.load %arg4[%c4_179, %c0_180, %c0_181] : memref<5x160x80xf32, #tpu.memory_space<vmem>>, vector<1x160x80xf32>
    %186 = vector.shape_cast %185 : vector<1x160x80xf32> to vector<160x80xf32>
    %cst_182 = arith.constant dense<0.000000e+00> : vector<8x80xf32>
    %187 = tpu.matmul %184, %186, %cst_182 {dimension_numbers = #tpu.dot_dimension_numbers<[1], [0], [0], [1], [0, 0, 1, 1], [], []>} : vector<8x160xf32>, vector<160x80xf32>, vector<8x80xf32> -> vector<8x80xf32>
    %188 = arith.addf %182, %187 : vector<8x80xf32>
    %189 = arith.addf %188, %76 : vector<8x80xf32>
    %190 = vector.shape_cast %189 : vector<8x80xf32> to vector<2x4x80xf32>
    %c0_183 = arith.constant 0 : index
    %c2_184 = arith.constant 2 : index
    %c40_185 = arith.constant 40 : index
    %191 = vector.load %arg36[%c0_183, %c2_184, %c40_185] : memref<2x8x160xf32, #tpu.memory_space<vmem>>, vector<2x4x80xf32>
    tpu.vector_store %arg36[%c0_183, %c2_184, %c40_185], %190 {strides = array<i32>} : memref<2x8x160xf32, #tpu.memory_space<vmem>>, vector<2x4x80xf32>,
    %cst_186 = arith.constant 0.000000e+00 : f32
    %192 = vector.broadcast %cst_186 : f32 to vector<8x80xf32>
    %c0_187 = arith.constant 0 : index
    %c0_188 = arith.constant 0 : index
    %193 = vector.load %arg12[%c0_187, %c0_188] : memref<1x80xf32, #tpu.memory_space<vmem>>, vector<1x80xf32>
    %194 = vector.broadcast %193 : vector<1x80xf32> to vector<8x80xf32>
    %195 = arith.addf %192, %194 : vector<8x80xf32>
    %c0_189 = arith.constant 0 : index
    %c0_190 = arith.constant 0 : index
    %c0_191 = arith.constant 0 : index
    %196 = vector.load %arg36[%c0_189, %c0_190, %c0_191] : memref<2x8x160xf32, #tpu.memory_space<vmem>>, vector<2x4x160xf32>
    %197 = vector.shape_cast %196 : vector<2x4x160xf32> to vector<8x160xf32>
    %c0_192 = arith.constant 0 : index
    %c0_193 = arith.constant 0 : index
    %c0_194 = arith.constant 0 : index
    %198 = vector.load %arg5[%c0_192, %c0_193, %c0_194] : memref<5x160x80xf32, #tpu.memory_space<vmem>>, vector<1x160x80xf32>
    %199 = vector.shape_cast %198 : vector<1x160x80xf32> to vector<160x80xf32>
    %cst_195 = arith.constant dense<0.000000e+00> : vector<8x80xf32>
    %200 = tpu.matmul %197, %199, %cst_195 {dimension_numbers = #tpu.dot_dimension_numbers<[1], [0], [0], [1], [0, 0, 1, 1], [], []>} : vector<8x160xf32>, vector<160x80xf32>, vector<8x80xf32> -> vector<8x80xf32>
    %201 = arith.addf %195, %200 : vector<8x80xf32>
    %c0_196 = arith.constant 0 : index
    %c1_197 = arith.constant 1 : index
    %c0_198 = arith.constant 0 : index
    %202 = vector.load %arg36[%c0_196, %c1_197, %c0_198] : memref<2x8x160xf32, #tpu.memory_space<vmem>>, vector<2x4x160xf32>
    %203 = vector.shape_cast %202 : vector<2x4x160xf32> to vector<8x160xf32>
    %c1_199 = arith.constant 1 : index
    %c0_200 = arith.constant 0 : index
    %c0_201 = arith.constant 0 : index
    %204 = vector.load %arg5[%c1_199, %c0_200, %c0_201] : memref<5x160x80xf32, #tpu.memory_space<vmem>>, vector<1x160x80xf32>
    %205 = vector.shape_cast %204 : vector<1x160x80xf32> to vector<160x80xf32>
    %cst_202 = arith.constant dense<0.000000e+00> : vector<8x80xf32>
    %206 = tpu.matmul %203, %205, %cst_202 {dimension_numbers = #tpu.dot_dimension_numbers<[1], [0], [0], [1], [0, 0, 1, 1], [], []>} : vector<8x160xf32>, vector<160x80xf32>, vector<8x80xf32> -> vector<8x80xf32>
    %207 = arith.addf %201, %206 : vector<8x80xf32>
    %c0_203 = arith.constant 0 : index
    %c2_204 = arith.constant 2 : index
    %c0_205 = arith.constant 0 : index
    %208 = vector.load %arg36[%c0_203, %c2_204, %c0_205] : memref<2x8x160xf32, #tpu.memory_space<vmem>>, vector<2x4x160xf32>
    %209 = vector.shape_cast %208 : vector<2x4x160xf32> to vector<8x160xf32>
    %c2_206 = arith.constant 2 : index
    %c0_207 = arith.constant 0 : index
    %c0_208 = arith.constant 0 : index
    %210 = vector.load %arg5[%c2_206, %c0_207, %c0_208] : memref<5x160x80xf32, #tpu.memory_space<vmem>>, vector<1x160x80xf32>
    %211 = vector.shape_cast %210 : vector<1x160x80xf32> to vector<160x80xf32>
    %cst_209 = arith.constant dense<0.000000e+00> : vector<8x80xf32>
    %212 = tpu.matmul %209, %211, %cst_209 {dimension_numbers = #tpu.dot_dimension_numbers<[1], [0], [0], [1], [0, 0, 1, 1], [], []>} : vector<8x160xf32>, vector<160x80xf32>, vector<8x80xf32> -> vector<8x80xf32>
    %213 = arith.addf %207, %212 : vector<8x80xf32>
    %c0_210 = arith.constant 0 : index
    %c3_211 = arith.constant 3 : index
    %c0_212 = arith.constant 0 : index
    %214 = vector.load %arg36[%c0_210, %c3_211, %c0_212] : memref<2x8x160xf32, #tpu.memory_space<vmem>>, vector<2x4x160xf32>
    %215 = vector.shape_cast %214 : vector<2x4x160xf32> to vector<8x160xf32>
    %c3_213 = arith.constant 3 : index
    %c0_214 = arith.constant 0 : index
    %c0_215 = arith.constant 0 : index
    %216 = vector.load %arg5[%c3_213, %c0_214, %c0_215] : memref<5x160x80xf32, #tpu.memory_space<vmem>>, vector<1x160x80xf32>
    %217 = vector.shape_cast %216 : vector<1x160x80xf32> to vector<160x80xf32>
    %cst_216 = arith.constant dense<0.000000e+00> : vector<8x80xf32>
    %218 = tpu.matmul %215, %217, %cst_216 {dimension_numbers = #tpu.dot_dimension_numbers<[1], [0], [0], [1], [0, 0, 1, 1], [], []>} : vector<8x160xf32>, vector<160x80xf32>, vector<8x80xf32> -> vector<8x80xf32>
    %219 = arith.addf %213, %218 : vector<8x80xf32>
    %c0_217 = arith.constant 0 : index
    %c4_218 = arith.constant 4 : index
    %c0_219 = arith.constant 0 : index
    %220 = vector.load %arg36[%c0_217, %c4_218, %c0_219] : memref<2x8x160xf32, #tpu.memory_space<vmem>>, vector<2x4x160xf32>
    %221 = vector.shape_cast %220 : vector<2x4x160xf32> to vector<8x160xf32>
    %c4_220 = arith.constant 4 : index
    %c0_221 = arith.constant 0 : index
    %c0_222 = arith.constant 0 : index
    %222 = vector.load %arg5[%c4_220, %c0_221, %c0_222] : memref<5x160x80xf32, #tpu.memory_space<vmem>>, vector<1x160x80xf32>
    %223 = vector.shape_cast %222 : vector<1x160x80xf32> to vector<160x80xf32>
    %cst_223 = arith.constant dense<0.000000e+00> : vector<8x80xf32>
    %224 = tpu.matmul %221, %223, %cst_223 {dimension_numbers = #tpu.dot_dimension_numbers<[1], [0], [0], [1], [0, 0, 1, 1], [], []>} : vector<8x160xf32>, vector<160x80xf32>, vector<8x80xf32> -> vector<8x80xf32>
    %225 = arith.addf %219, %224 : vector<8x80xf32>
    %cst_224 = arith.constant 0.000000e+00 : f32
    %226 = vector.broadcast %cst_224 : f32 to vector<8x80xf32>
    %227 = arith.maximumf %225, %226 : vector<8x80xf32>
    %228 = vector.shape_cast %227 : vector<8x80xf32> to vector<2x4x80xf32>
    %c0_225 = arith.constant 0 : index
    %c2_226 = arith.constant 2 : index
    %c40_227 = arith.constant 40 : index
    %229 = vector.load %arg36[%c0_225, %c2_226, %c40_227] : memref<2x8x160xf32, #tpu.memory_space<vmem>>, vector<2x4x80xf32>
    tpu.vector_store %arg36[%c0_225, %c2_226, %c40_227], %228 {strides = array<i32>} : memref<2x8x160xf32, #tpu.memory_space<vmem>>, vector<2x4x80xf32>,
    %cst_228 = arith.constant 0.000000e+00 : f32
    %230 = vector.broadcast %cst_228 : f32 to vector<8x80xf32>
    %c0_229 = arith.constant 0 : index
    %c0_230 = arith.constant 0 : index
    %231 = vector.load %arg13[%c0_229, %c0_230] : memref<1x80xf32, #tpu.memory_space<vmem>>, vector<1x80xf32>
    %232 = vector.broadcast %231 : vector<1x80xf32> to vector<8x80xf32>
    %233 = arith.addf %230, %232 : vector<8x80xf32>
    %c0_231 = arith.constant 0 : index
    %c0_232 = arith.constant 0 : index
    %c0_233 = arith.constant 0 : index
    %234 = vector.load %arg36[%c0_231, %c0_232, %c0_233] : memref<2x8x160xf32, #tpu.memory_space<vmem>>, vector<2x4x160xf32>
    %235 = vector.shape_cast %234 : vector<2x4x160xf32> to vector<8x160xf32>
    %c0_234 = arith.constant 0 : index
    %c0_235 = arith.constant 0 : index
    %c0_236 = arith.constant 0 : index
    %236 = vector.load %arg6[%c0_234, %c0_235, %c0_236] : memref<5x160x80xf32, #tpu.memory_space<vmem>>, vector<1x160x80xf32>
    %237 = vector.shape_cast %236 : vector<1x160x80xf32> to vector<160x80xf32>
    %cst_237 = arith.constant dense<0.000000e+00> : vector<8x80xf32>
    %238 = tpu.matmul %235, %237, %cst_237 {dimension_numbers = #tpu.dot_dimension_numbers<[1], [0], [0], [1], [0, 0, 1, 1], [], []>} : vector<8x160xf32>, vector<160x80xf32>, vector<8x80xf32> -> vector<8x80xf32>
    %239 = arith.addf %233, %238 : vector<8x80xf32>
    %c0_238 = arith.constant 0 : index
    %c1_239 = arith.constant 1 : index
    %c0_240 = arith.constant 0 : index
    %240 = vector.load %arg36[%c0_238, %c1_239, %c0_240] : memref<2x8x160xf32, #tpu.memory_space<vmem>>, vector<2x4x160xf32>
    %241 = vector.shape_cast %240 : vector<2x4x160xf32> to vector<8x160xf32>
    %c1_241 = arith.constant 1 : index
    %c0_242 = arith.constant 0 : index
    %c0_243 = arith.constant 0 : index
    %242 = vector.load %arg6[%c1_241, %c0_242, %c0_243] : memref<5x160x80xf32, #tpu.memory_space<vmem>>, vector<1x160x80xf32>
    %243 = vector.shape_cast %242 : vector<1x160x80xf32> to vector<160x80xf32>
    %cst_244 = arith.constant dense<0.000000e+00> : vector<8x80xf32>
    %244 = tpu.matmul %241, %243, %cst_244 {dimension_numbers = #tpu.dot_dimension_numbers<[1], [0], [0], [1], [0, 0, 1, 1], [], []>} : vector<8x160xf32>, vector<160x80xf32>, vector<8x80xf32> -> vector<8x80xf32>
    %245 = arith.addf %239, %244 : vector<8x80xf32>
    %c0_245 = arith.constant 0 : index
    %c2_246 = arith.constant 2 : index
    %c0_247 = arith.constant 0 : index
    %246 = vector.load %arg36[%c0_245, %c2_246, %c0_247] : memref<2x8x160xf32, #tpu.memory_space<vmem>>, vector<2x4x160xf32>
    %247 = vector.shape_cast %246 : vector<2x4x160xf32> to vector<8x160xf32>
    %c2_248 = arith.constant 2 : index
    %c0_249 = arith.constant 0 : index
    %c0_250 = arith.constant 0 : index
    %248 = vector.load %arg6[%c2_248, %c0_249, %c0_250] : memref<5x160x80xf32, #tpu.memory_space<vmem>>, vector<1x160x80xf32>
    %249 = vector.shape_cast %248 : vector<1x160x80xf32> to vector<160x80xf32>
    %cst_251 = arith.constant dense<0.000000e+00> : vector<8x80xf32>
    %250 = tpu.matmul %247, %249, %cst_251 {dimension_numbers = #tpu.dot_dimension_numbers<[1], [0], [0], [1], [0, 0, 1, 1], [], []>} : vector<8x160xf32>, vector<160x80xf32>, vector<8x80xf32> -> vector<8x80xf32>
    %251 = arith.addf %245, %250 : vector<8x80xf32>
    %c0_252 = arith.constant 0 : index
    %c3_253 = arith.constant 3 : index
    %c0_254 = arith.constant 0 : index
    %252 = vector.load %arg36[%c0_252, %c3_253, %c0_254] : memref<2x8x160xf32, #tpu.memory_space<vmem>>, vector<2x4x160xf32>
    %253 = vector.shape_cast %252 : vector<2x4x160xf32> to vector<8x160xf32>
    %c3_255 = arith.constant 3 : index
    %c0_256 = arith.constant 0 : index
    %c0_257 = arith.constant 0 : index
    %254 = vector.load %arg6[%c3_255, %c0_256, %c0_257] : memref<5x160x80xf32, #tpu.memory_space<vmem>>, vector<1x160x80xf32>
    %255 = vector.shape_cast %254 : vector<1x160x80xf32> to vector<160x80xf32>
    %cst_258 = arith.constant dense<0.000000e+00> : vector<8x80xf32>
    %256 = tpu.matmul %253, %255, %cst_258 {dimension_numbers = #tpu.dot_dimension_numbers<[1], [0], [0], [1], [0, 0, 1, 1], [], []>} : vector<8x160xf32>, vector<160x80xf32>, vector<8x80xf32> -> vector<8x80xf32>
    %257 = arith.addf %251, %256 : vector<8x80xf32>
    %c0_259 = arith.constant 0 : index
    %c4_260 = arith.constant 4 : index
    %c0_261 = arith.constant 0 : index
    %258 = vector.load %arg36[%c0_259, %c4_260, %c0_261] : memref<2x8x160xf32, #tpu.memory_space<vmem>>, vector<2x4x160xf32>
    %259 = vector.shape_cast %258 : vector<2x4x160xf32> to vector<8x160xf32>
    %c4_262 = arith.constant 4 : index
    %c0_263 = arith.constant 0 : index
    %c0_264 = arith.constant 0 : index
    %260 = vector.load %arg6[%c4_262, %c0_263, %c0_264] : memref<5x160x80xf32, #tpu.memory_space<vmem>>, vector<1x160x80xf32>
    %261 = vector.shape_cast %260 : vector<1x160x80xf32> to vector<160x80xf32>
    %cst_265 = arith.constant dense<0.000000e+00> : vector<8x80xf32>
    %262 = tpu.matmul %259, %261, %cst_265 {dimension_numbers = #tpu.dot_dimension_numbers<[1], [0], [0], [1], [0, 0, 1, 1], [], []>} : vector<8x160xf32>, vector<160x80xf32>, vector<8x80xf32> -> vector<8x80xf32>
    %263 = arith.addf %257, %262 : vector<8x80xf32>
    %cst_266 = arith.constant 0.000000e+00 : f32
    %264 = vector.broadcast %cst_266 : f32 to vector<8x80xf32>
    %265 = arith.maximumf %263, %264 : vector<8x80xf32>
    %266 = vector.shape_cast %265 : vector<8x80xf32> to vector<2x4x80xf32>
    %c0_267 = arith.constant 0 : index
    %c2_268 = arith.constant 2 : index
    %c40_269 = arith.constant 40 : index
    %267 = vector.load %arg36[%c0_267, %c2_268, %c40_269] : memref<2x8x160xf32, #tpu.memory_space<vmem>>, vector<2x4x80xf32>
    tpu.vector_store %arg36[%c0_267, %c2_268, %c40_269], %266 {strides = array<i32>} : memref<2x8x160xf32, #tpu.memory_space<vmem>>, vector<2x4x80xf32>,
    %cst_270 = arith.constant 0.000000e+00 : f32
    %268 = vector.broadcast %cst_270 : f32 to vector<8x80xf32>
    %c0_271 = arith.constant 0 : index
    %c0_272 = arith.constant 0 : index
    %269 = vector.load %arg14[%c0_271, %c0_272] : memref<1x80xf32, #tpu.memory_space<vmem>>, vector<1x80xf32>
    %270 = vector.broadcast %269 : vector<1x80xf32> to vector<8x80xf32>
    %271 = arith.addf %268, %270 : vector<8x80xf32>
    %c0_273 = arith.constant 0 : index
    %c0_274 = arith.constant 0 : index
    %c0_275 = arith.constant 0 : index
    %272 = vector.load %arg36[%c0_273, %c0_274, %c0_275] : memref<2x8x160xf32, #tpu.memory_space<vmem>>, vector<2x4x160xf32>
    %273 = vector.shape_cast %272 : vector<2x4x160xf32> to vector<8x160xf32>
    %c0_276 = arith.constant 0 : index
    %c0_277 = arith.constant 0 : index
    %c0_278 = arith.constant 0 : index
    %274 = vector.load %arg7[%c0_276, %c0_277, %c0_278] : memref<5x160x80xf32, #tpu.memory_space<vmem>>, vector<1x160x80xf32>
    %275 = vector.shape_cast %274 : vector<1x160x80xf32> to vector<160x80xf32>
    %cst_279 = arith.constant dense<0.000000e+00> : vector<8x80xf32>
    %276 = tpu.matmul %273, %275, %cst_279 {dimension_numbers = #tpu.dot_dimension_numbers<[1], [0], [0], [1], [0, 0, 1, 1], [], []>} : vector<8x160xf32>, vector<160x80xf32>, vector<8x80xf32> -> vector<8x80xf32>
    %277 = arith.addf %271, %276 : vector<8x80xf32>
    %c0_280 = arith.constant 0 : index
    %c1_281 = arith.constant 1 : index
    %c0_282 = arith.constant 0 : index
    %278 = vector.load %arg36[%c0_280, %c1_281, %c0_282] : memref<2x8x160xf32, #tpu.memory_space<vmem>>, vector<2x4x160xf32>
    %279 = vector.shape_cast %278 : vector<2x4x160xf32> to vector<8x160xf32>
    %c1_283 = arith.constant 1 : index
    %c0_284 = arith.constant 0 : index
    %c0_285 = arith.constant 0 : index
    %280 = vector.load %arg7[%c1_283, %c0_284, %c0_285] : memref<5x160x80xf32, #tpu.memory_space<vmem>>, vector<1x160x80xf32>
    %281 = vector.shape_cast %280 : vector<1x160x80xf32> to vector<160x80xf32>
    %cst_286 = arith.constant dense<0.000000e+00> : vector<8x80xf32>
    %282 = tpu.matmul %279, %281, %cst_286 {dimension_numbers = #tpu.dot_dimension_numbers<[1], [0], [0], [1], [0, 0, 1, 1], [], []>} : vector<8x160xf32>, vector<160x80xf32>, vector<8x80xf32> -> vector<8x80xf32>
    %283 = arith.addf %277, %282 : vector<8x80xf32>
    %c0_287 = arith.constant 0 : index
    %c2_288 = arith.constant 2 : index
    %c0_289 = arith.constant 0 : index
    %284 = vector.load %arg36[%c0_287, %c2_288, %c0_289] : memref<2x8x160xf32, #tpu.memory_space<vmem>>, vector<2x4x160xf32>
    %285 = vector.shape_cast %284 : vector<2x4x160xf32> to vector<8x160xf32>
    %c2_290 = arith.constant 2 : index
    %c0_291 = arith.constant 0 : index
    %c0_292 = arith.constant 0 : index
    %286 = vector.load %arg7[%c2_290, %c0_291, %c0_292] : memref<5x160x80xf32, #tpu.memory_space<vmem>>, vector<1x160x80xf32>
    %287 = vector.shape_cast %286 : vector<1x160x80xf32> to vector<160x80xf32>
    %cst_293 = arith.constant dense<0.000000e+00> : vector<8x80xf32>
    %288 = tpu.matmul %285, %287, %cst_293 {dimension_numbers = #tpu.dot_dimension_numbers<[1], [0], [0], [1], [0, 0, 1, 1], [], []>} : vector<8x160xf32>, vector<160x80xf32>, vector<8x80xf32> -> vector<8x80xf32>
    %289 = arith.addf %283, %288 : vector<8x80xf32>
    %c0_294 = arith.constant 0 : index
    %c3_295 = arith.constant 3 : index
    %c0_296 = arith.constant 0 : index
    %290 = vector.load %arg36[%c0_294, %c3_295, %c0_296] : memref<2x8x160xf32, #tpu.memory_space<vmem>>, vector<2x4x160xf32>
    %291 = vector.shape_cast %290 : vector<2x4x160xf32> to vector<8x160xf32>
    %c3_297 = arith.constant 3 : index
    %c0_298 = arith.constant 0 : index
    %c0_299 = arith.constant 0 : index
    %292 = vector.load %arg7[%c3_297, %c0_298, %c0_299] : memref<5x160x80xf32, #tpu.memory_space<vmem>>, vector<1x160x80xf32>
    %293 = vector.shape_cast %292 : vector<1x160x80xf32> to vector<160x80xf32>
    %cst_300 = arith.constant dense<0.000000e+00> : vector<8x80xf32>
    %294 = tpu.matmul %291, %293, %cst_300 {dimension_numbers = #tpu.dot_dimension_numbers<[1], [0], [0], [1], [0, 0, 1, 1], [], []>} : vector<8x160xf32>, vector<160x80xf32>, vector<8x80xf32> -> vector<8x80xf32>
    %295 = arith.addf %289, %294 : vector<8x80xf32>
    %c0_301 = arith.constant 0 : index
    %c4_302 = arith.constant 4 : index
    %c0_303 = arith.constant 0 : index
    %296 = vector.load %arg36[%c0_301, %c4_302, %c0_303] : memref<2x8x160xf32, #tpu.memory_space<vmem>>, vector<2x4x160xf32>
    %297 = vector.shape_cast %296 : vector<2x4x160xf32> to vector<8x160xf32>
    %c4_304 = arith.constant 4 : index
    %c0_305 = arith.constant 0 : index
    %c0_306 = arith.constant 0 : index
    %298 = vector.load %arg7[%c4_304, %c0_305, %c0_306] : memref<5x160x80xf32, #tpu.memory_space<vmem>>, vector<1x160x80xf32>
    %299 = vector.shape_cast %298 : vector<1x160x80xf32> to vector<160x80xf32>
    %cst_307 = arith.constant dense<0.000000e+00> : vector<8x80xf32>
    %300 = tpu.matmul %297, %299, %cst_307 {dimension_numbers = #tpu.dot_dimension_numbers<[1], [0], [0], [1], [0, 0, 1, 1], [], []>} : vector<8x160xf32>, vector<160x80xf32>, vector<8x80xf32> -> vector<8x80xf32>
    %301 = arith.addf %295, %300 : vector<8x80xf32>
    %302 = arith.addf %301, %189 : vector<8x80xf32>
    %303 = vector.shape_cast %302 : vector<8x80xf32> to vector<2x4x80xf32>
    %c0_308 = arith.constant 0 : index
    %c2_309 = arith.constant 2 : index
    %c40_310 = arith.constant 40 : index
    %304 = vector.load %arg36[%c0_308, %c2_309, %c40_310] : memref<2x8x160xf32, #tpu.memory_space<vmem>>, vector<2x4x80xf32>
    tpu.vector_store %arg36[%c0_308, %c2_309, %c40_310], %303 {strides = array<i32>} : memref<2x8x160xf32, #tpu.memory_space<vmem>>, vector<2x4x80xf32>,
    %cst_311 = arith.constant 0.000000e+00 : f32
    %305 = vector.broadcast %cst_311 : f32 to vector<2x4x160xf32>
    %c0_312 = arith.constant 0 : index
    %c0_313 = arith.constant 0 : index
    %c0_314 = arith.constant 0 : index
    %306 = vector.load %arg37[%c0_312, %c0_313, %c0_314] : memref<2x4x160xf32, #tpu.memory_space<vmem>>, vector<2x4x160xf32>
    tpu.vector_store %arg37[%c0_312, %c0_313, %c0_314], %305 {strides = array<i32>} : memref<2x4x160xf32, #tpu.memory_space<vmem>>, vector<2x4x160xf32>,
    %c0_315 = arith.constant 0 : index
    %c2_316 = arith.constant 2 : index
    %c40_317 = arith.constant 40 : index
    %307 = vector.load %arg36[%c0_315, %c2_316, %c40_317] : memref<2x8x160xf32, #tpu.memory_space<vmem>>, vector<2x2x40xf32>
    %cst_318 = arith.constant dense<0xFF800000> : vector<2x40xf32>
    %308 = vector.multi_reduction <maximumf>, %307, %cst_318 [1] : vector<2x2x40xf32> to vector<2x40xf32>
    %309 = vector.extract_strided_slice %308 {offsets = [0, 0], sizes = [2, 20], strides = [1, 1]} : vector<2x40xf32> to vector<2x20xf32>
    %310 = vector.extract_strided_slice %308 {offsets = [0, 20], sizes = [2, 20], strides = [1, 1]} : vector<2x40xf32> to vector<2x20xf32>
    %311 = arith.maximumf %309, %310 : vector<2x20xf32>
    %312 = vector.shape_cast %311 : vector<2x20xf32> to vector<2x1x20xf32>
    %c0_319 = arith.constant 0 : index
    %c1_320 = arith.constant 1 : index
    %c40_321 = arith.constant 40 : index
    %313 = vector.load %arg37[%c0_319, %c1_320, %c40_321] : memref<2x4x160xf32, #tpu.memory_space<vmem>>, vector<2x1x20xf32>
    tpu.vector_store %arg37[%c0_319, %c1_320, %c40_321], %312 {strides = array<i32>} : memref<2x4x160xf32, #tpu.memory_space<vmem>>, vector<2x1x20xf32>,
    %c0_322 = arith.constant 0 : index
    %c2_323 = arith.constant 2 : index
    %c80_324 = arith.constant 80 : index
    %314 = vector.load %arg36[%c0_322, %c2_323, %c80_324] : memref<2x8x160xf32, #tpu.memory_space<vmem>>, vector<2x2x40xf32>
    %cst_325 = arith.constant dense<0xFF800000> : vector<2x40xf32>
    %315 = vector.multi_reduction <maximumf>, %314, %cst_325 [1] : vector<2x2x40xf32> to vector<2x40xf32>
    %316 = vector.extract_strided_slice %315 {offsets = [0, 0], sizes = [2, 20], strides = [1, 1]} : vector<2x40xf32> to vector<2x20xf32>
    %317 = vector.extract_strided_slice %315 {offsets = [0, 20], sizes = [2, 20], strides = [1, 1]} : vector<2x40xf32> to vector<2x20xf32>
    %318 = arith.maximumf %316, %317 : vector<2x20xf32>
    %319 = vector.shape_cast %318 : vector<2x20xf32> to vector<2x1x20xf32>
    %c0_326 = arith.constant 0 : index
    %c1_327 = arith.constant 1 : index
    %c80_328 = arith.constant 80 : index
    %320 = vector.load %arg37[%c0_326, %c1_327, %c80_328] : memref<2x4x160xf32, #tpu.memory_space<vmem>>, vector<2x1x20xf32>
    tpu.vector_store %arg37[%c0_326, %c1_327, %c80_328], %319 {strides = array<i32>} : memref<2x4x160xf32, #tpu.memory_space<vmem>>, vector<2x1x20xf32>,
    %c0_329 = arith.constant 0 : index
    %c4_330 = arith.constant 4 : index
    %c40_331 = arith.constant 40 : index
    %321 = vector.load %arg36[%c0_329, %c4_330, %c40_331] : memref<2x8x160xf32, #tpu.memory_space<vmem>>, vector<2x2x40xf32>
    %cst_332 = arith.constant dense<0xFF800000> : vector<2x40xf32>
    %322 = vector.multi_reduction <maximumf>, %321, %cst_332 [1] : vector<2x2x40xf32> to vector<2x40xf32>
    %323 = vector.extract_strided_slice %322 {offsets = [0, 0], sizes = [2, 20], strides = [1, 1]} : vector<2x40xf32> to vector<2x20xf32>
    %324 = vector.extract_strided_slice %322 {offsets = [0, 20], sizes = [2, 20], strides = [1, 1]} : vector<2x40xf32> to vector<2x20xf32>
    %325 = arith.maximumf %323, %324 : vector<2x20xf32>
    %326 = vector.shape_cast %325 : vector<2x20xf32> to vector<2x1x20xf32>
    %c0_333 = arith.constant 0 : index
    %c2_334 = arith.constant 2 : index
    %c40_335 = arith.constant 40 : index
    %327 = vector.load %arg37[%c0_333, %c2_334, %c40_335] : memref<2x4x160xf32, #tpu.memory_space<vmem>>, vector<2x1x20xf32>
    tpu.vector_store %arg37[%c0_333, %c2_334, %c40_335], %326 {strides = array<i32>} : memref<2x4x160xf32, #tpu.memory_space<vmem>>, vector<2x1x20xf32>,
    %c0_336 = arith.constant 0 : index
    %c4_337 = arith.constant 4 : index
    %c80_338 = arith.constant 80 : index
    %328 = vector.load %arg36[%c0_336, %c4_337, %c80_338] : memref<2x8x160xf32, #tpu.memory_space<vmem>>, vector<2x2x40xf32>
    %cst_339 = arith.constant dense<0xFF800000> : vector<2x40xf32>
    %329 = vector.multi_reduction <maximumf>, %328, %cst_339 [1] : vector<2x2x40xf32> to vector<2x40xf32>
    %330 = vector.extract_strided_slice %329 {offsets = [0, 0], sizes = [2, 20], strides = [1, 1]} : vector<2x40xf32> to vector<2x20xf32>
    %331 = vector.extract_strided_slice %329 {offsets = [0, 20], sizes = [2, 20], strides = [1, 1]} : vector<2x40xf32> to vector<2x20xf32>
    %332 = arith.maximumf %330, %331 : vector<2x20xf32>
    %333 = vector.shape_cast %332 : vector<2x20xf32> to vector<2x1x20xf32>
    %c0_340 = arith.constant 0 : index
    %c2_341 = arith.constant 2 : index
    %c80_342 = arith.constant 80 : index
    %334 = vector.load %arg37[%c0_340, %c2_341, %c80_342] : memref<2x4x160xf32, #tpu.memory_space<vmem>>, vector<2x1x20xf32>
    tpu.vector_store %arg37[%c0_340, %c2_341, %c80_342], %333 {strides = array<i32>} : memref<2x4x160xf32, #tpu.memory_space<vmem>>, vector<2x1x20xf32>,
    %cst_343 = arith.constant 0.000000e+00 : f32
    %335 = vector.broadcast %cst_343 : f32 to vector<4x80xf32>
    %c0_344 = arith.constant 0 : index
    %c0_345 = arith.constant 0 : index
    %336 = vector.load %arg22[%c0_344, %c0_345] : memref<1x80xf32, #tpu.memory_space<vmem>>, vector<1x80xf32>
    %337 = vector.broadcast %336 : vector<1x80xf32> to vector<4x80xf32>
    %338 = arith.addf %335, %337 : vector<4x80xf32>
    %c0_346 = arith.constant 0 : index
    %c0_347 = arith.constant 0 : index
    %c0_348 = arith.constant 0 : index
    %339 = vector.load %arg37[%c0_346, %c0_347, %c0_348] : memref<2x4x160xf32, #tpu.memory_space<vmem>>, vector<2x2x160xf32>
    %340 = vector.shape_cast %339 : vector<2x2x160xf32> to vector<4x160xf32>
    %c0_349 = arith.constant 0 : index
    %c0_350 = arith.constant 0 : index
    %c0_351 = arith.constant 0 : index
    %341 = vector.load %arg15[%c0_349, %c0_350, %c0_351] : memref<3x160x80xf32, #tpu.memory_space<vmem>>, vector<1x160x80xf32>
    %342 = vector.shape_cast %341 : vector<1x160x80xf32> to vector<160x80xf32>
    %cst_352 = arith.constant dense<0.000000e+00> : vector<4x80xf32>
    %343 = tpu.matmul %340, %342, %cst_352 {dimension_numbers = #tpu.dot_dimension_numbers<[1], [0], [0], [1], [0, 0, 1, 1], [], []>} : vector<4x160xf32>, vector<160x80xf32>, vector<4x80xf32> -> vector<4x80xf32>
    %344 = arith.addf %338, %343 : vector<4x80xf32>
    %c0_353 = arith.constant 0 : index
    %c1_354 = arith.constant 1 : index
    %c0_355 = arith.constant 0 : index
    %345 = vector.load %arg37[%c0_353, %c1_354, %c0_355] : memref<2x4x160xf32, #tpu.memory_space<vmem>>, vector<2x2x160xf32>
    %346 = vector.shape_cast %345 : vector<2x2x160xf32> to vector<4x160xf32>
    %c1_356 = arith.constant 1 : index
    %c0_357 = arith.constant 0 : index
    %c0_358 = arith.constant 0 : index
    %347 = vector.load %arg15[%c1_356, %c0_357, %c0_358] : memref<3x160x80xf32, #tpu.memory_space<vmem>>, vector<1x160x80xf32>
    %348 = vector.shape_cast %347 : vector<1x160x80xf32> to vector<160x80xf32>
    %cst_359 = arith.constant dense<0.000000e+00> : vector<4x80xf32>
    %349 = tpu.matmul %346, %348, %cst_359 {dimension_numbers = #tpu.dot_dimension_numbers<[1], [0], [0], [1], [0, 0, 1, 1], [], []>} : vector<4x160xf32>, vector<160x80xf32>, vector<4x80xf32> -> vector<4x80xf32>
    %350 = arith.addf %344, %349 : vector<4x80xf32>
    %c0_360 = arith.constant 0 : index
    %c2_361 = arith.constant 2 : index
    %c0_362 = arith.constant 0 : index
    %351 = vector.load %arg37[%c0_360, %c2_361, %c0_362] : memref<2x4x160xf32, #tpu.memory_space<vmem>>, vector<2x2x160xf32>
    %352 = vector.shape_cast %351 : vector<2x2x160xf32> to vector<4x160xf32>
    %c2_363 = arith.constant 2 : index
    %c0_364 = arith.constant 0 : index
    %c0_365 = arith.constant 0 : index
    %353 = vector.load %arg15[%c2_363, %c0_364, %c0_365] : memref<3x160x80xf32, #tpu.memory_space<vmem>>, vector<1x160x80xf32>
    %354 = vector.shape_cast %353 : vector<1x160x80xf32> to vector<160x80xf32>
    %cst_366 = arith.constant dense<0.000000e+00> : vector<4x80xf32>
    %355 = tpu.matmul %352, %354, %cst_366 {dimension_numbers = #tpu.dot_dimension_numbers<[1], [0], [0], [1], [0, 0, 1, 1], [], []>} : vector<4x160xf32>, vector<160x80xf32>, vector<4x80xf32> -> vector<4x80xf32>
    %356 = arith.addf %350, %355 : vector<4x80xf32>
    %357 = vector.shape_cast %356 : vector<4x80xf32> to vector<2x2x80xf32>
    %c0_367 = arith.constant 0 : index
    %c1_368 = arith.constant 1 : index
    %c40_369 = arith.constant 40 : index
    %358 = vector.load %arg37[%c0_367, %c1_368, %c40_369] : memref<2x4x160xf32, #tpu.memory_space<vmem>>, vector<2x2x80xf32>
    tpu.vector_store %arg37[%c0_367, %c1_368, %c40_369], %357 {strides = array<i32>} : memref<2x4x160xf32, #tpu.memory_space<vmem>>, vector<2x2x80xf32>,
    %cst_370 = arith.constant 0.000000e+00 : f32
    %359 = vector.broadcast %cst_370 : f32 to vector<4x80xf32>
    %c0_371 = arith.constant 0 : index
    %c0_372 = arith.constant 0 : index
    %360 = vector.load %arg23[%c0_371, %c0_372] : memref<1x80xf32, #tpu.memory_space<vmem>>, vector<1x80xf32>
    %361 = vector.broadcast %360 : vector<1x80xf32> to vector<4x80xf32>
    %362 = arith.addf %359, %361 : vector<4x80xf32>
    %c0_373 = arith.constant 0 : index
    %c0_374 = arith.constant 0 : index
    %c0_375 = arith.constant 0 : index
    %363 = vector.load %arg37[%c0_373, %c0_374, %c0_375] : memref<2x4x160xf32, #tpu.memory_space<vmem>>, vector<2x2x160xf32>
    %364 = vector.shape_cast %363 : vector<2x2x160xf32> to vector<4x160xf32>
    %c0_376 = arith.constant 0 : index
    %c0_377 = arith.constant 0 : index
    %c0_378 = arith.constant 0 : index
    %365 = vector.load %arg16[%c0_376, %c0_377, %c0_378] : memref<3x160x80xf32, #tpu.memory_space<vmem>>, vector<1x160x80xf32>
    %366 = vector.shape_cast %365 : vector<1x160x80xf32> to vector<160x80xf32>
    %cst_379 = arith.constant dense<0.000000e+00> : vector<4x80xf32>
    %367 = tpu.matmul %364, %366, %cst_379 {dimension_numbers = #tpu.dot_dimension_numbers<[1], [0], [0], [1], [0, 0, 1, 1], [], []>} : vector<4x160xf32>, vector<160x80xf32>, vector<4x80xf32> -> vector<4x80xf32>
    %368 = arith.addf %362, %367 : vector<4x80xf32>
    %c0_380 = arith.constant 0 : index
    %c1_381 = arith.constant 1 : index
    %c0_382 = arith.constant 0 : index
    %369 = vector.load %arg37[%c0_380, %c1_381, %c0_382] : memref<2x4x160xf32, #tpu.memory_space<vmem>>, vector<2x2x160xf32>
    %370 = vector.shape_cast %369 : vector<2x2x160xf32> to vector<4x160xf32>
    %c1_383 = arith.constant 1 : index
    %c0_384 = arith.constant 0 : index
    %c0_385 = arith.constant 0 : index
    %371 = vector.load %arg16[%c1_383, %c0_384, %c0_385] : memref<3x160x80xf32, #tpu.memory_space<vmem>>, vector<1x160x80xf32>
    %372 = vector.shape_cast %371 : vector<1x160x80xf32> to vector<160x80xf32>
    %cst_386 = arith.constant dense<0.000000e+00> : vector<4x80xf32>
    %373 = tpu.matmul %370, %372, %cst_386 {dimension_numbers = #tpu.dot_dimension_numbers<[1], [0], [0], [1], [0, 0, 1, 1], [], []>} : vector<4x160xf32>, vector<160x80xf32>, vector<4x80xf32> -> vector<4x80xf32>
    %374 = arith.addf %368, %373 : vector<4x80xf32>
    %c0_387 = arith.constant 0 : index
    %c2_388 = arith.constant 2 : index
    %c0_389 = arith.constant 0 : index
    %375 = vector.load %arg37[%c0_387, %c2_388, %c0_389] : memref<2x4x160xf32, #tpu.memory_space<vmem>>, vector<2x2x160xf32>
    %376 = vector.shape_cast %375 : vector<2x2x160xf32> to vector<4x160xf32>
    %c2_390 = arith.constant 2 : index
    %c0_391 = arith.constant 0 : index
    %c0_392 = arith.constant 0 : index
    %377 = vector.load %arg16[%c2_390, %c0_391, %c0_392] : memref<3x160x80xf32, #tpu.memory_space<vmem>>, vector<1x160x80xf32>
    %378 = vector.shape_cast %377 : vector<1x160x80xf32> to vector<160x80xf32>
    %cst_393 = arith.constant dense<0.000000e+00> : vector<4x80xf32>
    %379 = tpu.matmul %376, %378, %cst_393 {dimension_numbers = #tpu.dot_dimension_numbers<[1], [0], [0], [1], [0, 0, 1, 1], [], []>} : vector<4x160xf32>, vector<160x80xf32>, vector<4x80xf32> -> vector<4x80xf32>
    %380 = arith.addf %374, %379 : vector<4x80xf32>
    %cst_394 = arith.constant 0.000000e+00 : f32
    %381 = vector.broadcast %cst_394 : f32 to vector<4x80xf32>
    %382 = arith.maximumf %380, %381 : vector<4x80xf32>
    %383 = vector.shape_cast %382 : vector<4x80xf32> to vector<2x2x80xf32>
    %c0_395 = arith.constant 0 : index
    %c1_396 = arith.constant 1 : index
    %c40_397 = arith.constant 40 : index
    %384 = vector.load %arg37[%c0_395, %c1_396, %c40_397] : memref<2x4x160xf32, #tpu.memory_space<vmem>>, vector<2x2x80xf32>
    tpu.vector_store %arg37[%c0_395, %c1_396, %c40_397], %383 {strides = array<i32>} : memref<2x4x160xf32, #tpu.memory_space<vmem>>, vector<2x2x80xf32>,
    %cst_398 = arith.constant 0.000000e+00 : f32
    %385 = vector.broadcast %cst_398 : f32 to vector<4x80xf32>
    %c0_399 = arith.constant 0 : index
    %c0_400 = arith.constant 0 : index
    %386 = vector.load %arg24[%c0_399, %c0_400] : memref<1x80xf32, #tpu.memory_space<vmem>>, vector<1x80xf32>
    %387 = vector.broadcast %386 : vector<1x80xf32> to vector<4x80xf32>
    %388 = arith.addf %385, %387 : vector<4x80xf32>
    %c0_401 = arith.constant 0 : index
    %c0_402 = arith.constant 0 : index
    %c0_403 = arith.constant 0 : index
    %389 = vector.load %arg37[%c0_401, %c0_402, %c0_403] : memref<2x4x160xf32, #tpu.memory_space<vmem>>, vector<2x2x160xf32>
    %390 = vector.shape_cast %389 : vector<2x2x160xf32> to vector<4x160xf32>
    %c0_404 = arith.constant 0 : index
    %c0_405 = arith.constant 0 : index
    %c0_406 = arith.constant 0 : index
    %391 = vector.load %arg17[%c0_404, %c0_405, %c0_406] : memref<3x160x80xf32, #tpu.memory_space<vmem>>, vector<1x160x80xf32>
    %392 = vector.shape_cast %391 : vector<1x160x80xf32> to vector<160x80xf32>
    %cst_407 = arith.constant dense<0.000000e+00> : vector<4x80xf32>
    %393 = tpu.matmul %390, %392, %cst_407 {dimension_numbers = #tpu.dot_dimension_numbers<[1], [0], [0], [1], [0, 0, 1, 1], [], []>} : vector<4x160xf32>, vector<160x80xf32>, vector<4x80xf32> -> vector<4x80xf32>
    %394 = arith.addf %388, %393 : vector<4x80xf32>
    %c0_408 = arith.constant 0 : index
    %c1_409 = arith.constant 1 : index
    %c0_410 = arith.constant 0 : index
    %395 = vector.load %arg37[%c0_408, %c1_409, %c0_410] : memref<2x4x160xf32, #tpu.memory_space<vmem>>, vector<2x2x160xf32>
    %396 = vector.shape_cast %395 : vector<2x2x160xf32> to vector<4x160xf32>
    %c1_411 = arith.constant 1 : index
    %c0_412 = arith.constant 0 : index
    %c0_413 = arith.constant 0 : index
    %397 = vector.load %arg17[%c1_411, %c0_412, %c0_413] : memref<3x160x80xf32, #tpu.memory_space<vmem>>, vector<1x160x80xf32>
    %398 = vector.shape_cast %397 : vector<1x160x80xf32> to vector<160x80xf32>
    %cst_414 = arith.constant dense<0.000000e+00> : vector<4x80xf32>
    %399 = tpu.matmul %396, %398, %cst_414 {dimension_numbers = #tpu.dot_dimension_numbers<[1], [0], [0], [1], [0, 0, 1, 1], [], []>} : vector<4x160xf32>, vector<160x80xf32>, vector<4x80xf32> -> vector<4x80xf32>
    %400 = arith.addf %394, %399 : vector<4x80xf32>
    %c0_415 = arith.constant 0 : index
    %c2_416 = arith.constant 2 : index
    %c0_417 = arith.constant 0 : index
    %401 = vector.load %arg37[%c0_415, %c2_416, %c0_417] : memref<2x4x160xf32, #tpu.memory_space<vmem>>, vector<2x2x160xf32>
    %402 = vector.shape_cast %401 : vector<2x2x160xf32> to vector<4x160xf32>
    %c2_418 = arith.constant 2 : index
    %c0_419 = arith.constant 0 : index
    %c0_420 = arith.constant 0 : index
    %403 = vector.load %arg17[%c2_418, %c0_419, %c0_420] : memref<3x160x80xf32, #tpu.memory_space<vmem>>, vector<1x160x80xf32>
    %404 = vector.shape_cast %403 : vector<1x160x80xf32> to vector<160x80xf32>
    %cst_421 = arith.constant dense<0.000000e+00> : vector<4x80xf32>
    %405 = tpu.matmul %402, %404, %cst_421 {dimension_numbers = #tpu.dot_dimension_numbers<[1], [0], [0], [1], [0, 0, 1, 1], [], []>} : vector<4x160xf32>, vector<160x80xf32>, vector<4x80xf32> -> vector<4x80xf32>
    %406 = arith.addf %400, %405 : vector<4x80xf32>
    %cst_422 = arith.constant 0.000000e+00 : f32
    %407 = vector.broadcast %cst_422 : f32 to vector<4x80xf32>
    %408 = arith.maximumf %406, %407 : vector<4x80xf32>
    %409 = vector.shape_cast %408 : vector<4x80xf32> to vector<2x2x80xf32>
    %c0_423 = arith.constant 0 : index
    %c1_424 = arith.constant 1 : index
    %c40_425 = arith.constant 40 : index
    %410 = vector.load %arg37[%c0_423, %c1_424, %c40_425] : memref<2x4x160xf32, #tpu.memory_space<vmem>>, vector<2x2x80xf32>
    tpu.vector_store %arg37[%c0_423, %c1_424, %c40_425], %409 {strides = array<i32>} : memref<2x4x160xf32, #tpu.memory_space<vmem>>, vector<2x2x80xf32>,
    %cst_426 = arith.constant 0.000000e+00 : f32
    %411 = vector.broadcast %cst_426 : f32 to vector<4x80xf32>
    %c0_427 = arith.constant 0 : index
    %c0_428 = arith.constant 0 : index
    %412 = vector.load %arg25[%c0_427, %c0_428] : memref<1x80xf32, #tpu.memory_space<vmem>>, vector<1x80xf32>
    %413 = vector.broadcast %412 : vector<1x80xf32> to vector<4x80xf32>
    %414 = arith.addf %411, %413 : vector<4x80xf32>
    %c0_429 = arith.constant 0 : index
    %c0_430 = arith.constant 0 : index
    %c0_431 = arith.constant 0 : index
    %415 = vector.load %arg37[%c0_429, %c0_430, %c0_431] : memref<2x4x160xf32, #tpu.memory_space<vmem>>, vector<2x2x160xf32>
    %416 = vector.shape_cast %415 : vector<2x2x160xf32> to vector<4x160xf32>
    %c0_432 = arith.constant 0 : index
    %c0_433 = arith.constant 0 : index
    %c0_434 = arith.constant 0 : index
    %417 = vector.load %arg18[%c0_432, %c0_433, %c0_434] : memref<3x160x80xf32, #tpu.memory_space<vmem>>, vector<1x160x80xf32>
    %418 = vector.shape_cast %417 : vector<1x160x80xf32> to vector<160x80xf32>
    %cst_435 = arith.constant dense<0.000000e+00> : vector<4x80xf32>
    %419 = tpu.matmul %416, %418, %cst_435 {dimension_numbers = #tpu.dot_dimension_numbers<[1], [0], [0], [1], [0, 0, 1, 1], [], []>} : vector<4x160xf32>, vector<160x80xf32>, vector<4x80xf32> -> vector<4x80xf32>
    %420 = arith.addf %414, %419 : vector<4x80xf32>
    %c0_436 = arith.constant 0 : index
    %c1_437 = arith.constant 1 : index
    %c0_438 = arith.constant 0 : index
    %421 = vector.load %arg37[%c0_436, %c1_437, %c0_438] : memref<2x4x160xf32, #tpu.memory_space<vmem>>, vector<2x2x160xf32>
    %422 = vector.shape_cast %421 : vector<2x2x160xf32> to vector<4x160xf32>
    %c1_439 = arith.constant 1 : index
    %c0_440 = arith.constant 0 : index
    %c0_441 = arith.constant 0 : index
    %423 = vector.load %arg18[%c1_439, %c0_440, %c0_441] : memref<3x160x80xf32, #tpu.memory_space<vmem>>, vector<1x160x80xf32>
    %424 = vector.shape_cast %423 : vector<1x160x80xf32> to vector<160x80xf32>
    %cst_442 = arith.constant dense<0.000000e+00> : vector<4x80xf32>
    %425 = tpu.matmul %422, %424, %cst_442 {dimension_numbers = #tpu.dot_dimension_numbers<[1], [0], [0], [1], [0, 0, 1, 1], [], []>} : vector<4x160xf32>, vector<160x80xf32>, vector<4x80xf32> -> vector<4x80xf32>
    %426 = arith.addf %420, %425 : vector<4x80xf32>
    %c0_443 = arith.constant 0 : index
    %c2_444 = arith.constant 2 : index
    %c0_445 = arith.constant 0 : index
    %427 = vector.load %arg37[%c0_443, %c2_444, %c0_445] : memref<2x4x160xf32, #tpu.memory_space<vmem>>, vector<2x2x160xf32>
    %428 = vector.shape_cast %427 : vector<2x2x160xf32> to vector<4x160xf32>
    %c2_446 = arith.constant 2 : index
    %c0_447 = arith.constant 0 : index
    %c0_448 = arith.constant 0 : index
    %429 = vector.load %arg18[%c2_446, %c0_447, %c0_448] : memref<3x160x80xf32, #tpu.memory_space<vmem>>, vector<1x160x80xf32>
    %430 = vector.shape_cast %429 : vector<1x160x80xf32> to vector<160x80xf32>
    %cst_449 = arith.constant dense<0.000000e+00> : vector<4x80xf32>
    %431 = tpu.matmul %428, %430, %cst_449 {dimension_numbers = #tpu.dot_dimension_numbers<[1], [0], [0], [1], [0, 0, 1, 1], [], []>} : vector<4x160xf32>, vector<160x80xf32>, vector<4x80xf32> -> vector<4x80xf32>
    %432 = arith.addf %426, %431 : vector<4x80xf32>
    %433 = arith.addf %432, %356 : vector<4x80xf32>
    %434 = vector.shape_cast %433 : vector<4x80xf32> to vector<2x2x80xf32>
    %c0_450 = arith.constant 0 : index
    %c1_451 = arith.constant 1 : index
    %c40_452 = arith.constant 40 : index
    %435 = vector.load %arg37[%c0_450, %c1_451, %c40_452] : memref<2x4x160xf32, #tpu.memory_space<vmem>>, vector<2x2x80xf32>
    tpu.vector_store %arg37[%c0_450, %c1_451, %c40_452], %434 {strides = array<i32>} : memref<2x4x160xf32, #tpu.memory_space<vmem>>, vector<2x2x80xf32>,
    %cst_453 = arith.constant 0.000000e+00 : f32
    %436 = vector.broadcast %cst_453 : f32 to vector<4x80xf32>
    %c0_454 = arith.constant 0 : index
    %c0_455 = arith.constant 0 : index
    %437 = vector.load %arg26[%c0_454, %c0_455] : memref<1x80xf32, #tpu.memory_space<vmem>>, vector<1x80xf32>
    %438 = vector.broadcast %437 : vector<1x80xf32> to vector<4x80xf32>
    %439 = arith.addf %436, %438 : vector<4x80xf32>
    %c0_456 = arith.constant 0 : index
    %c0_457 = arith.constant 0 : index
    %c0_458 = arith.constant 0 : index
    %440 = vector.load %arg37[%c0_456, %c0_457, %c0_458] : memref<2x4x160xf32, #tpu.memory_space<vmem>>, vector<2x2x160xf32>
    %441 = vector.shape_cast %440 : vector<2x2x160xf32> to vector<4x160xf32>
    %c0_459 = arith.constant 0 : index
    %c0_460 = arith.constant 0 : index
    %c0_461 = arith.constant 0 : index
    %442 = vector.load %arg19[%c0_459, %c0_460, %c0_461] : memref<3x160x80xf32, #tpu.memory_space<vmem>>, vector<1x160x80xf32>
    %443 = vector.shape_cast %442 : vector<1x160x80xf32> to vector<160x80xf32>
    %cst_462 = arith.constant dense<0.000000e+00> : vector<4x80xf32>
    %444 = tpu.matmul %441, %443, %cst_462 {dimension_numbers = #tpu.dot_dimension_numbers<[1], [0], [0], [1], [0, 0, 1, 1], [], []>} : vector<4x160xf32>, vector<160x80xf32>, vector<4x80xf32> -> vector<4x80xf32>
    %445 = arith.addf %439, %444 : vector<4x80xf32>
    %c0_463 = arith.constant 0 : index
    %c1_464 = arith.constant 1 : index
    %c0_465 = arith.constant 0 : index
    %446 = vector.load %arg37[%c0_463, %c1_464, %c0_465] : memref<2x4x160xf32, #tpu.memory_space<vmem>>, vector<2x2x160xf32>
    %447 = vector.shape_cast %446 : vector<2x2x160xf32> to vector<4x160xf32>
    %c1_466 = arith.constant 1 : index
    %c0_467 = arith.constant 0 : index
    %c0_468 = arith.constant 0 : index
    %448 = vector.load %arg19[%c1_466, %c0_467, %c0_468] : memref<3x160x80xf32, #tpu.memory_space<vmem>>, vector<1x160x80xf32>
    %449 = vector.shape_cast %448 : vector<1x160x80xf32> to vector<160x80xf32>
    %cst_469 = arith.constant dense<0.000000e+00> : vector<4x80xf32>
    %450 = tpu.matmul %447, %449, %cst_469 {dimension_numbers = #tpu.dot_dimension_numbers<[1], [0], [0], [1], [0, 0, 1, 1], [], []>} : vector<4x160xf32>, vector<160x80xf32>, vector<4x80xf32> -> vector<4x80xf32>
    %451 = arith.addf %445, %450 : vector<4x80xf32>
    %c0_470 = arith.constant 0 : index
    %c2_471 = arith.constant 2 : index
    %c0_472 = arith.constant 0 : index
    %452 = vector.load %arg37[%c0_470, %c2_471, %c0_472] : memref<2x4x160xf32, #tpu.memory_space<vmem>>, vector<2x2x160xf32>
    %453 = vector.shape_cast %452 : vector<2x2x160xf32> to vector<4x160xf32>
    %c2_473 = arith.constant 2 : index
    %c0_474 = arith.constant 0 : index
    %c0_475 = arith.constant 0 : index
    %454 = vector.load %arg19[%c2_473, %c0_474, %c0_475] : memref<3x160x80xf32, #tpu.memory_space<vmem>>, vector<1x160x80xf32>
    %455 = vector.shape_cast %454 : vector<1x160x80xf32> to vector<160x80xf32>
    %cst_476 = arith.constant dense<0.000000e+00> : vector<4x80xf32>
    %456 = tpu.matmul %453, %455, %cst_476 {dimension_numbers = #tpu.dot_dimension_numbers<[1], [0], [0], [1], [0, 0, 1, 1], [], []>} : vector<4x160xf32>, vector<160x80xf32>, vector<4x80xf32> -> vector<4x80xf32>
    %457 = arith.addf %451, %456 : vector<4x80xf32>
    %cst_477 = arith.constant 0.000000e+00 : f32
    %458 = vector.broadcast %cst_477 : f32 to vector<4x80xf32>
    %459 = arith.maximumf %457, %458 : vector<4x80xf32>
    %460 = vector.shape_cast %459 : vector<4x80xf32> to vector<2x2x80xf32>
    %c0_478 = arith.constant 0 : index
    %c1_479 = arith.constant 1 : index
    %c40_480 = arith.constant 40 : index
    %461 = vector.load %arg37[%c0_478, %c1_479, %c40_480] : memref<2x4x160xf32, #tpu.memory_space<vmem>>, vector<2x2x80xf32>
    tpu.vector_store %arg37[%c0_478, %c1_479, %c40_480], %460 {strides = array<i32>} : memref<2x4x160xf32, #tpu.memory_space<vmem>>, vector<2x2x80xf32>,
    %cst_481 = arith.constant 0.000000e+00 : f32
    %462 = vector.broadcast %cst_481 : f32 to vector<4x80xf32>
    %c0_482 = arith.constant 0 : index
    %c0_483 = arith.constant 0 : index
    %463 = vector.load %arg27[%c0_482, %c0_483] : memref<1x80xf32, #tpu.memory_space<vmem>>, vector<1x80xf32>
    %464 = vector.broadcast %463 : vector<1x80xf32> to vector<4x80xf32>
    %465 = arith.addf %462, %464 : vector<4x80xf32>
    %c0_484 = arith.constant 0 : index
    %c0_485 = arith.constant 0 : index
    %c0_486 = arith.constant 0 : index
    %466 = vector.load %arg37[%c0_484, %c0_485, %c0_486] : memref<2x4x160xf32, #tpu.memory_space<vmem>>, vector<2x2x160xf32>
    %467 = vector.shape_cast %466 : vector<2x2x160xf32> to vector<4x160xf32>
    %c0_487 = arith.constant 0 : index
    %c0_488 = arith.constant 0 : index
    %c0_489 = arith.constant 0 : index
    %468 = vector.load %arg20[%c0_487, %c0_488, %c0_489] : memref<3x160x80xf32, #tpu.memory_space<vmem>>, vector<1x160x80xf32>
    %469 = vector.shape_cast %468 : vector<1x160x80xf32> to vector<160x80xf32>
    %cst_490 = arith.constant dense<0.000000e+00> : vector<4x80xf32>
    %470 = tpu.matmul %467, %469, %cst_490 {dimension_numbers = #tpu.dot_dimension_numbers<[1], [0], [0], [1], [0, 0, 1, 1], [], []>} : vector<4x160xf32>, vector<160x80xf32>, vector<4x80xf32> -> vector<4x80xf32>
    %471 = arith.addf %465, %470 : vector<4x80xf32>
    %c0_491 = arith.constant 0 : index
    %c1_492 = arith.constant 1 : index
    %c0_493 = arith.constant 0 : index
    %472 = vector.load %arg37[%c0_491, %c1_492, %c0_493] : memref<2x4x160xf32, #tpu.memory_space<vmem>>, vector<2x2x160xf32>
    %473 = vector.shape_cast %472 : vector<2x2x160xf32> to vector<4x160xf32>
    %c1_494 = arith.constant 1 : index
    %c0_495 = arith.constant 0 : index
    %c0_496 = arith.constant 0 : index
    %474 = vector.load %arg20[%c1_494, %c0_495, %c0_496] : memref<3x160x80xf32, #tpu.memory_space<vmem>>, vector<1x160x80xf32>
    %475 = vector.shape_cast %474 : vector<1x160x80xf32> to vector<160x80xf32>
    %cst_497 = arith.constant dense<0.000000e+00> : vector<4x80xf32>
    %476 = tpu.matmul %473, %475, %cst_497 {dimension_numbers = #tpu.dot_dimension_numbers<[1], [0], [0], [1], [0, 0, 1, 1], [], []>} : vector<4x160xf32>, vector<160x80xf32>, vector<4x80xf32> -> vector<4x80xf32>
    %477 = arith.addf %471, %476 : vector<4x80xf32>
    %c0_498 = arith.constant 0 : index
    %c2_499 = arith.constant 2 : index
    %c0_500 = arith.constant 0 : index
    %478 = vector.load %arg37[%c0_498, %c2_499, %c0_500] : memref<2x4x160xf32, #tpu.memory_space<vmem>>, vector<2x2x160xf32>
    %479 = vector.shape_cast %478 : vector<2x2x160xf32> to vector<4x160xf32>
    %c2_501 = arith.constant 2 : index
    %c0_502 = arith.constant 0 : index
    %c0_503 = arith.constant 0 : index
    %480 = vector.load %arg20[%c2_501, %c0_502, %c0_503] : memref<3x160x80xf32, #tpu.memory_space<vmem>>, vector<1x160x80xf32>
    %481 = vector.shape_cast %480 : vector<1x160x80xf32> to vector<160x80xf32>
    %cst_504 = arith.constant dense<0.000000e+00> : vector<4x80xf32>
    %482 = tpu.matmul %479, %481, %cst_504 {dimension_numbers = #tpu.dot_dimension_numbers<[1], [0], [0], [1], [0, 0, 1, 1], [], []>} : vector<4x160xf32>, vector<160x80xf32>, vector<4x80xf32> -> vector<4x80xf32>
    %483 = arith.addf %477, %482 : vector<4x80xf32>
    %cst_505 = arith.constant 0.000000e+00 : f32
    %484 = vector.broadcast %cst_505 : f32 to vector<4x80xf32>
    %485 = arith.maximumf %483, %484 : vector<4x80xf32>
    %486 = vector.shape_cast %485 : vector<4x80xf32> to vector<2x2x80xf32>
    %c0_506 = arith.constant 0 : index
    %c1_507 = arith.constant 1 : index
    %c40_508 = arith.constant 40 : index
    %487 = vector.load %arg37[%c0_506, %c1_507, %c40_508] : memref<2x4x160xf32, #tpu.memory_space<vmem>>, vector<2x2x80xf32>
    tpu.vector_store %arg37[%c0_506, %c1_507, %c40_508], %486 {strides = array<i32>} : memref<2x4x160xf32, #tpu.memory_space<vmem>>, vector<2x2x80xf32>,
    %cst_509 = arith.constant 0.000000e+00 : f32
    %488 = vector.broadcast %cst_509 : f32 to vector<4x80xf32>
    %c0_510 = arith.constant 0 : index
    %c0_511 = arith.constant 0 : index
    %489 = vector.load %arg28[%c0_510, %c0_511] : memref<1x80xf32, #tpu.memory_space<vmem>>, vector<1x80xf32>
    %490 = vector.broadcast %489 : vector<1x80xf32> to vector<4x80xf32>
    %491 = arith.addf %488, %490 : vector<4x80xf32>
    %c0_512 = arith.constant 0 : index
    %c0_513 = arith.constant 0 : index
    %c0_514 = arith.constant 0 : index
    %492 = vector.load %arg37[%c0_512, %c0_513, %c0_514] : memref<2x4x160xf32, #tpu.memory_space<vmem>>, vector<2x2x160xf32>
    %493 = vector.shape_cast %492 : vector<2x2x160xf32> to vector<4x160xf32>
    %c0_515 = arith.constant 0 : index
    %c0_516 = arith.constant 0 : index
    %c0_517 = arith.constant 0 : index
    %494 = vector.load %arg21[%c0_515, %c0_516, %c0_517] : memref<3x160x80xf32, #tpu.memory_space<vmem>>, vector<1x160x80xf32>
    %495 = vector.shape_cast %494 : vector<1x160x80xf32> to vector<160x80xf32>
    %cst_518 = arith.constant dense<0.000000e+00> : vector<4x80xf32>
    %496 = tpu.matmul %493, %495, %cst_518 {dimension_numbers = #tpu.dot_dimension_numbers<[1], [0], [0], [1], [0, 0, 1, 1], [], []>} : vector<4x160xf32>, vector<160x80xf32>, vector<4x80xf32> -> vector<4x80xf32>
    %497 = arith.addf %491, %496 : vector<4x80xf32>
    %c0_519 = arith.constant 0 : index
    %c1_520 = arith.constant 1 : index
    %c0_521 = arith.constant 0 : index
    %498 = vector.load %arg37[%c0_519, %c1_520, %c0_521] : memref<2x4x160xf32, #tpu.memory_space<vmem>>, vector<2x2x160xf32>
    %499 = vector.shape_cast %498 : vector<2x2x160xf32> to vector<4x160xf32>
    %c1_522 = arith.constant 1 : index
    %c0_523 = arith.constant 0 : index
    %c0_524 = arith.constant 0 : index
    %500 = vector.load %arg21[%c1_522, %c0_523, %c0_524] : memref<3x160x80xf32, #tpu.memory_space<vmem>>, vector<1x160x80xf32>
    %501 = vector.shape_cast %500 : vector<1x160x80xf32> to vector<160x80xf32>
    %cst_525 = arith.constant dense<0.000000e+00> : vector<4x80xf32>
    %502 = tpu.matmul %499, %501, %cst_525 {dimension_numbers = #tpu.dot_dimension_numbers<[1], [0], [0], [1], [0, 0, 1, 1], [], []>} : vector<4x160xf32>, vector<160x80xf32>, vector<4x80xf32> -> vector<4x80xf32>
    %503 = arith.addf %497, %502 : vector<4x80xf32>
    %c0_526 = arith.constant 0 : index
    %c2_527 = arith.constant 2 : index
    %c0_528 = arith.constant 0 : index
    %504 = vector.load %arg37[%c0_526, %c2_527, %c0_528] : memref<2x4x160xf32, #tpu.memory_space<vmem>>, vector<2x2x160xf32>
    %505 = vector.shape_cast %504 : vector<2x2x160xf32> to vector<4x160xf32>
    %c2_529 = arith.constant 2 : index
    %c0_530 = arith.constant 0 : index
    %c0_531 = arith.constant 0 : index
    %506 = vector.load %arg21[%c2_529, %c0_530, %c0_531] : memref<3x160x80xf32, #tpu.memory_space<vmem>>, vector<1x160x80xf32>
    %507 = vector.shape_cast %506 : vector<1x160x80xf32> to vector<160x80xf32>
    %cst_532 = arith.constant dense<0.000000e+00> : vector<4x80xf32>
    %508 = tpu.matmul %505, %507, %cst_532 {dimension_numbers = #tpu.dot_dimension_numbers<[1], [0], [0], [1], [0, 0, 1, 1], [], []>} : vector<4x160xf32>, vector<160x80xf32>, vector<4x80xf32> -> vector<4x80xf32>
    %509 = arith.addf %503, %508 : vector<4x80xf32>
    %510 = arith.addf %509, %433 : vector<4x80xf32>
    %511 = vector.shape_cast %510 : vector<4x80xf32> to vector<2x2x80xf32>
    %c0_533 = arith.constant 0 : index
    %c1_534 = arith.constant 1 : index
    %c40_535 = arith.constant 40 : index
    %512 = vector.load %arg37[%c0_533, %c1_534, %c40_535] : memref<2x4x160xf32, #tpu.memory_space<vmem>>, vector<2x2x80xf32>
    tpu.vector_store %arg37[%c0_533, %c1_534, %c40_535], %511 {strides = array<i32>} : memref<2x4x160xf32, #tpu.memory_space<vmem>>, vector<2x2x80xf32>,
    %cst_536 = arith.constant 0.000000e+00 : f32
    %513 = vector.broadcast %cst_536 : f32 to vector<2x120xf32>
    %c0_537 = arith.constant 0 : index
    %c0_538 = arith.constant 0 : index
    %514 = vector.load %arg32[%c0_537, %c0_538] : memref<1x120xf32, #tpu.memory_space<vmem>>, vector<1x120xf32>
    %515 = vector.broadcast %514 : vector<1x120xf32> to vector<2x120xf32>
    %516 = arith.addf %513, %515 : vector<2x120xf32>
    %c0_539 = arith.constant 0 : index
    %c1_540 = arith.constant 1 : index
    %c40_541 = arith.constant 40 : index
    %517 = vector.load %arg37[%c0_539, %c1_540, %c40_541] : memref<2x4x160xf32, #tpu.memory_space<vmem>>, vector<2x1x40xf32>
    %518 = vector.shape_cast %517 : vector<2x1x40xf32> to vector<2x40xf32>
    %c0_542 = arith.constant 0 : index
    %c0_543 = arith.constant 0 : index
    %c0_544 = arith.constant 0 : index
    %519 = vector.load %arg29[%c0_542, %c0_543, %c0_544] : memref<4x40x120xf32, #tpu.memory_space<vmem>>, vector<1x40x120xf32>
    %520 = vector.shape_cast %519 : vector<1x40x120xf32> to vector<40x120xf32>
    %cst_545 = arith.constant dense<0.000000e+00> : vector<2x120xf32>
    %521 = tpu.matmul %518, %520, %cst_545 {dimension_numbers = #tpu.dot_dimension_numbers<[1], [0], [0], [1], [0, 0, 1, 1], [], []>} : vector<2x40xf32>, vector<40x120xf32>, vector<2x120xf32> -> vector<2x120xf32>
    %522 = arith.addf %516, %521 : vector<2x120xf32>
    %c0_546 = arith.constant 0 : index
    %c1_547 = arith.constant 1 : index
    %c80_548 = arith.constant 80 : index
    %523 = vector.load %arg37[%c0_546, %c1_547, %c80_548] : memref<2x4x160xf32, #tpu.memory_space<vmem>>, vector<2x1x40xf32>
    %524 = vector.shape_cast %523 : vector<2x1x40xf32> to vector<2x40xf32>
    %c1_549 = arith.constant 1 : index
    %c0_550 = arith.constant 0 : index
    %c0_551 = arith.constant 0 : index
    %525 = vector.load %arg29[%c1_549, %c0_550, %c0_551] : memref<4x40x120xf32, #tpu.memory_space<vmem>>, vector<1x40x120xf32>
    %526 = vector.shape_cast %525 : vector<1x40x120xf32> to vector<40x120xf32>
    %cst_552 = arith.constant dense<0.000000e+00> : vector<2x120xf32>
    %527 = tpu.matmul %524, %526, %cst_552 {dimension_numbers = #tpu.dot_dimension_numbers<[1], [0], [0], [1], [0, 0, 1, 1], [], []>} : vector<2x40xf32>, vector<40x120xf32>, vector<2x120xf32> -> vector<2x120xf32>
    %528 = arith.addf %522, %527 : vector<2x120xf32>
    %c0_553 = arith.constant 0 : index
    %c2_554 = arith.constant 2 : index
    %c40_555 = arith.constant 40 : index
    %529 = vector.load %arg37[%c0_553, %c2_554, %c40_555] : memref<2x4x160xf32, #tpu.memory_space<vmem>>, vector<2x1x40xf32>
    %530 = vector.shape_cast %529 : vector<2x1x40xf32> to vector<2x40xf32>
    %c2_556 = arith.constant 2 : index
    %c0_557 = arith.constant 0 : index
    %c0_558 = arith.constant 0 : index
    %531 = vector.load %arg29[%c2_556, %c0_557, %c0_558] : memref<4x40x120xf32, #tpu.memory_space<vmem>>, vector<1x40x120xf32>
    %532 = vector.shape_cast %531 : vector<1x40x120xf32> to vector<40x120xf32>
    %cst_559 = arith.constant dense<0.000000e+00> : vector<2x120xf32>
    %533 = tpu.matmul %530, %532, %cst_559 {dimension_numbers = #tpu.dot_dimension_numbers<[1], [0], [0], [1], [0, 0, 1, 1], [], []>} : vector<2x40xf32>, vector<40x120xf32>, vector<2x120xf32> -> vector<2x120xf32>
    %534 = arith.addf %528, %533 : vector<2x120xf32>
    %c0_560 = arith.constant 0 : index
    %c2_561 = arith.constant 2 : index
    %c80_562 = arith.constant 80 : index
    %535 = vector.load %arg37[%c0_560, %c2_561, %c80_562] : memref<2x4x160xf32, #tpu.memory_space<vmem>>, vector<2x1x40xf32>
    %536 = vector.shape_cast %535 : vector<2x1x40xf32> to vector<2x40xf32>
    %c3_563 = arith.constant 3 : index
    %c0_564 = arith.constant 0 : index
    %c0_565 = arith.constant 0 : index
    %537 = vector.load %arg29[%c3_563, %c0_564, %c0_565] : memref<4x40x120xf32, #tpu.memory_space<vmem>>, vector<1x40x120xf32>
    %538 = vector.shape_cast %537 : vector<1x40x120xf32> to vector<40x120xf32>
    %cst_566 = arith.constant dense<0.000000e+00> : vector<2x120xf32>
    %539 = tpu.matmul %536, %538, %cst_566 {dimension_numbers = #tpu.dot_dimension_numbers<[1], [0], [0], [1], [0, 0, 1, 1], [], []>} : vector<2x40xf32>, vector<40x120xf32>, vector<2x120xf32> -> vector<2x120xf32>
    %540 = arith.addf %534, %539 : vector<2x120xf32>
    %cst_567 = arith.constant 0.000000e+00 : f32
    %541 = vector.broadcast %cst_567 : f32 to vector<2x120xf32>
    %542 = arith.maximumf %540, %541 : vector<2x120xf32>
    %c0_568 = arith.constant 0 : index
    %c0_569 = arith.constant 0 : index
    %543 = vector.load %arg30[%c0_568, %c0_569] : memref<120x60xf32, #tpu.memory_space<vmem>>, vector<120x60xf32>
    %cst_570 = arith.constant dense<0.000000e+00> : vector<2x60xf32>
    %544 = tpu.matmul %542, %543, %cst_570 {dimension_numbers = #tpu.dot_dimension_numbers<[1], [0], [0], [1], [0, 0, 1, 1], [], []>} : vector<2x120xf32>, vector<120x60xf32>, vector<2x60xf32> -> vector<2x60xf32>
    %c0_571 = arith.constant 0 : index
    %c0_572 = arith.constant 0 : index
    %545 = vector.load %arg33[%c0_571, %c0_572] : memref<1x60xf32, #tpu.memory_space<vmem>>, vector<1x60xf32>
    %546 = vector.broadcast %545 : vector<1x60xf32> to vector<2x60xf32>
    %547 = arith.addf %544, %546 : vector<2x60xf32>
    %cst_573 = arith.constant 0.000000e+00 : f32
    %548 = vector.broadcast %cst_573 : f32 to vector<2x60xf32>
    %549 = arith.maximumf %547, %548 : vector<2x60xf32>
    %c0_574 = arith.constant 0 : index
    %c0_575 = arith.constant 0 : index
    %550 = vector.load %arg31[%c0_574, %c0_575] : memref<60x1xf32, #tpu.memory_space<vmem>>, vector<60x1xf32>
    %cst_576 = arith.constant dense<0.000000e+00> : vector<2x1xf32>
    %551 = tpu.matmul %549, %550, %cst_576 {dimension_numbers = #tpu.dot_dimension_numbers<[1], [0], [0], [1], [0, 0, 1, 1], [], []>} : vector<2x60xf32>, vector<60x1xf32>, vector<2x1xf32> -> vector<2x1xf32>
    %c0_577 = arith.constant 0 : index
    %c0_578 = arith.constant 0 : index
    %552 = vector.load %arg34[%c0_577, %c0_578] : memref<1x1xf32, #tpu.memory_space<vmem>>, vector<1x1xf32>
    %553 = vector.broadcast %552 : vector<1x1xf32> to vector<2x1xf32>
    %554 = arith.addf %551, %553 : vector<2x1xf32>
    %c0_579 = arith.constant 0 : index
    %c0_580 = arith.constant 0 : index
    %555 = vector.load %arg35[%c0_579, %c0_580] : memref<2x1xf32, #tpu.memory_space<vmem>>, vector<2x1xf32>
    tpu.vector_store %arg35[%c0_579, %c0_580], %554 {strides = array<i32>} : memref<2x1xf32, #tpu.memory_space<vmem>>, vector<2x1xf32>,
    return
  }
}

</mosaic_0001>

<bundles_post_ra>
// kernel: model_residual_forward.1
= control target key start
LH: loop header
LB: loop body
LE: loop exit
PB: predicated region body
PF: predicated region fallthrough
CT: control target
= control target key end

     0   :  { %s11149_s6 = smov 1   ;;  %s11150_s10 = smov 2   ;;  %s12805_s0 = inlined_call_operand.smem [shape: u32[36], index: -1, kind: input, shape index: {}] }
   0x1   :  { %s11220_s5 = sld [smem:[%s12805_s0]]   ;;  %s11151_s14 = smov 3  }
   0x2   :  { %s11225_s9 = sld [smem:[%s12805_s0 + %s11149_s6]]   ;;  %s11152_s18 = smov 4  }
   0x3   :  { %s11230_s13 = sld [smem:[%s12805_s0 + %s11150_s10]]   ;;  %s11153_s22 = smov 5  }
   0x4   :  { %s11235_s17 = sld [smem:[%s12805_s0 + %s11151_s14]]   ;;  %s11154_s26 = smov 6  }
   0x5   :  { %s11240_s21 = sld [smem:[%s12805_s0 + %s11152_s18]]   ;;  %s11155_s30 = smov 7  }
   0x6   :  { %s11245_s25 = sld [smem:[%s12805_s0 + %s11153_s22]]   ;;  %s11156_s4 = smov 8  }
   0x7   :  { %12810 = sst [smem:[#allocation35_spill]] %s11220_s5  ;;  %s11157_s10 = smov 9  }
   0x8   :  { %s11250_s29 = sld [smem:[%s12805_s0 + %s11154_s26]]   ;;  %s11158_s15 = smov 10  }
   0x9   :  { %s11255_s3 = sld [smem:[%s12805_s0 + %s11155_s30]]   ;;  %s11159_s20 = smov 11  }
   0xa   :  { %s11260_s8 = sld [smem:[%s12805_s0 + %s11156_s4]]   ;;  %s11160_s26 = smov 12  }
   0xb   :  { %s11265_s14 = sld [smem:[%s12805_s0 + %s11157_s10]]   ;;  %s11161_s1 = smov 13  }
   0xc   :  { %s11270_s19 = sld [smem:[%s12805_s0 + %s11158_s15]]   ;;  %s11162_s7 = smov 14  }
   0xd   :  { %s11275_s24 = sld [smem:[%s12805_s0 + %s11159_s20]]   ;;  %s11163_s15 = smov 15  }
   0xe   :  { %s11280_s30 = sld [smem:[%s12805_s0 + %s11160_s26]]   ;;  %s11164_s22 = smov 16  }
   0xf   :  { %s11285_s6 = sld [smem:[%s12805_s0 + %s11161_s1]]   ;;  %s11165_s28 = smov 17  }
  0x10   :  { %12811 = sst [smem:[#allocation36_spill]] %s11260_s8  ;;  %s11183_s16 = smov 35  }
  0x11   :  { %12812 = sst [smem:[#allocation37_spill]] %s11265_s14 }
  0x12   :  { %12813 = sst [smem:[#allocation38_spill]] %s11270_s19 }
  0x13   :  { %12814 = sst [smem:[#allocation39_spill]] %s11275_s24 }
  0x14   :  { %12815 = sst [smem:[#allocation40_spill]] %s11280_s30 }
  0x15   :  { %12816 = sst [smem:[#allocation41_spill]] %s11285_s6 }
  0x16   :  { %s11290_s12 = sld [smem:[%s12805_s0 + %s11162_s7]]   ;;  %s11166_s7 = smov 18  }
  0x17   :  { %s11295_s20 = sld [smem:[%s12805_s0 + %s11163_s15]]   ;;  %s11167_s15 = smov 19  }
  0x18   :  { %s11300_s27 = sld [smem:[%s12805_s0 + %s11164_s22]]   ;;  %s11168_s22 = smov 20  }
  0x19   :  { %s11305_s4 = sld [smem:[%s12805_s0 + %s11165_s28]]   ;;  %s11169_s28 = smov 21  }
  0x1a   :  { %s11315_s6 = sld [smem:[%s12805_s0 + %s11167_s15]]   ;;  %s11171_s15 = smov 23  }
  0x1b   :  { %s11320_s30 = sld [smem:[%s12805_s0 + %s11168_s22]]   ;;  %s11172_s22 = smov 24  }
  0x1c   :  { %12817 = sst [smem:[#allocation42_spill]] %s11290_s12 }
  0x1d   :  { %s11310_s12 = sld [smem:[%s12805_s0 + %s11166_s7]]   ;;  %s11170_s7 = smov 22  }
  0x1e   :  { %s11325_s24 = sld [smem:[%s12805_s0 + %s11169_s28]]   ;;  %s11173_s28 = smov 25  }
  0x1f   :  { %s11330_s19 = sld [smem:[%s12805_s0 + %s11170_s7]]   ;;  %s11174_s7 = smov 26  }
  0x20   :  { %s11335_s14 = sld [smem:[%s12805_s0 + %s11171_s15]]   ;;  %s11175_s15 = smov 27  }
  0x21   :  { %s11340_s8 = sld [smem:[%s12805_s0 + %s11172_s22]]   ;;  %s11176_s22 = smov 28  }
  0x22   :  { %s11345_s5 = sld [smem:[%s12805_s0 + %s11173_s28]]   ;;  %s11177_s28 = smov 29  }
  0x25   :  { %12818 = sst [smem:[#allocation43_spill]] %s11330_s19 }
  0x26   :  { %12819 = sst [smem:[#allocation44_spill]] %s11335_s14 }
  0x27   :  { %12820 = sst [smem:[#allocation45_spill]] %s11340_s8 }
  0x28   :  { %12821 = sst [smem:[#allocation46_spill]] %s11345_s5 }
  0x29   :  { %s11350_s19 = sld [smem:[%s12805_s0 + %s11174_s7]]   ;;  %s11178_s7 = smov 30  }
  0x2a   :  { %s11355_s14 = sld [smem:[%s12805_s0 + %s11175_s15]]   ;;  %s11179_s15 = smov 31  }
  0x2b   :  { %s11360_s8 = sld [smem:[%s12805_s0 + %s11176_s22]]   ;;  %s11180_s22 = smov 32  }
  0x2c   :  { %s11365_s5 = sld [smem:[%s12805_s0 + %s11177_s28]]   ;;  %s11181_s28 = smov 33  }
  0x2f   :  { %12822 = sst [smem:[#allocation47_spill]] %s11350_s19 }
  0x30   :  { %12823 = sst [smem:[#allocation48_spill]] %s11355_s14 }
  0x31   :  { %12824 = sst [smem:[#allocation49_spill]] %s11360_s8 }
  0x32   :  { %12825 = sst [smem:[#allocation50_spill]] %s11365_s5 }
  0x33   :  { %s11370_s19 = sld [smem:[%s12805_s0 + %s11178_s7]]   ;;  %s11182_s7 = smov 34  }
  0x34   :  { %s11375_s14 = sld [smem:[%s12805_s0 + %s11179_s15]]  }
  0x35   :  { %s11380_s8 = sld [smem:[%s12805_s0 + %s11180_s22]]  }
  0x36   :  { %s11385_s5 = sld [smem:[%s12805_s0 + %s11181_s28]]  }
  0x39   :  { %12826 = sst [smem:[#allocation51_spill]] %s11370_s19 }
  0x3a   :  { %12827 = sst [smem:[#allocation52_spill]] %s11375_s14 }
  0x3b   :  { %s8402_s19 = sld [smem:[%s12805_s0 + %s11182_s7]]  }
  0x3c   :  { %s11393_s14 = sld [smem:[%s12805_s0 + %s11183_s16]]  }
  0x41   :  { %v76_v0 = vstv %s8402_s19 }
  0x42   :  { %77 = vst [vmem:[#allocation4] sm:$0x1] %v76_v0 }
  0x43   :  { %78 = vsyncpa [#allocation6], 0 }
  0x44   :  { %79 = vsyncpa [#allocation8], 0 }
  0x45   :  { %80 = vsyncpa [#allocation11], 0 }
  0x46   :  { %81 = vsyncpa [#allocation14], 0 }
  0x47   :  { %82 = vsyncpa [#allocation17], 0 }
  0x48   :  { %83 = vsyncpa [#allocation20], 0 }
  0x49   :  { %84 = vsyncpa [#allocation23], 0 }
  0x4a   :  { %85 = vsyncpa [#allocation26], 0  ;;  %s11184_s22 = smov [#allocation7]   ;;  %s11185_s26 = smov [#allocation10]  }
  0x4b   :  { %s105_s23 = sshll.u32 %s11184_s22, 4  ;;  %s129_s28 = sshll.u32 %s11185_s26, 4  ;;  %s106_s23 = int_to_ptr.vmem [resolvable:$true] %s105_s23  ;;  %s11395_s28 = int_to_ptr.vmem [resolvable:$true] %s129_s28 }
  0x4c   :  { %s10825_s0 = scalar_lea.hbm %s11230_s13, 12800 }
  0x4d   :  { %p10826_p0 = scmp.ne.s32.totalorder %s11230_s13, %s10825_s0  ;;  %p10829_p1 = scmp.lt.u32.totalorder %s10825_s0, %s11230_s13 }
  0x4f   :  { %p10831_p2 = pnand %p10829_p1, %p10826_p0 }
  0x51   :  { %10834 = shalt.err (!%p10831_p2)
}
  0x52   :  { %s10835_s19 = scalar_lea.vmem %s106_s23, 12800  ;;  %p10840_p4 = scmp.lt.s32.totalorder %s106_s23, %s106_s23 }
  0x53   :  { %p10836_p3 = scmp.ne.s32.totalorder %s106_s23, %s10835_s19  ;;  %p10841_p5 = scmp.lt.s32.totalorder %s10835_s19, %s10835_s19 }
  0x55   :  { %p10842_p6 = por %p10841_p5, %p10840_p4 }
  0x57   :  { %p10843_p7 = pnand %p10842_p6, %p10836_p3 }
  0x59   :  { %10846 = shalt.err (!%p10843_p7)
}
  0x5a   :  { %s11186_s1 = smov 128   ;;  %s11187_s2 = smov 8  }
  0x5b   :  { %111 = dma.hbm_to_vmem [thread:$0]  %s11230_s13, 12800, %s106_s23, [#allocation8], %s11186_s1, %s11186_s1, %s11187_s2  }
  0x5c   :  { %s10847_s7 = scalar_lea.hbm %s11240_s21, 12800 }
  0x5d   :  { %p10848_p8 = scmp.ne.s32.totalorder %s11240_s21, %s10847_s7  ;;  %p10851_p9 = scmp.lt.u32.totalorder %s10847_s7, %s11240_s21 }
  0x5f   :  { %p10853_p10 = pnand %p10851_p9, %p10848_p8 }
  0x61   :  { %10856 = shalt.err (!%p10853_p10)
}
  0x62   :  { %s10857_s10 = scalar_lea.vmem %s11395_s28, 12800  ;;  %p10862_p12 = scmp.lt.s32.totalorder %s11395_s28, %s11395_s28 }
  0x63   :  { %p10858_p11 = scmp.ne.s32.totalorder %s11395_s28, %s10857_s10  ;;  %p10863_p13 = scmp.lt.s32.totalorder %s10857_s10, %s10857_s10 }
  0x65   :  { %p10864_p0 = por %p10863_p13, %p10862_p12 }
  0x67   :  { %p10865_p1 = pnand %p10864_p0, %p10858_p11 }
  0x69   :  { %10868 = shalt.err (!%p10865_p1)
}
  0x6a   :  { %135 = dma.hbm_to_vmem [thread:$0]  %s11240_s21, 12800, %s11395_s28, [#allocation11], %s11186_s1, %s11186_s1, %s11187_s2  }
  0x6b   :  { %s11188_s13 = smov [#allocation13]   ;;  %s11189_s16 = smov [#allocation16]  }
  0x6c   :  { %s153_s11 = sshll.u32 %s11188_s13, 4  ;;  %s191_s15 = sshll.u32 %s11189_s16, 4  ;;  %s154_s11 = int_to_ptr.vmem [resolvable:$true] %s153_s11  ;;  %s11416_s15 = int_to_ptr.vmem [resolvable:$true] %s191_s15 }
  0x6d   :  { %s10869_s18 = scalar_lea.hbm %s11250_s29, 12800 }
  0x6e   :  { %p10870_p2 = scmp.ne.s32.totalorder %s11250_s29, %s10869_s18  ;;  %p10873_p3 = scmp.lt.u32.totalorder %s10869_s18, %s11250_s29 }
  0x70   :  { %p10875_p4 = pnand %p10873_p3, %p10870_p2 }
  0x72   :  { %10878 = shalt.err (!%p10875_p4)
}
  0x73   :  { %s10879_s22 = scalar_lea.vmem %s154_s11, 12800  ;;  %p10884_p6 = scmp.lt.s32.totalorder %s154_s11, %s154_s11 }
  0x74   :  { %p10880_p5 = scmp.ne.s32.totalorder %s154_s11, %s10879_s22  ;;  %p10885_p7 = scmp.lt.s32.totalorder %s10879_s22, %s10879_s22 }
  0x76   :  { %p10886_p8 = por %p10885_p7, %p10884_p6 }
  0x78   :  { %p10887_p9 = pnand %p10886_p8, %p10880_p5 }
  0x7a   :  { %10890 = shalt.err (!%p10887_p9)
}
  0x7b   :  { %159 = dma.hbm_to_vmem [thread:$0]  %s11250_s29, 12800, %s154_s11, [#allocation14], %s11186_s1, %s11186_s1, %s11187_s2  }
  0x7c   :  { %s10891_s21 = scalar_lea.hbm %s11295_s20, 7680 }
  0x7d   :  { %p10892_p10 = scmp.ne.s32.totalorder %s11295_s20, %s10891_s21  ;;  %p10895_p11 = scmp.lt.u32.totalorder %s10891_s21, %s11295_s20 }
  0x7f   :  { %p10897_p12 = pnand %p10895_p11, %p10892_p10 }
  0x81   :  { %10900 = shalt.err (!%p10897_p12)
}
  0x82   :  { %s10901_s23 = scalar_lea.vmem %s11416_s15, 7680  ;;  %p10906_p0 = scmp.lt.s32.totalorder %s11416_s15, %s11416_s15 }
  0x83   :  { %p10902_p13 = scmp.ne.s32.totalorder %s11416_s15, %s10901_s23  ;;  %p10907_p1 = scmp.lt.s32.totalorder %s10901_s23, %s10901_s23 }
  0x85   :  { %p10908_p2 = por %p10907_p1, %p10906_p0 }
  0x87   :  { %p10909_p3 = pnand %p10908_p2, %p10902_p13 }
  0x89   :  { %10912 = shalt.err (!%p10909_p3)
}
  0x8a   :  { %197 = dma.hbm_to_vmem [thread:$0]  %s11295_s20, 7680, %s11416_s15, [#allocation17], %s11186_s1, %s11186_s1, %s11187_s2  }
  0x8b   :  { %s11190_s29 = smov [#allocation19]   ;;  %s11191_s28 = smov [#allocation22]  }
  0x8c   :  { %s215_s26 = sshll.u32 %s11190_s29, 4  ;;  %s239_s0 = sshll.u32 %s11191_s28, 4  ;;  %s216_s26 = int_to_ptr.vmem [resolvable:$true] %s215_s26  ;;  %s11437_s0 = int_to_ptr.vmem [resolvable:$true] %s239_s0 }
  0x8d   :  { %s10913_s19 = scalar_lea.hbm %s11305_s4, 7680 }
  0x8e   :  { %p10914_p4 = scmp.ne.s32.totalorder %s11305_s4, %s10913_s19  ;;  %p10917_p5 = scmp.lt.u32.totalorder %s10913_s19, %s11305_s4 }
  0x90   :  { %p10919_p6 = pnand %p10917_p5, %p10914_p4 }
  0x92   :  { %10922 = shalt.err (!%p10919_p6)
}
  0x93   :  { %s10923_s7 = scalar_lea.vmem %s216_s26, 7680  ;;  %p10928_p8 = scmp.lt.s32.totalorder %s216_s26, %s216_s26 }
  0x94   :  { %p10924_p7 = scmp.ne.s32.totalorder %s216_s26, %s10923_s7  ;;  %p10929_p9 = scmp.lt.s32.totalorder %s10923_s7, %s10923_s7 }
  0x96   :  { %p10930_p10 = por %p10929_p9, %p10928_p8 }
  0x98   :  { %p10931_p11 = pnand %p10930_p10, %p10924_p7 }
  0x9a   :  { %10934 = shalt.err (!%p10931_p11)
}
  0x9b   :  { %221 = dma.hbm_to_vmem [thread:$0]  %s11305_s4, 7680, %s216_s26, [#allocation20], %s11186_s1, %s11186_s1, %s11187_s2  }
  0x9c   :  { %s10935_s20 = scalar_lea.hbm %s11315_s6, 7680 }
  0x9d   :  { %p10936_p12 = scmp.ne.s32.totalorder %s11315_s6, %s10935_s20  ;;  %p10939_p13 = scmp.lt.u32.totalorder %s10935_s20, %s11315_s6 }
  0x9f   :  { %p10941_p0 = pnand %p10939_p13, %p10936_p12 }
  0xa1   :  { %10944 = shalt.err (!%p10941_p0)
}
  0xa2   :  { %s10945_s10 = scalar_lea.vmem %s11437_s0, 7680  ;;  %p10950_p2 = scmp.lt.s32.totalorder %s11437_s0, %s11437_s0 }
  0xa3   :  { %p10946_p1 = scmp.ne.s32.totalorder %s11437_s0, %s10945_s10  ;;  %p10951_p3 = scmp.lt.s32.totalorder %s10945_s10, %s10945_s10 }
  0xa5   :  { %p10952_p4 = por %p10951_p3, %p10950_p2 }
  0xa7   :  { %p10953_p5 = pnand %p10952_p4, %p10946_p1 }
  0xa9   :  { %10956 = shalt.err (!%p10953_p5)
}
  0xaa   :  { %245 = dma.hbm_to_vmem [thread:$0]  %s11315_s6, 7680, %s11437_s0, [#allocation23], %s11186_s1, %s11186_s1, %s11187_s2  }
  0xab   :  { %s11192_s4 = smov [#allocation5]   ;;  %s11193_s11 = smov [#allocation9]  }
  0xac   :  { %s93_s13 = sshll.u32 %s11192_s4, 4  ;;  %s117_s16 = sshll.u32 %s11193_s11, 4  ;;  %s94_s13 = int_to_ptr.vmem [resolvable:$true] %s93_s13  ;;  %s11458_s16 = int_to_ptr.vmem [resolvable:$true] %s117_s16 }
  0xad   :  { %s10957_s15 = scalar_lea.hbm %s11225_s9, 12800 }
  0xae   :  { %p10958_p6 = scmp.ne.s32.totalorder %s11225_s9, %s10957_s15  ;;  %p10961_p7 = scmp.lt.u32.totalorder %s10957_s15, %s11225_s9 }
  0xb0   :  { %p10963_p8 = pnand %p10961_p7, %p10958_p6 }
  0xb2   :  { %10966 = shalt.err (!%p10963_p8)
}
  0xb3   :  { %s10967_s18 = scalar_lea.vmem %s94_s13, 12800  ;;  %p10972_p10 = scmp.lt.s32.totalorder %s94_s13, %s94_s13 }
  0xb4   :  { %p10968_p9 = scmp.ne.s32.totalorder %s94_s13, %s10967_s18  ;;  %p10973_p11 = scmp.lt.s32.totalorder %s10967_s18, %s10967_s18 }
  0xb6   :  { %p10974_p12 = por %p10973_p11, %p10972_p10 }
  0xb8   :  { %p10975_p13 = pnand %p10974_p12, %p10968_p9 }
  0xba   :  { %10978 = shalt.err (!%p10975_p13)
}
  0xbb   :  { %99 = dma.hbm_to_vmem [thread:$0]  %s11225_s9, 12800, %s94_s13, [#allocation6], %s11186_s1, %s11186_s1, %s11187_s2  }
  0xbc   :  { %s10979_s6 = scalar_lea.hbm %s11235_s17, 12800 }
  0xbd   :  { %p10980_p0 = scmp.ne.s32.totalorder %s11235_s17, %s10979_s6  ;;  %p10983_p1 = scmp.lt.u32.totalorder %s10979_s6, %s11235_s17 }
  0xbf   :  { %p10985_p2 = pnand %p10983_p1, %p10980_p0 }
  0xc1   :  { %10988 = shalt.err (!%p10985_p2)
}
  0xc2   :  { %s10989_s22 = scalar_lea.vmem %s11458_s16, 12800  ;;  %p10994_p4 = scmp.lt.s32.totalorder %s11458_s16, %s11458_s16 }
  0xc3   :  { %p10990_p3 = scmp.ne.s32.totalorder %s11458_s16, %s10989_s22  ;;  %p10995_p5 = scmp.lt.s32.totalorder %s10989_s22, %s10989_s22 }
  0xc5   :  { %p10996_p6 = por %p10995_p5, %p10994_p4 }
  0xc7   :  { %p10997_p7 = pnand %p10996_p6, %p10990_p3 }
  0xc9   :  { %11000 = shalt.err (!%p10997_p7)
}
  0xca   :  { %123 = dma.hbm_to_vmem [thread:$0]  %s11235_s17, 12800, %s11458_s16, [#allocation8], %s11186_s1, %s11186_s1, %s11187_s2  }
  0xcb   :  { %s11194_s9 = smov [#allocation12]   ;;  %s11195_s23 = smov [#allocation15]  }
  0xcc   :  { %s141_s21 = sshll.u32 %s11194_s9, 4  ;;  %s165_s29 = sshll.u32 %s11195_s23, 4  ;;  %s142_s21 = int_to_ptr.vmem [resolvable:$true] %s141_s21  ;;  %s11479_s29 = int_to_ptr.vmem [resolvable:$true] %s165_s29 }
  0xcd   :  { %s11001_s26 = scalar_lea.hbm %s11245_s25, 12800 }
  0xce   :  { %p11002_p8 = scmp.ne.s32.totalorder %s11245_s25, %s11001_s26  ;;  %p11005_p9 = scmp.lt.u32.totalorder %s11001_s26, %s11245_s25 }
  0xd0   :  { %p11007_p10 = pnand %p11005_p9, %p11002_p8 }
  0xd2   :  { %11010 = shalt.err (!%p11007_p10)
}
  0xd3   :  { %s11011_s28 = scalar_lea.vmem %s142_s21, 12800  ;;  %p11016_p12 = scmp.lt.s32.totalorder %s142_s21, %s142_s21 }
  0xd4   :  { %p11012_p11 = scmp.ne.s32.totalorder %s142_s21, %s11011_s28  ;;  %p11017_p13 = scmp.lt.s32.totalorder %s11011_s28, %s11011_s28 }
  0xd6   :  { %p11018_p0 = por %p11017_p13, %p11016_p12 }
  0xd8   :  { %p11019_p1 = pnand %p11018_p0, %p11012_p11 }
  0xda   :  { %11022 = shalt.err (!%p11019_p1)
}
  0xdb   :  { %147 = dma.hbm_to_vmem [thread:$0]  %s11245_s25, 12800, %s142_s21, [#allocation11], %s11186_s1, %s11186_s1, %s11187_s2  }
  0xdc   :  { %s11023_s17 = scalar_lea.hbm %s11255_s3, 12800 }
  0xdd   :  { %p11024_p2 = scmp.ne.s32.totalorder %s11255_s3, %s11023_s17  ;;  %p11027_p3 = scmp.lt.u32.totalorder %s11023_s17, %s11255_s3 }
  0xdf   :  { %p11029_p4 = pnand %p11027_p3, %p11024_p2 }
  0xe1   :  { %11032 = shalt.err (!%p11029_p4)
}
  0xe2   :  { %s11033_s0 = scalar_lea.vmem %s11479_s29, 12800  ;;  %p11038_p6 = scmp.lt.s32.totalorder %s11479_s29, %s11479_s29 }
  0xe3   :  { %p11034_p5 = scmp.ne.s32.totalorder %s11479_s29, %s11033_s0  ;;  %p11039_p7 = scmp.lt.s32.totalorder %s11033_s0, %s11033_s0 }
  0xe5   :  { %p11040_p8 = por %p11039_p7, %p11038_p6 }
  0xe7   :  { %p11041_p9 = pnand %p11040_p8, %p11034_p5 }
  0xe9   :  { %11044 = shalt.err (!%p11041_p9)
}
  0xea   :  { %171 = dma.hbm_to_vmem [thread:$0]  %s11255_s3, 12800, %s11479_s29, [#allocation14], %s11186_s1, %s11186_s1, %s11187_s2  }
  0xeb   :  { %s11196_s25 = smov [#allocation18]   ;;  %s11197_s7 = smov [#allocation21]  }
  0xec   :  { %s203_s19 = sshll.u32 %s11196_s25, 4  ;;  %s227_s20 = sshll.u32 %s11197_s7, 4  ;;  %s204_s19 = int_to_ptr.vmem [resolvable:$true] %s203_s19  ;;  %s11500_s20 = int_to_ptr.vmem [resolvable:$true] %s227_s20 }
  0xed   :  { %s11045_s10 = scalar_lea.hbm %s11300_s27, 7680 }
  0xee   :  { %p11046_p10 = scmp.ne.s32.totalorder %s11300_s27, %s11045_s10  ;;  %p11049_p11 = scmp.lt.u32.totalorder %s11045_s10, %s11300_s27 }
  0xf0   :  { %p11051_p12 = pnand %p11049_p11, %p11046_p10 }
  0xf2   :  { %11054 = shalt.err (!%p11051_p12)
}
  0xf3   :  { %s11055_s4 = scalar_lea.vmem %s204_s19, 7680  ;;  %p11060_p0 = scmp.lt.s32.totalorder %s204_s19, %s204_s19 }
  0xf4   :  { %p11056_p13 = scmp.ne.s32.totalorder %s204_s19, %s11055_s4  ;;  %p11061_p1 = scmp.lt.s32.totalorder %s11055_s4, %s11055_s4 }
  0xf6   :  { %p11062_p2 = por %p11061_p1, %p11060_p0 }
  0xf8   :  { %p11063_p3 = pnand %p11062_p2, %p11056_p13 }
  0xfa   :  { %11066 = shalt.err (!%p11063_p3)
}
  0xfb   :  { %209 = dma.hbm_to_vmem [thread:$0]  %s11300_s27, 7680, %s204_s19, [#allocation17], %s11186_s1, %s11186_s1, %s11187_s2  }
  0xfc   :  { %s11067_s3 = scalar_lea.hbm %s11310_s12, 7680 }
  0xfd   :  { %p11068_p4 = scmp.ne.s32.totalorder %s11310_s12, %s11067_s3  ;;  %p11071_p5 = scmp.lt.u32.totalorder %s11067_s3, %s11310_s12 }
  0xff   :  { %p11073_p6 = pnand %p11071_p5, %p11068_p4 }
 0x101   :  { %11076 = shalt.err (!%p11073_p6)
}
 0x102   :  { %s11077_s13 = scalar_lea.vmem %s11500_s20, 7680  ;;  %p11082_p8 = scmp.lt.s32.totalorder %s11500_s20, %s11500_s20 }
 0x103   :  { %p11078_p7 = scmp.ne.s32.totalorder %s11500_s20, %s11077_s13  ;;  %p11083_p9 = scmp.lt.s32.totalorder %s11077_s13, %s11077_s13 }
 0x105   :  { %p11084_p10 = por %p11083_p9, %p11082_p8 }
 0x107   :  { %p11085_p11 = pnand %p11084_p10, %p11078_p7 }
 0x109   :  { %11088 = shalt.err (!%p11085_p11)
}
 0x10a   :  { %233 = dma.hbm_to_vmem [thread:$0]  %s11310_s12, 7680, %s11500_s20, [#allocation20], %s11186_s1, %s11186_s1, %s11187_s2  }
 0x10b   :  { %s11198_s27 = smov [#allocation24]   ;;  %s11199_s16 = smov [#allocation25]  }
 0x10c   :  { %s251_s11 = sshll.u32 %s11198_s27, 4  ;;  %s263_s15 = sshll.u32 %s11199_s16, 4  ;;  %s252_s11 = int_to_ptr.vmem [resolvable:$true] %s251_s11  ;;  %s11521_s15 = int_to_ptr.vmem [resolvable:$true] %s263_s15 }
 0x10d   :  { %s11089_s18 = scalar_lea.hbm %s11320_s30, 7680 }
 0x10e   :  { %p11090_p12 = scmp.ne.s32.totalorder %s11320_s30, %s11089_s18  ;;  %p11093_p13 = scmp.lt.u32.totalorder %s11089_s18, %s11320_s30 }
 0x110   :  { %p11095_p0 = pnand %p11093_p13, %p11090_p12 }
 0x112   :  { %11098 = shalt.err (!%p11095_p0)
}
 0x113   :  { %s11099_s6 = scalar_lea.vmem %s252_s11, 7680  ;;  %p11104_p2 = scmp.lt.s32.totalorder %s252_s11, %s252_s11 }
 0x114   :  { %p11100_p1 = scmp.ne.s32.totalorder %s252_s11, %s11099_s6  ;;  %p11105_p3 = scmp.lt.s32.totalorder %s11099_s6, %s11099_s6 }
 0x116   :  { %p11106_p4 = por %p11105_p3, %p11104_p2 }
 0x118   :  { %p11107_p5 = pnand %p11106_p4, %p11100_p1 }
 0x11a   :  { %11110 = shalt.err (!%p11107_p5)
}
 0x11b   :  { %257 = dma.hbm_to_vmem [thread:$0]  %s11320_s30, 7680, %s252_s11, [#allocation23], %s11186_s1, %s11186_s1, %s11187_s2  }
 0x11c   :  { %s11111_s12 = scalar_lea.hbm %s11325_s24, 7680 }
 0x11d   :  { %p11112_p6 = scmp.ne.s32.totalorder %s11325_s24, %s11111_s12  ;;  %p11115_p7 = scmp.lt.u32.totalorder %s11111_s12, %s11325_s24 }
 0x11f   :  { %p11117_p8 = pnand %p11115_p7, %p11112_p6 }
 0x121   :  { %11120 = shalt.err (!%p11117_p8)
}
 0x122   :  { %s11121_s22 = scalar_lea.vmem %s11521_s15, 7680  ;;  %p11126_p10 = scmp.lt.s32.totalorder %s11521_s15, %s11521_s15 }
 0x123   :  { %p11122_p9 = scmp.ne.s32.totalorder %s11521_s15, %s11121_s22  ;;  %p11127_p11 = scmp.lt.s32.totalorder %s11121_s22, %s11121_s22 }
 0x125   :  { %p11128_p12 = por %p11127_p11, %p11126_p10 }
 0x127   :  { %p11129_p13 = pnand %p11128_p12, %p11122_p9 }
 0x129   :  { %11132 = shalt.err (!%p11129_p13)
}
 0x12a   :  { %269 = dma.hbm_to_vmem [thread:$0]  %s11325_s24, 7680, %s11521_s15, [#allocation26], %s11186_s1, %s11186_s1, %s11187_s2  }
 0x12b   :  { %11133 = dma.done.wait [#allocation6], 12800  }
 0x12c   :  { %11134 = vsyncadd [#allocation6], 4294954496 }
 0x12d   :  { %11135 = dma.done.wait [#allocation8], 25600  }
 0x12e   :  { %11136 = vsyncadd [#allocation8], 4294941696 }
 0x12f   :  { %11137 = dma.done.wait [#allocation11], 25600  }
 0x130   :  { %11138 = vsyncadd [#allocation11], 4294941696 }
 0x131   :  { %11139 = dma.done.wait [#allocation14], 25600  }
 0x132   :  { %11140 = vsyncadd [#allocation14], 4294941696 }
 0x133   :  { %11141 = dma.done.wait [#allocation17], 15360  }
 0x134   :  { %11142 = vsyncadd [#allocation17], 4294951936 }
 0x135   :  { %11143 = dma.done.wait [#allocation20], 15360  }
 0x136   :  { %11144 = vsyncadd [#allocation20], 4294951936 }
 0x137   :  { %11145 = dma.done.wait [#allocation23], 15360  }
 0x138   :  { %11146 = vsyncadd [#allocation23], 4294951936 }
 0x139   :  { %11147 = dma.done.wait [#allocation26], 7680  }
 0x13a   :  { %11148 = vsyncadd [#allocation26], 4294959616  ;;  %s12828_s30 = sld [smem:[#allocation35_spill]]  ;;  %v11200_v1 = vmov 0.0|0.0   ;;  %vm346_vm0 = vcmask 19456   ;;  %vm412_vm1 = vcmask 23552  }
 0x13b   :  { %8789 = vmatprep.subr.bf16.mxu0 %v11200_v1  ;;  %8939 = vmatprep.subr.bf16.mxu1 %v11200_v1  ;;  %vm552_vm2 = vcmask 1043459   ;;  %vm555_vm3 = vcmask 1044484   ;;  %vm558_vm4 = vcmask 1045509   ;;  %s11202_s24 = smov 60   ;;  %s11203_s1 = smov 40   ;;  %vm538_vm5 = vcmask 261120  }
 0x13c   :  { %s11204_s2 = smov 80   ;;  %s11205_s9 = smov 100   ;;  %vm573_vm6 = vcmask 349506   ;;  %vm596_vm7 = vcmask 513506   ;;  %vm617_vm8 = vcmask 677506   ;;  %vm638_vm9 = vcmask 841506  }
 0x13d   :  { %vm767_vm10 = vcmask 1042432   ;;  %vm768_vm11 = vcmask 1046532   ;;  %vm887_vm13 = vcmask 1041408   ;;  %vm888_vm14 = vcmask 1045508   ;;  %s12835_s21 = sld [smem:[#allocation36_spill]]  ;;  %s12836_s23 = sld [smem:[#allocation37_spill]] }
 0x13e   :  { %vm11725_vm12 = vmor %vm767_vm10, %vm768_vm11  ;;  %s12837_s29 = sld [smem:[#allocation38_spill]]  ;;  %s12838_s26 = sld [smem:[#allocation39_spill]]  ;;  %vm4812_vm10 = vcmask 652612   ;;  %vm4841_vm11 = vcmask 980612  }
 0x13f   :  { %vm11748_vm15 = vmor %vm887_vm13, %vm888_vm14  ;;  %s12839_s28 = sld [smem:[#allocation40_spill]]  ;;  %s12840_s17 = sld [smem:[#allocation41_spill]]  ;;  %vm4807_vm13 = vcmask 811648   ;;  %vm5017_vm14 = vcmask 1042434  }
 0x140   :  { %v11545_v2 = vld [vmem:[%s12828_s30] sm:$0xf]  ;;  %v11548_v3 = vld [vmem:[%s12828_s30 + $0x4] sm:$0xf]  ;;  %v11551_v4 = vld [vmem:[%s12828_s30 + $0x8] sm:$0xf] }
 0x141   :  { %v11554_v5 = vld [vmem:[%s12828_s30 + $0xc] sm:$0xf]  ;;  %v347_v6 = vsel %vm346_vm0, %v11545_v2, 0.0  ;;  %v354_v7 = vsel %vm346_vm0, %v11548_v3, 0.0  ;;  %v361_v8 = vsel %vm346_vm0, %v11551_v4, 0.0  ;;  %s12841_s0 = sld [smem:[#allocation42_spill]] }
 0x142   :  { %v348_v9 = vrot.slane %v347_v6, 4  ;;  %v355_v10 = vrot.slane %v354_v7, 4  ;;  %v362_v11 = vrot.slane %v361_v8, 4  ;;  %v368_v12 = vsel %vm346_vm0, %v11554_v5, 0.0  ;;  %v11565_v13 = vld [vmem:[%s12828_s30 + $0x10] sm:$0xf] }
 0x143   :  { %v369_v14 = vrot.slane %v368_v12, 4  ;;  %v11568_v15 = vld [vmem:[%s12828_s30 + $0x14] sm:$0xf]  ;;  %v11571_v16 = vld [vmem:[%s12828_s30 + $0x18] sm:$0xf]  ;;  %v375_v17 = vsel %vm346_vm0, %v11565_v13, 0.0 }
 0x144   :  { %v349_v18 = vadd.f32 %v348_v9, %v347_v6  ;;  %v356_v19 = vadd.f32 %v355_v10, %v354_v7  ;;  %v363_v20 = vadd.f32 %v362_v11, %v361_v8  ;;  %v11576_v21 = vld [vmem:[%s12828_s30 + $0x1c] sm:$0xf]  ;;  %v376_v22 = vrot.slane %v375_v17, 4  ;;  %v659_v8 = vld [vmem:[#allocation5] sm:$0xff]  ;;  %s11206_s25 = smov 108   ;;  %s12844_s19 = sld [smem:[#allocation43_spill]] }
 0x145   :  { %v370_v23 = vadd.f32 %v369_v14, %v368_v12  ;;  %v382_v24 = vsel %vm346_vm0, %v11568_v15, 0.0  ;;  %v389_v25 = vsel %vm346_vm0, %v11571_v16, 0.0  ;;  %v396_v26 = vsel %vm346_vm0, %v11576_v21, 0.0  ;;  %v660_v9 = vld [vmem:[#allocation5 + $0x8] sm:$0xff]  ;;  %s12845_s7 = sld [smem:[#allocation44_spill]]  ;;  %s12846_s20 = sld [smem:[#allocation45_spill]] }
 0x146   :  { %v350_v27 = vrot.slane %v349_v18, 2  ;;  %v357_v28 = vrot.slane %v356_v19, 2  ;;  %v364_v29 = vrot.slane %v363_v20, 2  ;;  %v377_v30 = vadd.f32 %v376_v22, %v375_v17  ;;  %v662_v22 = vld [vmem:[#allocation5 + $0x18] sm:$0xff]  ;;  %s12847_s10 = sld [smem:[#allocation46_spill]]  ;;  %s12848_s4 = sld [smem:[#allocation47_spill]] }
 0x147   :  { %v371_v31 = vrot.slane %v370_v23, 2  ;;  %v383_v32 = vrot.slane %v382_v24, 4  ;;  %v390_v33 = vrot.slane %v389_v25, 4  ;;  %v397_v34 = vrot.slane %v396_v26, 4  ;;  %s12849_s3 = sld [smem:[#allocation48_spill]]  ;;  %s12850_s13 = sld [smem:[#allocation49_spill]] }
 0x148   :  { %v351_v35 = vadd.f32 %v350_v27, %v349_v18  ;;  %v358_v36 = vadd.f32 %v357_v28, %v356_v19  ;;  %v365_v37 = vadd.f32 %v364_v29, %v363_v20  ;;  %v378_v38 = vrot.slane %v377_v30, 2  ;;  %v661_v20 = vld [vmem:[#allocation5 + $0x10] sm:$0xff]  ;;  %s12851_s27 = sld [smem:[#allocation50_spill]]  ;;  %s12852_s11 = sld [smem:[#allocation51_spill]] }
 0x149   :  { %v372_v39 = vadd.f32 %v371_v31, %v370_v23  ;;  %v384_v40 = vadd.f32 %v383_v32, %v382_v24  ;;  %v391_v41 = vadd.f32 %v390_v33, %v389_v25  ;;  %v398_v42 = vadd.f32 %v397_v34, %v396_v26  ;;  %s11209_s16 = smov 48   ;;  %s11210_s15 = smov 88  }
 0x14a   :  { %v352_v43 = vrot.slane %v351_v35, 1  ;;  %v359_v44 = vrot.slane %v358_v36, 1  ;;  %v366_v45 = vrot.slane %v365_v37, 1  ;;  %v379_v46 = vadd.f32 %v378_v38, %v377_v30  ;;  %s12853_s18 = sld [smem:[#allocation52_spill]] }
 0x14b   :  { %v373_v47 = vrot.slane %v372_v39, 1  ;;  %v385_v48 = vrot.slane %v384_v40, 2  ;;  %v392_v49 = vrot.slane %v391_v41, 2  ;;  %v399_v50 = vrot.slane %v398_v42, 2 }
 0x14c   :  { %v353_v51 = vadd.f32 %v352_v43, %v351_v35  ;;  %v360_v52 = vadd.f32 %v359_v44, %v358_v36  ;;  %v367_v53 = vadd.f32 %v366_v45, %v365_v37  ;;  %v380_v54 = vrot.slane %v379_v46, 1  ;;  %v663_v35 = vld [vmem:[#allocation5 + $0x20] sm:$0xff]  ;;  %v664_v36 = vld [vmem:[#allocation5 + $0x28] sm:$0xff] }
 0x14d   :  { %v374_v55 = vadd.f32 %v373_v47, %v372_v39  ;;  %v386_v56 = vadd.f32 %v385_v48, %v384_v40  ;;  %v393_v57 = vadd.f32 %v392_v49, %v391_v41  ;;  %v400_v58 = vadd.f32 %v399_v50, %v398_v42  ;;  %v665_v42 = vld [vmem:[#allocation5 + $0x30] sm:$0xff]  ;;  %v666_v47 = vld [vmem:[#allocation5 + $0x38] sm:$0xff]  ;;  %v667_v48 = vld [vmem:[#allocation5 + $0x40] sm:$0xff] }
 0x14e   :  { %v404_v59 = vmul.f32 0.25, %v353_v51  ;;  %v405_v60 = vmul.f32 0.25, %v360_v52  ;;  %v406_v61 = vmul.f32 0.25, %v367_v53  ;;  %v381_v62 = vadd.f32 %v380_v54, %v379_v46  ;;  %v668_v49 = vld [vmem:[#allocation5 + $0x48] sm:$0xff] }
 0x14f   :  { %v407_v63 = vmul.f32 0.25, %v374_v55  ;;  %v387_v0 = vrot.slane %v386_v56, 1  ;;  %v394_v6 = vrot.slane %v393_v57, 1  ;;  %v401_v7 = vrot.slane %v400_v58, 1 }
 0x150   :  { %v413_v10 = vsel %vm412_vm1, %v404_v59, 0.0  ;;  %v414_v11 = vsel %vm412_vm1, %v405_v60, 0.0  ;;  %v416_v12 = vsel %vm412_vm1, %v406_v61, 0.0  ;;  %v408_v14 = vmul.f32 0.25, %v381_v62 }
 0x151   :  { %v415_v17 = vadd.f32 %v414_v11, %v413_v10  ;;  %v388_v18 = vadd.f32 %v387_v0, %v386_v56  ;;  %v395_v19 = vadd.f32 %v394_v6, %v393_v57  ;;  %v418_v23 = vsel %vm412_vm1, %v407_v63, 0.0 }
 0x152   :  { %v402_v24 = vadd.f32 %v401_v7, %v400_v58  ;;  %v8790_v25 = vpack.c.bf16 %v660_v9, %v659_v8  ;;  %v420_v29 = vsel %vm412_vm1, %v408_v14, 0.0  ;;  %v8793_v31 = vpack.c.bf16 %v662_v22, %v661_v20 }
 0x153   :  { %v417_v26 = vadd.f32 %v416_v12, %v415_v17  ;;  %v409_v27 = vmul.f32 0.25, %v388_v18  ;;  %v410_v28 = vmul.f32 0.25, %v395_v19  ;;  %v8796_v41 = vpack.c.bf16 %v664_v36, %v663_v35 }
 0x154   :  { %v411_v30 = vmul.f32 0.25, %v402_v24  ;;  %8791 = vmatpush1.bf16.msra.mxu0 %v8790_v25  ;;  %v8799_v52 = vpack.c.bf16 %v666_v47, %v665_v42  ;;  %v8802_v53 = vpack.c.bf16 %v668_v49, %v667_v48 }
 0x155   :  { %v419_v32 = vadd.f32 %v418_v23, %v417_v26  ;;  %v421_v33 = vsel %vm412_vm1, %v409_v27, 0.0  ;;  %v423_v34 = vsel %vm412_vm1, %v410_v28, 0.0  ;;  %8792 = vmatprep.subr.bf16.mxu0 %v11200_v1 }
 0x156   :  { %v422_v37 = vadd.f32 %v421_v33, %v420_v29  ;;  %v425_v39 = vsel %vm412_vm1, %v411_v30, 0.0 }
 0x157   :  { %v427_v38 = vmul.f32 0.25, %v419_v32 }
 0x158   :  { %v424_v40 = vadd.f32 %v423_v34, %v422_v37  ;;  %8794 = vmatpush1.bf16.msra.mxu0 %v8793_v31 }
 0x159   :  { %v11594_v43 = vsub.f32 %v11545_v2, %v427_v38  ;;  %v11597_v44 = vsub.f32 %v11548_v3, %v427_v38  ;;  %v11600_v45 = vsub.f32 %v11551_v4, %v427_v38  ;;  %v11603_v46 = vsub.f32 %v11554_v5, %v427_v38  ;;  %8795 = vmatprep.subr.bf16.mxu0 %v11200_v1 }
 0x15a   :  { %v426_v50 = vadd.f32 %v425_v39, %v424_v40 }
 0x15b   :  { %v437_v51 = vmul.f32 %v11594_v43, %v11594_v43  ;;  %v438_v2 = vmul.f32 %v11597_v44, %v11597_v44  ;;  %v439_v3 = vmul.f32 %v11600_v45, %v11600_v45  ;;  %v440_v4 = vmul.f32 %v11603_v46, %v11603_v46 }
 0x15c   :  { %v428_v5 = vmul.f32 0.25, %v426_v50  ;;  %8797 = vmatpush1.bf16.msra.mxu0 %v8796_v41 }
 0x15d   :  { %v445_v54 = vsel %vm346_vm0, %v437_v51, 0.0  ;;  %v452_v55 = vsel %vm346_vm0, %v438_v2, 0.0  ;;  %v459_v56 = vsel %vm346_vm0, %v439_v3, 0.0  ;;  %v466_v57 = vsel %vm346_vm0, %v440_v4, 0.0  ;;  %8798 = vmatprep.subr.bf16.mxu0 %v11200_v1 }
 0x15e   :  { %v446_v58 = vrot.slane %v445_v54, 4  ;;  %v453_v59 = vrot.slane %v452_v55, 4  ;;  %v460_v60 = vrot.slane %v459_v56, 4  ;;  %v467_v61 = vrot.slane %v466_v57, 4 }
 0x15f   :  { %v11620_v62 = vsub.f32 %v11565_v13, %v428_v5  ;;  %v11623_v63 = vsub.f32 %v11568_v15, %v428_v5  ;;  %v11626_v0 = vsub.f32 %v11571_v16, %v428_v5  ;;  %v11629_v6 = vsub.f32 %v11576_v21, %v428_v5 }
 0x160   :  { %v447_v7 = vadd.f32 %v446_v58, %v445_v54  ;;  %v454_v8 = vadd.f32 %v453_v59, %v452_v55  ;;  %v461_v9 = vadd.f32 %v460_v60, %v459_v56  ;;  %v468_v10 = vadd.f32 %v467_v61, %v466_v57  ;;  %8800 = vmatpush1.bf16.msra.mxu0 %v8799_v52 }
 0x161   :  { %v441_v11 = vmul.f32 %v11620_v62, %v11620_v62  ;;  %v442_v13 = vmul.f32 %v11623_v63, %v11623_v63  ;;  %v443_v15 = vmul.f32 %v11626_v0, %v11626_v0  ;;  %v444_v16 = vmul.f32 %v11629_v6, %v11629_v6  ;;  %8801 = vmatprep.subr.bf16.mxu0 %v11200_v1 }
 0x162   :  { %v448_v21 = vrot.slane %v447_v7, 2  ;;  %v455_v12 = vrot.slane %v454_v8, 2  ;;  %v462_v14 = vrot.slane %v461_v9, 2  ;;  %v469_v17 = vrot.slane %v468_v10, 2 }
 0x163   :  { %v473_v18 = vsel %vm346_vm0, %v441_v11, 0.0  ;;  %v480_v19 = vsel %vm346_vm0, %v442_v13, 0.0  ;;  %v487_v20 = vsel %vm346_vm0, %v443_v15, 0.0  ;;  %v494_v22 = vsel %vm346_vm0, %v444_v16, 0.0 }
 0x164   :  { %v449_v23 = vadd.f32 %v448_v21, %v447_v7  ;;  %v456_v24 = vadd.f32 %v455_v12, %v454_v8  ;;  %v463_v25 = vadd.f32 %v462_v14, %v461_v9  ;;  %v470_v26 = vadd.f32 %v469_v17, %v468_v10  ;;  %8803 = vmatpush1.bf16.msra.mxu0 %v8802_v53 }
 0x165   :  { %v474_v27 = vrot.slane %v473_v18, 4  ;;  %v481_v28 = vrot.slane %v480_v19, 4  ;;  %v488_v29 = vrot.slane %v487_v20, 4  ;;  %v495_v30 = vrot.slane %v494_v22, 4  ;;  %8804 = vmatprep.subr.bf16.mxu0 %v11200_v1 }
 0x166   :  { %v450_v31 = vrot.slane %v449_v23, 1  ;;  %v457_v32 = vrot.slane %v456_v24, 1  ;;  %v464_v33 = vrot.slane %v463_v25, 1  ;;  %v471_v34 = vrot.slane %v470_v26, 1 }
 0x167   :  { %v475_v35 = vadd.f32 %v474_v27, %v473_v18  ;;  %v482_v36 = vadd.f32 %v481_v28, %v480_v19  ;;  %v489_v37 = vadd.f32 %v488_v29, %v487_v20  ;;  %v496_v38 = vadd.f32 %v495_v30, %v494_v22 }
 0x168   :  { %v451_v39 = vadd.f32 %v450_v31, %v449_v23  ;;  %v458_v40 = vadd.f32 %v457_v32, %v456_v24  ;;  %v465_v41 = vadd.f32 %v464_v33, %v463_v25  ;;  %v472_v42 = vadd.f32 %v471_v34, %v470_v26  ;;  %v669_v31 = vld [vmem:[#allocation5 + $0x50] sm:$0xff]  ;;  %v670_v32 = vld [vmem:[#allocation5 + $0x58] sm:$0xff] }
 0x169   :  { %v476_v47 = vrot.slane %v475_v35, 2  ;;  %v483_v48 = vrot.slane %v482_v36, 2  ;;  %v490_v49 = vrot.slane %v489_v37, 2  ;;  %v497_v50 = vrot.slane %v496_v38, 2 }
 0x16a   :  { %v501_v51 = vmul.f32 0.25, %v451_v39  ;;  %v502_v2 = vmul.f32 0.25, %v458_v40  ;;  %v503_v3 = vmul.f32 0.25, %v465_v41  ;;  %v504_v4 = vmul.f32 0.25, %v472_v42  ;;  %v671_v39 = vld [vmem:[#allocation5 + $0x60] sm:$0xff]  ;;  %v672_v40 = vld [vmem:[#allocation5 + $0x68] sm:$0xff] }
 0x16b   :  { %v477_v5 = vadd.f32 %v476_v47, %v475_v35  ;;  %v484_v52 = vadd.f32 %v483_v48, %v482_v36  ;;  %v491_v53 = vadd.f32 %v490_v49, %v489_v37  ;;  %v498_v54 = vadd.f32 %v497_v50, %v496_v38 }
 0x16c   :  { %v509_v55 = vsel %vm412_vm1, %v501_v51, 0.0  ;;  %v510_v56 = vsel %vm412_vm1, %v502_v2, 0.0  ;;  %v512_v57 = vsel %vm412_vm1, %v503_v3, 0.0  ;;  %v514_v7 = vsel %vm412_vm1, %v504_v4, 0.0 }
 0x16d   :  { %v511_v58 = vadd.f32 %v510_v56, %v509_v55  ;;  %v478_v59 = vrot.slane %v477_v5, 1  ;;  %v485_v60 = vrot.slane %v484_v52, 1  ;;  %v492_v61 = vrot.slane %v491_v53, 1 }
 0x16e   :  { %v499_v8 = vrot.slane %v498_v54, 1  ;;  %v11201_v30 = vmov 0.0   ;;  %v8805_v33 = vpack.c.bf16 %v670_v32, %v669_v31  ;;  %v8808_v41 = vpack.c.bf16 %v672_v40, %v671_v39  ;;  %v675_v31 = vld [vmem:[#allocation5 + $0x80] sm:$0xff]  ;;  %v676_v32 = vld [vmem:[#allocation5 + $0x88] sm:$0xff] }
 0x16f   :  { %v513_v9 = vadd.f32 %v512_v57, %v511_v58  ;;  %v479_v10 = vadd.f32 %v478_v59, %v477_v5  ;;  %v486_v11 = vadd.f32 %v485_v60, %v484_v52  ;;  %v493_v13 = vadd.f32 %v492_v61, %v491_v53  ;;  %537 = vst [vmem:[#allocation2] sm:$0xff] %v11201_v30 }
 0x170   :  { %v500_v15 = vadd.f32 %v499_v8, %v498_v54  ;;  %540 = vst [vmem:[#allocation2 + $0x10] sm:$0xff] %v11201_v30  ;;  %8806 = vmatpush1.bf16.msra.mxu0 %v8805_v33  ;;  %539 = vst.msk [vmem:[#allocation2 + $0x8] sm:$0xff] %vm538_vm5, %v11201_v30  ;;  %vm1007_vm0 = vcmask 1040384  }
 0x171   :  { %v515_v16 = vadd.f32 %v514_v7, %v513_v9  ;;  %v505_v21 = vmul.f32 0.25, %v479_v10  ;;  %v506_v12 = vmul.f32 0.25, %v486_v11  ;;  %v507_v14 = vmul.f32 0.25, %v493_v13  ;;  %8807 = vmatprep.subr.bf16.mxu0 %v11200_v1  ;;  %541 = vst.msk [vmem:[#allocation2 + $0x18] sm:$0xff] %vm538_vm5, %v11201_v30 }
 0x172   :  { %v508_v17 = vmul.f32 0.25, %v500_v15 }
 0x173   :  { %v523_v18 = vmul.f32 0.25, %v515_v16  ;;  %v516_v19 = vsel %vm412_vm1, %v505_v21, 0.0  ;;  %v517_v20 = vsel %vm412_vm1, %v506_v12, 0.0  ;;  %v519_v22 = vsel %vm412_vm1, %v507_v14, 0.0 }
 0x174   :  { %v518_v23 = vadd.f32 %v517_v20, %v516_v19  ;;  %v521_v25 = vsel %vm412_vm1, %v508_v17, 0.0  ;;  %8809 = vmatpush1.bf16.msra.mxu0 %v8808_v41  ;;  %v673_v19 = vld [vmem:[#allocation5 + $0x70] sm:$0xff]  ;;  %v674_v20 = vld [vmem:[#allocation5 + $0x78] sm:$0xff]  ;;  %vm11777_vm1 = vmor %vm1007_vm0, %vm555_vm3 }
 0x175   :  { %v525_v24 = vadd.f32 1e-05, %v523_v18  ;;  %8810 = vmatprep.subr.bf16.mxu0 %v11200_v1 }
 0x176   :  { %v520_v26 = vadd.f32 %v519_v22, %v518_v23 }
 0x177   :  { %10821 = vrsqrt.f32 %v525_v24 }
 0x178   :  { %v522_v27 = vadd.f32 %v521_v25, %v520_v26 }
 0x17a   :  { %v524_v28 = vmul.f32 0.25, %v522_v27 }
 0x17c   :  { %v526_v29 = vadd.f32 1e-05, %v524_v28 }
 0x17e   :  { %10823 = vrsqrt.f32 %v526_v29 }
 0x181   :  { %v10822_v34 = vpop.eup %10821 }
 0x182   :  { %v11657_v35 = vmul.f32 %v10822_v34, %v11594_v43  ;;  %v11660_v36 = vmul.f32 %v10822_v34, %v11597_v44  ;;  %v11663_v37 = vmul.f32 %v10822_v34, %v11600_v45  ;;  %v11666_v38 = vmul.f32 %v10822_v34, %v11603_v46 }
 0x184   :  { %v576_v42 = vrot.slane %v11657_v35, 7  ;;  %v577_v43 = vrot.slane %v11660_v36, 6  ;;  %v579_v47 = vrot.slane %v11663_v37, 5  ;;  %v581_v44 = vrot.slane %v11666_v38, 4 }
 0x185   :  { %v550_v45 = vrot.slane %v11657_v35, 6  ;;  %v551_v48 = vrot.slane %v11660_v36, 5  ;;  %v554_v46 = vrot.slane %v11663_v37, 4  ;;  %v557_v49 = vrot.slane %v11666_v38, 3 }
 0x186   :  { %v578_v50 = vsel %vm552_vm2, %v577_v43, %v576_v42  ;;  %v599_v51 = vrot.slane %v11660_v36, 7  ;;  %v601_v53 = vrot.slane %v11663_v37, 6  ;;  %v603_v54 = vrot.slane %v11666_v38, 5  ;;  %v678_v43 = vld [vmem:[#allocation5 + $0x98] sm:$0xff] }
 0x187   :  { %v580_v2 = vsel %vm555_vm3, %v579_v47, %v578_v50  ;;  %v553_v3 = vsel %vm552_vm2, %v551_v48, %v550_v45  ;;  %v620_v61 = vrot.slane %v11657_v35, 1  ;;  %v622_v7 = vrot.slane %v11663_v37, 7  ;;  %v10667_v45 = vld [vmem:[#allocation2 + $0x8] ss:$16 sps:$4 sm:$0xff]  }
 0x188   :  { %v10824_v4 = vpop.eup %10823  ;;  %v582_v5 = vsel %vm558_vm4, %v581_v44, %v580_v2  ;;  %v556_v52 = vsel %vm555_vm3, %v554_v46, %v553_v3  ;;  %v600_v60 = vsel %vm552_vm2, %v599_v51, %v11657_v35  ;;  %v8811_v35 = vpack.c.bf16 %v674_v20, %v673_v19  ;;  %8407 = vmatprep.mubr.msk.f32.mxu0 %vm538_vm5, %v10667_v45  ;;  %v789_v19 = vld [vmem:[#allocation5 + $0xf0] sm:$0xff]  ;;  %v790_v20 = vld [vmem:[#allocation5 + $0xf8] sm:$0xff]  ;;  %v900_v45 = vld [vmem:[#allocation5 + $0x148] sm:$0xff] }
 0x189   :  { %590 = vrot.lane.b32.xlu1 %v582_v5, %s11202_s24  ;;  %v559_v55 = vsel %vm558_vm4, %v557_v49, %v556_v52  ;;  %v533_v56 = vmul.f32 %v10824_v4, %v11620_v62  ;;  %v534_v57 = vmul.f32 %v10824_v4, %v11623_v63  ;;  %v535_v58 = vmul.f32 %v10824_v4, %v11626_v0  ;;  %v779_v5 = vld [vmem:[#allocation5 + $0xa0] sm:$0xff]  ;;  %v780_v52 = vld [vmem:[#allocation5 + $0xa8] sm:$0xff] }
 0x18a   :  { %567 = vrot.lane.b32.xlu0 %v559_v55, %s11203_s1  ;;  %v536_v59 = vmul.f32 %v10824_v4, %v11629_v6  ;;  %v602_v17 = vsel %vm555_vm3, %v601_v53, %v600_v60  ;;  %v621_v29 = vsel %vm552_vm2, %v11660_v36, %v620_v61  ;;  %v624_v40 = vrot.slane %v11666_v38, 6  ;;  %8812 = vmatpush1.bf16.msra.mxu0 %v8811_v35  ;;  %v677_v36 = vld [vmem:[#allocation5 + $0x90] sm:$0xff] }
 0x18b   :  { %v583_v8 = vrot.slane %v533_v56, 7  ;;  %v584_v9 = vrot.slane %v534_v57, 6  ;;  %v586_v10 = vrot.slane %v535_v58, 5  ;;  %v560_v62 = vrot.slane %v533_v56, 6  ;;  %8813 = vmatprep.subr.bf16.mxu0 %v11200_v1  ;;  %v781_v53 = vld [vmem:[#allocation5 + $0xb0] sm:$0xff] }
 0x18c   :  { %v588_v11 = vrot.slane %v536_v59, 4  ;;  %v561_v63 = vrot.slane %v534_v57, 5  ;;  %v563_v13 = vrot.slane %v535_v58, 4  ;;  %v565_v0 = vrot.slane %v536_v59, 3 }
 0x18d   :  { %v585_v15 = vsel %vm552_vm2, %v584_v9, %v583_v8  ;;  %v605_v16 = vrot.slane %v534_v57, 7  ;;  %v607_v21 = vrot.slane %v535_v58, 6  ;;  %v609_v6 = vrot.slane %v536_v59, 5 }
 0x18e   :  { %v587_v12 = vsel %vm555_vm3, %v586_v10, %v585_v15  ;;  %v562_v14 = vsel %vm552_vm2, %v561_v63, %v560_v62  ;;  %v626_v18 = vrot.slane %v533_v56, 1  ;;  %v628_v25 = vrot.slane %v535_v58, 7  ;;  %v784_v63 = vld [vmem:[#allocation5 + $0xc8] sm:$0xff] }
 0x18f   :  { %v589_v22 = vsel %vm558_vm4, %v588_v11, %v587_v12  ;;  %v564_v23 = vsel %vm555_vm3, %v563_v13, %v562_v14  ;;  %v606_v24 = vsel %vm552_vm2, %v605_v16, %v533_v56  ;;  %v630_v34 = vrot.slane %v536_v59, 6  ;;  %v783_v11 = vld [vmem:[#allocation5 + $0xc0] sm:$0xff] }
 0x190   :  { %592 = vrot.lane.b32.xlu1 %v589_v22, %s11202_s24  ;;  %v566_v26 = vsel %vm558_vm4, %v565_v0, %v564_v23  ;;  %v608_v27 = vsel %vm555_vm3, %v607_v21, %v606_v24  ;;  %v627_v28 = vsel %vm552_vm2, %v534_v57, %v626_v18  ;;  %v604_v37 = vsel %vm558_vm4, %v603_v54, %v602_v17  ;;  %v782_v54 = vld [vmem:[#allocation5 + $0xb8] sm:$0xff]  ;;  %v785_v21 = vld [vmem:[#allocation5 + $0xd0] sm:$0xff]  ;;  %v787_v14 = vld [vmem:[#allocation5 + $0xe0] sm:$0xff] }
 0x191   :  { %569 = vrot.lane.b32.xlu0 %v566_v26, %s11203_s1  ;;  %v610_v33 = vsel %vm558_vm4, %v609_v6, %v608_v27  ;;  %v629_v39 = vsel %vm555_vm3, %v628_v25, %v627_v28  ;;  %v623_v41 = vsel %vm555_vm3, %v622_v7, %v621_v29  ;;  %v8814_v42 = vpack.c.bf16 %v676_v32, %v675_v31  ;;  %v786_v6 = vld [vmem:[#allocation5 + $0xd8] sm:$0xff]  ;;  %v788_v17 = vld [vmem:[#allocation5 + $0xe8] sm:$0xff]  ;;  %v791_v23 = vld [vmem:[#allocation5 + $0x100] sm:$0xff] }
 0x192   :  { %v631_v38 = vsel %vm558_vm4, %v630_v34, %v629_v39  ;;  %v625_v47 = vsel %vm558_vm4, %v624_v40, %v623_v41  ;;  %v8817_v44 = vpack.c.bf16 %v678_v43, %v677_v36  ;;  %v8820_v55 = vpack.c.bf16 %v780_v52, %v779_v5  ;;  %v792_v24 = vld [vmem:[#allocation5 + $0x108] sm:$0xff]  ;;  %v793_v26 = vld [vmem:[#allocation5 + $0x110] sm:$0xff]  ;;  %v794_v27 = vld [vmem:[#allocation5 + $0x118] sm:$0xff] }
 0x193   :  { %8815 = vmatpush1.bf16.msra.mxu0 %v8814_v42  ;;  %v8823_v7 = vpack.c.bf16 %v782_v54, %v781_v53  ;;  %v8826_v16 = vpack.c.bf16 %v784_v63, %v783_v11  ;;  %v8829_v12 = vpack.c.bf16 %v786_v6, %v785_v21  ;;  %v8832_v18 = vpack.c.bf16 %v788_v17, %v787_v14  ;;  %v795_v29 = vld [vmem:[#allocation5 + $0x120] sm:$0xff]  ;;  %v796_v31 = vld [vmem:[#allocation5 + $0x128] sm:$0xff]  ;;  %v797_v39 = vld [vmem:[#allocation5 + $0x130] sm:$0xff] }
 0x194   :  { %613 = vrot.lane.b32.xlu1 %v610_v33, %s11204_s2  ;;  %8816 = vmatprep.subr.bf16.mxu0 %v11200_v1  ;;  %v8835_v22 = vpack.c.bf16 %v790_v20, %v789_v19  ;;  %v8838_v25 = vpack.c.bf16 %v792_v24, %v791_v23  ;;  %v8841_v28 = vpack.c.bf16 %v794_v27, %v793_v26  ;;  %v798_v40 = vld [vmem:[#allocation5 + $0x138] sm:$0xff]  ;;  %v903_v5 = vld [vmem:[#allocation5 + $0x160] sm:$0xff]  ;;  %v904_v52 = vld [vmem:[#allocation5 + $0x168] sm:$0xff]  ;;  %vm1232_vm2 = vcmask 980290  }
 0x195   :  { %611 = vrot.lane.b32.xlu0 %v604_v37, %s11204_s2  ;;  %v8844_v37 = vpack.c.bf16 %v796_v31, %v795_v29  ;;  %v8856_v53 = vpack.c.bf16 %v904_v52, %v903_v5  ;;  %v905_v54 = vld [vmem:[#allocation5 + $0x170] sm:$0xff]  ;;  %v914_v63 = vld [vmem:[#allocation5 + $0x1b8] sm:$0xff]  ;;  %v1018_v26 = vld [vmem:[#allocation5 + $0x1e0] sm:$0xff]  ;;  %vm4745_vm4 = vcmask 1043456  }
 0x196   :  { %v913_v11 = vld [vmem:[#allocation5 + $0x1b0] sm:$0xff]  ;;  %v1019_v27 = vld [vmem:[#allocation5 + $0x1e8] sm:$0xff]  ;;  %v1034_v52 = vld [vmem:[#allocation5 + $0x260] sm:$0xff] }
 0x197   :  { %8818 = vmatpush1.bf16.msra.mxu0 %v8817_v44  ;;  %v899_v44 = vld [vmem:[#allocation5 + $0x140] sm:$0xff]  ;;  %v917_v17 = vld [vmem:[#allocation5 + $0x1d0] sm:$0xff]  ;;  %v8880_v31 = vpack.c.bf16 %v1019_v27, %v1018_v26 }
 0x198   :  { %634 = vrot.lane.b32.xlu1 %v631_v38, %s11205_s9  ;;  %8819 = vmatprep.subr.bf16.mxu0 %v11200_v1  ;;  %v8847_v38 = vpack.c.bf16 %v798_v40, %v797_v39  ;;  %v1022_v39 = vld [vmem:[#allocation5 + $0x200] sm:$0xff]  ;;  %v1023_v40 = vld [vmem:[#allocation5 + $0x208] sm:$0xff]  ;;  %v4422_v24 = vld [vmem:[#allocation15 + $0x190] sm:$0xff] }
 0x199   :  { %632 = vrot.lane.b32.xlu0 %v625_v47, %s11205_s9  ;;  %v1141_v27 = vld [vmem:[#allocation5 + $0x300] sm:$0xff] }
 0x1fb   :  { %v591_v48 = vpop.permute.xlu1 %590 }
 0x1fc   :  { %v568_v46 = vpop.permute.xlu0 %567 }
 0x1fd   :  { %574 = vst.msk [vmem:[#allocation2] sm:$0x3c] %vm573_vm6, %v568_v46 }
 0x1fe   :  { %597 = vst.msk [vmem:[#allocation2] sm:$0x3c] %vm596_vm7, %v591_v48 }
 0x202   :  { %v593_v49 = vpop.permute.xlu1 %592 }
 0x203   :  { %v570_v50 = vpop.permute.xlu0 %569 }
 0x204   :  { %575 = vst.msk [vmem:[#allocation2 + $0x10] sm:$0x3c] %vm573_vm6, %v570_v50  ;;  %vm4746_vm6 = vcmask 261124  }
 0x205   :  { %598 = vst.msk [vmem:[#allocation2 + $0x10] sm:$0x3c] %vm596_vm7, %v593_v49  ;;  %v8850_v49 = vpack.c.bf16 %v900_v45, %v899_v44  ;;  %v1027_v44 = vld [vmem:[#allocation5 + $0x228] sm:$0xff]  ;;  %vm4747_vm7 = vmor %vm4746_vm6, %vm4745_vm4 }
 0x206   :  { %v614_v51 = vpop.permute.xlu1 %613  ;;  %4748 = vst.msk [vmem:[#allocation3] sm:$0xff] %vm4747_vm7, %v11201_v30  ;;  %4749 = vst.msk [vmem:[#allocation3 + $0x8] sm:$0xff] %vm4747_vm7, %v11201_v30  ;;  %vm7835_vm7 = vcmask 326656  }
 0x207   :  { %619 = vst.msk [vmem:[#allocation2 + $0x10] sm:$0x3c] %vm617_vm8, %v614_v51  ;;  %v612_v2 = vpop.permute.xlu0 %611  ;;  %v901_v51 = vld [vmem:[#allocation5 + $0x150] sm:$0xff] }
 0x208   :  { %618 = vst.msk [vmem:[#allocation2] sm:$0x3c] %vm617_vm8, %v612_v2  ;;  %v902_v2 = vld [vmem:[#allocation5 + $0x158] sm:$0xff]  ;;  %vm4752_vm8 = vcmask 650562  }
 0x20a   :  { %v635_v3 = vpop.permute.xlu1 %634 }
 0x20b   :  { %640 = vst.msk [vmem:[#allocation2 + $0x10] sm:$0x3c] %vm638_vm9, %v635_v3  ;;  %v633_v4 = vpop.permute.xlu0 %632 }
 0x20c   :  { %639 = vst.msk [vmem:[#allocation2] sm:$0x3c] %vm638_vm9, %v633_v4  ;;  %v8853_v4 = vpack.c.bf16 %v902_v2, %v901_v51  ;;  %v1031_v51 = vld [vmem:[#allocation5 + $0x248] sm:$0xff]  ;;  %vm4782_vm9 = vcmask 978562  }
 0x212   :  { %v10672_v59 = vld [vmem:[#allocation2 + $0x10] ss:$8 sps:$4 sm:$0xee]   ;;  %v10674_v60 = vld [vmem:[#allocation2 + $0x14] ss:$8 sps:$4 sm:$0x11]  }
 0x213   :  { %v10668_v56 = vld [vmem:[#allocation2] ss:$16 sps:$4 sm:$0xff]   ;;  %v10671_v58 = vld [vmem:[#allocation2 + $0x4] ss:$8 sps:$4 sm:$0x11]   ;;  %v8409_v10 = vrot.slane %v10672_v59, 9 }
 0x214   :  { %v10669_v57 = vld [vmem:[#allocation2] ss:$8 sps:$4 sm:$0xee]   ;;  %749 = vmatmul.mubr.f32.vlgmr.msra.gmra.mrb[0].mxu0 %v10668_v56  ;;  %v772_v9 = vrot.slane %v10671_v58, 5  ;;  %v776_v62 = vrot.slane %v10674_v60, 5  ;;  %v908_v58 = vld [vmem:[#allocation5 + $0x188] sm:$0xff] }
 0x215   :  { %8821 = vmatpush1.bf16.msra.mxu0 %v8820_v55  ;;  %v8408_v8 = vrot.slane %v10669_v57, 9  ;;  %v10675_v32 = vld [vmem:[#allocation2] ss:$8 sps:$4 sm:$0xcc]   ;;  %v907_v57 = vld [vmem:[#allocation5 + $0x180] sm:$0xff] }
 0x216   :  { %8822 = vmatprep.subr.bf16.mxu0 %v11200_v1  ;;  %v11736_v0 = vsel %vm11725_vm12, %v8409_v10, %v776_v62  ;;  %v10677_v33 = vld [vmem:[#allocation2 + $0x4] ss:$8 sps:$4 sm:$0x33]   ;;  %v10678_v34 = vld [vmem:[#allocation2 + $0x10] ss:$8 sps:$4 sm:$0xcc]   ;;  %v8862_v59 = vpack.c.bf16 %v908_v58, %v907_v57 }
 0x217   :  { %v11732_v13 = vsel %vm11725_vm12, %v8408_v8, %v772_v9  ;;  %v10680_v35 = vld [vmem:[#allocation2 + $0x14] ss:$8 sps:$4 sm:$0x33]   ;;  %v8411_v41 = vrot.slane %v10675_v32, 10  ;;  %v892_v42 = vrot.slane %v10677_v33, 6  ;;  %v8412_v36 = vrot.slane %v10678_v34, 10 }
 0x218   :  { %v800_v15 = vcombine.high %v11732_v13, %v11736_v0  ;;  %v896_v43 = vrot.slane %v10680_v35, 6  ;;  %v799_v50 = vcombine.low %v11732_v13, %v11736_v0  ;;  %v906_v55 = vld [vmem:[#allocation5 + $0x178] sm:$0xff]  ;;  %v909_v60 = vld [vmem:[#allocation5 + $0x190] sm:$0xff]  ;;  %v911_v9 = vld [vmem:[#allocation5 + $0x1a0] sm:$0xff]  ;;  %v8871_v13 = vpack.c.bf16 %v914_v63, %v913_v11 }
 0x219   :  { %8824 = vmatpush1.bf16.msra.mxu0 %v8823_v7  ;;  %v11755_v48 = vsel %vm11748_vm15, %v8411_v41, %v892_v42  ;;  %v8859_v56 = vpack.c.bf16 %v906_v55, %v905_v54  ;;  %v910_v7 = vld [vmem:[#allocation5 + $0x198] sm:$0xff]  ;;  %v912_v10 = vld [vmem:[#allocation5 + $0x1a8] sm:$0xff]  ;;  %v915_v0 = vld [vmem:[#allocation5 + $0x1c0] sm:$0xff]  ;;  %v8886_v41 = vpack.c.bf16 %v1023_v40, %v1022_v39 }
 0x21a   :  { %8825 = vmatprep.subr.bf16.mxu0 %v11200_v1  ;;  %8410 = vmatprep.mubr.msk.f32.mxu0 %vm538_vm5, %v800_v15  ;;  %v11759_v46 = vsel %vm11748_vm15, %v8412_v36, %v896_v43  ;;  %v8865_v8 = vpack.c.bf16 %v910_v7, %v909_v60  ;;  %v8868_v62 = vpack.c.bf16 %v912_v10, %v911_v9  ;;  %v916_v15 = vld [vmem:[#allocation5 + $0x1c8] sm:$0xff]  ;;  %v10683_v21 = vld [vmem:[#allocation2 + $0x4] ss:$8 sps:$4 sm:$0x77]   ;;  %v1125_v58 = vld [vmem:[#allocation5 + $0x280] sm:$0xff] }
 0x21b   :  { %v920_v3 = vcombine.high %v11755_v48, %v11759_v46  ;;  %v10684_v6 = vld [vmem:[#allocation2 + $0x10] ss:$8 sps:$4 sm:$0x88]   ;;  %v8874_v14 = vpack.c.bf16 %v916_v15, %v915_v0  ;;  %v1011_v20 = vrot.slane %v10683_v21, 7  ;;  %v919_v32 = vcombine.low %v11755_v48, %v11759_v46  ;;  %v1020_v33 = vld [vmem:[#allocation5 + $0x1f0] sm:$0xff]  ;;  %v1021_v34 = vld [vmem:[#allocation5 + $0x1f8] sm:$0xff] }
 0x21c   :  { %v1024_v42 = vld [vmem:[#allocation5 + $0x210] sm:$0xff]  ;;  %v1025_v36 = vld [vmem:[#allocation5 + $0x218] sm:$0xff]  ;;  %v1129_v11 = vld [vmem:[#allocation5 + $0x2a0] sm:$0xff] }
 0x21d   :  { %8827 = vmatpush1.bf16.msra.mxu0 %v8826_v16  ;;  %v10681_v16 = vld [vmem:[#allocation2] ss:$8 sps:$4 sm:$0x88]   ;;  %v8889_v43 = vpack.c.bf16 %v1025_v36, %v1024_v42  ;;  %v10687_v7 = vld [vmem:[#allocation2 + $0xc] ss:$16 sps:$4 sm:$0xff]   ;;  %v1133_v21 = vld [vmem:[#allocation5 + $0x2c0] sm:$0xff] }
 0x21e   :  { %8828 = vmatprep.subr.bf16.mxu0 %v11200_v1  ;;  %v8414_v19 = vrot.slane %v10681_v16, 11  ;;  %v1028_v48 = vld [vmem:[#allocation5 + $0x230] sm:$0xff]  ;;  %v1029_v46 = vld [vmem:[#allocation5 + $0x238] sm:$0xff]  ;;  %v1130_v63 = vld [vmem:[#allocation5 + $0x2a8] sm:$0xff] }
 0x21f   :  { %v1036_v55 = vld [vmem:[#allocation5 + $0x270] sm:$0xff]  ;;  %v1128_v10 = vld [vmem:[#allocation5 + $0x298] sm:$0xff]  ;;  %v1257_v36 = vld [vmem:[#allocation7 + $0x20] sm:$0xff] }
 0x220   :  { %v1127_v9 = vld [vmem:[#allocation5 + $0x290] sm:$0xff]  ;;  %v1132_v15 = vld [vmem:[#allocation5 + $0x2b8] sm:$0xff] }
 0x221   :  { %8830 = vmatpush1.bf16.msra.mxu0 %v8829_v12  ;;  %v10686_v12 = vld [vmem:[#allocation2 + $0x14] ss:$8 sps:$4 sm:$0x77]   ;;  %v1131_v0 = vld [vmem:[#allocation5 + $0x2b0] sm:$0xff] }
 0x222   :  { %8831 = vmatprep.subr.bf16.mxu0 %v11200_v1  ;;  %v1015_v23 = vrot.slane %v10686_v12, 7  ;;  %v8919_v16 = vpack.c.bf16 %v1132_v15, %v1131_v0  ;;  %v1255_v39 = vld [vmem:[#allocation7 + $0x10] sm:$0xff] }
 0x225   :  { %8833 = vmatpush1.bf16.msra.mxu0 %v8832_v18  ;;  %v918_v18 = vld [vmem:[#allocation5 + $0x1d8] sm:$0xff] }
 0x226   :  { %8834 = vmatprep.subr.bf16.mxu0 %v11200_v1 }
 0x229   :  { %8836 = vmatpush1.bf16.msra.mxu0 %v8835_v22  ;;  %v8415_v22 = vrot.slane %v10684_v6, 11  ;;  %v1134_v6 = vld [vmem:[#allocation5 + $0x2c8] sm:$0xff] }
 0x22a   :  { %8837 = vmatprep.subr.bf16.mxu0 %v11200_v1  ;;  %v8922_v12 = vpack.c.bf16 %v1134_v6, %v1133_v21  ;;  %v1370_v6 = vld [vmem:[#allocation7 + $0xa0] sm:$0xff] }
 0x22b   :  { %v1016_v29 = vsel %vm11777_vm1, %v8415_v22, %v1015_v23  ;;  %v1139_v23 = vld [vmem:[#allocation5 + $0x2f0] sm:$0xff] }
 0x22d   :  { %8839 = vmatpush1.bf16.msra.mxu0 %v8838_v25  ;;  %v8877_v25 = vpack.c.bf16 %v918_v18, %v917_v17  ;;  %v1136_v17 = vld [vmem:[#allocation5 + $0x2d8] sm:$0xff] }
 0x22e   :  { %8840 = vmatprep.subr.bf16.mxu0 %v11200_v1 }
 0x231   :  { %8842 = vmatpush1.bf16.msra.mxu0 %v8841_v28  ;;  %v11784_v28 = vsel %vm11777_vm1, %v8414_v19, %v1011_v20  ;;  %v1137_v19 = vld [vmem:[#allocation5 + $0x2e0] sm:$0xff]  ;;  %v1138_v20 = vld [vmem:[#allocation5 + $0x2e8] sm:$0xff] }
 0x232   :  { %8843 = vmatprep.subr.bf16.mxu0 %v11200_v1  ;;  %v1039_v35 = vcombine.high %v11784_v28, %v1016_v29  ;;  %v8928_v22 = vpack.c.bf16 %v1138_v20, %v1137_v19 }
 0x235   :  { %8845 = vmatpush1.bf16.msra.mxu0 %v8844_v37  ;;  %v8883_v37 = vpack.c.bf16 %v1021_v34, %v1020_v33  ;;  %v10688_v34 = vld [vmem:[#allocation2 + $0x4] ss:$16 sps:$4 sm:$0xff]  }
 0x236   :  { %8846 = vmatprep.subr.bf16.mxu0 %v11200_v1 }
 0x239   :  { %8848 = vmatpush1.bf16.msra.mxu0 %v8847_v38  ;;  %v1026_v38 = vld [vmem:[#allocation5 + $0x220] sm:$0xff] }
 0x23a   :  { %8849 = vmatprep.subr.bf16.mxu0 %v11200_v1  ;;  %v8892_v45 = vpack.c.bf16 %v1027_v44, %v1026_v38  ;;  %v1259_v44 = vld [vmem:[#allocation7 + $0x30] sm:$0xff] }
 0x23c   :  { %869 = vmatmul.mubr.f32.vlgmr.msra.gmra.mrb[0].mxu0 %v799_v50  ;;  %v1030_v50 = vld [vmem:[#allocation5 + $0x240] sm:$0xff] }
 0x23d   :  { %8851 = vmatpush1.bf16.msra.mxu0 %v8850_v49  ;;  %8413 = vmatprep.mubr.msk.f32.mxu0 %vm538_vm5, %v920_v3  ;;  %v8895_v49 = vpack.c.bf16 %v1029_v46, %v1028_v48  ;;  %v8898_v2 = vpack.c.bf16 %v1031_v51, %v1030_v50  ;;  %v1032_v3 = vld [vmem:[#allocation5 + $0x250] sm:$0xff]  ;;  %v1261_v46 = vld [vmem:[#allocation7 + $0x40] sm:$0xff] }
 0x23e   :  { %8852 = vmatprep.subr.bf16.mxu0 %v11200_v1  ;;  %v1263_v51 = vld [vmem:[#allocation7 + $0x50] sm:$0xff] }
 0x241   :  { %8854 = vmatpush1.bf16.msra.mxu0 %v8853_v4  ;;  %v1033_v4 = vld [vmem:[#allocation5 + $0x258] sm:$0xff] }
 0x242   :  { %8855 = vmatprep.subr.bf16.mxu0 %v11200_v1  ;;  %v8901_v5 = vpack.c.bf16 %v1033_v4, %v1032_v3  ;;  %v1265_v4 = vld [vmem:[#allocation7 + $0x60] sm:$0xff] }
 0x245   :  { %8857 = vmatpush1.bf16.msra.mxu0 %v8856_v53  ;;  %v1035_v53 = vld [vmem:[#allocation5 + $0x268] sm:$0xff] }
 0x246   :  { %8858 = vmatprep.subr.bf16.mxu0 %v11200_v1  ;;  %v8904_v54 = vpack.c.bf16 %v1035_v53, %v1034_v52  ;;  %v1267_v53 = vld [vmem:[#allocation7 + $0x70] sm:$0xff] }
 0x249   :  { %8860 = vmatpush1.bf16.msra.mxu0 %v8859_v56  ;;  %v1037_v56 = vld [vmem:[#allocation5 + $0x278] sm:$0xff] }
 0x24a   :  { %8861 = vmatprep.subr.bf16.mxu0 %v11200_v1  ;;  %v8907_v57 = vpack.c.bf16 %v1037_v56, %v1036_v55  ;;  %v1269_v56 = vld [vmem:[#allocation7 + $0x80] sm:$0xff] }
 0x24d   :  { %8863 = vmatpush1.bf16.msra.mxu0 %v8862_v59  ;;  %v1126_v59 = vld [vmem:[#allocation5 + $0x288] sm:$0xff] }
 0x24e   :  { %8864 = vmatprep.subr.bf16.mxu0 %v11200_v1  ;;  %v8910_v60 = vpack.c.bf16 %v1126_v59, %v1125_v58  ;;  %v10689_v59 = vld [vmem:[#allocation2 + $0x8] ss:$16 sps:$4 sm:$0xff]  }
 0x24f   :  { %8423 = vmatprep.mubr.msk.f32.mxu1 %vm538_vm5, %v10689_v59 }
 0x251   :  { %8866 = vmatpush1.bf16.msra.mxu0 %v8865_v8  ;;  %v1038_v8 = vcombine.low %v11784_v28, %v1016_v29  ;;  %v1142_v28 = vld [vmem:[#allocation5 + $0x308] sm:$0xff] }
 0x252   :  { %8867 = vmatprep.subr.bf16.mxu0 %v11200_v1  ;;  %v8934_v29 = vpack.c.bf16 %v1142_v28, %v1141_v27 }
 0x255   :  { %8869 = vmatpush1.bf16.msra.mxu0 %v8868_v62  ;;  %v8913_v62 = vpack.c.bf16 %v1128_v10, %v1127_v9 }
 0x256   :  { %8870 = vmatprep.subr.bf16.mxu0 %v11200_v1 }
 0x259   :  { %8872 = vmatpush1.bf16.msra.mxu0 %v8871_v13  ;;  %v8916_v13 = vpack.c.bf16 %v1130_v63, %v1129_v11 }
 0x25a   :  { %8873 = vmatprep.subr.bf16.mxu0 %v11200_v1 }
 0x25d   :  { %8875 = vmatpush1.bf16.msra.mxu0 %v8874_v14  ;;  %v1135_v14 = vld [vmem:[#allocation5 + $0x2d0] sm:$0xff] }
 0x25e   :  { %8876 = vmatprep.subr.bf16.mxu0 %v11200_v1  ;;  %v8925_v18 = vpack.c.bf16 %v1136_v17, %v1135_v14  ;;  %v1372_v14 = vld [vmem:[#allocation7 + $0xb0] sm:$0xff]  ;;  %v1373_v17 = vld [vmem:[#allocation7 + $0xb8] sm:$0xff] }
 0x25f   :  { %v8973_v28 = vpack.c.bf16 %v1373_v17, %v1372_v14  ;;  %v1491_v14 = vld [vmem:[#allocation7 + $0x160] sm:$0xff]  ;;  %v1492_v17 = vld [vmem:[#allocation7 + $0x168] sm:$0xff] }
 0x261   :  { %8878 = vmatpush1.bf16.msra.mxu0 %v8877_v25  ;;  %v1140_v25 = vld [vmem:[#allocation5 + $0x2f8] sm:$0xff] }
 0x262   :  { %8879 = vmatprep.subr.bf16.mxu0 %v11200_v1  ;;  %v8931_v26 = vpack.c.bf16 %v1140_v25, %v1139_v23 }
 0x264   :  { %989 = vmatmul.mubr.f32.vlgmr.msra.gmra.mrb[0].mxu0 %v919_v32  ;;  %v1144_v32 = vld [vmem:[#allocation5 + $0x318] sm:$0xff] }
 0x265   :  { %8881 = vmatpush1.bf16.msra.mxu0 %v8880_v31  ;;  %8416 = vmatprep.mubr.msk.f32.mxu0 %vm538_vm5, %v1039_v35  ;;  %v1143_v31 = vld [vmem:[#allocation5 + $0x310] sm:$0xff]  ;;  %v1253_v35 = vld [vmem:[#allocation7] sm:$0xff] }
 0x266   :  { %8882 = vmatprep.subr.bf16.mxu0 %v11200_v1  ;;  %v8937_v33 = vpack.c.bf16 %v1144_v32, %v1143_v31  ;;  %v1374_v32 = vld [vmem:[#allocation7 + $0xc0] sm:$0xff] }
 0x269   :  { %8884 = vmatpush1.bf16.msra.mxu0 %v8883_v37  ;;  %v1254_v37 = vld [vmem:[#allocation7 + $0x8] sm:$0xff] }
 0x26a   :  { %8885 = vmatprep.subr.bf16.mxu0 %v11200_v1  ;;  %v8940_v40 = vpack.c.bf16 %v1254_v37, %v1253_v35 }
 0x26c   :  { %8941 = vmatpush1.bf16.msra.mxu1 %v8940_v40  ;;  %v1376_v40 = vld [vmem:[#allocation7 + $0xd0] sm:$0xff] }
 0x26d   :  { %8887 = vmatpush1.bf16.msra.mxu0 %v8886_v41  ;;  %v1256_v41 = vld [vmem:[#allocation7 + $0x18] sm:$0xff]  ;;  %8942 = vmatprep.subr.bf16.mxu1 %v11200_v1 }
 0x26e   :  { %8888 = vmatprep.subr.bf16.mxu0 %v11200_v1  ;;  %v8943_v42 = vpack.c.bf16 %v1256_v41, %v1255_v39  ;;  %v1377_v41 = vld [vmem:[#allocation7 + $0xd8] sm:$0xff] }
 0x270   :  { %8944 = vmatpush1.bf16.msra.mxu1 %v8943_v42  ;;  %v8979_v42 = vpack.c.bf16 %v1377_v41, %v1376_v40  ;;  %v1504_v40 = vld [vmem:[#allocation7 + $0x1c8] sm:$0xff] }
 0x271   :  { %8890 = vmatpush1.bf16.msra.mxu0 %v8889_v43  ;;  %v1258_v43 = vld [vmem:[#allocation7 + $0x28] sm:$0xff]  ;;  %8945 = vmatprep.subr.bf16.mxu1 %v11200_v1 }
 0x272   :  { %8891 = vmatprep.subr.bf16.mxu0 %v11200_v1  ;;  %v8946_v38 = vpack.c.bf16 %v1258_v43, %v1257_v36  ;;  %v1378_v36 = vld [vmem:[#allocation7 + $0xe0] sm:$0xff]  ;;  %v1379_v43 = vld [vmem:[#allocation7 + $0xe8] sm:$0xff] }
 0x274   :  { %8947 = vmatpush1.bf16.msra.mxu1 %v8946_v38  ;;  %v8982_v38 = vpack.c.bf16 %v1379_v43, %v1378_v36  ;;  %v1505_v43 = vld [vmem:[#allocation7 + $0x1d0] sm:$0xff] }
 0x275   :  { %8893 = vmatpush1.bf16.msra.mxu0 %v8892_v45  ;;  %v1260_v45 = vld [vmem:[#allocation7 + $0x38] sm:$0xff]  ;;  %8948 = vmatprep.subr.bf16.mxu1 %v11200_v1 }
 0x276   :  { %8894 = vmatprep.subr.bf16.mxu0 %v11200_v1  ;;  %v8949_v48 = vpack.c.bf16 %v1260_v45, %v1259_v44  ;;  %v1380_v44 = vld [vmem:[#allocation7 + $0xf0] sm:$0xff]  ;;  %v1381_v45 = vld [vmem:[#allocation7 + $0xf8] sm:$0xff] }
 0x278   :  { %8950 = vmatpush1.bf16.msra.mxu1 %v8949_v48  ;;  %v8985_v48 = vpack.c.bf16 %v1381_v45, %v1380_v44 }
 0x279   :  { %8896 = vmatpush1.bf16.msra.mxu0 %v8895_v49  ;;  %v1262_v49 = vld [vmem:[#allocation7 + $0x48] sm:$0xff]  ;;  %8951 = vmatprep.subr.bf16.mxu1 %v11200_v1 }
 0x27a   :  { %8897 = vmatprep.subr.bf16.mxu0 %v11200_v1  ;;  %v8952_v50 = vpack.c.bf16 %v1262_v49, %v1261_v46  ;;  %v1382_v46 = vld [vmem:[#allocation7 + $0x100] sm:$0xff]  ;;  %v1383_v49 = vld [vmem:[#allocation7 + $0x108] sm:$0xff] }
 0x27c   :  { %8953 = vmatpush1.bf16.msra.mxu1 %v8952_v50  ;;  %v8988_v50 = vpack.c.bf16 %v1383_v49, %v1382_v46 }
 0x27d   :  { %8899 = vmatpush1.bf16.msra.mxu0 %v8898_v2  ;;  %v1264_v2 = vld [vmem:[#allocation7 + $0x58] sm:$0xff]  ;;  %8954 = vmatprep.subr.bf16.mxu1 %v11200_v1 }
 0x27e   :  { %8900 = vmatprep.subr.bf16.mxu0 %v11200_v1  ;;  %v8955_v3 = vpack.c.bf16 %v1264_v2, %v1263_v51  ;;  %v1384_v51 = vld [vmem:[#allocation7 + $0x110] sm:$0xff]  ;;  %v1385_v2 = vld [vmem:[#allocation7 + $0x118] sm:$0xff] }
 0x280   :  { %8956 = vmatpush1.bf16.msra.mxu1 %v8955_v3  ;;  %v8991_v3 = vpack.c.bf16 %v1385_v2, %v1384_v51  ;;  %v1605_v51 = vld [vmem:[#allocation7 + $0x1e8] sm:$0xff] }
 0x281   :  { %8902 = vmatpush1.bf16.msra.mxu0 %v8901_v5  ;;  %v1266_v5 = vld [vmem:[#allocation7 + $0x68] sm:$0xff]  ;;  %8957 = vmatprep.subr.bf16.mxu1 %v11200_v1 }
 0x282   :  { %8903 = vmatprep.subr.bf16.mxu0 %v11200_v1  ;;  %v8958_v52 = vpack.c.bf16 %v1266_v5, %v1265_v4  ;;  %v1386_v4 = vld [vmem:[#allocation7 + $0x120] sm:$0xff]  ;;  %v1387_v5 = vld [vmem:[#allocation7 + $0x128] sm:$0xff] }
 0x284   :  { %8959 = vmatpush1.bf16.msra.mxu1 %v8958_v52 }
 0x285   :  { %8905 = vmatpush1.bf16.msra.mxu0 %v8904_v54  ;;  %8960 = vmatprep.subr.bf16.mxu1 %v11200_v1  ;;  %v1268_v54 = vld [vmem:[#allocation7 + $0x78] sm:$0xff] }
 0x286   :  { %8906 = vmatprep.subr.bf16.mxu0 %v11200_v1  ;;  %v8961_v55 = vpack.c.bf16 %v1268_v54, %v1267_v53  ;;  %v8994_v54 = vpack.c.bf16 %v1387_v5, %v1386_v4 }
 0x288   :  { %8962 = vmatpush1.bf16.msra.mxu1 %v8961_v55  ;;  %v1388_v55 = vld [vmem:[#allocation7 + $0x130] sm:$0xff] }
 0x289   :  { %8908 = vmatpush1.bf16.msra.mxu0 %v8907_v57  ;;  %v1270_v57 = vld [vmem:[#allocation7 + $0x88] sm:$0xff]  ;;  %8963 = vmatprep.subr.bf16.mxu1 %v11200_v1 }
 0x28a   :  { %8909 = vmatprep.subr.bf16.mxu0 %v11200_v1  ;;  %v8964_v58 = vpack.c.bf16 %v1270_v57, %v1269_v56  ;;  %v1389_v56 = vld [vmem:[#allocation7 + $0x138] sm:$0xff] }
 0x28c   :  { %1108 = vmatmul.mubr.f32.vlgmr.msra.gmra.mrb[0].mxu0 %v1038_v8  ;;  %v1272_v8 = vld [vmem:[#allocation7 + $0x98] sm:$0xff]  ;;  %8965 = vmatpush1.bf16.msra.mxu1 %v8964_v58 }
 0x28d   :  { %8911 = vmatpush1.bf16.msra.mxu0 %v8910_v60  ;;  %8419 = vmatprep.mubr.msk.f32.mxu0 %vm538_vm5, %v10687_v7  ;;  %v8404_v60 = vld [vmem:[%s12835_s21] ss:$0 sm:$0xff]  ;;  %v1271_v7 = vld [vmem:[#allocation7 + $0x90] sm:$0xff] }
 0x28e   :  { %8912 = vmatprep.subr.bf16.mxu0 %v11200_v1  ;;  %v8967_v11 = vpack.c.bf16 %v1272_v8, %v1271_v7  ;;  %8966 = vmatprep.subr.bf16.mxu1 %v11200_v1  ;;  %v8997_v7 = vpack.c.bf16 %v1389_v56, %v1388_v55  ;;  %v1487_v8 = vld [vmem:[#allocation7 + $0x140] sm:$0xff]  ;;  %v1607_v55 = vld [vmem:[#allocation7 + $0x1f8] sm:$0xff] }
 0x290   :  { %8968 = vmatpush1.bf16.msra.mxu1 %v8967_v11 }
 0x291   :  { %8914 = vmatpush1.bf16.msra.mxu0 %v8913_v62  ;;  %8969 = vmatprep.subr.bf16.mxu1 %v11200_v1 }
 0x292   :  { %8915 = vmatprep.subr.bf16.mxu0 %v11200_v1 }
 0x295   :  { %8917 = vmatpush1.bf16.msra.mxu0 %v8916_v13 }
 0x296   :  { %8918 = vmatprep.subr.bf16.mxu0 %v11200_v1 }
 0x299   :  { %8920 = vmatpush1.bf16.msra.mxu0 %v8919_v16 }
 0x29a   :  { %8921 = vmatprep.subr.bf16.mxu0 %v11200_v1 }
 0x29d   :  { %8923 = vmatpush1.bf16.msra.mxu0 %v8922_v12  ;;  %v1371_v12 = vld [vmem:[#allocation7 + $0xa8] sm:$0xff] }
 0x29e   :  { %8924 = vmatprep.subr.bf16.mxu0 %v11200_v1 }
 0x2a1   :  { %8926 = vmatpush1.bf16.msra.mxu0 %v8925_v18  ;;  %v8970_v18 = vpack.c.bf16 %v1371_v12, %v1370_v6 }
 0x2a2   :  { %8927 = vmatprep.subr.bf16.mxu0 %v11200_v1 }
 0x2a5   :  { %8929 = vmatpush1.bf16.msra.mxu0 %v8928_v22 }
 0x2a6   :  { %8930 = vmatprep.subr.bf16.mxu0 %v11200_v1 }
 0x2a9   :  { %8932 = vmatpush1.bf16.msra.mxu0 %v8931_v26 }
 0x2aa   :  { %8933 = vmatprep.subr.bf16.mxu0 %v11200_v1 }
 0x2ad   :  { %8935 = vmatpush1.bf16.msra.mxu0 %v8934_v29 }
 0x2ae   :  { %8936 = vmatprep.subr.bf16.mxu0 %v11200_v1 }
 0x2b1   :  { %8938 = vmatpush1.bf16.msra.mxu0 %v8937_v33  ;;  %v1375_v33 = vld [vmem:[#allocation7 + $0xc8] sm:$0xff] }
 0x2b2   :  { %9089 = vmatprep.subr.bf16.mxu0 %v11200_v1  ;;  %v8976_v39 = vpack.c.bf16 %v1375_v33, %v1374_v32  ;;  %v1500_v32 = vld [vmem:[#allocation7 + $0x1a8] sm:$0xff] }
 0x2b4   :  { %1215 = vmatmul.mubr.f32.vlgmr.msra.gmra.mrb[0].mxu0 %v10688_v34 }
 0x387   :  { %v1216_v9 = vpop.f32.mrb[0].mxu0 }
 0x388   :  { %v10527_v10 = vadd.f32 %v8404_v60, %v1216_v9  ;;  %v1218_v62 = vpop.f32.mrb[1].mxu0  ;;  %v1488_v9 = vld [vmem:[#allocation7 + $0x148] sm:$0xff] }
 0x38a   :  { %v11826_v63 = vmax.f32 %v10527_v10, 0.0 }
 0x38c   :  { %v1224_v13 = vrot.slane %v11826_v63, 6  ;;  %v1223_v0 = vcombine.high %v11826_v63, %v11826_v63 }
 0x38e   :  { %1226 = vrot.lane.b32.xlu0 %v1224_v13, %s11203_s1  ;;  %v1225_v15 = vrot.slane %v1223_v0, 6  ;;  %v9000_v13 = vpack.c.bf16 %v1488_v9, %v1487_v8  ;;  %v1611_v8 = vld [vmem:[#allocation7 + $0x218] sm:$0xff] }
 0x390   :  { %1228 = vrot.lane.b32.xlu1 %v1225_v15, %s11203_s1 }
 0x400   :  { %v1227_v16 = vpop.permute.xlu0 %1226 }
 0x401   :  { %1233 = vst.msk [vmem:[#allocation2] sm:$0x3c] %vm1232_vm2, %v1227_v16  ;;  %v1489_v16 = vld [vmem:[#allocation7 + $0x150] sm:$0xff] }
 0x402   :  { %v1229_v21 = vpop.permute.xlu1 %1228 }
 0x403   :  { %1234 = vst.msk [vmem:[#allocation2 + $0x10] sm:$0x3c] %vm1232_vm2, %v1229_v21  ;;  %v1490_v21 = vld [vmem:[#allocation7 + $0x158] sm:$0xff] }
 0x404   :  { %v9003_v12 = vpack.c.bf16 %v1490_v21, %v1489_v16  ;;  %v1616_v16 = vld [vmem:[#allocation7 + $0x240] sm:$0xff]  ;;  %v1617_v21 = vld [vmem:[#allocation7 + $0x248] sm:$0xff] }
 0x408   :  { %v10691_v19 = vld [vmem:[#allocation2] ss:$8 sps:$4 sm:$0xee]   ;;  %v10693_v20 = vld [vmem:[#allocation2 + $0x4] ss:$8 sps:$4 sm:$0x11]  }
 0x409   :  { %v8424_v26 = vrot.slane %v10691_v19, 9  ;;  %v1363_v27 = vrot.slane %v10693_v20, 5  ;;  %v10697_v57 = vld [vmem:[#allocation2] ss:$8 sps:$4 sm:$0xcc]  }
 0x40a   :  { %v10690_v22 = vld [vmem:[#allocation2] ss:$16 sps:$4 sm:$0xff]   ;;  %v10696_v25 = vld [vmem:[#allocation2 + $0x14] ss:$8 sps:$4 sm:$0x11]   ;;  %v8427_v10 = vrot.slane %v10697_v57, 10 }
 0x40b   :  { %v10694_v23 = vld [vmem:[#allocation2 + $0x10] ss:$8 sps:$4 sm:$0xee]   ;;  %1343 = vmatmul.mubr.f32.vlgmr.msra.gmra.mrb[0].mxu1 %v10690_v22  ;;  %v1367_v31 = vrot.slane %v10696_v25, 5  ;;  %v1364_v34 = vsel %vm11725_vm12, %v8424_v26, %v1363_v27  ;;  %v1493_v19 = vld [vmem:[#allocation7 + $0x170] sm:$0xff]  ;;  %v1494_v20 = vld [vmem:[#allocation7 + $0x178] sm:$0xff] }
 0x40c   :  { %8971 = vmatpush1.bf16.msra.mxu1 %v8970_v18  ;;  %v8425_v29 = vrot.slane %v10694_v23, 9  ;;  %v10700_v52 = vld [vmem:[#allocation2 + $0x10] ss:$8 sps:$4 sm:$0xcc]   ;;  %v9006_v18 = vpack.c.bf16 %v1492_v17, %v1491_v14  ;;  %v9009_v22 = vpack.c.bf16 %v1494_v20, %v1493_v19  ;;  %v1497_v27 = vld [vmem:[#allocation7 + $0x190] sm:$0xff]  ;;  %v1619_v14 = vld [vmem:[#allocation7 + $0x258] sm:$0xff] }
 0x40d   :  { %8972 = vmatprep.subr.bf16.mxu1 %v11200_v1  ;;  %v10702_v53 = vld [vmem:[#allocation2 + $0x14] ss:$8 sps:$4 sm:$0x33]   ;;  %v10699_v58 = vld [vmem:[#allocation2 + $0x4] ss:$8 sps:$4 sm:$0x33]  }
 0x40e   :  { %v1368_v35 = vsel %vm11725_vm12, %v8425_v29, %v1367_v31  ;;  %v8428_v59 = vrot.slane %v10700_v52, 10  ;;  %v1484_v60 = vrot.slane %v10702_v53, 6  ;;  %v1480_v62 = vrot.slane %v10699_v58, 6  ;;  %v1495_v23 = vld [vmem:[#allocation7 + $0x180] sm:$0xff]  ;;  %v1496_v25 = vld [vmem:[#allocation7 + $0x188] sm:$0xff] }
 0x40f   :  { %v1391_v37 = vcombine.high %v1364_v34, %v1368_v35  ;;  %v1390_v0 = vcombine.low %v1364_v34, %v1368_v35  ;;  %v9012_v26 = vpack.c.bf16 %v1496_v25, %v1495_v23  ;;  %v1499_v31 = vld [vmem:[#allocation7 + $0x1a0] sm:$0xff]  ;;  %v1501_v34 = vld [vmem:[#allocation7 + $0x1b0] sm:$0xff]  ;;  %v1502_v35 = vld [vmem:[#allocation7 + $0x1b8] sm:$0xff] }
 0x410   :  { %8974 = vmatpush1.bf16.msra.mxu1 %v8973_v28  ;;  %v11852_v11 = vsel %vm11748_vm15, %v8428_v59, %v1484_v60  ;;  %v11857_v15 = vsel %vm11748_vm15, %v8427_v10, %v1480_v62  ;;  %v1498_v28 = vld [vmem:[#allocation7 + $0x198] sm:$0xff]  ;;  %v9018_v33 = vpack.c.bf16 %v1500_v32, %v1499_v31  ;;  %v10706_v41 = vld [vmem:[#allocation2 + $0x10] ss:$8 sps:$4 sm:$0x88]   ;;  %v1713_v32 = vld [vmem:[#allocation7 + $0x290] sm:$0xff] }
 0x411   :  { %8426 = vmatprep.mubr.msk.f32.mxu1 %vm538_vm5, %v1391_v37  ;;  %8975 = vmatprep.subr.bf16.mxu1 %v11200_v1  ;;  %v1508_v6 = vcombine.high %v11857_v15, %v11852_v11  ;;  %v9015_v29 = vpack.c.bf16 %v1498_v28, %v1497_v27  ;;  %v9021_v37 = vpack.c.bf16 %v1502_v35, %v1501_v34  ;;  %v10703_v44 = vld [vmem:[#allocation2] ss:$8 sps:$4 sm:$0x88]   ;;  %v10705_v45 = vld [vmem:[#allocation2 + $0x4] ss:$8 sps:$4 sm:$0x77]  }
 0x412   :  { %v8430_v2 = vrot.slane %v10703_v44, 11  ;;  %v1507_v52 = vcombine.low %v11857_v15, %v11852_v11  ;;  %v1608_v58 = vld [vmem:[#allocation7 + $0x200] sm:$0xff]  ;;  %v1609_v59 = vld [vmem:[#allocation7 + $0x208] sm:$0xff]  ;;  %v1623_v23 = vld [vmem:[#allocation7 + $0x278] sm:$0xff] }
 0x413   :  { %v9036_v60 = vpack.c.bf16 %v1609_v59, %v1608_v58  ;;  %v1612_v10 = vld [vmem:[#allocation7 + $0x220] sm:$0xff]  ;;  %v1613_v62 = vld [vmem:[#allocation7 + $0x228] sm:$0xff]  ;;  %v1721_v44 = vld [vmem:[#allocation7 + $0x2d0] sm:$0xff] }
 0x414   :  { %8977 = vmatpush1.bf16.msra.mxu1 %v8976_v39  ;;  %v1503_v39 = vld [vmem:[#allocation7 + $0x1c0] sm:$0xff]  ;;  %v9042_v11 = vpack.c.bf16 %v1613_v62, %v1612_v10  ;;  %v1621_v19 = vld [vmem:[#allocation7 + $0x268] sm:$0xff]  ;;  %v1840_v59 = vld [vmem:[#allocation9 + $0x10] sm:$0xff] }
 0x415   :  { %8978 = vmatprep.subr.bf16.mxu1 %v11200_v1  ;;  %v9024_v36 = vpack.c.bf16 %v1504_v40, %v1503_v39  ;;  %v1712_v27 = vld [vmem:[#allocation7 + $0x288] sm:$0xff]  ;;  %v1715_v35 = vld [vmem:[#allocation7 + $0x2a0] sm:$0xff]  ;;  %v1717_v40 = vld [vmem:[#allocation7 + $0x2b0] sm:$0xff] }
 0x416   :  { %v1839_v58 = vld [vmem:[#allocation9 + $0x8] sm:$0xff] }
 0x417   :  { %v1843_v10 = vld [vmem:[#allocation9 + $0x28] sm:$0xff] }
 0x418   :  { %8980 = vmatpush1.bf16.msra.mxu1 %v8979_v42  ;;  %v10708_v42 = vld [vmem:[#allocation2 + $0x14] ss:$8 sps:$4 sm:$0x77]  }
 0x419   :  { %8981 = vmatprep.subr.bf16.mxu1 %v11200_v1  ;;  %v1601_v46 = vrot.slane %v10708_v42, 7 }
 0x41c   :  { %8983 = vmatpush1.bf16.msra.mxu1 %v8982_v38  ;;  %v1506_v38 = vld [vmem:[#allocation7 + $0x1d8] sm:$0xff] }
 0x41d   :  { %8984 = vmatprep.subr.bf16.mxu1 %v11200_v1  ;;  %v9027_v49 = vpack.c.bf16 %v1506_v38, %v1505_v43  ;;  %v1720_v43 = vld [vmem:[#allocation7 + $0x2c8] sm:$0xff] }
 0x420   :  { %8986 = vmatpush1.bf16.msra.mxu1 %v8985_v48  ;;  %v8431_v48 = vrot.slane %v10706_v41, 11  ;;  %v1718_v41 = vld [vmem:[#allocation7 + $0x2b8] sm:$0xff] }
 0x421   :  { %8987 = vmatprep.subr.bf16.mxu1 %v11200_v1  ;;  %v9069_v42 = vpack.c.bf16 %v1718_v41, %v1717_v40 }
 0x422   :  { %v11873_v4 = vsel %vm11777_vm1, %v8431_v48, %v1601_v46  ;;  %v1723_v46 = vld [vmem:[#allocation7 + $0x2e0] sm:$0xff] }
 0x424   :  { %8989 = vmatpush1.bf16.msra.mxu1 %v8988_v50  ;;  %v1604_v50 = vld [vmem:[#allocation7 + $0x1e0] sm:$0xff] }
 0x425   :  { %8990 = vmatprep.subr.bf16.mxu1 %v11200_v1  ;;  %v9030_v5 = vpack.c.bf16 %v1605_v51, %v1604_v50  ;;  %v1725_v51 = vld [vmem:[#allocation7 + $0x2f0] sm:$0xff] }
 0x428   :  { %8992 = vmatpush1.bf16.msra.mxu1 %v8991_v3  ;;  %v1597_v3 = vrot.slane %v10705_v45, 7  ;;  %v1722_v45 = vld [vmem:[#allocation7 + $0x2d8] sm:$0xff] }
 0x429   :  { %8993 = vmatprep.subr.bf16.mxu1 %v11200_v1  ;;  %v9075_v48 = vpack.c.bf16 %v1722_v45, %v1721_v44  ;;  %v1956_v44 = vld [vmem:[#allocation9 + $0xa8] sm:$0xff]  ;;  %v1957_v45 = vld [vmem:[#allocation9 + $0xb0] sm:$0xff] }
 0x42a   :  { %v1598_v53 = vsel %vm11777_vm1, %v8430_v2, %v1597_v3  ;;  %v1726_v2 = vld [vmem:[#allocation7 + $0x2f8] sm:$0xff] }
 0x42b   :  { %v1625_v56 = vcombine.high %v1598_v53, %v11873_v4  ;;  %v1624_v31 = vcombine.low %v1598_v53, %v11873_v4  ;;  %v9081_v3 = vpack.c.bf16 %v1726_v2, %v1725_v51  ;;  %v1727_v4 = vld [vmem:[#allocation7 + $0x300] sm:$0xff]  ;;  %v1729_v53 = vld [vmem:[#allocation7 + $0x310] sm:$0xff] }
 0x42c   :  { %8995 = vmatpush1.bf16.msra.mxu1 %v8994_v54  ;;  %v1606_v54 = vld [vmem:[#allocation7 + $0x1f0] sm:$0xff] }
 0x42d   :  { %8996 = vmatprep.subr.bf16.mxu1 %v11200_v1  ;;  %v9033_v57 = vpack.c.bf16 %v1607_v55, %v1606_v54  ;;  %v1730_v54 = vld [vmem:[#allocation7 + $0x318] sm:$0xff] }
 0x42e   :  { %v9087_v55 = vpack.c.bf16 %v1730_v54, %v1729_v53 }
 0x430   :  { %8998 = vmatpush1.bf16.msra.mxu1 %v8997_v7  ;;  %v1610_v7 = vld [vmem:[#allocation7 + $0x210] sm:$0xff] }
 0x431   :  { %8999 = vmatprep.subr.bf16.mxu1 %v11200_v1  ;;  %v9039_v9 = vpack.c.bf16 %v1611_v8, %v1610_v7  ;;  %v1841_v7 = vld [vmem:[#allocation9 + $0x18] sm:$0xff] }
 0x432   :  { %v9093_v8 = vpack.c.bf16 %v1841_v7, %v1840_v59  ;;  %v1961_v7 = vld [vmem:[#allocation9 + $0xd0] sm:$0xff] }
 0x433   :  { %1460 = vmatmul.mubr.f32.vlgmr.msra.gmra.mrb[0].mxu1 %v1390_v0  ;;  %v1615_v0 = vld [vmem:[#allocation7 + $0x238] sm:$0xff] }
 0x434   :  { %9001 = vmatpush1.bf16.msra.mxu1 %v9000_v13  ;;  %8429 = vmatprep.mubr.msk.f32.mxu1 %vm538_vm5, %v1508_v6  ;;  %v1614_v13 = vld [vmem:[#allocation7 + $0x230] sm:$0xff]  ;;  %v9048_v6 = vpack.c.bf16 %v1617_v21, %v1616_v16  ;;  %v1847_v16 = vld [vmem:[#allocation9 + $0x48] sm:$0xff] }
 0x435   :  { %9002 = vmatprep.subr.bf16.mxu1 %v11200_v1  ;;  %v9045_v15 = vpack.c.bf16 %v1615_v0, %v1614_v13  ;;  %v1845_v13 = vld [vmem:[#allocation9 + $0x38] sm:$0xff] }
 0x438   :  { %9004 = vmatpush1.bf16.msra.mxu1 %v9003_v12  ;;  %v1618_v12 = vld [vmem:[#allocation7 + $0x250] sm:$0xff] }
 0x439   :  { %9005 = vmatprep.subr.bf16.mxu1 %v11200_v1  ;;  %v9051_v17 = vpack.c.bf16 %v1619_v14, %v1618_v12  ;;  %v1849_v12 = vld [vmem:[#allocation9 + $0x58] sm:$0xff] }
 0x43c   :  { %9007 = vmatpush1.bf16.msra.mxu1 %v9006_v18  ;;  %v1620_v18 = vld [vmem:[#allocation7 + $0x260] sm:$0xff] }
 0x43d   :  { %9008 = vmatprep.subr.bf16.mxu1 %v11200_v1  ;;  %v9054_v20 = vpack.c.bf16 %v1621_v19, %v1620_v18  ;;  %v1851_v18 = vld [vmem:[#allocation9 + $0x68] sm:$0xff] }
 0x440   :  { %9010 = vmatpush1.bf16.msra.mxu1 %v9009_v22  ;;  %v1622_v22 = vld [vmem:[#allocation7 + $0x270] sm:$0xff] }
 0x441   :  { %9011 = vmatprep.subr.bf16.mxu1 %v11200_v1  ;;  %v9057_v25 = vpack.c.bf16 %v1623_v23, %v1622_v22  ;;  %v1853_v22 = vld [vmem:[#allocation9 + $0x78] sm:$0xff] }
 0x444   :  { %9013 = vmatpush1.bf16.msra.mxu1 %v9012_v26  ;;  %v1711_v26 = vld [vmem:[#allocation7 + $0x280] sm:$0xff] }
 0x445   :  { %9014 = vmatprep.subr.bf16.mxu1 %v11200_v1  ;;  %v9060_v28 = vpack.c.bf16 %v1712_v27, %v1711_v26  ;;  %v1855_v26 = vld [vmem:[#allocation9 + $0x88] sm:$0xff] }
 0x448   :  { %9016 = vmatpush1.bf16.msra.mxu1 %v9015_v29  ;;  %v10709_v29 = vld [vmem:[#allocation2 + $0xc] ss:$16 sps:$4 sm:$0xff]  }
 0x449   :  { %9017 = vmatprep.subr.bf16.mxu1 %v11200_v1 }
 0x44c   :  { %9019 = vmatpush1.bf16.msra.mxu1 %v9018_v33  ;;  %v1714_v33 = vld [vmem:[#allocation7 + $0x298] sm:$0xff] }
 0x44d   :  { %9020 = vmatprep.subr.bf16.mxu1 %v11200_v1  ;;  %v9063_v34 = vpack.c.bf16 %v1714_v33, %v1713_v32  ;;  %v1857_v32 = vld [vmem:[#allocation9 + $0x98] sm:$0xff] }
 0x450   :  { %9022 = vmatpush1.bf16.msra.mxu1 %v9021_v37  ;;  %v1716_v37 = vld [vmem:[#allocation7 + $0x2a8] sm:$0xff] }
 0x451   :  { %9023 = vmatprep.subr.bf16.mxu1 %v11200_v1  ;;  %v9066_v39 = vpack.c.bf16 %v1716_v37, %v1715_v35 }
 0x454   :  { %9025 = vmatpush1.bf16.msra.mxu1 %v9024_v36  ;;  %v1719_v36 = vld [vmem:[#allocation7 + $0x2c0] sm:$0xff] }
 0x455   :  { %9026 = vmatprep.subr.bf16.mxu1 %v11200_v1  ;;  %v9072_v38 = vpack.c.bf16 %v1720_v43, %v1719_v36 }
 0x458   :  { %9028 = vmatpush1.bf16.msra.mxu1 %v9027_v49  ;;  %v1724_v49 = vld [vmem:[#allocation7 + $0x2e8] sm:$0xff] }
 0x459   :  { %9029 = vmatprep.subr.bf16.mxu1 %v11200_v1  ;;  %v9078_v50 = vpack.c.bf16 %v1724_v49, %v1723_v46 }
 0x45b   :  { %1577 = vmatmul.mubr.f32.vlgmr.msra.gmra.mrb[0].mxu1 %v1507_v52 }
 0x45c   :  { %9031 = vmatpush1.bf16.msra.mxu1 %v9030_v5  ;;  %8432 = vmatprep.mubr.msk.f32.mxu1 %vm538_vm5, %v1625_v56  ;;  %v1728_v5 = vld [vmem:[#allocation7 + $0x308] sm:$0xff]  ;;  %v10710_v56 = vld [vmem:[#allocation2 + $0x4] ss:$16 sps:$4 sm:$0xff]  }
 0x45d   :  { %9032 = vmatprep.subr.bf16.mxu1 %v11200_v1  ;;  %v9084_v52 = vpack.c.bf16 %v1728_v5, %v1727_v4 }
 0x460   :  { %9034 = vmatpush1.bf16.msra.mxu1 %v9033_v57  ;;  %v1838_v57 = vld [vmem:[#allocation9] sm:$0xff] }
 0x461   :  { %9035 = vmatprep.subr.bf16.mxu1 %v11200_v1 }
 0x464   :  { %9037 = vmatpush1.bf16.msra.mxu1 %v9036_v60  ;;  %v9090_v60 = vpack.c.bf16 %v1839_v58, %v1838_v57 }
 0x465   :  { %9038 = vmatprep.subr.bf16.mxu1 %v11200_v1 }
 0x466   :  { %9091 = vmatpush1.bf16.msra.mxu0 %v9090_v60 }
 0x467   :  { %9092 = vmatprep.subr.bf16.mxu0 %v11200_v1 }
 0x468   :  { %9040 = vmatpush1.bf16.msra.mxu1 %v9039_v9  ;;  %v1842_v9 = vld [vmem:[#allocation9 + $0x20] sm:$0xff] }
 0x469   :  { %9041 = vmatprep.subr.bf16.mxu1 %v11200_v1  ;;  %v9096_v62 = vpack.c.bf16 %v1843_v10, %v1842_v9  ;;  %v1963_v10 = vld [vmem:[#allocation9 + $0xe0] sm:$0xff] }
 0x46a   :  { %9094 = vmatpush1.bf16.msra.mxu0 %v9093_v8  ;;  %v1962_v8 = vld [vmem:[#allocation9 + $0xd8] sm:$0xff] }
 0x46b   :  { %9095 = vmatprep.subr.bf16.mxu0 %v11200_v1  ;;  %v9129_v9 = vpack.c.bf16 %v1962_v8, %v1961_v7  ;;  %v2089_v7 = vld [vmem:[#allocation9 + $0x1c8] sm:$0xff] }
 0x46c   :  { %9043 = vmatpush1.bf16.msra.mxu1 %v9042_v11  ;;  %v1844_v11 = vld [vmem:[#allocation9 + $0x30] sm:$0xff] }
 0x46d   :  { %9044 = vmatprep.subr.bf16.mxu1 %v11200_v1  ;;  %v9099_v0 = vpack.c.bf16 %v1845_v13, %v1844_v11  ;;  %v1965_v13 = vld [vmem:[#allocation9 + $0xf0] sm:$0xff] }
 0x46e   :  { %9097 = vmatpush1.bf16.msra.mxu0 %v9096_v62  ;;  %v1964_v62 = vld [vmem:[#allocation9 + $0xe8] sm:$0xff] }
 0x46f   :  { %9098 = vmatprep.subr.bf16.mxu0 %v11200_v1  ;;  %v9132_v11 = vpack.c.bf16 %v1964_v62, %v1963_v10  ;;  %v2090_v62 = vld [vmem:[#allocation9 + $0x1d0] sm:$0xff] }
 0x470   :  { %9046 = vmatpush1.bf16.msra.mxu1 %v9045_v15  ;;  %v1846_v15 = vld [vmem:[#allocation9 + $0x40] sm:$0xff] }
 0x471   :  { %9047 = vmatprep.subr.bf16.mxu1 %v11200_v1  ;;  %v9102_v21 = vpack.c.bf16 %v1847_v16, %v1846_v15  ;;  %v1967_v16 = vld [vmem:[#allocation9 + $0x100] sm:$0xff] }
 0x472   :  { %9100 = vmatpush1.bf16.msra.mxu0 %v9099_v0  ;;  %v1966_v0 = vld [vmem:[#allocation9 + $0xf8] sm:$0xff] }
 0x473   :  { %9101 = vmatprep.subr.bf16.mxu0 %v11200_v1  ;;  %v9135_v15 = vpack.c.bf16 %v1966_v0, %v1965_v13 }
 0x474   :  { %9049 = vmatpush1.bf16.msra.mxu1 %v9048_v6  ;;  %v1848_v6 = vld [vmem:[#allocation9 + $0x50] sm:$0xff] }
 0x475   :  { %9050 = vmatprep.subr.bf16.mxu1 %v11200_v1  ;;  %v9105_v14 = vpack.c.bf16 %v1849_v12, %v1848_v6  ;;  %v1969_v12 = vld [vmem:[#allocation9 + $0x110] sm:$0xff] }
 0x476   :  { %9103 = vmatpush1.bf16.msra.mxu0 %v9102_v21  ;;  %v1968_v21 = vld [vmem:[#allocation9 + $0x108] sm:$0xff] }
 0x477   :  { %9104 = vmatprep.subr.bf16.mxu0 %v11200_v1  ;;  %v9138_v6 = vpack.c.bf16 %v1968_v21, %v1967_v16 }
 0x478   :  { %9052 = vmatpush1.bf16.msra.mxu1 %v9051_v17  ;;  %v1850_v17 = vld [vmem:[#allocation9 + $0x60] sm:$0xff] }
 0x479   :  { %9053 = vmatprep.subr.bf16.mxu1 %v11200_v1  ;;  %v9108_v19 = vpack.c.bf16 %v1851_v18, %v1850_v17  ;;  %v1971_v18 = vld [vmem:[#allocation9 + $0x120] sm:$0xff] }
 0x47a   :  { %9106 = vmatpush1.bf16.msra.mxu0 %v9105_v14  ;;  %v1970_v14 = vld [vmem:[#allocation9 + $0x118] sm:$0xff] }
 0x47b   :  { %9107 = vmatprep.subr.bf16.mxu0 %v11200_v1  ;;  %v9141_v17 = vpack.c.bf16 %v1970_v14, %v1969_v12  ;;  %v2190_v12 = vld [vmem:[#allocation9 + $0x1e8] sm:$0xff] }
 0x47c   :  { %9055 = vmatpush1.bf16.msra.mxu1 %v9054_v20  ;;  %v1852_v20 = vld [vmem:[#allocation9 + $0x70] sm:$0xff] }
 0x47d   :  { %9056 = vmatprep.subr.bf16.mxu1 %v11200_v1  ;;  %v9111_v23 = vpack.c.bf16 %v1853_v22, %v1852_v20 }
 0x47e   :  { %9109 = vmatpush1.bf16.msra.mxu0 %v9108_v19  ;;  %v1972_v19 = vld [vmem:[#allocation9 + $0x128] sm:$0xff] }
 0x47f   :  { %9110 = vmatprep.subr.bf16.mxu0 %v11200_v1 }
 0x480   :  { %9058 = vmatpush1.bf16.msra.mxu1 %v9057_v25  ;;  %v1854_v25 = vld [vmem:[#allocation9 + $0x80] sm:$0xff] }
 0x481   :  { %9059 = vmatprep.subr.bf16.mxu1 %v11200_v1  ;;  %v9114_v27 = vpack.c.bf16 %v1855_v26, %v1854_v25  ;;  %v1973_v25 = vld [vmem:[#allocation9 + $0x130] sm:$0xff]  ;;  %v1974_v26 = vld [vmem:[#allocation9 + $0x138] sm:$0xff] }
 0x482   :  { %9112 = vmatpush1.bf16.msra.mxu0 %v9111_v23  ;;  %v9144_v23 = vpack.c.bf16 %v1972_v19, %v1971_v18 }
 0x483   :  { %1694 = vmatmul.mubr.f32.vlgmr.msra.gmra.mrb[0].mxu1 %v1624_v31  ;;  %9113 = vmatprep.subr.bf16.mxu0 %v11200_v1  ;;  %v1856_v31 = vld [vmem:[#allocation9 + $0x90] sm:$0xff] }
 0x484   :  { %9061 = vmatpush1.bf16.msra.mxu1 %v9060_v28  ;;  %8435 = vmatprep.mubr.msk.f32.mxu1 %vm538_vm5, %v10709_v29  ;;  %v10711_v28 = vld [vmem:[#allocation2 + $0x8] ss:$16 sps:$4 sm:$0xff]   ;;  %v8420_v29 = vld [vmem:[%s12836_s23] ss:$0 sm:$0xff]  ;;  %v9117_v37 = vpack.c.bf16 %v1857_v32, %v1856_v31  ;;  %v9147_v32 = vpack.c.bf16 %v1974_v26, %v1973_v25 }
 0x485   :  { %9062 = vmatprep.subr.bf16.mxu1 %v11200_v1  ;;  %8439 = vmatprep.mubr.msk.f32.mxu0 %vm538_vm5, %v10711_v28  ;;  %v2192_v25 = vld [vmem:[#allocation9 + $0x1f8] sm:$0xff] }
 0x486   :  { %9115 = vmatpush1.bf16.msra.mxu0 %v9114_v27 }
 0x487   :  { %9116 = vmatprep.subr.bf16.mxu0 %v11200_v1 }
 0x488   :  { %9064 = vmatpush1.bf16.msra.mxu1 %v9063_v34 }
 0x489   :  { %9065 = vmatprep.subr.bf16.mxu1 %v11200_v1 }
 0x48a   :  { %9118 = vmatpush1.bf16.msra.mxu0 %v9117_v37 }
 0x48b   :  { %9119 = vmatprep.subr.bf16.mxu0 %v11200_v1 }
 0x48c   :  { %9067 = vmatpush1.bf16.msra.mxu1 %v9066_v39 }
 0x48d   :  { %9068 = vmatprep.subr.bf16.mxu1 %v11200_v1 }
 0x490   :  { %9070 = vmatpush1.bf16.msra.mxu1 %v9069_v42 }
 0x491   :  { %9071 = vmatprep.subr.bf16.mxu1 %v11200_v1 }
 0x494   :  { %9073 = vmatpush1.bf16.msra.mxu1 %v9072_v38  ;;  %v1955_v38 = vld [vmem:[#allocation9 + $0xa0] sm:$0xff] }
 0x495   :  { %9074 = vmatprep.subr.bf16.mxu1 %v11200_v1  ;;  %v9120_v46 = vpack.c.bf16 %v1956_v44, %v1955_v38 }
 0x498   :  { %9076 = vmatpush1.bf16.msra.mxu1 %v9075_v48  ;;  %v1958_v48 = vld [vmem:[#allocation9 + $0xb8] sm:$0xff] }
 0x499   :  { %9077 = vmatprep.subr.bf16.mxu1 %v11200_v1 }
 0x49c   :  { %9079 = vmatpush1.bf16.msra.mxu1 %v9078_v50 }
 0x49d   :  { %9080 = vmatprep.subr.bf16.mxu1 %v11200_v1 }
 0x4a0   :  { %9082 = vmatpush1.bf16.msra.mxu1 %v9081_v3 }
 0x4a1   :  { %9083 = vmatprep.subr.bf16.mxu1 %v11200_v1 }
 0x4a4   :  { %9085 = vmatpush1.bf16.msra.mxu1 %v9084_v52  ;;  %v9123_v52 = vpack.c.bf16 %v1958_v48, %v1957_v45  ;;  %v2076_v45 = vld [vmem:[#allocation9 + $0x160] sm:$0xff]  ;;  %v2077_v48 = vld [vmem:[#allocation9 + $0x168] sm:$0xff] }
 0x4a5   :  { %9086 = vmatprep.subr.bf16.mxu1 %v11200_v1 }
 0x4a8   :  { %9088 = vmatpush1.bf16.msra.mxu1 %v9087_v55  ;;  %v1959_v55 = vld [vmem:[#allocation9 + $0xc0] sm:$0xff] }
 0x4a9   :  { %9239 = vmatprep.subr.bf16.mxu1 %v11200_v1 }
 0x4ab   :  { %1801 = vmatmul.mubr.f32.vlgmr.msra.gmra.mrb[0].mxu1 %v10710_v56  ;;  %v1960_v56 = vld [vmem:[#allocation9 + $0xc8] sm:$0xff] }
 0x4ac   :  { %v9126_v60 = vpack.c.bf16 %v1960_v56, %v1959_v55  ;;  %v2085_v55 = vld [vmem:[#allocation9 + $0x1a8] sm:$0xff] }
 0x57e   :  { %v1802_v33 = vpop.f32.mrb[0].mxu1 }
 0x57f   :  { %v10528_v34 = vadd.f32 %v8420_v29, %v1802_v33  ;;  %v1804_v35 = vpop.f32.mrb[1].mxu1  ;;  %v2072_v33 = vld [vmem:[#allocation9 + $0x140] sm:$0xff] }
 0x581   :  { %v1807_v39 = vmax.f32 %v10528_v34, 0.0  ;;  %v2073_v34 = vld [vmem:[#allocation9 + $0x148] sm:$0xff] }
 0x583   :  { %v1809_v40 = vcombine.high %v1807_v39, %v1807_v39  ;;  %v1810_v41 = vrot.slane %v1807_v39, 6 }
 0x585   :  { %v1811_v42 = vrot.slane %v1809_v40, 6  ;;  %1812 = vrot.lane.b32.xlu0 %v1810_v41, %s11203_s1  ;;  %v9150_v40 = vpack.c.bf16 %v2073_v34, %v2072_v33  ;;  %v2196_v33 = vld [vmem:[#allocation9 + $0x218] sm:$0xff] }
 0x587   :  { %1814 = vrot.lane.b32.xlu1 %v1811_v42, %s11203_s1 }
 0x5f7   :  { %v1813_v36 = vpop.permute.xlu0 %1812 }
 0x5f8   :  { %1818 = vst.msk [vmem:[#allocation2] sm:$0x3c] %vm1232_vm2, %v1813_v36  ;;  %v2074_v36 = vld [vmem:[#allocation9 + $0x150] sm:$0xff] }
 0x5f9   :  { %v1815_v43 = vpop.permute.xlu1 %1814 }
 0x5fa   :  { %1819 = vst.msk [vmem:[#allocation2 + $0x10] sm:$0x3c] %vm1232_vm2, %v1815_v43  ;;  %v2075_v43 = vld [vmem:[#allocation9 + $0x158] sm:$0xff] }
 0x5fb   :  { %v9153_v44 = vpack.c.bf16 %v2075_v43, %v2074_v36  ;;  %v2201_v36 = vld [vmem:[#allocation9 + $0x240] sm:$0xff]  ;;  %v2202_v43 = vld [vmem:[#allocation9 + $0x248] sm:$0xff] }
 0x5ff   :  { %v10713_v49 = vld [vmem:[#allocation2] ss:$8 sps:$4 sm:$0xee]   ;;  %v10715_v50 = vld [vmem:[#allocation2 + $0x4] ss:$8 sps:$4 sm:$0x11]  }
 0x600   :  { %v8440_v4 = vrot.slane %v10713_v49, 9  ;;  %v1948_v5 = vrot.slane %v10715_v50, 5  ;;  %v10719_v27 = vld [vmem:[#allocation2] ss:$8 sps:$4 sm:$0xcc]  }
 0x601   :  { %v10712_v51 = vld [vmem:[#allocation2] ss:$16 sps:$4 sm:$0xff]   ;;  %v10718_v3 = vld [vmem:[#allocation2 + $0x14] ss:$8 sps:$4 sm:$0x11]   ;;  %v8443_v35 = vrot.slane %v10719_v27, 10 }
 0x602   :  { %v10716_v2 = vld [vmem:[#allocation2 + $0x10] ss:$8 sps:$4 sm:$0xee]   ;;  %1928 = vmatmul.mubr.f32.vlgmr.msra.gmra.mrb[2].mxu0 %v10712_v51  ;;  %v1952_v54 = vrot.slane %v10718_v3, 5  ;;  %v1949_v57 = vsel %vm11725_vm12, %v8440_v4, %v1948_v5  ;;  %v2078_v49 = vld [vmem:[#allocation9 + $0x170] sm:$0xff]  ;;  %v2079_v50 = vld [vmem:[#allocation9 + $0x178] sm:$0xff] }
 0x603   :  { %9121 = vmatpush1.bf16.msra.mxu0 %v9120_v46  ;;  %v8441_v53 = vrot.slane %v10716_v2, 9  ;;  %v10722_v20 = vld [vmem:[#allocation2 + $0x10] ss:$8 sps:$4 sm:$0xcc]   ;;  %v9156_v46 = vpack.c.bf16 %v2077_v48, %v2076_v45  ;;  %v9159_v51 = vpack.c.bf16 %v2079_v50, %v2078_v49  ;;  %v2082_v5 = vld [vmem:[#allocation9 + $0x190] sm:$0xff]  ;;  %v2204_v45 = vld [vmem:[#allocation9 + $0x258] sm:$0xff] }
 0x604   :  { %9122 = vmatprep.subr.bf16.mxu0 %v11200_v1  ;;  %v10724_v22 = vld [vmem:[#allocation2 + $0x14] ss:$8 sps:$4 sm:$0x33]   ;;  %v10721_v28 = vld [vmem:[#allocation2 + $0x4] ss:$8 sps:$4 sm:$0x33]  }
 0x605   :  { %v1953_v58 = vsel %vm11725_vm12, %v8441_v53, %v1952_v54  ;;  %v8444_v29 = vrot.slane %v10722_v20, 10  ;;  %v2069_v31 = vrot.slane %v10724_v22, 6  ;;  %v2065_v37 = vrot.slane %v10721_v28, 6  ;;  %v2080_v2 = vld [vmem:[#allocation9 + $0x180] sm:$0xff]  ;;  %v2081_v3 = vld [vmem:[#allocation9 + $0x188] sm:$0xff] }
 0x606   :  { %v1976_v59 = vcombine.high %v1949_v57, %v1953_v58  ;;  %v1975_v41 = vcombine.low %v1949_v57, %v1953_v58  ;;  %v9162_v4 = vpack.c.bf16 %v2081_v3, %v2080_v2  ;;  %v2084_v54 = vld [vmem:[#allocation9 + $0x1a0] sm:$0xff]  ;;  %v2086_v57 = vld [vmem:[#allocation9 + $0x1b0] sm:$0xff]  ;;  %v2087_v58 = vld [vmem:[#allocation9 + $0x1b8] sm:$0xff] }
 0x607   :  { %9124 = vmatpush1.bf16.msra.mxu0 %v9123_v52  ;;  %v11936_v39 = vsel %vm11748_vm15, %v8444_v29, %v2069_v31  ;;  %v11941_v42 = vsel %vm11748_vm15, %v8443_v35, %v2065_v37  ;;  %v2083_v52 = vld [vmem:[#allocation9 + $0x198] sm:$0xff]  ;;  %v9168_v56 = vpack.c.bf16 %v2085_v55, %v2084_v54  ;;  %v10728_v8 = vld [vmem:[#allocation2 + $0x10] ss:$8 sps:$4 sm:$0x88]   ;;  %v2298_v55 = vld [vmem:[#allocation9 + $0x290] sm:$0xff] }
 0x608   :  { %8442 = vmatprep.mubr.msk.f32.mxu0 %vm538_vm5, %v1976_v59  ;;  %9125 = vmatprep.subr.bf16.mxu0 %v11200_v1  ;;  %v2093_v38 = vcombine.high %v11941_v42, %v11936_v39  ;;  %v9165_v53 = vpack.c.bf16 %v2083_v52, %v2082_v5  ;;  %v9171_v59 = vpack.c.bf16 %v2087_v58, %v2086_v57  ;;  %v10725_v13 = vld [vmem:[#allocation2] ss:$8 sps:$4 sm:$0x88]   ;;  %v10727_v0 = vld [vmem:[#allocation2 + $0x4] ss:$8 sps:$4 sm:$0x77]  }
 0x609   :  { %v8446_v14 = vrot.slane %v10725_v13, 11  ;;  %v2092_v20 = vcombine.low %v11941_v42, %v11936_v39  ;;  %v2193_v28 = vld [vmem:[#allocation9 + $0x200] sm:$0xff]  ;;  %v2194_v29 = vld [vmem:[#allocation9 + $0x208] sm:$0xff]  ;;  %v2208_v2 = vld [vmem:[#allocation9 + $0x278] sm:$0xff] }
 0x60a   :  { %v9186_v31 = vpack.c.bf16 %v2194_v29, %v2193_v28  ;;  %v2197_v35 = vld [vmem:[#allocation9 + $0x220] sm:$0xff]  ;;  %v2198_v37 = vld [vmem:[#allocation9 + $0x228] sm:$0xff]  ;;  %v2306_v13 = vld [vmem:[#allocation9 + $0x2d0] sm:$0xff] }
 0x60b   :  { %9127 = vmatpush1.bf16.msra.mxu0 %v9126_v60  ;;  %v2088_v60 = vld [vmem:[#allocation9 + $0x1c0] sm:$0xff]  ;;  %v9192_v39 = vpack.c.bf16 %v2198_v37, %v2197_v35  ;;  %v2206_v49 = vld [vmem:[#allocation9 + $0x268] sm:$0xff]  ;;  %v2425_v29 = vld [vmem:[#allocation10 + $0x10] sm:$0xff] }
 0x60c   :  { %9128 = vmatprep.subr.bf16.mxu0 %v11200_v1  ;;  %v9174_v10 = vpack.c.bf16 %v2089_v7, %v2088_v60  ;;  %v2297_v5 = vld [vmem:[#allocation9 + $0x288] sm:$0xff]  ;;  %v2300_v58 = vld [vmem:[#allocation9 + $0x2a0] sm:$0xff]  ;;  %v2302_v7 = vld [vmem:[#allocation9 + $0x2b0] sm:$0xff] }
 0x60d   :  { %v2424_v28 = vld [vmem:[#allocation10 + $0x8] sm:$0xff] }
 0x60e   :  { %v2428_v35 = vld [vmem:[#allocation10 + $0x28] sm:$0xff] }
 0x60f   :  { %9130 = vmatpush1.bf16.msra.mxu0 %v9129_v9  ;;  %v10730_v9 = vld [vmem:[#allocation2 + $0x14] ss:$8 sps:$4 sm:$0x77]  }
 0x610   :  { %9131 = vmatprep.subr.bf16.mxu0 %v11200_v1  ;;  %v2186_v16 = vrot.slane %v10730_v9, 7 }
 0x613   :  { %9133 = vmatpush1.bf16.msra.mxu0 %v9132_v11  ;;  %v2091_v11 = vld [vmem:[#allocation9 + $0x1d8] sm:$0xff] }
 0x614   :  { %9134 = vmatprep.subr.bf16.mxu0 %v11200_v1  ;;  %v9177_v21 = vpack.c.bf16 %v2091_v11, %v2090_v62  ;;  %v2305_v62 = vld [vmem:[#allocation9 + $0x2c8] sm:$0xff] }
 0x617   :  { %9136 = vmatpush1.bf16.msra.mxu0 %v9135_v15  ;;  %v8447_v15 = vrot.slane %v10728_v8, 11  ;;  %v2303_v8 = vld [vmem:[#allocation9 + $0x2b8] sm:$0xff] }
 0x618   :  { %9137 = vmatprep.subr.bf16.mxu0 %v11200_v1  ;;  %v9219_v9 = vpack.c.bf16 %v2303_v8, %v2302_v7 }
 0x619   :  { %v11957_v18 = vsel %vm11777_vm1, %v8447_v15, %v2186_v16  ;;  %v2308_v16 = vld [vmem:[#allocation9 + $0x2e0] sm:$0xff] }
 0x61b   :  { %9139 = vmatpush1.bf16.msra.mxu0 %v9138_v6  ;;  %v2189_v6 = vld [vmem:[#allocation9 + $0x1e0] sm:$0xff] }
 0x61c   :  { %9140 = vmatprep.subr.bf16.mxu0 %v11200_v1  ;;  %v9180_v19 = vpack.c.bf16 %v2190_v12, %v2189_v6  ;;  %v2310_v12 = vld [vmem:[#allocation9 + $0x2f0] sm:$0xff] }
 0x61f   :  { %9142 = vmatpush1.bf16.msra.mxu0 %v9141_v17  ;;  %v2182_v17 = vrot.slane %v10727_v0, 7  ;;  %v2307_v0 = vld [vmem:[#allocation9 + $0x2d8] sm:$0xff] }
 0x620   :  { %9143 = vmatprep.subr.bf16.mxu0 %v11200_v1  ;;  %v9225_v15 = vpack.c.bf16 %v2307_v0, %v2306_v13  ;;  %v2541_v13 = vld [vmem:[#allocation10 + $0xa8] sm:$0xff]  ;;  %v2542_v0 = vld [vmem:[#allocation10 + $0xb0] sm:$0xff] }
 0x621   :  { %v2183_v22 = vsel %vm11777_vm1, %v8446_v14, %v2182_v17  ;;  %v2311_v14 = vld [vmem:[#allocation9 + $0x2f8] sm:$0xff] }
 0x622   :  { %v2210_v26 = vcombine.high %v2183_v22, %v11957_v18  ;;  %v2209_v54 = vcombine.low %v2183_v22, %v11957_v18  ;;  %v9231_v17 = vpack.c.bf16 %v2311_v14, %v2310_v12  ;;  %v2312_v18 = vld [vmem:[#allocation9 + $0x300] sm:$0xff]  ;;  %v2314_v22 = vld [vmem:[#allocation9 + $0x310] sm:$0xff] }
 0x623   :  { %9145 = vmatpush1.bf16.msra.mxu0 %v9144_v23  ;;  %v2191_v23 = vld [vmem:[#allocation9 + $0x1f0] sm:$0xff] }
 0x624   :  { %9146 = vmatprep.subr.bf16.mxu0 %v11200_v1  ;;  %v9183_v27 = vpack.c.bf16 %v2192_v25, %v2191_v23  ;;  %v2315_v23 = vld [vmem:[#allocation9 + $0x318] sm:$0xff] }
 0x625   :  { %v9237_v25 = vpack.c.bf16 %v2315_v23, %v2314_v22 }
 0x627   :  { %9148 = vmatpush1.bf16.msra.mxu0 %v9147_v32  ;;  %v2195_v32 = vld [vmem:[#allocation9 + $0x210] sm:$0xff] }
 0x628   :  { %9149 = vmatprep.subr.bf16.mxu0 %v11200_v1  ;;  %v9189_v34 = vpack.c.bf16 %v2196_v33, %v2195_v32  ;;  %v2426_v32 = vld [vmem:[#allocation10 + $0x18] sm:$0xff] }
 0x629   :  { %v9243_v33 = vpack.c.bf16 %v2426_v32, %v2425_v29  ;;  %v2546_v32 = vld [vmem:[#allocation10 + $0xd0] sm:$0xff] }
 0x62a   :  { %2045 = vmatmul.mubr.f32.vlgmr.msra.gmra.mrb[2].mxu0 %v1975_v41  ;;  %v2200_v41 = vld [vmem:[#allocation9 + $0x238] sm:$0xff] }
 0x62b   :  { %9151 = vmatpush1.bf16.msra.mxu0 %v9150_v40  ;;  %8445 = vmatprep.mubr.msk.f32.mxu0 %vm538_vm5, %v2093_v38  ;;  %v2199_v40 = vld [vmem:[#allocation9 + $0x230] sm:$0xff]  ;;  %v9198_v38 = vpack.c.bf16 %v2202_v43, %v2201_v36  ;;  %v2432_v36 = vld [vmem:[#allocation10 + $0x48] sm:$0xff] }
 0x62c   :  { %9152 = vmatprep.subr.bf16.mxu0 %v11200_v1  ;;  %v9195_v42 = vpack.c.bf16 %v2200_v41, %v2199_v40  ;;  %v2430_v40 = vld [vmem:[#allocation10 + $0x38] sm:$0xff] }
 0x62f   :  { %9154 = vmatpush1.bf16.msra.mxu0 %v9153_v44  ;;  %v2203_v44 = vld [vmem:[#allocation9 + $0x250] sm:$0xff] }
 0x630   :  { %9155 = vmatprep.subr.bf16.mxu0 %v11200_v1  ;;  %v9201_v48 = vpack.c.bf16 %v2204_v45, %v2203_v44  ;;  %v2434_v44 = vld [vmem:[#allocation10 + $0x58] sm:$0xff] }
 0x633   :  { %9157 = vmatpush1.bf16.msra.mxu0 %v9156_v46  ;;  %v2205_v46 = vld [vmem:[#allocation9 + $0x260] sm:$0xff] }
 0x634   :  { %9158 = vmatprep.subr.bf16.mxu0 %v11200_v1  ;;  %v9204_v50 = vpack.c.bf16 %v2206_v49, %v2205_v46  ;;  %v2436_v46 = vld [vmem:[#allocation10 + $0x68] sm:$0xff] }
 0x637   :  { %9160 = vmatpush1.bf16.msra.mxu0 %v9159_v51  ;;  %v2207_v51 = vld [vmem:[#allocation9 + $0x270] sm:$0xff] }
 0x638   :  { %9161 = vmatprep.subr.bf16.mxu0 %v11200_v1  ;;  %v9207_v3 = vpack.c.bf16 %v2208_v2, %v2207_v51  ;;  %v2438_v51 = vld [vmem:[#allocation10 + $0x78] sm:$0xff] }
 0x63b   :  { %9163 = vmatpush1.bf16.msra.mxu0 %v9162_v4  ;;  %v2296_v4 = vld [vmem:[#allocation9 + $0x280] sm:$0xff] }
 0x63c   :  { %9164 = vmatprep.subr.bf16.mxu0 %v11200_v1  ;;  %v9210_v52 = vpack.c.bf16 %v2297_v5, %v2296_v4  ;;  %v2440_v4 = vld [vmem:[#allocation10 + $0x88] sm:$0xff] }
 0x63f   :  { %9166 = vmatpush1.bf16.msra.mxu0 %v9165_v53  ;;  %v10731_v53 = vld [vmem:[#allocation2 + $0xc] ss:$16 sps:$4 sm:$0xff]  }
 0x640   :  { %9167 = vmatprep.subr.bf16.mxu0 %v11200_v1 }
 0x643   :  { %9169 = vmatpush1.bf16.msra.mxu0 %v9168_v56  ;;  %v2299_v56 = vld [vmem:[#allocation9 + $0x298] sm:$0xff] }
 0x644   :  { %9170 = vmatprep.subr.bf16.mxu0 %v11200_v1  ;;  %v9213_v57 = vpack.c.bf16 %v2299_v56, %v2298_v55  ;;  %v2442_v55 = vld [vmem:[#allocation10 + $0x98] sm:$0xff] }
 0x647   :  { %9172 = vmatpush1.bf16.msra.mxu0 %v9171_v59  ;;  %v2301_v59 = vld [vmem:[#allocation9 + $0x2a8] sm:$0xff] }
 0x648   :  { %9173 = vmatprep.subr.bf16.mxu0 %v11200_v1  ;;  %v9216_v60 = vpack.c.bf16 %v2301_v59, %v2300_v58 }
 0x64b   :  { %9175 = vmatpush1.bf16.msra.mxu0 %v9174_v10  ;;  %v2304_v10 = vld [vmem:[#allocation9 + $0x2c0] sm:$0xff] }
 0x64c   :  { %9176 = vmatprep.subr.bf16.mxu0 %v11200_v1  ;;  %v9222_v11 = vpack.c.bf16 %v2305_v62, %v2304_v10 }
 0x64f   :  { %9178 = vmatpush1.bf16.msra.mxu0 %v9177_v21  ;;  %v2309_v21 = vld [vmem:[#allocation9 + $0x2e8] sm:$0xff] }
 0x650   :  { %9179 = vmatprep.subr.bf16.mxu0 %v11200_v1  ;;  %v9228_v6 = vpack.c.bf16 %v2309_v21, %v2308_v16 }
 0x652   :  { %2162 = vmatmul.mubr.f32.vlgmr.msra.gmra.mrb[2].mxu0 %v2092_v20 }
 0x653   :  { %9181 = vmatpush1.bf16.msra.mxu0 %v9180_v19  ;;  %8448 = vmatprep.mubr.msk.f32.mxu0 %vm538_vm5, %v2210_v26  ;;  %v2313_v19 = vld [vmem:[#allocation9 + $0x308] sm:$0xff]  ;;  %v10732_v26 = vld [vmem:[#allocation2 + $0x4] ss:$16 sps:$4 sm:$0xff]  }
 0x654   :  { %9182 = vmatprep.subr.bf16.mxu0 %v11200_v1  ;;  %v9234_v20 = vpack.c.bf16 %v2313_v19, %v2312_v18 }
 0x657   :  { %9184 = vmatpush1.bf16.msra.mxu0 %v9183_v27  ;;  %v2423_v27 = vld [vmem:[#allocation10] sm:$0xff] }
 0x658   :  { %9185 = vmatprep.subr.bf16.mxu0 %v11200_v1 }
 0x65b   :  { %9187 = vmatpush1.bf16.msra.mxu0 %v9186_v31  ;;  %v9240_v31 = vpack.c.bf16 %v2424_v28, %v2423_v27 }
 0x65c   :  { %9188 = vmatprep.subr.bf16.mxu0 %v11200_v1 }
 0x65d   :  { %9241 = vmatpush1.bf16.msra.mxu1 %v9240_v31 }
 0x65e   :  { %9242 = vmatprep.subr.bf16.mxu1 %v11200_v1 }
 0x65f   :  { %9190 = vmatpush1.bf16.msra.mxu0 %v9189_v34  ;;  %v2427_v34 = vld [vmem:[#allocation10 + $0x20] sm:$0xff] }
 0x660   :  { %9191 = vmatprep.subr.bf16.mxu0 %v11200_v1  ;;  %v9246_v37 = vpack.c.bf16 %v2428_v35, %v2427_v34  ;;  %v2548_v35 = vld [vmem:[#allocation10 + $0xe0] sm:$0xff] }
 0x661   :  { %9244 = vmatpush1.bf16.msra.mxu1 %v9243_v33  ;;  %v2547_v33 = vld [vmem:[#allocation10 + $0xd8] sm:$0xff] }
 0x662   :  { %9245 = vmatprep.subr.bf16.mxu1 %v11200_v1  ;;  %v9279_v34 = vpack.c.bf16 %v2547_v33, %v2546_v32  ;;  %v2674_v32 = vld [vmem:[#allocation10 + $0x1c8] sm:$0xff] }
 0x663   :  { %9193 = vmatpush1.bf16.msra.mxu0 %v9192_v39  ;;  %v2429_v39 = vld [vmem:[#allocation10 + $0x30] sm:$0xff] }
 0x664   :  { %9194 = vmatprep.subr.bf16.mxu0 %v11200_v1  ;;  %v9249_v41 = vpack.c.bf16 %v2430_v40, %v2429_v39  ;;  %v2550_v40 = vld [vmem:[#allocation10 + $0xf0] sm:$0xff] }
 0x665   :  { %9247 = vmatpush1.bf16.msra.mxu1 %v9246_v37  ;;  %v2549_v37 = vld [vmem:[#allocation10 + $0xe8] sm:$0xff] }
 0x666   :  { %9248 = vmatprep.subr.bf16.mxu1 %v11200_v1  ;;  %v9282_v39 = vpack.c.bf16 %v2549_v37, %v2548_v35  ;;  %v2675_v37 = vld [vmem:[#allocation10 + $0x1d0] sm:$0xff] }
 0x667   :  { %9196 = vmatpush1.bf16.msra.mxu0 %v9195_v42  ;;  %v2431_v42 = vld [vmem:[#allocation10 + $0x40] sm:$0xff] }
 0x668   :  { %9197 = vmatprep.subr.bf16.mxu0 %v11200_v1  ;;  %v9252_v43 = vpack.c.bf16 %v2432_v36, %v2431_v42  ;;  %v2552_v36 = vld [vmem:[#allocation10 + $0x100] sm:$0xff] }
 0x669   :  { %9250 = vmatpush1.bf16.msra.mxu1 %v9249_v41  ;;  %v2551_v41 = vld [vmem:[#allocation10 + $0xf8] sm:$0xff] }
 0x66a   :  { %9251 = vmatprep.subr.bf16.mxu1 %v11200_v1  ;;  %v9285_v42 = vpack.c.bf16 %v2551_v41, %v2550_v40 }
 0x66b   :  { %9199 = vmatpush1.bf16.msra.mxu0 %v9198_v38  ;;  %v2433_v38 = vld [vmem:[#allocation10 + $0x50] sm:$0xff] }
 0x66c   :  { %9200 = vmatprep.subr.bf16.mxu0 %v11200_v1  ;;  %v9255_v45 = vpack.c.bf16 %v2434_v44, %v2433_v38  ;;  %v2554_v44 = vld [vmem:[#allocation10 + $0x110] sm:$0xff] }
 0x66d   :  { %9253 = vmatpush1.bf16.msra.mxu1 %v9252_v43  ;;  %v2553_v43 = vld [vmem:[#allocation10 + $0x108] sm:$0xff] }
 0x66e   :  { %9254 = vmatprep.subr.bf16.mxu1 %v11200_v1  ;;  %v9288_v38 = vpack.c.bf16 %v2553_v43, %v2552_v36 }
 0x66f   :  { %9202 = vmatpush1.bf16.msra.mxu0 %v9201_v48  ;;  %v2435_v48 = vld [vmem:[#allocation10 + $0x60] sm:$0xff] }
 0x670   :  { %9203 = vmatprep.subr.bf16.mxu0 %v11200_v1  ;;  %v9258_v49 = vpack.c.bf16 %v2436_v46, %v2435_v48  ;;  %v2556_v46 = vld [vmem:[#allocation10 + $0x120] sm:$0xff] }
 0x671   :  { %9256 = vmatpush1.bf16.msra.mxu1 %v9255_v45  ;;  %v2555_v45 = vld [vmem:[#allocation10 + $0x118] sm:$0xff] }
 0x672   :  { %9257 = vmatprep.subr.bf16.mxu1 %v11200_v1  ;;  %v9291_v48 = vpack.c.bf16 %v2555_v45, %v2554_v44  ;;  %v2775_v44 = vld [vmem:[#allocation10 + $0x1e8] sm:$0xff] }
 0x673   :  { %9205 = vmatpush1.bf16.msra.mxu0 %v9204_v50  ;;  %v2437_v50 = vld [vmem:[#allocation10 + $0x70] sm:$0xff] }
 0x674   :  { %9206 = vmatprep.subr.bf16.mxu0 %v11200_v1  ;;  %v9261_v2 = vpack.c.bf16 %v2438_v51, %v2437_v50 }
 0x675   :  { %9259 = vmatpush1.bf16.msra.mxu1 %v9258_v49  ;;  %v2557_v49 = vld [vmem:[#allocation10 + $0x128] sm:$0xff] }
 0x676   :  { %9260 = vmatprep.subr.bf16.mxu1 %v11200_v1 }
 0x677   :  { %9208 = vmatpush1.bf16.msra.mxu0 %v9207_v3  ;;  %v2439_v3 = vld [vmem:[#allocation10 + $0x80] sm:$0xff] }
 0x678   :  { %9209 = vmatprep.subr.bf16.mxu0 %v11200_v1  ;;  %v9264_v5 = vpack.c.bf16 %v2440_v4, %v2439_v3  ;;  %v2558_v3 = vld [vmem:[#allocation10 + $0x130] sm:$0xff]  ;;  %v2559_v4 = vld [vmem:[#allocation10 + $0x138] sm:$0xff] }
 0x679   :  { %9262 = vmatpush1.bf16.msra.mxu1 %v9261_v2  ;;  %v9294_v2 = vpack.c.bf16 %v2557_v49, %v2556_v46 }
 0x67a   :  { %2279 = vmatmul.mubr.f32.vlgmr.msra.gmra.mrb[2].mxu0 %v2209_v54  ;;  %9263 = vmatprep.subr.bf16.mxu1 %v11200_v1  ;;  %v2441_v54 = vld [vmem:[#allocation10 + $0x90] sm:$0xff] }
 0x67b   :  { %9211 = vmatpush1.bf16.msra.mxu0 %v9210_v52  ;;  %8451 = vmatprep.mubr.msk.f32.mxu0 %vm538_vm5, %v10731_v53  ;;  %v10733_v52 = vld [vmem:[#allocation2 + $0x8] ss:$16 sps:$4 sm:$0xff]   ;;  %v8436_v53 = vld [vmem:[%s12837_s29] ss:$0 sm:$0xff]  ;;  %v9267_v59 = vpack.c.bf16 %v2442_v55, %v2441_v54  ;;  %v9297_v55 = vpack.c.bf16 %v2559_v4, %v2558_v3 }
 0x67c   :  { %9212 = vmatprep.subr.bf16.mxu0 %v11200_v1  ;;  %8455 = vmatprep.mubr.msk.f32.mxu1 %vm538_vm5, %v10733_v52  ;;  %v2777_v3 = vld [vmem:[#allocation10 + $0x1f8] sm:$0xff] }
 0x67d   :  { %9265 = vmatpush1.bf16.msra.mxu1 %v9264_v5 }
 0x67e   :  { %9266 = vmatprep.subr.bf16.mxu1 %v11200_v1 }
 0x67f   :  { %9214 = vmatpush1.bf16.msra.mxu0 %v9213_v57 }
 0x680   :  { %9215 = vmatprep.subr.bf16.mxu0 %v11200_v1 }
 0x681   :  { %9268 = vmatpush1.bf16.msra.mxu1 %v9267_v59 }
 0x682   :  { %9269 = vmatprep.subr.bf16.mxu1 %v11200_v1 }
 0x683   :  { %9217 = vmatpush1.bf16.msra.mxu0 %v9216_v60 }
 0x684   :  { %9218 = vmatprep.subr.bf16.mxu0 %v11200_v1 }
 0x687   :  { %9220 = vmatpush1.bf16.msra.mxu0 %v9219_v9 }
 0x688   :  { %9221 = vmatprep.subr.bf16.mxu0 %v11200_v1 }
 0x68b   :  { %9223 = vmatpush1.bf16.msra.mxu0 %v9222_v11  ;;  %v2540_v11 = vld [vmem:[#allocation10 + $0xa0] sm:$0xff] }
 0x68c   :  { %9224 = vmatprep.subr.bf16.mxu0 %v11200_v1  ;;  %v9270_v16 = vpack.c.bf16 %v2541_v13, %v2540_v11 }
 0x68f   :  { %9226 = vmatpush1.bf16.msra.mxu0 %v9225_v15  ;;  %v2543_v15 = vld [vmem:[#allocation10 + $0xb8] sm:$0xff] }
 0x690   :  { %9227 = vmatprep.subr.bf16.mxu0 %v11200_v1 }
 0x693   :  { %9229 = vmatpush1.bf16.msra.mxu0 %v9228_v6 }
 0x694   :  { %9230 = vmatprep.subr.bf16.mxu0 %v11200_v1 }
 0x697   :  { %9232 = vmatpush1.bf16.msra.mxu0 %v9231_v17 }
 0x698   :  { %9233 = vmatprep.subr.bf16.mxu0 %v11200_v1 }
 0x69b   :  { %9235 = vmatpush1.bf16.msra.mxu0 %v9234_v20  ;;  %v9273_v20 = vpack.c.bf16 %v2543_v15, %v2542_v0  ;;  %v2661_v0 = vld [vmem:[#allocation10 + $0x160] sm:$0xff]  ;;  %v2662_v15 = vld [vmem:[#allocation10 + $0x168] sm:$0xff] }
 0x69c   :  { %9236 = vmatprep.subr.bf16.mxu0 %v11200_v1 }
 0x69f   :  { %9238 = vmatpush1.bf16.msra.mxu0 %v9237_v25  ;;  %v2544_v25 = vld [vmem:[#allocation10 + $0xc0] sm:$0xff] }
 0x6a0   :  { %9389 = vmatprep.subr.bf16.mxu0 %v11200_v1 }
 0x6a2   :  { %2386 = vmatmul.mubr.f32.vlgmr.msra.gmra.mrb[2].mxu0 %v10732_v26  ;;  %v2545_v26 = vld [vmem:[#allocation10 + $0xc8] sm:$0xff] }
 0x6a3   :  { %v9276_v31 = vpack.c.bf16 %v2545_v26, %v2544_v25  ;;  %v2670_v25 = vld [vmem:[#allocation10 + $0x1a8] sm:$0xff] }
 0x775   :  { %v2387_v56 = vpop.f32.mrb[2].mxu0 }
 0x776   :  { %v10529_v57 = vadd.f32 %v8436_v53, %v2387_v56  ;;  %v2389_v58 = vpop.f32.mrb[3].mxu0  ;;  %v2657_v56 = vld [vmem:[#allocation10 + $0x140] sm:$0xff] }
 0x778   :  { %v2392_v60 = vmax.f32 %v10529_v57, 0.0  ;;  %v2658_v57 = vld [vmem:[#allocation10 + $0x148] sm:$0xff] }
 0x77a   :  { %v2394_v7 = vcombine.high %v2392_v60, %v2392_v60  ;;  %v2395_v8 = vrot.slane %v2392_v60, 6 }
 0x77c   :  { %v2396_v9 = vrot.slane %v2394_v7, 6  ;;  %2397 = vrot.lane.b32.xlu0 %v2395_v8, %s11203_s1  ;;  %v9300_v7 = vpack.c.bf16 %v2658_v57, %v2657_v56  ;;  %v2781_v56 = vld [vmem:[#allocation10 + $0x218] sm:$0xff] }
 0x77e   :  { %2399 = vrot.lane.b32.xlu1 %v2396_v9, %s11203_s1 }
 0x7ee   :  { %v2398_v10 = vpop.permute.xlu0 %2397 }
 0x7ef   :  { %2403 = vst.msk [vmem:[#allocation2] sm:$0x3c] %vm1232_vm2, %v2398_v10  ;;  %v2659_v10 = vld [vmem:[#allocation10 + $0x150] sm:$0xff] }
 0x7f0   :  { %v2400_v62 = vpop.permute.xlu1 %2399 }
 0x7f1   :  { %2404 = vst.msk [vmem:[#allocation2 + $0x10] sm:$0x3c] %vm1232_vm2, %v2400_v62  ;;  %v2660_v62 = vld [vmem:[#allocation10 + $0x158] sm:$0xff] }
 0x7f2   :  { %v9303_v13 = vpack.c.bf16 %v2660_v62, %v2659_v10  ;;  %v2786_v10 = vld [vmem:[#allocation10 + $0x240] sm:$0xff]  ;;  %v2787_v62 = vld [vmem:[#allocation10 + $0x248] sm:$0xff] }
 0x7f6   :  { %v10735_v21 = vld [vmem:[#allocation2] ss:$8 sps:$4 sm:$0xee]   ;;  %v10737_v6 = vld [vmem:[#allocation2 + $0x4] ss:$8 sps:$4 sm:$0x11]  }
 0x7f7   :  { %v8456_v18 = vrot.slane %v10735_v21, 9  ;;  %v2533_v19 = vrot.slane %v10737_v6, 5  ;;  %v10741_v5 = vld [vmem:[#allocation2] ss:$8 sps:$4 sm:$0xcc]  }
 0x7f8   :  { %v10734_v12 = vld [vmem:[#allocation2] ss:$16 sps:$4 sm:$0xff]   ;;  %v10740_v17 = vld [vmem:[#allocation2 + $0x14] ss:$8 sps:$4 sm:$0x11]   ;;  %v8459_v58 = vrot.slane %v10741_v5, 10 }
 0x7f9   :  { %v10738_v14 = vld [vmem:[#allocation2 + $0x10] ss:$8 sps:$4 sm:$0xee]   ;;  %2513 = vmatmul.mubr.f32.vlgmr.msra.gmra.mrb[2].mxu1 %v10734_v12  ;;  %v2537_v23 = vrot.slane %v10740_v17, 5  ;;  %v2534_v27 = vsel %vm11725_vm12, %v8456_v18, %v2533_v19  ;;  %v2663_v21 = vld [vmem:[#allocation10 + $0x170] sm:$0xff]  ;;  %v2664_v6 = vld [vmem:[#allocation10 + $0x178] sm:$0xff] }
 0x7fa   :  { %9271 = vmatpush1.bf16.msra.mxu1 %v9270_v16  ;;  %v8457_v22 = vrot.slane %v10738_v14, 9  ;;  %v10744_v50 = vld [vmem:[#allocation2 + $0x10] ss:$8 sps:$4 sm:$0xcc]   ;;  %v9306_v16 = vpack.c.bf16 %v2662_v15, %v2661_v0  ;;  %v9309_v12 = vpack.c.bf16 %v2664_v6, %v2663_v21  ;;  %v2667_v19 = vld [vmem:[#allocation10 + $0x190] sm:$0xff]  ;;  %v2789_v0 = vld [vmem:[#allocation10 + $0x258] sm:$0xff] }
 0x7fb   :  { %9272 = vmatprep.subr.bf16.mxu1 %v11200_v1  ;;  %v10746_v51 = vld [vmem:[#allocation2 + $0x14] ss:$8 sps:$4 sm:$0x33]   ;;  %v10743_v52 = vld [vmem:[#allocation2 + $0x4] ss:$8 sps:$4 sm:$0x33]  }
 0x7fc   :  { %v2538_v28 = vsel %vm11725_vm12, %v8457_v22, %v2537_v23  ;;  %v8460_v53 = vrot.slane %v10744_v50, 10  ;;  %v2654_v54 = vrot.slane %v10746_v51, 6  ;;  %v2650_v59 = vrot.slane %v10743_v52, 6  ;;  %v2665_v14 = vld [vmem:[#allocation10 + $0x180] sm:$0xff]  ;;  %v2666_v17 = vld [vmem:[#allocation10 + $0x188] sm:$0xff] }
 0x7fd   :  { %v2561_v29 = vcombine.high %v2534_v27, %v2538_v28  ;;  %v2560_v8 = vcombine.low %v2534_v27, %v2538_v28  ;;  %v9312_v18 = vpack.c.bf16 %v2666_v17, %v2665_v14  ;;  %v2669_v23 = vld [vmem:[#allocation10 + $0x1a0] sm:$0xff]  ;;  %v2671_v27 = vld [vmem:[#allocation10 + $0x1b0] sm:$0xff]  ;;  %v2672_v28 = vld [vmem:[#allocation10 + $0x1b8] sm:$0xff] }
 0x7fe   :  { %9274 = vmatpush1.bf16.msra.mxu1 %v9273_v20  ;;  %v12020_v60 = vsel %vm11748_vm15, %v8460_v53, %v2654_v54  ;;  %v12025_v9 = vsel %vm11748_vm15, %v8459_v58, %v2650_v59  ;;  %v2668_v20 = vld [vmem:[#allocation10 + $0x198] sm:$0xff]  ;;  %v9318_v26 = vpack.c.bf16 %v2670_v25, %v2669_v23  ;;  %v10750_v33 = vld [vmem:[#allocation2 + $0x10] ss:$8 sps:$4 sm:$0x88]   ;;  %v2883_v25 = vld [vmem:[#allocation10 + $0x290] sm:$0xff] }
 0x7ff   :  { %8458 = vmatprep.mubr.msk.f32.mxu1 %vm538_vm5, %v2561_v29  ;;  %9275 = vmatprep.subr.bf16.mxu1 %v11200_v1  ;;  %v2678_v11 = vcombine.high %v12025_v9, %v12020_v60  ;;  %v9315_v22 = vpack.c.bf16 %v2668_v20, %v2667_v19  ;;  %v9321_v29 = vpack.c.bf16 %v2672_v28, %v2671_v27  ;;  %v10747_v40 = vld [vmem:[#allocation2] ss:$8 sps:$4 sm:$0x88]   ;;  %v10749_v41 = vld [vmem:[#allocation2 + $0x4] ss:$8 sps:$4 sm:$0x77]  }
 0x800   :  { %v8462_v45 = vrot.slane %v10747_v40, 11  ;;  %v2677_v50 = vcombine.low %v12025_v9, %v12020_v60  ;;  %v2778_v52 = vld [vmem:[#allocation10 + $0x200] sm:$0xff]  ;;  %v2779_v53 = vld [vmem:[#allocation10 + $0x208] sm:$0xff]  ;;  %v2793_v14 = vld [vmem:[#allocation10 + $0x278] sm:$0xff] }
 0x801   :  { %v9336_v54 = vpack.c.bf16 %v2779_v53, %v2778_v52  ;;  %v2782_v58 = vld [vmem:[#allocation10 + $0x220] sm:$0xff]  ;;  %v2783_v59 = vld [vmem:[#allocation10 + $0x228] sm:$0xff]  ;;  %v2891_v40 = vld [vmem:[#allocation10 + $0x2d0] sm:$0xff] }
 0x802   :  { %9277 = vmatpush1.bf16.msra.mxu1 %v9276_v31  ;;  %v2673_v31 = vld [vmem:[#allocation10 + $0x1c0] sm:$0xff]  ;;  %v9342_v60 = vpack.c.bf16 %v2783_v59, %v2782_v58  ;;  %v2791_v21 = vld [vmem:[#allocation10 + $0x268] sm:$0xff] }
 0x803   :  { %9278 = vmatprep.subr.bf16.mxu1 %v11200_v1  ;;  %v9324_v35 = vpack.c.bf16 %v2674_v32, %v2673_v31  ;;  %v2882_v19 = vld [vmem:[#allocation10 + $0x288] sm:$0xff]  ;;  %v2885_v28 = vld [vmem:[#allocation10 + $0x2a0] sm:$0xff]  ;;  %v2887_v32 = vld [vmem:[#allocation10 + $0x2b0] sm:$0xff] }
 0x804   :  { %v8452_v53 = vld [vmem:[%s12838_s26] ss:$0 sm:$0xff]  ;;  %v3008_v58 = vld [vmem:[#allocation12] sm:$0xff] }
 0x805   :  { %v3009_v59 = vld [vmem:[#allocation12 + $0x8] sm:$0xff] }
 0x806   :  { %9280 = vmatpush1.bf16.msra.mxu1 %v9279_v34  ;;  %v10752_v34 = vld [vmem:[#allocation2 + $0x14] ss:$8 sps:$4 sm:$0x77]  }
 0x807   :  { %9281 = vmatprep.subr.bf16.mxu1 %v11200_v1  ;;  %v2771_v36 = vrot.slane %v10752_v34, 7 }
 0x80a   :  { %9283 = vmatpush1.bf16.msra.mxu1 %v9282_v39  ;;  %v2676_v39 = vld [vmem:[#allocation10 + $0x1d8] sm:$0xff] }
 0x80b   :  { %9284 = vmatprep.subr.bf16.mxu1 %v11200_v1  ;;  %v9327_v43 = vpack.c.bf16 %v2676_v39, %v2675_v37  ;;  %v2890_v37 = vld [vmem:[#allocation10 + $0x2c8] sm:$0xff] }
 0x80e   :  { %9286 = vmatpush1.bf16.msra.mxu1 %v9285_v42  ;;  %v8463_v42 = vrot.slane %v10750_v33, 11  ;;  %v2888_v33 = vld [vmem:[#allocation10 + $0x2b8] sm:$0xff] }
 0x80f   :  { %9287 = vmatprep.subr.bf16.mxu1 %v11200_v1  ;;  %v9369_v34 = vpack.c.bf16 %v2888_v33, %v2887_v32  ;;  %v3024_v33 = vld [vmem:[#allocation12 + $0x80] sm:$0xff] }
 0x810   :  { %v12041_v46 = vsel %vm11777_vm1, %v8463_v42, %v2771_v36  ;;  %v2893_v36 = vld [vmem:[#allocation10 + $0x2e0] sm:$0xff] }
 0x812   :  { %9289 = vmatpush1.bf16.msra.mxu1 %v9288_v38  ;;  %v2774_v38 = vld [vmem:[#allocation10 + $0x1e0] sm:$0xff] }
 0x813   :  { %9290 = vmatprep.subr.bf16.mxu1 %v11200_v1  ;;  %v9330_v49 = vpack.c.bf16 %v2775_v44, %v2774_v38  ;;  %v2895_v44 = vld [vmem:[#allocation10 + $0x2f0] sm:$0xff] }
 0x816   :  { %9292 = vmatpush1.bf16.msra.mxu1 %v9291_v48  ;;  %v2767_v48 = vrot.slane %v10749_v41, 7  ;;  %v2892_v41 = vld [vmem:[#allocation10 + $0x2d8] sm:$0xff] }
 0x817   :  { %9293 = vmatprep.subr.bf16.mxu1 %v11200_v1  ;;  %v9375_v42 = vpack.c.bf16 %v2892_v41, %v2891_v40  ;;  %v3027_v40 = vld [vmem:[#allocation12 + $0x98] sm:$0xff] }
 0x818   :  { %v2768_v51 = vsel %vm11777_vm1, %v8462_v45, %v2767_v48  ;;  %v2896_v45 = vld [vmem:[#allocation10 + $0x2f8] sm:$0xff] }
 0x819   :  { %v2795_v4 = vcombine.high %v2768_v51, %v12041_v46  ;;  %v2794_v23 = vcombine.low %v2768_v51, %v12041_v46  ;;  %v9381_v48 = vpack.c.bf16 %v2896_v45, %v2895_v44  ;;  %v2897_v46 = vld [vmem:[#allocation10 + $0x300] sm:$0xff]  ;;  %v2899_v51 = vld [vmem:[#allocation10 + $0x310] sm:$0xff] }
 0x81a   :  { %9295 = vmatpush1.bf16.msra.mxu1 %v9294_v2  ;;  %v2776_v2 = vld [vmem:[#allocation10 + $0x1f0] sm:$0xff] }
 0x81b   :  { %9296 = vmatprep.subr.bf16.mxu1 %v11200_v1  ;;  %v9333_v5 = vpack.c.bf16 %v2777_v3, %v2776_v2  ;;  %v2900_v2 = vld [vmem:[#allocation10 + $0x318] sm:$0xff] }
 0x81c   :  { %v9387_v3 = vpack.c.bf16 %v2900_v2, %v2899_v51  ;;  %v3127_v51 = vld [vmem:[#allocation12 + $0xb0] sm:$0xff]  ;;  %v3128_v2 = vld [vmem:[#allocation12 + $0xb8] sm:$0xff] }
 0x81e   :  { %9298 = vmatpush1.bf16.msra.mxu1 %v9297_v55  ;;  %v2780_v55 = vld [vmem:[#allocation10 + $0x210] sm:$0xff] }
 0x81f   :  { %9299 = vmatprep.subr.bf16.mxu1 %v11200_v1  ;;  %v9339_v57 = vpack.c.bf16 %v2781_v56, %v2780_v55 }
 0x821   :  { %2630 = vmatmul.mubr.f32.vlgmr.msra.gmra.mrb[4].mxu1 %v2560_v8  ;;  %v2785_v8 = vld [vmem:[#allocation10 + $0x238] sm:$0xff] }
 0x822   :  { %9301 = vmatpush1.bf16.msra.mxu1 %v9300_v7  ;;  %8461 = vmatprep.mubr.msk.f32.mxu1 %vm538_vm5, %v2678_v11  ;;  %v2784_v7 = vld [vmem:[#allocation10 + $0x230] sm:$0xff]  ;;  %v9348_v11 = vpack.c.bf16 %v2787_v62, %v2786_v10  ;;  %v3012_v10 = vld [vmem:[#allocation12 + $0x20] sm:$0xff]  ;;  %v3013_v62 = vld [vmem:[#allocation12 + $0x28] sm:$0xff] }
 0x823   :  { %9302 = vmatprep.subr.bf16.mxu1 %v11200_v1  ;;  %v9345_v9 = vpack.c.bf16 %v2785_v8, %v2784_v7  ;;  %v9390_v7 = vpack.c.bf16 %v3009_v59, %v3008_v58  ;;  %v3011_v8 = vld [vmem:[#allocation12 + $0x18] sm:$0xff] }
 0x825   :  { %9391 = vmatpush1.bf16.msra.mxu0 %v9390_v7  ;;  %v3130_v7 = vld [vmem:[#allocation12 + $0xc8] sm:$0xff] }
 0x826   :  { %9304 = vmatpush1.bf16.msra.mxu1 %v9303_v13  ;;  %v2788_v13 = vld [vmem:[#allocation10 + $0x250] sm:$0xff]  ;;  %9392 = vmatprep.subr.bf16.mxu0 %v11200_v1 }
 0x827   :  { %9305 = vmatprep.subr.bf16.mxu1 %v11200_v1  ;;  %v9351_v15 = vpack.c.bf16 %v2789_v0, %v2788_v13  ;;  %v3014_v13 = vld [vmem:[#allocation12 + $0x30] sm:$0xff]  ;;  %v3015_v0 = vld [vmem:[#allocation12 + $0x38] sm:$0xff] }
 0x82a   :  { %9307 = vmatpush1.bf16.msra.mxu1 %v9306_v16  ;;  %v2790_v16 = vld [vmem:[#allocation10 + $0x260] sm:$0xff] }
 0x82b   :  { %9308 = vmatprep.subr.bf16.mxu1 %v11200_v1  ;;  %v9354_v6 = vpack.c.bf16 %v2791_v21, %v2790_v16  ;;  %v3016_v16 = vld [vmem:[#allocation12 + $0x40] sm:$0xff]  ;;  %v3017_v21 = vld [vmem:[#allocation12 + $0x48] sm:$0xff] }
 0x82e   :  { %9310 = vmatpush1.bf16.msra.mxu1 %v9309_v12  ;;  %v2792_v12 = vld [vmem:[#allocation10 + $0x270] sm:$0xff] }
 0x82f   :  { %9311 = vmatprep.subr.bf16.mxu1 %v11200_v1  ;;  %v9357_v17 = vpack.c.bf16 %v2793_v14, %v2792_v12  ;;  %v3018_v12 = vld [vmem:[#allocation12 + $0x50] sm:$0xff]  ;;  %v3019_v14 = vld [vmem:[#allocation12 + $0x58] sm:$0xff] }
 0x832   :  { %9313 = vmatpush1.bf16.msra.mxu1 %v9312_v18  ;;  %v2881_v18 = vld [vmem:[#allocation10 + $0x280] sm:$0xff] }
 0x833   :  { %9314 = vmatprep.subr.bf16.mxu1 %v11200_v1  ;;  %v9360_v20 = vpack.c.bf16 %v2882_v19, %v2881_v18  ;;  %v3020_v18 = vld [vmem:[#allocation12 + $0x60] sm:$0xff]  ;;  %v3021_v19 = vld [vmem:[#allocation12 + $0x68] sm:$0xff] }
 0x836   :  { %9316 = vmatpush1.bf16.msra.mxu1 %v9315_v22  ;;  %v10753_v22 = vld [vmem:[#allocation2 + $0xc] ss:$16 sps:$4 sm:$0xff]  }
 0x837   :  { %9317 = vmatprep.subr.bf16.mxu1 %v11200_v1 }
 0x83a   :  { %9319 = vmatpush1.bf16.msra.mxu1 %v9318_v26  ;;  %v2884_v26 = vld [vmem:[#allocation10 + $0x298] sm:$0xff] }
 0x83b   :  { %9320 = vmatprep.subr.bf16.mxu1 %v11200_v1  ;;  %v9363_v27 = vpack.c.bf16 %v2884_v26, %v2883_v25 }
 0x83e   :  { %9322 = vmatpush1.bf16.msra.mxu1 %v9321_v29  ;;  %v2886_v29 = vld [vmem:[#allocation10 + $0x2a8] sm:$0xff] }
 0x83f   :  { %9323 = vmatprep.subr.bf16.mxu1 %v11200_v1  ;;  %v9366_v31 = vpack.c.bf16 %v2886_v29, %v2885_v28  ;;  %v3022_v29 = vld [vmem:[#allocation12 + $0x70] sm:$0xff] }
 0x842   :  { %9325 = vmatpush1.bf16.msra.mxu1 %v9324_v35  ;;  %v2889_v35 = vld [vmem:[#allocation10 + $0x2c0] sm:$0xff] }
 0x843   :  { %9326 = vmatprep.subr.bf16.mxu1 %v11200_v1  ;;  %v9372_v39 = vpack.c.bf16 %v2890_v37, %v2889_v35  ;;  %v10755_v37 = vld [vmem:[#allocation2 + $0x8] ss:$16 sps:$4 sm:$0xff]  }
 0x844   :  { %8471 = vmatprep.mubr.msk.f32.mxu0 %vm538_vm5, %v10755_v37 }
 0x846   :  { %9328 = vmatpush1.bf16.msra.mxu1 %v9327_v43  ;;  %v2894_v43 = vld [vmem:[#allocation10 + $0x2e8] sm:$0xff] }
 0x847   :  { %9329 = vmatprep.subr.bf16.mxu1 %v11200_v1  ;;  %v9378_v38 = vpack.c.bf16 %v2894_v43, %v2893_v36 }
 0x849   :  { %2747 = vmatmul.mubr.f32.vlgmr.msra.gmra.mrb[6].mxu1 %v2677_v50 }
 0x84a   :  { %9331 = vmatpush1.bf16.msra.mxu1 %v9330_v49  ;;  %8464 = vmatprep.mubr.msk.f32.mxu1 %vm538_vm5, %v2795_v4  ;;  %v2898_v49 = vld [vmem:[#allocation10 + $0x308] sm:$0xff]  ;;  %v10754_v4 = vld [vmem:[#allocation2 + $0x4] ss:$16 sps:$4 sm:$0xff]  }
 0x84b   :  { %9332 = vmatprep.subr.bf16.mxu1 %v11200_v1  ;;  %v9384_v50 = vpack.c.bf16 %v2898_v49, %v2897_v46 }
 0x84e   :  { %9334 = vmatpush1.bf16.msra.mxu1 %v9333_v5 }
 0x84f   :  { %9335 = vmatprep.subr.bf16.mxu1 %v11200_v1 }
 0x852   :  { %9337 = vmatpush1.bf16.msra.mxu1 %v9336_v54 }
 0x853   :  { %9338 = vmatprep.subr.bf16.mxu1 %v11200_v1 }
 0x856   :  { %9340 = vmatpush1.bf16.msra.mxu1 %v9339_v57 }
 0x857   :  { %9341 = vmatprep.subr.bf16.mxu1 %v11200_v1 }
 0x85a   :  { %9343 = vmatpush1.bf16.msra.mxu1 %v9342_v60  ;;  %v3010_v60 = vld [vmem:[#allocation12 + $0x10] sm:$0xff] }
 0x85b   :  { %9344 = vmatprep.subr.bf16.mxu1 %v11200_v1 }
 0x85e   :  { %9346 = vmatpush1.bf16.msra.mxu1 %v9345_v9  ;;  %v9393_v9 = vpack.c.bf16 %v3011_v8, %v3010_v60  ;;  %v3129_v60 = vld [vmem:[#allocation12 + $0xc0] sm:$0xff] }
 0x85f   :  { %9347 = vmatprep.subr.bf16.mxu1 %v11200_v1 }
 0x860   :  { %9394 = vmatpush1.bf16.msra.mxu0 %v9393_v9 }
 0x861   :  { %9395 = vmatprep.subr.bf16.mxu0 %v11200_v1 }
 0x862   :  { %9349 = vmatpush1.bf16.msra.mxu1 %v9348_v11  ;;  %v9396_v11 = vpack.c.bf16 %v3013_v62, %v3012_v10  ;;  %v9426_v62 = vpack.c.bf16 %v3130_v7, %v3129_v60  ;;  %v3255_v60 = vld [vmem:[#allocation12 + $0x1a8] sm:$0xff] }
 0x863   :  { %9350 = vmatprep.subr.bf16.mxu1 %v11200_v1 }
 0x864   :  { %9397 = vmatpush1.bf16.msra.mxu0 %v9396_v11  ;;  %v3131_v11 = vld [vmem:[#allocation12 + $0xd0] sm:$0xff] }
 0x865   :  { %9398 = vmatprep.subr.bf16.mxu0 %v11200_v1 }
 0x866   :  { %9352 = vmatpush1.bf16.msra.mxu1 %v9351_v15  ;;  %v9399_v15 = vpack.c.bf16 %v3015_v0, %v3014_v13  ;;  %v3132_v13 = vld [vmem:[#allocation12 + $0xd8] sm:$0xff] }
 0x867   :  { %9353 = vmatprep.subr.bf16.mxu1 %v11200_v1  ;;  %v9429_v0 = vpack.c.bf16 %v3132_v13, %v3131_v11  ;;  %v3259_v11 = vld [vmem:[#allocation12 + $0x1c8] sm:$0xff] }
 0x868   :  { %9400 = vmatpush1.bf16.msra.mxu0 %v9399_v15  ;;  %v3133_v15 = vld [vmem:[#allocation12 + $0xe0] sm:$0xff] }
 0x869   :  { %9401 = vmatprep.subr.bf16.mxu0 %v11200_v1 }
 0x86a   :  { %9355 = vmatpush1.bf16.msra.mxu1 %v9354_v6  ;;  %v9402_v6 = vpack.c.bf16 %v3017_v21, %v3016_v16  ;;  %v3134_v16 = vld [vmem:[#allocation12 + $0xe8] sm:$0xff] }
 0x86b   :  { %9356 = vmatprep.subr.bf16.mxu1 %v11200_v1  ;;  %v9432_v21 = vpack.c.bf16 %v3134_v16, %v3133_v15  ;;  %v3260_v16 = vld [vmem:[#allocation12 + $0x1d0] sm:$0xff] }
 0x86c   :  { %9403 = vmatpush1.bf16.msra.mxu0 %v9402_v6  ;;  %v3135_v6 = vld [vmem:[#allocation12 + $0xf0] sm:$0xff] }
 0x86d   :  { %9404 = vmatprep.subr.bf16.mxu0 %v11200_v1 }
 0x86e   :  { %9358 = vmatpush1.bf16.msra.mxu1 %v9357_v17  ;;  %v9405_v17 = vpack.c.bf16 %v3019_v14, %v3018_v12  ;;  %v3136_v12 = vld [vmem:[#allocation12 + $0xf8] sm:$0xff] }
 0x86f   :  { %9359 = vmatprep.subr.bf16.mxu1 %v11200_v1  ;;  %v9435_v14 = vpack.c.bf16 %v3136_v12, %v3135_v6 }
 0x870   :  { %9406 = vmatpush1.bf16.msra.mxu0 %v9405_v17  ;;  %v3137_v17 = vld [vmem:[#allocation12 + $0x100] sm:$0xff] }
 0x871   :  { %2864 = vmatmul.mubr.f32.vlgmr.msra.gmra.mrb[8].mxu1 %v2794_v23  ;;  %9407 = vmatprep.subr.bf16.mxu0 %v11200_v1 }
 0x872   :  { %9361 = vmatpush1.bf16.msra.mxu1 %v9360_v20  ;;  %8467 = vmatprep.mubr.msk.f32.mxu1 %vm538_vm5, %v10753_v22  ;;  %v9408_v20 = vpack.c.bf16 %v3021_v19, %v3020_v18  ;;  %v3138_v18 = vld [vmem:[#allocation12 + $0x108] sm:$0xff] }
 0x873   :  { %9362 = vmatprep.subr.bf16.mxu1 %v11200_v1  ;;  %v9438_v19 = vpack.c.bf16 %v3138_v18, %v3137_v17 }
 0x874   :  { %9409 = vmatpush1.bf16.msra.mxu0 %v9408_v20  ;;  %v3139_v20 = vld [vmem:[#allocation12 + $0x110] sm:$0xff] }
 0x875   :  { %9410 = vmatprep.subr.bf16.mxu0 %v11200_v1 }
 0x876   :  { %9364 = vmatpush1.bf16.msra.mxu1 %v9363_v27 }
 0x877   :  { %9365 = vmatprep.subr.bf16.mxu1 %v11200_v1 }
 0x87a   :  { %9367 = vmatpush1.bf16.msra.mxu1 %v9366_v31  ;;  %v3023_v31 = vld [vmem:[#allocation12 + $0x78] sm:$0xff] }
 0x87b   :  { %9368 = vmatprep.subr.bf16.mxu1 %v11200_v1  ;;  %v9411_v32 = vpack.c.bf16 %v3023_v31, %v3022_v29  ;;  %v3143_v31 = vld [vmem:[#allocation12 + $0x130] sm:$0xff] }
 0x87d   :  { %9412 = vmatpush1.bf16.msra.mxu0 %v9411_v32  ;;  %v3144_v32 = vld [vmem:[#allocation12 + $0x138] sm:$0xff] }
 0x87e   :  { %9370 = vmatpush1.bf16.msra.mxu1 %v9369_v34  ;;  %v3025_v34 = vld [vmem:[#allocation12 + $0x88] sm:$0xff]  ;;  %9413 = vmatprep.subr.bf16.mxu0 %v11200_v1 }
 0x87f   :  { %9371 = vmatprep.subr.bf16.mxu1 %v11200_v1  ;;  %v9414_v35 = vpack.c.bf16 %v3025_v34, %v3024_v33 }
 0x881   :  { %9415 = vmatpush1.bf16.msra.mxu0 %v9414_v35 }
 0x882   :  { %9373 = vmatpush1.bf16.msra.mxu1 %v9372_v39  ;;  %v3026_v39 = vld [vmem:[#allocation12 + $0x90] sm:$0xff]  ;;  %9416 = vmatprep.subr.bf16.mxu0 %v11200_v1 }
 0x883   :  { %9374 = vmatprep.subr.bf16.mxu1 %v11200_v1  ;;  %v9417_v43 = vpack.c.bf16 %v3027_v40, %v3026_v39  ;;  %v9447_v39 = vpack.c.bf16 %v3144_v32, %v3143_v31  ;;  %v3242_v40 = vld [vmem:[#allocation12 + $0x140] sm:$0xff]  ;;  %v3362_v31 = vld [vmem:[#allocation12 + $0x1f8] sm:$0xff] }
 0x885   :  { %9418 = vmatpush1.bf16.msra.mxu0 %v9417_v43 }
 0x886   :  { %9376 = vmatpush1.bf16.msra.mxu1 %v9375_v42  ;;  %9419 = vmatprep.subr.bf16.mxu0 %v11200_v1 }
 0x887   :  { %9377 = vmatprep.subr.bf16.mxu1 %v11200_v1 }
 0x88a   :  { %9379 = vmatpush1.bf16.msra.mxu1 %v9378_v38 }
 0x88b   :  { %9380 = vmatprep.subr.bf16.mxu1 %v11200_v1 }
 0x88e   :  { %9382 = vmatpush1.bf16.msra.mxu1 %v9381_v48 }
 0x88f   :  { %9383 = vmatprep.subr.bf16.mxu1 %v11200_v1 }
 0x892   :  { %9385 = vmatpush1.bf16.msra.mxu1 %v9384_v50  ;;  %v3126_v50 = vld [vmem:[#allocation12 + $0xa8] sm:$0xff] }
 0x893   :  { %9386 = vmatprep.subr.bf16.mxu1 %v11200_v1 }
 0x896   :  { %9388 = vmatpush1.bf16.msra.mxu1 %v9387_v3 }
 0x897   :  { %9539 = vmatprep.subr.bf16.mxu1 %v11200_v1 }
 0x899   :  { %2971 = vmatmul.mubr.f32.vlgmr.msra.gmra.mrb[10].mxu1 %v10754_v4 }
 0x8cc   :  { %v2514_v5 = vpop.f32.mrb[2].mxu1 }
 0x8cd   :  { %v2516_v52 = vpop.f32.mrb[3].mxu1  ;;  %v2518_v54 = vadd.f32 %v8452_v53, %v2514_v5 }
 0x8f4   :  { %v2631_v55 = vpop.f32.mrb[4].mxu1 }
 0x8f5   :  { %v2635_v56 = vadd.f32 %v2631_v55, %v2518_v54  ;;  %v2633_v57 = vpop.f32.mrb[5].mxu1 }
 0x8f6   :  { %v9423_v57 = vpack.c.bf16 %v3128_v2, %v3127_v51  ;;  %v3246_v51 = vld [vmem:[#allocation12 + $0x160] sm:$0xff]  ;;  %v3247_v2 = vld [vmem:[#allocation12 + $0x168] sm:$0xff] }
 0x91c   :  { %v2748_v22 = vpop.f32.mrb[6].mxu1 }
 0x91d   :  { %v2752_v23 = vadd.f32 %v2748_v22, %v2635_v56  ;;  %v2750_v25 = vpop.f32.mrb[7].mxu1  ;;  %v3140_v22 = vld [vmem:[#allocation12 + $0x118] sm:$0xff] }
 0x91e   :  { %v3141_v25 = vld [vmem:[#allocation12 + $0x120] sm:$0xff] }
 0x944   :  { %v2865_v26 = vpop.f32.mrb[8].mxu1 }
 0x945   :  { %v2869_v27 = vadd.f32 %v2865_v26, %v2752_v23  ;;  %v2867_v28 = vpop.f32.mrb[9].mxu1  ;;  %v9441_v23 = vpack.c.bf16 %v3140_v22, %v3139_v20  ;;  %v3142_v26 = vld [vmem:[#allocation12 + $0x128] sm:$0xff] }
 0x946   :  { %v9444_v29 = vpack.c.bf16 %v3142_v26, %v3141_v25  ;;  %v3360_v20 = vld [vmem:[#allocation12 + $0x1e8] sm:$0xff] }
 0x96c   :  { %v2972_v41 = vpop.f32.mrb[10].mxu1 }
 0x96d   :  { %v2976_v42 = vadd.f32 %v2972_v41, %v2869_v27  ;;  %v2974_v36 = vpop.f32.mrb[11].mxu1  ;;  %v3243_v41 = vld [vmem:[#allocation12 + $0x148] sm:$0xff] }
 0x96f   :  { %v12084_v38 = vadd.f32 %v2976_v42, %v11826_v63  ;;  %v3125_v63 = vld [vmem:[#allocation12 + $0xa0] sm:$0xff] }
 0x970   :  { %v9420_v3 = vpack.c.bf16 %v3126_v50, %v3125_v63 }
 0x971   :  { %v2980_v44 = vrot.slane %v12084_v38, 6  ;;  %v2979_v45 = vcombine.high %v12084_v38, %v12084_v38 }
 0x973   :  { %2982 = vrot.lane.b32.xlu0 %v2980_v44, %s11203_s1  ;;  %v2981_v48 = vrot.slane %v2979_v45, 6  ;;  %v9450_v44 = vpack.c.bf16 %v3243_v41, %v3242_v40  ;;  %v3366_v40 = vld [vmem:[#allocation12 + $0x218] sm:$0xff] }
 0x975   :  { %2984 = vrot.lane.b32.xlu1 %v2981_v48, %s11203_s1 }
 0x9e5   :  { %v2983_v46 = vpop.permute.xlu0 %2982 }
 0x9e6   :  { %2988 = vst.msk [vmem:[#allocation2] sm:$0x3c] %vm1232_vm2, %v2983_v46  ;;  %v3244_v46 = vld [vmem:[#allocation12 + $0x150] sm:$0xff] }
 0x9e7   :  { %v2985_v49 = vpop.permute.xlu1 %2984 }
 0x9e8   :  { %2989 = vst.msk [vmem:[#allocation2 + $0x10] sm:$0x3c] %vm1232_vm2, %v2985_v49  ;;  %v3245_v49 = vld [vmem:[#allocation12 + $0x158] sm:$0xff] }
 0x9e9   :  { %v9453_v50 = vpack.c.bf16 %v3245_v49, %v3244_v46  ;;  %v3371_v46 = vld [vmem:[#allocation12 + $0x240] sm:$0xff]  ;;  %v3372_v49 = vld [vmem:[#allocation12 + $0x248] sm:$0xff] }
 0x9ed   :  { %v10757_v4 = vld [vmem:[#allocation2] ss:$8 sps:$4 sm:$0xee]   ;;  %v10759_v5 = vld [vmem:[#allocation2 + $0x4] ss:$8 sps:$4 sm:$0x11]  }
 0x9ee   :  { %v8472_v55 = vrot.slane %v10757_v4, 9  ;;  %v3118_v56 = vrot.slane %v10759_v5, 5  ;;  %v10763_v33 = vld [vmem:[#allocation2] ss:$8 sps:$4 sm:$0xcc]  }
 0x9ef   :  { %v10756_v52 = vld [vmem:[#allocation2] ss:$16 sps:$4 sm:$0xff]   ;;  %v10762_v54 = vld [vmem:[#allocation2 + $0x14] ss:$8 sps:$4 sm:$0x11]   ;;  %v8475_v42 = vrot.slane %v10763_v33, 10 }
 0x9f0   :  { %v10760_v53 = vld [vmem:[#allocation2 + $0x10] ss:$8 sps:$4 sm:$0xee]   ;;  %3098 = vmatmul.mubr.f32.vlgmr.msra.gmra.mrb[4].mxu0 %v10756_v52  ;;  %v3122_v59 = vrot.slane %v10762_v54, 5  ;;  %v3119_v8 = vsel %vm11725_vm12, %v8472_v55, %v3118_v56  ;;  %v3248_v4 = vld [vmem:[#allocation12 + $0x170] sm:$0xff]  ;;  %v3249_v5 = vld [vmem:[#allocation12 + $0x178] sm:$0xff] }
 0x9f1   :  { %9421 = vmatpush1.bf16.msra.mxu0 %v9420_v3  ;;  %v8473_v58 = vrot.slane %v10760_v53, 9  ;;  %v10766_v27 = vld [vmem:[#allocation2 + $0x10] ss:$8 sps:$4 sm:$0xcc]   ;;  %v9456_v3 = vpack.c.bf16 %v3247_v2, %v3246_v51  ;;  %v9459_v52 = vpack.c.bf16 %v3249_v5, %v3248_v4  ;;  %v3252_v56 = vld [vmem:[#allocation12 + $0x190] sm:$0xff]  ;;  %v3374_v51 = vld [vmem:[#allocation12 + $0x258] sm:$0xff] }
 0x9f2   :  { %9422 = vmatprep.subr.bf16.mxu0 %v11200_v1  ;;  %v10768_v28 = vld [vmem:[#allocation2 + $0x14] ss:$8 sps:$4 sm:$0x33]   ;;  %v10765_v34 = vld [vmem:[#allocation2 + $0x4] ss:$8 sps:$4 sm:$0x33]  }
 0x9f3   :  { %v3123_v9 = vsel %vm11725_vm12, %v8473_v58, %v3122_v59  ;;  %v8476_v35 = vrot.slane %v10766_v27, 10  ;;  %v3239_v37 = vrot.slane %v10768_v28, 6  ;;  %v3235_v36 = vrot.slane %v10765_v34, 6  ;;  %v3250_v53 = vld [vmem:[#allocation12 + $0x180] sm:$0xff]  ;;  %v3251_v54 = vld [vmem:[#allocation12 + $0x188] sm:$0xff] }
 0x9f4   :  { %v3146_v10 = vcombine.high %v3119_v8, %v3123_v9  ;;  %v3145_v45 = vcombine.low %v3119_v8, %v3123_v9  ;;  %v9462_v55 = vpack.c.bf16 %v3251_v54, %v3250_v53  ;;  %v3254_v59 = vld [vmem:[#allocation12 + $0x1a0] sm:$0xff]  ;;  %v3256_v8 = vld [vmem:[#allocation12 + $0x1b0] sm:$0xff]  ;;  %v3257_v9 = vld [vmem:[#allocation12 + $0x1b8] sm:$0xff] }
 0x9f5   :  { %9424 = vmatpush1.bf16.msra.mxu0 %v9423_v57  ;;  %v12110_v43 = vsel %vm11748_vm15, %v8476_v35, %v3239_v37  ;;  %v12115_v48 = vsel %vm11748_vm15, %v8475_v42, %v3235_v36  ;;  %v3253_v57 = vld [vmem:[#allocation12 + $0x198] sm:$0xff]  ;;  %v9468_v7 = vpack.c.bf16 %v3255_v60, %v3254_v59  ;;  %v10772_v13 = vld [vmem:[#allocation2 + $0x10] ss:$8 sps:$4 sm:$0x88]   ;;  %v3468_v60 = vld [vmem:[#allocation12 + $0x290] sm:$0xff] }
 0x9f6   :  { %8474 = vmatprep.mubr.msk.f32.mxu0 %vm538_vm5, %v3146_v10  ;;  %9425 = vmatprep.subr.bf16.mxu0 %v11200_v1  ;;  %v3263_v63 = vcombine.high %v12115_v48, %v12110_v43  ;;  %v9465_v58 = vpack.c.bf16 %v3253_v57, %v3252_v56  ;;  %v9471_v10 = vpack.c.bf16 %v3257_v9, %v3256_v8  ;;  %v10769_v6 = vld [vmem:[#allocation2] ss:$8 sps:$4 sm:$0x88]   ;;  %v10771_v12 = vld [vmem:[#allocation2 + $0x4] ss:$8 sps:$4 sm:$0x77]  }
 0x9f7   :  { %v8478_v22 = vrot.slane %v10769_v6, 11  ;;  %v3262_v27 = vcombine.low %v12115_v48, %v12110_v43  ;;  %v3363_v34 = vld [vmem:[#allocation12 + $0x200] sm:$0xff]  ;;  %v3364_v35 = vld [vmem:[#allocation12 + $0x208] sm:$0xff]  ;;  %v3378_v53 = vld [vmem:[#allocation12 + $0x278] sm:$0xff] }
 0x9f8   :  { %v9486_v37 = vpack.c.bf16 %v3364_v35, %v3363_v34  ;;  %v3367_v42 = vld [vmem:[#allocation12 + $0x220] sm:$0xff]  ;;  %v3368_v36 = vld [vmem:[#allocation12 + $0x228] sm:$0xff]  ;;  %v3476_v6 = vld [vmem:[#allocation12 + $0x2d0] sm:$0xff] }
 0x9f9   :  { %9427 = vmatpush1.bf16.msra.mxu0 %v9426_v62  ;;  %v3258_v62 = vld [vmem:[#allocation12 + $0x1c0] sm:$0xff]  ;;  %v9492_v43 = vpack.c.bf16 %v3368_v36, %v3367_v42  ;;  %v3376_v4 = vld [vmem:[#allocation12 + $0x268] sm:$0xff]  ;;  %v3595_v35 = vld [vmem:[#allocation13 + $0x10] sm:$0xff] }
 0x9fa   :  { %9428 = vmatprep.subr.bf16.mxu0 %v11200_v1  ;;  %v9474_v15 = vpack.c.bf16 %v3259_v11, %v3258_v62  ;;  %v3467_v56 = vld [vmem:[#allocation12 + $0x288] sm:$0xff]  ;;  %v3470_v9 = vld [vmem:[#allocation12 + $0x2a0] sm:$0xff]  ;;  %v3472_v11 = vld [vmem:[#allocation12 + $0x2b0] sm:$0xff] }
 0x9fb   :  { %v3594_v34 = vld [vmem:[#allocation13 + $0x8] sm:$0xff] }
 0x9fc   :  { %v3598_v42 = vld [vmem:[#allocation13 + $0x28] sm:$0xff] }
 0x9fd   :  { %9430 = vmatpush1.bf16.msra.mxu0 %v9429_v0  ;;  %v10774_v0 = vld [vmem:[#allocation2 + $0x14] ss:$8 sps:$4 sm:$0x77]  }
 0x9fe   :  { %9431 = vmatprep.subr.bf16.mxu0 %v11200_v1  ;;  %v3356_v17 = vrot.slane %v10774_v0, 7 }
 0xa01   :  { %9433 = vmatpush1.bf16.msra.mxu0 %v9432_v21  ;;  %v3261_v21 = vld [vmem:[#allocation12 + $0x1d8] sm:$0xff] }
 0xa02   :  { %9434 = vmatprep.subr.bf16.mxu0 %v11200_v1  ;;  %v9477_v18 = vpack.c.bf16 %v3261_v21, %v3260_v16  ;;  %v3475_v16 = vld [vmem:[#allocation12 + $0x2c8] sm:$0xff] }
 0xa05   :  { %9436 = vmatpush1.bf16.msra.mxu0 %v9435_v14  ;;  %v8479_v14 = vrot.slane %v10772_v13, 11  ;;  %v3473_v13 = vld [vmem:[#allocation12 + $0x2b8] sm:$0xff] }
 0xa06   :  { %9437 = vmatprep.subr.bf16.mxu0 %v11200_v1  ;;  %v9519_v0 = vpack.c.bf16 %v3473_v13, %v3472_v11 }
 0xa07   :  { %v12131_v25 = vsel %vm11777_vm1, %v8479_v14, %v3356_v17  ;;  %v3478_v17 = vld [vmem:[#allocation12 + $0x2e0] sm:$0xff] }
 0xa09   :  { %9439 = vmatpush1.bf16.msra.mxu0 %v9438_v19  ;;  %v3359_v19 = vld [vmem:[#allocation12 + $0x1e0] sm:$0xff] }
 0xa0a   :  { %9440 = vmatprep.subr.bf16.mxu0 %v11200_v1  ;;  %v9480_v26 = vpack.c.bf16 %v3360_v20, %v3359_v19  ;;  %v3480_v20 = vld [vmem:[#allocation12 + $0x2f0] sm:$0xff] }
 0xa0d   :  { %9442 = vmatpush1.bf16.msra.mxu0 %v9441_v23  ;;  %v3352_v23 = vrot.slane %v10771_v12, 7  ;;  %v3477_v12 = vld [vmem:[#allocation12 + $0x2d8] sm:$0xff] }
 0xa0e   :  { %9443 = vmatprep.subr.bf16.mxu0 %v11200_v1  ;;  %v9525_v14 = vpack.c.bf16 %v3477_v12, %v3476_v6  ;;  %v3711_v6 = vld [vmem:[#allocation13 + $0xa8] sm:$0xff]  ;;  %v3712_v12 = vld [vmem:[#allocation13 + $0xb0] sm:$0xff] }
 0xa0f   :  { %v3353_v28 = vsel %vm11777_vm1, %v8478_v22, %v3352_v23  ;;  %v3481_v22 = vld [vmem:[#allocation12 + $0x2f8] sm:$0xff] }
 0xa10   :  { %v3380_v32 = vcombine.high %v3353_v28, %v12131_v25  ;;  %v3379_v59 = vcombine.low %v3353_v28, %v12131_v25  ;;  %v9531_v23 = vpack.c.bf16 %v3481_v22, %v3480_v20  ;;  %v3482_v25 = vld [vmem:[#allocation12 + $0x300] sm:$0xff]  ;;  %v3484_v28 = vld [vmem:[#allocation12 + $0x310] sm:$0xff] }
 0xa11   :  { %9445 = vmatpush1.bf16.msra.mxu0 %v9444_v29  ;;  %v3361_v29 = vld [vmem:[#allocation12 + $0x1f0] sm:$0xff] }
 0xa12   :  { %9446 = vmatprep.subr.bf16.mxu0 %v11200_v1  ;;  %v9483_v33 = vpack.c.bf16 %v3362_v31, %v3361_v29  ;;  %v3485_v29 = vld [vmem:[#allocation12 + $0x318] sm:$0xff] }
 0xa13   :  { %v9537_v31 = vpack.c.bf16 %v3485_v29, %v3484_v28 }
 0xa15   :  { %9448 = vmatpush1.bf16.msra.mxu0 %v9447_v39  ;;  %v3365_v39 = vld [vmem:[#allocation12 + $0x210] sm:$0xff] }
 0xa16   :  { %9449 = vmatprep.subr.bf16.mxu0 %v11200_v1  ;;  %v9489_v41 = vpack.c.bf16 %v3366_v40, %v3365_v39  ;;  %v3596_v39 = vld [vmem:[#allocation13 + $0x18] sm:$0xff] }
 0xa17   :  { %v9543_v40 = vpack.c.bf16 %v3596_v39, %v3595_v35  ;;  %v3716_v39 = vld [vmem:[#allocation13 + $0xd0] sm:$0xff] }
 0xa18   :  { %3215 = vmatmul.mubr.f32.vlgmr.msra.gmra.mrb[4].mxu0 %v3145_v45  ;;  %v3370_v45 = vld [vmem:[#allocation12 + $0x238] sm:$0xff] }
 0xa19   :  { %9451 = vmatpush1.bf16.msra.mxu0 %v9450_v44  ;;  %8477 = vmatprep.mubr.msk.f32.mxu0 %vm538_vm5, %v3263_v63  ;;  %v3369_v44 = vld [vmem:[#allocation12 + $0x230] sm:$0xff]  ;;  %v9498_v63 = vpack.c.bf16 %v3372_v49, %v3371_v46  ;;  %v3602_v46 = vld [vmem:[#allocation13 + $0x48] sm:$0xff] }
 0xa1a   :  { %9452 = vmatprep.subr.bf16.mxu0 %v11200_v1  ;;  %v9495_v48 = vpack.c.bf16 %v3370_v45, %v3369_v44  ;;  %v3600_v44 = vld [vmem:[#allocation13 + $0x38] sm:$0xff] }
 0xa1d   :  { %9454 = vmatpush1.bf16.msra.mxu0 %v9453_v50  ;;  %v3373_v50 = vld [vmem:[#allocation12 + $0x250] sm:$0xff] }
 0xa1e   :  { %9455 = vmatprep.subr.bf16.mxu0 %v11200_v1  ;;  %v9501_v2 = vpack.c.bf16 %v3374_v51, %v3373_v50  ;;  %v3604_v50 = vld [vmem:[#allocation13 + $0x58] sm:$0xff] }
 0xa21   :  { %9457 = vmatpush1.bf16.msra.mxu0 %v9456_v3  ;;  %v3375_v3 = vld [vmem:[#allocation12 + $0x260] sm:$0xff] }
 0xa22   :  { %9458 = vmatprep.subr.bf16.mxu0 %v11200_v1  ;;  %v9504_v5 = vpack.c.bf16 %v3376_v4, %v3375_v3  ;;  %v3606_v3 = vld [vmem:[#allocation13 + $0x68] sm:$0xff] }
 0xa25   :  { %9460 = vmatpush1.bf16.msra.mxu0 %v9459_v52  ;;  %v3377_v52 = vld [vmem:[#allocation12 + $0x270] sm:$0xff] }
 0xa26   :  { %9461 = vmatprep.subr.bf16.mxu0 %v11200_v1  ;;  %v9507_v54 = vpack.c.bf16 %v3378_v53, %v3377_v52  ;;  %v3608_v52 = vld [vmem:[#allocation13 + $0x78] sm:$0xff] }
 0xa29   :  { %9463 = vmatpush1.bf16.msra.mxu0 %v9462_v55  ;;  %v3466_v55 = vld [vmem:[#allocation12 + $0x280] sm:$0xff] }
 0xa2a   :  { %9464 = vmatprep.subr.bf16.mxu0 %v11200_v1  ;;  %v9510_v57 = vpack.c.bf16 %v3467_v56, %v3466_v55  ;;  %v3610_v55 = vld [vmem:[#allocation13 + $0x88] sm:$0xff] }
 0xa2d   :  { %9466 = vmatpush1.bf16.msra.mxu0 %v9465_v58  ;;  %v10775_v58 = vld [vmem:[#allocation2 + $0xc] ss:$16 sps:$4 sm:$0xff]  }
 0xa2e   :  { %9467 = vmatprep.subr.bf16.mxu0 %v11200_v1 }
 0xa31   :  { %9469 = vmatpush1.bf16.msra.mxu0 %v9468_v7  ;;  %v3469_v7 = vld [vmem:[#allocation12 + $0x298] sm:$0xff] }
 0xa32   :  { %9470 = vmatprep.subr.bf16.mxu0 %v11200_v1  ;;  %v9513_v8 = vpack.c.bf16 %v3469_v7, %v3468_v60  ;;  %v3612_v60 = vld [vmem:[#allocation13 + $0x98] sm:$0xff] }
 0xa35   :  { %9472 = vmatpush1.bf16.msra.mxu0 %v9471_v10  ;;  %v3471_v10 = vld [vmem:[#allocation12 + $0x2a8] sm:$0xff] }
 0xa36   :  { %9473 = vmatprep.subr.bf16.mxu0 %v11200_v1  ;;  %v9516_v62 = vpack.c.bf16 %v3471_v10, %v3470_v9 }
 0xa39   :  { %9475 = vmatpush1.bf16.msra.mxu0 %v9474_v15  ;;  %v3474_v15 = vld [vmem:[#allocation12 + $0x2c0] sm:$0xff] }
 0xa3a   :  { %9476 = vmatprep.subr.bf16.mxu0 %v11200_v1  ;;  %v9522_v21 = vpack.c.bf16 %v3475_v16, %v3474_v15 }
 0xa3d   :  { %9478 = vmatpush1.bf16.msra.mxu0 %v9477_v18  ;;  %v3479_v18 = vld [vmem:[#allocation12 + $0x2e8] sm:$0xff] }
 0xa3e   :  { %9479 = vmatprep.subr.bf16.mxu0 %v11200_v1  ;;  %v9528_v19 = vpack.c.bf16 %v3479_v18, %v3478_v17 }
 0xa40   :  { %3332 = vmatmul.mubr.f32.vlgmr.msra.gmra.mrb[4].mxu0 %v3262_v27 }
 0xa41   :  { %9481 = vmatpush1.bf16.msra.mxu0 %v9480_v26  ;;  %8480 = vmatprep.mubr.msk.f32.mxu0 %vm538_vm5, %v3380_v32  ;;  %v3483_v26 = vld [vmem:[#allocation12 + $0x308] sm:$0xff]  ;;  %v10776_v32 = vld [vmem:[#allocation2 + $0x4] ss:$16 sps:$4 sm:$0xff]  }
 0xa42   :  { %9482 = vmatprep.subr.bf16.mxu0 %v11200_v1  ;;  %v9534_v27 = vpack.c.bf16 %v3483_v26, %v3482_v25 }
 0xa45   :  { %9484 = vmatpush1.bf16.msra.mxu0 %v9483_v33  ;;  %v3593_v33 = vld [vmem:[#allocation13] sm:$0xff] }
 0xa46   :  { %9485 = vmatprep.subr.bf16.mxu0 %v11200_v1 }
 0xa49   :  { %9487 = vmatpush1.bf16.msra.mxu0 %v9486_v37  ;;  %v9540_v37 = vpack.c.bf16 %v3594_v34, %v3593_v33 }
 0xa4a   :  { %9488 = vmatprep.subr.bf16.mxu0 %v11200_v1 }
 0xa4b   :  { %9541 = vmatpush1.bf16.msra.mxu1 %v9540_v37 }
 0xa4c   :  { %9542 = vmatprep.subr.bf16.mxu1 %v11200_v1 }
 0xa4d   :  { %9490 = vmatpush1.bf16.msra.mxu0 %v9489_v41  ;;  %v3597_v41 = vld [vmem:[#allocation13 + $0x20] sm:$0xff] }
 0xa4e   :  { %9491 = vmatprep.subr.bf16.mxu0 %v11200_v1  ;;  %v9546_v36 = vpack.c.bf16 %v3598_v42, %v3597_v41  ;;  %v3718_v42 = vld [vmem:[#allocation13 + $0xe0] sm:$0xff] }
 0xa4f   :  { %9544 = vmatpush1.bf16.msra.mxu1 %v9543_v40  ;;  %v3717_v40 = vld [vmem:[#allocation13 + $0xd8] sm:$0xff] }
 0xa50   :  { %9545 = vmatprep.subr.bf16.mxu1 %v11200_v1  ;;  %v9579_v41 = vpack.c.bf16 %v3717_v40, %v3716_v39  ;;  %v3844_v39 = vld [vmem:[#allocation13 + $0x1c8] sm:$0xff] }
 0xa51   :  { %9493 = vmatpush1.bf16.msra.mxu0 %v9492_v43  ;;  %v3599_v43 = vld [vmem:[#allocation13 + $0x30] sm:$0xff] }
 0xa52   :  { %9494 = vmatprep.subr.bf16.mxu0 %v11200_v1  ;;  %v9549_v45 = vpack.c.bf16 %v3600_v44, %v3599_v43  ;;  %v3720_v44 = vld [vmem:[#allocation13 + $0xf0] sm:$0xff] }
 0xa53   :  { %9547 = vmatpush1.bf16.msra.mxu1 %v9546_v36  ;;  %v3719_v36 = vld [vmem:[#allocation13 + $0xe8] sm:$0xff] }
 0xa54   :  { %9548 = vmatprep.subr.bf16.mxu1 %v11200_v1  ;;  %v9582_v43 = vpack.c.bf16 %v3719_v36, %v3718_v42  ;;  %v3845_v36 = vld [vmem:[#allocation13 + $0x1d0] sm:$0xff] }
 0xa55   :  { %9496 = vmatpush1.bf16.msra.mxu0 %v9495_v48  ;;  %v3601_v48 = vld [vmem:[#allocation13 + $0x40] sm:$0xff] }
 0xa56   :  { %9497 = vmatprep.subr.bf16.mxu0 %v11200_v1  ;;  %v9552_v49 = vpack.c.bf16 %v3602_v46, %v3601_v48  ;;  %v3722_v46 = vld [vmem:[#allocation13 + $0x100] sm:$0xff] }
 0xa57   :  { %9550 = vmatpush1.bf16.msra.mxu1 %v9549_v45  ;;  %v3721_v45 = vld [vmem:[#allocation13 + $0xf8] sm:$0xff] }
 0xa58   :  { %9551 = vmatprep.subr.bf16.mxu1 %v11200_v1  ;;  %v9585_v48 = vpack.c.bf16 %v3721_v45, %v3720_v44 }
 0xa59   :  { %9499 = vmatpush1.bf16.msra.mxu0 %v9498_v63  ;;  %v3603_v63 = vld [vmem:[#allocation13 + $0x50] sm:$0xff] }
 0xa5a   :  { %9500 = vmatprep.subr.bf16.mxu0 %v11200_v1  ;;  %v9555_v51 = vpack.c.bf16 %v3604_v50, %v3603_v63  ;;  %v3724_v50 = vld [vmem:[#allocation13 + $0x110] sm:$0xff] }
 0xa5b   :  { %9553 = vmatpush1.bf16.msra.mxu1 %v9552_v49  ;;  %v3723_v49 = vld [vmem:[#allocation13 + $0x108] sm:$0xff] }
 0xa5c   :  { %9554 = vmatprep.subr.bf16.mxu1 %v11200_v1  ;;  %v9588_v63 = vpack.c.bf16 %v3723_v49, %v3722_v46 }
 0xa5d   :  { %9502 = vmatpush1.bf16.msra.mxu0 %v9501_v2  ;;  %v3605_v2 = vld [vmem:[#allocation13 + $0x60] sm:$0xff] }
 0xa5e   :  { %9503 = vmatprep.subr.bf16.mxu0 %v11200_v1  ;;  %v9558_v4 = vpack.c.bf16 %v3606_v3, %v3605_v2  ;;  %v3726_v3 = vld [vmem:[#allocation13 + $0x120] sm:$0xff] }
 0xa5f   :  { %9556 = vmatpush1.bf16.msra.mxu1 %v9555_v51  ;;  %v3725_v51 = vld [vmem:[#allocation13 + $0x118] sm:$0xff] }
 0xa60   :  { %9557 = vmatprep.subr.bf16.mxu1 %v11200_v1  ;;  %v9591_v2 = vpack.c.bf16 %v3725_v51, %v3724_v50  ;;  %v3945_v50 = vld [vmem:[#allocation13 + $0x1e8] sm:$0xff] }
 0xa61   :  { %9505 = vmatpush1.bf16.msra.mxu0 %v9504_v5  ;;  %v3607_v5 = vld [vmem:[#allocation13 + $0x70] sm:$0xff] }
 0xa62   :  { %9506 = vmatprep.subr.bf16.mxu0 %v11200_v1  ;;  %v9561_v53 = vpack.c.bf16 %v3608_v52, %v3607_v5 }
 0xa63   :  { %9559 = vmatpush1.bf16.msra.mxu1 %v9558_v4  ;;  %v3727_v4 = vld [vmem:[#allocation13 + $0x128] sm:$0xff] }
 0xa64   :  { %9560 = vmatprep.subr.bf16.mxu1 %v11200_v1 }
 0xa65   :  { %9508 = vmatpush1.bf16.msra.mxu0 %v9507_v54  ;;  %v3609_v54 = vld [vmem:[#allocation13 + $0x80] sm:$0xff] }
 0xa66   :  { %9509 = vmatprep.subr.bf16.mxu0 %v11200_v1  ;;  %v9564_v56 = vpack.c.bf16 %v3610_v55, %v3609_v54  ;;  %v3728_v54 = vld [vmem:[#allocation13 + $0x130] sm:$0xff]  ;;  %v3729_v55 = vld [vmem:[#allocation13 + $0x138] sm:$0xff] }
 0xa67   :  { %9562 = vmatpush1.bf16.msra.mxu1 %v9561_v53  ;;  %v9594_v53 = vpack.c.bf16 %v3727_v4, %v3726_v3 }
 0xa68   :  { %3449 = vmatmul.mubr.f32.vlgmr.msra.gmra.mrb[4].mxu0 %v3379_v59  ;;  %9563 = vmatprep.subr.bf16.mxu1 %v11200_v1  ;;  %v3611_v59 = vld [vmem:[#allocation13 + $0x90] sm:$0xff] }
 0xa69   :  { %9511 = vmatpush1.bf16.msra.mxu0 %v9510_v57  ;;  %8483 = vmatprep.mubr.msk.f32.mxu0 %vm538_vm5, %v10775_v58  ;;  %v10777_v57 = vld [vmem:[#allocation2 + $0x8] ss:$16 sps:$4 sm:$0xff]   ;;  %v8468_v58 = vld [vmem:[%s12839_s28] ss:$0 sm:$0xff]  ;;  %v9567_v10 = vpack.c.bf16 %v3612_v60, %v3611_v59  ;;  %v9597_v60 = vpack.c.bf16 %v3729_v55, %v3728_v54 }
 0xa6a   :  { %9512 = vmatprep.subr.bf16.mxu0 %v11200_v1  ;;  %8487 = vmatprep.mubr.msk.f32.mxu1 %vm538_vm5, %v10777_v57  ;;  %v3947_v54 = vld [vmem:[#allocation13 + $0x1f8] sm:$0xff] }
 0xa6b   :  { %9565 = vmatpush1.bf16.msra.mxu1 %v9564_v56 }
 0xa6c   :  { %9566 = vmatprep.subr.bf16.mxu1 %v11200_v1 }
 0xa6d   :  { %9514 = vmatpush1.bf16.msra.mxu0 %v9513_v8 }
 0xa6e   :  { %9515 = vmatprep.subr.bf16.mxu0 %v11200_v1 }
 0xa6f   :  { %9568 = vmatpush1.bf16.msra.mxu1 %v9567_v10 }
 0xa70   :  { %9569 = vmatprep.subr.bf16.mxu1 %v11200_v1 }
 0xa71   :  { %9517 = vmatpush1.bf16.msra.mxu0 %v9516_v62 }
 0xa72   :  { %9518 = vmatprep.subr.bf16.mxu0 %v11200_v1 }
 0xa75   :  { %9520 = vmatpush1.bf16.msra.mxu0 %v9519_v0 }
 0xa76   :  { %9521 = vmatprep.subr.bf16.mxu0 %v11200_v1 }
 0xa79   :  { %9523 = vmatpush1.bf16.msra.mxu0 %v9522_v21  ;;  %v3710_v21 = vld [vmem:[#allocation13 + $0xa0] sm:$0xff] }
 0xa7a   :  { %9524 = vmatprep.subr.bf16.mxu0 %v11200_v1  ;;  %v9570_v17 = vpack.c.bf16 %v3711_v6, %v3710_v21 }
 0xa7d   :  { %9526 = vmatpush1.bf16.msra.mxu0 %v9525_v14  ;;  %v3713_v14 = vld [vmem:[#allocation13 + $0xb8] sm:$0xff] }
 0xa7e   :  { %9527 = vmatprep.subr.bf16.mxu0 %v11200_v1 }
 0xa81   :  { %9529 = vmatpush1.bf16.msra.mxu0 %v9528_v19 }
 0xa82   :  { %9530 = vmatprep.subr.bf16.mxu0 %v11200_v1 }
 0xa85   :  { %9532 = vmatpush1.bf16.msra.mxu0 %v9531_v23 }
 0xa86   :  { %9533 = vmatprep.subr.bf16.mxu0 %v11200_v1 }
 0xa89   :  { %9535 = vmatpush1.bf16.msra.mxu0 %v9534_v27  ;;  %v9573_v27 = vpack.c.bf16 %v3713_v14, %v3712_v12  ;;  %v3831_v12 = vld [vmem:[#allocation13 + $0x160] sm:$0xff]  ;;  %v3832_v14 = vld [vmem:[#allocation13 + $0x168] sm:$0xff] }
 0xa8a   :  { %9536 = vmatprep.subr.bf16.mxu0 %v11200_v1 }
 0xa8d   :  { %9538 = vmatpush1.bf16.msra.mxu0 %v9537_v31  ;;  %v3714_v31 = vld [vmem:[#allocation13 + $0xc0] sm:$0xff] }
 0xa8e   :  { %9689 = vmatprep.subr.bf16.mxu0 %v11200_v1 }
 0xa90   :  { %3556 = vmatmul.mubr.f32.vlgmr.msra.gmra.mrb[4].mxu0 %v10776_v32  ;;  %v3715_v32 = vld [vmem:[#allocation13 + $0xc8] sm:$0xff] }
 0xa91   :  { %v9576_v37 = vpack.c.bf16 %v3715_v32, %v3714_v31  ;;  %v3840_v31 = vld [vmem:[#allocation13 + $0x1a8] sm:$0xff] }
 0xb63   :  { %v3557_v7 = vpop.f32.mrb[4].mxu0 }
 0xb64   :  { %v10530_v8 = vadd.f32 %v8468_v58, %v3557_v7  ;;  %v3559_v9 = vpop.f32.mrb[5].mxu0  ;;  %v3827_v7 = vld [vmem:[#allocation13 + $0x140] sm:$0xff] }
 0xb66   :  { %v3562_v62 = vmax.f32 %v10530_v8, 0.0  ;;  %v3828_v8 = vld [vmem:[#allocation13 + $0x148] sm:$0xff] }
 0xb68   :  { %v3564_v11 = vcombine.high %v3562_v62, %v3562_v62  ;;  %v3565_v13 = vrot.slane %v3562_v62, 6 }
 0xb6a   :  { %v3566_v0 = vrot.slane %v3564_v11, 6  ;;  %3567 = vrot.lane.b32.xlu0 %v3565_v13, %s11203_s1  ;;  %v9600_v11 = vpack.c.bf16 %v3828_v8, %v3827_v7  ;;  %v3951_v7 = vld [vmem:[#allocation13 + $0x218] sm:$0xff] }
 0xb6c   :  { %3569 = vrot.lane.b32.xlu1 %v3566_v0, %s11203_s1 }
 0xbdc   :  { %v3568_v15 = vpop.permute.xlu0 %3567 }
 0xbdd   :  { %3573 = vst.msk [vmem:[#allocation2] sm:$0x3c] %vm1232_vm2, %v3568_v15  ;;  %v3829_v15 = vld [vmem:[#allocation13 + $0x150] sm:$0xff] }
 0xbde   :  { %v3570_v16 = vpop.permute.xlu1 %3569 }
 0xbdf   :  { %3574 = vst.msk [vmem:[#allocation2 + $0x10] sm:$0x3c] %vm1232_vm2, %v3570_v16  ;;  %v3830_v16 = vld [vmem:[#allocation13 + $0x158] sm:$0xff] }
 0xbe0   :  { %v9603_v6 = vpack.c.bf16 %v3830_v16, %v3829_v15  ;;  %v3956_v15 = vld [vmem:[#allocation13 + $0x240] sm:$0xff]  ;;  %v3957_v16 = vld [vmem:[#allocation13 + $0x248] sm:$0xff] }
 0xbe4   :  { %v10779_v18 = vld [vmem:[#allocation2] ss:$8 sps:$4 sm:$0xee]   ;;  %v10781_v19 = vld [vmem:[#allocation2 + $0x4] ss:$8 sps:$4 sm:$0x11]  }
 0xbe5   :  { %v8488_v25 = vrot.slane %v10779_v18, 9  ;;  %v3703_v26 = vrot.slane %v10781_v19, 5  ;;  %v10785_v56 = vld [vmem:[#allocation2] ss:$8 sps:$4 sm:$0xcc]  }
 0xbe6   :  { %v10778_v20 = vld [vmem:[#allocation2] ss:$16 sps:$4 sm:$0xff]   ;;  %v10784_v23 = vld [vmem:[#allocation2 + $0x14] ss:$8 sps:$4 sm:$0x11]   ;;  %v8491_v9 = vrot.slane %v10785_v56, 10 }
 0xbe7   :  { %v10782_v22 = vld [vmem:[#allocation2 + $0x10] ss:$8 sps:$4 sm:$0xee]   ;;  %3683 = vmatmul.mubr.f32.vlgmr.msra.gmra.mrb[12].mxu1 %v10778_v20  ;;  %v3707_v29 = vrot.slane %v10784_v23, 5  ;;  %v3704_v33 = vsel %vm11725_vm12, %v8488_v25, %v3703_v26  ;;  %v3833_v18 = vld [vmem:[#allocation13 + $0x170] sm:$0xff]  ;;  %v3834_v19 = vld [vmem:[#allocation13 + $0x178] sm:$0xff] }
 0xbe8   :  { %9571 = vmatpush1.bf16.msra.mxu1 %v9570_v17  ;;  %v8489_v28 = vrot.slane %v10782_v22, 9  ;;  %v10788_v5 = vld [vmem:[#allocation2 + $0x10] ss:$8 sps:$4 sm:$0xcc]   ;;  %v9606_v17 = vpack.c.bf16 %v3832_v14, %v3831_v12  ;;  %v9609_v20 = vpack.c.bf16 %v3834_v19, %v3833_v18  ;;  %v3837_v26 = vld [vmem:[#allocation13 + $0x190] sm:$0xff]  ;;  %v3959_v12 = vld [vmem:[#allocation13 + $0x258] sm:$0xff] }
 0xbe9   :  { %9572 = vmatprep.subr.bf16.mxu1 %v11200_v1  ;;  %v10790_v52 = vld [vmem:[#allocation2 + $0x14] ss:$8 sps:$4 sm:$0x33]   ;;  %v10787_v57 = vld [vmem:[#allocation2 + $0x4] ss:$8 sps:$4 sm:$0x33]  }
 0xbea   :  { %v3708_v34 = vsel %vm11725_vm12, %v8489_v28, %v3707_v29  ;;  %v8492_v58 = vrot.slane %v10788_v5, 10  ;;  %v3824_v59 = vrot.slane %v10790_v52, 6  ;;  %v3820_v10 = vrot.slane %v10787_v57, 6  ;;  %v3835_v22 = vld [vmem:[#allocation13 + $0x180] sm:$0xff]  ;;  %v3836_v23 = vld [vmem:[#allocation13 + $0x188] sm:$0xff] }
 0xbeb   :  { %v3731_v35 = vcombine.high %v3704_v33, %v3708_v34  ;;  %v3730_v13 = vcombine.low %v3704_v33, %v3708_v34  ;;  %v9612_v25 = vpack.c.bf16 %v3836_v23, %v3835_v22  ;;  %v3839_v29 = vld [vmem:[#allocation13 + $0x1a0] sm:$0xff]  ;;  %v3841_v33 = vld [vmem:[#allocation13 + $0x1b0] sm:$0xff]  ;;  %v3842_v34 = vld [vmem:[#allocation13 + $0x1b8] sm:$0xff] }
 0xbec   :  { %9574 = vmatpush1.bf16.msra.mxu1 %v9573_v27  ;;  %v12194_v62 = vsel %vm11748_vm15, %v8492_v58, %v3824_v59  ;;  %v12199_v0 = vsel %vm11748_vm15, %v8491_v9, %v3820_v10  ;;  %v3838_v27 = vld [vmem:[#allocation13 + $0x198] sm:$0xff]  ;;  %v9618_v32 = vpack.c.bf16 %v3840_v31, %v3839_v29  ;;  %v10794_v40 = vld [vmem:[#allocation2 + $0x10] ss:$8 sps:$4 sm:$0x88]   ;;  %v4053_v31 = vld [vmem:[#allocation13 + $0x290] sm:$0xff] }
 0xbed   :  { %8490 = vmatprep.mubr.msk.f32.mxu1 %vm538_vm5, %v3731_v35  ;;  %9575 = vmatprep.subr.bf16.mxu1 %v11200_v1  ;;  %v3848_v21 = vcombine.high %v12199_v0, %v12194_v62  ;;  %v9615_v28 = vpack.c.bf16 %v3838_v27, %v3837_v26  ;;  %v9621_v35 = vpack.c.bf16 %v3842_v34, %v3841_v33  ;;  %v10791_v44 = vld [vmem:[#allocation2] ss:$8 sps:$4 sm:$0x88]   ;;  %v10793_v45 = vld [vmem:[#allocation2 + $0x4] ss:$8 sps:$4 sm:$0x77]  }
 0xbee   :  { %v8494_v51 = vrot.slane %v10791_v44, 11  ;;  %v3847_v5 = vcombine.low %v12199_v0, %v12194_v62  ;;  %v3948_v57 = vld [vmem:[#allocation13 + $0x200] sm:$0xff]  ;;  %v3949_v58 = vld [vmem:[#allocation13 + $0x208] sm:$0xff]  ;;  %v3963_v22 = vld [vmem:[#allocation13 + $0x278] sm:$0xff] }
 0xbef   :  { %v9636_v59 = vpack.c.bf16 %v3949_v58, %v3948_v57  ;;  %v3952_v9 = vld [vmem:[#allocation13 + $0x220] sm:$0xff]  ;;  %v3953_v10 = vld [vmem:[#allocation13 + $0x228] sm:$0xff]  ;;  %v4061_v44 = vld [vmem:[#allocation13 + $0x2d0] sm:$0xff] }
 0xbf0   :  { %9577 = vmatpush1.bf16.msra.mxu1 %v9576_v37  ;;  %v3843_v37 = vld [vmem:[#allocation13 + $0x1c0] sm:$0xff]  ;;  %v9642_v62 = vpack.c.bf16 %v3953_v10, %v3952_v9  ;;  %v3961_v18 = vld [vmem:[#allocation13 + $0x268] sm:$0xff]  ;;  %v4180_v58 = vld [vmem:[#allocation15 + $0x10] sm:$0xff] }
 0xbf1   :  { %9578 = vmatprep.subr.bf16.mxu1 %v11200_v1  ;;  %v9624_v42 = vpack.c.bf16 %v3844_v39, %v3843_v37  ;;  %v4052_v26 = vld [vmem:[#allocation13 + $0x288] sm:$0xff]  ;;  %v4055_v34 = vld [vmem:[#allocation13 + $0x2a0] sm:$0xff]  ;;  %v4057_v39 = vld [vmem:[#allocation13 + $0x2b0] sm:$0xff] }
 0xbf2   :  { %v4179_v57 = vld [vmem:[#allocation15 + $0x8] sm:$0xff]  ;;  %v4297_v10 = vld [vmem:[#allocation15 + $0xb0] sm:$0xff] }
 0xbf4   :  { %9580 = vmatpush1.bf16.msra.mxu1 %v9579_v41  ;;  %v10796_v41 = vld [vmem:[#allocation2 + $0x14] ss:$8 sps:$4 sm:$0x77]  }
 0xbf5   :  { %9581 = vmatprep.subr.bf16.mxu1 %v11200_v1  ;;  %v3941_v46 = vrot.slane %v10796_v41, 7 }
 0xbf8   :  { %9583 = vmatpush1.bf16.msra.mxu1 %v9582_v43  ;;  %v3846_v43 = vld [vmem:[#allocation13 + $0x1d8] sm:$0xff] }
 0xbf9   :  { %9584 = vmatprep.subr.bf16.mxu1 %v11200_v1  ;;  %v9627_v49 = vpack.c.bf16 %v3846_v43, %v3845_v36  ;;  %v4060_v36 = vld [vmem:[#allocation13 + $0x2c8] sm:$0xff] }
 0xbfc   :  { %9586 = vmatpush1.bf16.msra.mxu1 %v9585_v48  ;;  %v8495_v48 = vrot.slane %v10794_v40, 11  ;;  %v4058_v40 = vld [vmem:[#allocation13 + $0x2b8] sm:$0xff] }
 0xbfd   :  { %9587 = vmatprep.subr.bf16.mxu1 %v11200_v1  ;;  %v9669_v41 = vpack.c.bf16 %v4058_v40, %v4057_v39  ;;  %v4191_v39 = vld [vmem:[#allocation15 + $0x68] sm:$0xff] }
 0xbfe   :  { %v12215_v3 = vsel %vm11777_vm1, %v8495_v48, %v3941_v46  ;;  %v4063_v46 = vld [vmem:[#allocation13 + $0x2e0] sm:$0xff] }
 0xc00   :  { %9589 = vmatpush1.bf16.msra.mxu1 %v9588_v63  ;;  %v3944_v63 = vld [vmem:[#allocation13 + $0x1e0] sm:$0xff] }
 0xc01   :  { %9590 = vmatprep.subr.bf16.mxu1 %v11200_v1  ;;  %v9630_v4 = vpack.c.bf16 %v3945_v50, %v3944_v63  ;;  %v4065_v50 = vld [vmem:[#allocation13 + $0x2f0] sm:$0xff] }
 0xc04   :  { %9592 = vmatpush1.bf16.msra.mxu1 %v9591_v2  ;;  %v3937_v2 = vrot.slane %v10793_v45, 7  ;;  %v4062_v45 = vld [vmem:[#allocation13 + $0x2d8] sm:$0xff] }
 0xc05   :  { %9593 = vmatprep.subr.bf16.mxu1 %v11200_v1  ;;  %v9675_v48 = vpack.c.bf16 %v4062_v45, %v4061_v44  ;;  %v4307_v44 = vld [vmem:[#allocation15 + $0x100] sm:$0xff]  ;;  %v4308_v45 = vld [vmem:[#allocation15 + $0x108] sm:$0xff] }
 0xc06   :  { %v3938_v52 = vsel %vm11777_vm1, %v8494_v51, %v3937_v2  ;;  %v4066_v51 = vld [vmem:[#allocation13 + $0x2f8] sm:$0xff] }
 0xc07   :  { %v3965_v55 = vcombine.high %v3938_v52, %v12215_v3  ;;  %v3964_v29 = vcombine.low %v3938_v52, %v12215_v3  ;;  %v9681_v2 = vpack.c.bf16 %v4066_v51, %v4065_v50  ;;  %v4067_v3 = vld [vmem:[#allocation13 + $0x300] sm:$0xff]  ;;  %v4069_v52 = vld [vmem:[#allocation13 + $0x310] sm:$0xff]  ;;  %v4310_v50 = vld [vmem:[#allocation15 + $0x118] sm:$0xff] }
 0xc08   :  { %9595 = vmatpush1.bf16.msra.mxu1 %v9594_v53  ;;  %v3946_v53 = vld [vmem:[#allocation13 + $0x1f0] sm:$0xff]  ;;  %v8484_v51 = vld [vmem:[%s12840_s17] ss:$0 sm:$0xff] }
 0xc09   :  { %9596 = vmatprep.subr.bf16.mxu1 %v11200_v1  ;;  %v9633_v56 = vpack.c.bf16 %v3947_v54, %v3946_v53  ;;  %v4070_v53 = vld [vmem:[#allocation13 + $0x318] sm:$0xff] }
 0xc0a   :  { %v9687_v54 = vpack.c.bf16 %v4070_v53, %v4069_v52  ;;  %v10799_v52 = vld [vmem:[#allocation2 + $0x8] ss:$16 sps:$4 sm:$0xff]  }
 0xc0b   :  { %8503 = vmatprep.mubr.msk.f32.mxu0 %vm538_vm5, %v10799_v52 }
 0xc0c   :  { %9598 = vmatpush1.bf16.msra.mxu1 %v9597_v60  ;;  %v3950_v60 = vld [vmem:[#allocation13 + $0x210] sm:$0xff] }
 0xc0d   :  { %9599 = vmatprep.subr.bf16.mxu1 %v11200_v1  ;;  %v9639_v8 = vpack.c.bf16 %v3951_v7, %v3950_v60  ;;  %v4181_v60 = vld [vmem:[#allocation15 + $0x18] sm:$0xff]  ;;  %v4295_v7 = vld [vmem:[#allocation15 + $0xa0] sm:$0xff] }
 0xc0f   :  { %3800 = vmatmul.mubr.f32.vlgmr.msra.gmra.mrb[12].mxu1 %v3730_v13  ;;  %v3955_v13 = vld [vmem:[#allocation13 + $0x238] sm:$0xff] }
 0xc10   :  { %9601 = vmatpush1.bf16.msra.mxu1 %v9600_v11  ;;  %8493 = vmatprep.mubr.msk.f32.mxu1 %vm538_vm5, %v3848_v21  ;;  %v3954_v11 = vld [vmem:[#allocation13 + $0x230] sm:$0xff]  ;;  %v9648_v21 = vpack.c.bf16 %v3957_v16, %v3956_v15  ;;  %v4299_v16 = vld [vmem:[#allocation15 + $0xc0] sm:$0xff] }
 0xc11   :  { %9602 = vmatprep.subr.bf16.mxu1 %v11200_v1  ;;  %v9645_v0 = vpack.c.bf16 %v3955_v13, %v3954_v11  ;;  %v4298_v11 = vld [vmem:[#allocation15 + $0xb8] sm:$0xff]  ;;  %v4182_v13 = vld [vmem:[#allocation15 + $0x20] sm:$0xff] }
 0xc12   :  { %v9723_v15 = vpack.c.bf16 %v4298_v11, %v4297_v10  ;;  %v4314_v10 = vld [vmem:[#allocation15 + $0x138] sm:$0xff] }
 0xc14   :  { %9604 = vmatpush1.bf16.msra.mxu1 %v9603_v6  ;;  %v3958_v6 = vld [vmem:[#allocation13 + $0x250] sm:$0xff] }
 0xc15   :  { %9605 = vmatprep.subr.bf16.mxu1 %v11200_v1  ;;  %v9651_v14 = vpack.c.bf16 %v3959_v12, %v3958_v6  ;;  %v4184_v12 = vld [vmem:[#allocation15 + $0x30] sm:$0xff] }
 0xc18   :  { %9607 = vmatpush1.bf16.msra.mxu1 %v9606_v17  ;;  %v3960_v17 = vld [vmem:[#allocation13 + $0x260] sm:$0xff] }
 0xc19   :  { %9608 = vmatprep.subr.bf16.mxu1 %v11200_v1  ;;  %v9654_v19 = vpack.c.bf16 %v3961_v18, %v3960_v17  ;;  %v4301_v18 = vld [vmem:[#allocation15 + $0xd0] sm:$0xff] }
 0xc1c   :  { %9610 = vmatpush1.bf16.msra.mxu1 %v9609_v20  ;;  %v3962_v20 = vld [vmem:[#allocation13 + $0x270] sm:$0xff] }
 0xc1d   :  { %9611 = vmatprep.subr.bf16.mxu1 %v11200_v1  ;;  %v9657_v23 = vpack.c.bf16 %v3963_v22, %v3962_v20  ;;  %v4186_v22 = vld [vmem:[#allocation15 + $0x40] sm:$0xff] }
 0xc20   :  { %9613 = vmatpush1.bf16.msra.mxu1 %v9612_v25  ;;  %v4051_v25 = vld [vmem:[#allocation13 + $0x280] sm:$0xff] }
 0xc21   :  { %9614 = vmatprep.subr.bf16.mxu1 %v11200_v1  ;;  %v9660_v27 = vpack.c.bf16 %v4052_v26, %v4051_v25  ;;  %v4303_v26 = vld [vmem:[#allocation15 + $0xe0] sm:$0xff] }
 0xc24   :  { %9616 = vmatpush1.bf16.msra.mxu1 %v9615_v28  ;;  %v10797_v28 = vld [vmem:[#allocation2 + $0xc] ss:$16 sps:$4 sm:$0xff]  }
 0xc25   :  { %9617 = vmatprep.subr.bf16.mxu1 %v11200_v1 }
 0xc28   :  { %9619 = vmatpush1.bf16.msra.mxu1 %v9618_v32  ;;  %v4054_v32 = vld [vmem:[#allocation13 + $0x298] sm:$0xff] }
 0xc29   :  { %9620 = vmatprep.subr.bf16.mxu1 %v11200_v1  ;;  %v9663_v33 = vpack.c.bf16 %v4054_v32, %v4053_v31  ;;  %v4189_v31 = vld [vmem:[#allocation15 + $0x58] sm:$0xff] }
 0xc2c   :  { %9622 = vmatpush1.bf16.msra.mxu1 %v9621_v35  ;;  %v4056_v35 = vld [vmem:[#allocation13 + $0x2a8] sm:$0xff] }
 0xc2d   :  { %9623 = vmatprep.subr.bf16.mxu1 %v11200_v1  ;;  %v9666_v37 = vpack.c.bf16 %v4056_v35, %v4055_v34  ;;  %v4306_v34 = vld [vmem:[#allocation15 + $0xf8] sm:$0xff] }
 0xc30   :  { %9625 = vmatpush1.bf16.msra.mxu1 %v9624_v42  ;;  %v4059_v42 = vld [vmem:[#allocation13 + $0x2c0] sm:$0xff] }
 0xc31   :  { %9626 = vmatprep.subr.bf16.mxu1 %v11200_v1  ;;  %v9672_v43 = vpack.c.bf16 %v4060_v36, %v4059_v42  ;;  %v4192_v42 = vld [vmem:[#allocation15 + $0x70] sm:$0xff]  ;;  %v4193_v36 = vld [vmem:[#allocation15 + $0x78] sm:$0xff] }
 0xc34   :  { %9628 = vmatpush1.bf16.msra.mxu1 %v9627_v49  ;;  %v4064_v49 = vld [vmem:[#allocation13 + $0x2e8] sm:$0xff] }
 0xc35   :  { %9629 = vmatprep.subr.bf16.mxu1 %v11200_v1  ;;  %v9678_v63 = vpack.c.bf16 %v4064_v49, %v4063_v46  ;;  %v9738_v46 = vpack.c.bf16 %v4308_v45, %v4307_v44  ;;  %v4195_v49 = vld [vmem:[#allocation15 + $0x88] sm:$0xff] }
 0xc37   :  { %3917 = vmatmul.mubr.f32.vlgmr.msra.gmra.mrb[12].mxu1 %v3847_v5 }
 0xc38   :  { %9631 = vmatpush1.bf16.msra.mxu1 %v9630_v4  ;;  %8496 = vmatprep.mubr.msk.f32.mxu1 %vm538_vm5, %v3965_v55  ;;  %v4068_v4 = vld [vmem:[#allocation13 + $0x308] sm:$0xff]  ;;  %v10798_v55 = vld [vmem:[#allocation2 + $0x4] ss:$16 sps:$4 sm:$0xff]  }
 0xc39   :  { %9632 = vmatprep.subr.bf16.mxu1 %v11200_v1  ;;  %v9684_v5 = vpack.c.bf16 %v4068_v4, %v4067_v3  ;;  %v4196_v3 = vld [vmem:[#allocation15 + $0x90] sm:$0xff]  ;;  %v4197_v4 = vld [vmem:[#allocation15 + $0x98] sm:$0xff] }
 0xc3c   :  { %9634 = vmatpush1.bf16.msra.mxu1 %v9633_v56  ;;  %v4178_v56 = vld [vmem:[#allocation15] sm:$0xff] }
 0xc3d   :  { %9635 = vmatprep.subr.bf16.mxu1 %v11200_v1 }
 0xc40   :  { %9637 = vmatpush1.bf16.msra.mxu1 %v9636_v59  ;;  %v9690_v59 = vpack.c.bf16 %v4179_v57, %v4178_v56 }
 0xc41   :  { %9638 = vmatprep.subr.bf16.mxu1 %v11200_v1 }
 0xc42   :  { %9691 = vmatpush1.bf16.msra.mxu0 %v9690_v59 }
 0xc43   :  { %9692 = vmatprep.subr.bf16.mxu0 %v11200_v1 }
 0xc44   :  { %9640 = vmatpush1.bf16.msra.mxu1 %v9639_v8  ;;  %v4296_v8 = vld [vmem:[#allocation15 + $0xa8] sm:$0xff] }
 0xc45   :  { %9641 = vmatprep.subr.bf16.mxu1 %v11200_v1  ;;  %v9720_v9 = vpack.c.bf16 %v4296_v8, %v4295_v7 }
 0xc48   :  { %9643 = vmatpush1.bf16.msra.mxu1 %v9642_v62  ;;  %v9693_v62 = vpack.c.bf16 %v4181_v60, %v4180_v58  ;;  %v9717_v58 = vpack.c.bf16 %v4197_v4, %v4196_v3 }
 0xc49   :  { %9644 = vmatprep.subr.bf16.mxu1 %v11200_v1 }
 0xc4a   :  { %9694 = vmatpush1.bf16.msra.mxu0 %v9693_v62 }
 0xc4b   :  { %9695 = vmatprep.subr.bf16.mxu0 %v11200_v1 }
 0xc4c   :  { %9646 = vmatpush1.bf16.msra.mxu1 %v9645_v0  ;;  %v4183_v0 = vld [vmem:[#allocation15 + $0x28] sm:$0xff] }
 0xc4d   :  { %9647 = vmatprep.subr.bf16.mxu1 %v11200_v1  ;;  %v9696_v6 = vpack.c.bf16 %v4183_v0, %v4182_v13 }
 0xc4f   :  { %9697 = vmatpush1.bf16.msra.mxu0 %v9696_v6  ;;  %v4415_v6 = vld [vmem:[#allocation15 + $0x158] sm:$0xff] }
 0xc50   :  { %9649 = vmatpush1.bf16.msra.mxu1 %v9648_v21  ;;  %v4300_v21 = vld [vmem:[#allocation15 + $0xc8] sm:$0xff]  ;;  %9698 = vmatprep.subr.bf16.mxu0 %v11200_v1 }
 0xc51   :  { %9650 = vmatprep.subr.bf16.mxu1 %v11200_v1  ;;  %v9726_v17 = vpack.c.bf16 %v4300_v21, %v4299_v16  ;;  %v4413_v16 = vld [vmem:[#allocation15 + $0x148] sm:$0xff]  ;;  %v4414_v21 = vld [vmem:[#allocation15 + $0x150] sm:$0xff] }
 0xc54   :  { %9652 = vmatpush1.bf16.msra.mxu1 %v9651_v14  ;;  %v4185_v14 = vld [vmem:[#allocation15 + $0x38] sm:$0xff] }
 0xc55   :  { %9653 = vmatprep.subr.bf16.mxu1 %v11200_v1  ;;  %v9699_v20 = vpack.c.bf16 %v4185_v14, %v4184_v12 }
 0xc57   :  { %9700 = vmatpush1.bf16.msra.mxu0 %v9699_v20  ;;  %v4530_v20 = vld [vmem:[#allocation15 + $0x1e8] sm:$0xff] }
 0xc58   :  { %9655 = vmatpush1.bf16.msra.mxu1 %v9654_v19  ;;  %v4302_v19 = vld [vmem:[#allocation15 + $0xd8] sm:$0xff]  ;;  %9701 = vmatprep.subr.bf16.mxu0 %v11200_v1 }
 0xc59   :  { %9656 = vmatprep.subr.bf16.mxu1 %v11200_v1  ;;  %v9729_v25 = vpack.c.bf16 %v4302_v19, %v4301_v18  ;;  %v4529_v19 = vld [vmem:[#allocation15 + $0x1e0] sm:$0xff] }
 0xc5c   :  { %9658 = vmatpush1.bf16.msra.mxu1 %v9657_v23  ;;  %v4187_v23 = vld [vmem:[#allocation15 + $0x48] sm:$0xff] }
 0xc5d   :  { %9659 = vmatprep.subr.bf16.mxu1 %v11200_v1 }
 0xc5f   :  { %4034 = vmatmul.mubr.f32.vlgmr.msra.gmra.mrb[12].mxu1 %v3964_v29  ;;  %v4188_v29 = vld [vmem:[#allocation15 + $0x50] sm:$0xff] }
 0xc60   :  { %9661 = vmatpush1.bf16.msra.mxu1 %v9660_v27  ;;  %8499 = vmatprep.mubr.msk.f32.mxu1 %vm538_vm5, %v10797_v28  ;;  %v4304_v27 = vld [vmem:[#allocation15 + $0xe8] sm:$0xff]  ;;  %v9702_v28 = vpack.c.bf16 %v4187_v23, %v4186_v22  ;;  %v9705_v35 = vpack.c.bf16 %v4189_v31, %v4188_v29 }
 0xc61   :  { %9662 = vmatprep.subr.bf16.mxu1 %v11200_v1  ;;  %v9732_v32 = vpack.c.bf16 %v4304_v27, %v4303_v26  ;;  %v4416_v27 = vld [vmem:[#allocation15 + $0x160] sm:$0xff] }
 0xc62   :  { %9703 = vmatpush1.bf16.msra.mxu0 %v9702_v28  ;;  %v9753_v28 = vpack.c.bf16 %v4415_v6, %v4414_v21 }
 0xc63   :  { %9704 = vmatprep.subr.bf16.mxu0 %v11200_v1 }
 0xc64   :  { %9664 = vmatpush1.bf16.msra.mxu1 %v9663_v33  ;;  %v4305_v33 = vld [vmem:[#allocation15 + $0xf0] sm:$0xff] }
 0xc65   :  { %9665 = vmatprep.subr.bf16.mxu1 %v11200_v1  ;;  %v9735_v40 = vpack.c.bf16 %v4306_v34, %v4305_v33  ;;  %v4417_v33 = vld [vmem:[#allocation15 + $0x168] sm:$0xff] }
 0xc66   :  { %9706 = vmatpush1.bf16.msra.mxu0 %v9705_v35  ;;  %v9756_v3 = vpack.c.bf16 %v4417_v33, %v4416_v27  ;;  %v4429_v33 = vld [vmem:[#allocation15 + $0x1c8] sm:$0xff] }
 0xc67   :  { %9707 = vmatprep.subr.bf16.mxu0 %v11200_v1 }
 0xc68   :  { %9667 = vmatpush1.bf16.msra.mxu1 %v9666_v37  ;;  %v4190_v37 = vld [vmem:[#allocation15 + $0x60] sm:$0xff] }
 0xc69   :  { %9668 = vmatprep.subr.bf16.mxu1 %v11200_v1 }
 0xc6c   :  { %9670 = vmatpush1.bf16.msra.mxu1 %v9669_v41  ;;  %v9708_v41 = vpack.c.bf16 %v4191_v39, %v4190_v37 }
 0xc6d   :  { %9671 = vmatprep.subr.bf16.mxu1 %v11200_v1 }
 0xc6e   :  { %9709 = vmatpush1.bf16.msra.mxu0 %v9708_v41 }
 0xc6f   :  { %9710 = vmatprep.subr.bf16.mxu0 %v11200_v1 }
 0xc70   :  { %9673 = vmatpush1.bf16.msra.mxu1 %v9672_v43  ;;  %v9711_v43 = vpack.c.bf16 %v4193_v36, %v4192_v42  ;;  %v9780_v42 = vpack.c.bf16 %v4530_v20, %v4529_v19  ;;  %v4531_v36 = vld [vmem:[#allocation15 + $0x1f0] sm:$0xff] }
 0xc71   :  { %9674 = vmatprep.subr.bf16.mxu1 %v11200_v1 }
 0xc72   :  { %9712 = vmatpush1.bf16.msra.mxu0 %v9711_v43  ;;  %v4532_v43 = vld [vmem:[#allocation15 + $0x1f8] sm:$0xff] }
 0xc73   :  { %9713 = vmatprep.subr.bf16.mxu0 %v11200_v1 }
 0xc74   :  { %9676 = vmatpush1.bf16.msra.mxu1 %v9675_v48  ;;  %v4194_v48 = vld [vmem:[#allocation15 + $0x80] sm:$0xff] }
 0xc75   :  { %9677 = vmatprep.subr.bf16.mxu1 %v11200_v1 }
 0xc78   :  { %9679 = vmatpush1.bf16.msra.mxu1 %v9678_v63  ;;  %v4309_v63 = vld [vmem:[#allocation15 + $0x110] sm:$0xff] }
 0xc79   :  { %9680 = vmatprep.subr.bf16.mxu1 %v11200_v1 }
 0xc7c   :  { %9682 = vmatpush1.bf16.msra.mxu1 %v9681_v2  ;;  %v9714_v2 = vpack.c.bf16 %v4195_v49, %v4194_v48 }
 0xc7d   :  { %9683 = vmatprep.subr.bf16.mxu1 %v11200_v1 }
 0xc7e   :  { %9715 = vmatpush1.bf16.msra.mxu0 %v9714_v2 }
 0xc7f   :  { %9716 = vmatprep.subr.bf16.mxu0 %v11200_v1 }
 0xc80   :  { %9685 = vmatpush1.bf16.msra.mxu1 %v9684_v5  ;;  %v9741_v5 = vpack.c.bf16 %v4310_v50, %v4309_v63  ;;  %v4418_v63 = vld [vmem:[#allocation15 + $0x170] sm:$0xff]  ;;  %v4419_v50 = vld [vmem:[#allocation15 + $0x178] sm:$0xff] }
 0xc81   :  { %9686 = vmatprep.subr.bf16.mxu1 %v11200_v1 }
 0xc82   :  { %9718 = vmatpush1.bf16.msra.mxu0 %v9717_v58  ;;  %v9783_v58 = vpack.c.bf16 %v4532_v43, %v4531_v36  ;;  %v4545_v43 = vld [vmem:[#allocation15 + $0x260] sm:$0xff] }
 0xc83   :  { %9749 = vmatprep.subr.bf16.mxu0 %v11200_v1 }
 0xc84   :  { %9688 = vmatpush1.bf16.msra.mxu1 %v9687_v54  ;;  %v4311_v54 = vld [vmem:[#allocation15 + $0x120] sm:$0xff] }
 0xc85   :  { %9719 = vmatprep.subr.bf16.mxu1 %v11200_v1 }
 0xc87   :  { %4141 = vmatmul.mubr.f32.vlgmr.msra.gmra.mrb[12].mxu1 %v10798_v55  ;;  %v4312_v55 = vld [vmem:[#allocation15 + $0x128] sm:$0xff] }
 0xc88   :  { %9721 = vmatpush1.bf16.msra.mxu1 %v9720_v9  ;;  %v9744_v60 = vpack.c.bf16 %v4312_v55, %v4311_v54  ;;  %v4313_v9 = vld [vmem:[#allocation15 + $0x130] sm:$0xff] }
 0xc89   :  { %9722 = vmatprep.subr.bf16.mxu1 %v11200_v1  ;;  %v9747_v11 = vpack.c.bf16 %v4314_v10, %v4313_v9  ;;  %v4420_v9 = vld [vmem:[#allocation15 + $0x180] sm:$0xff]  ;;  %v4421_v10 = vld [vmem:[#allocation15 + $0x188] sm:$0xff] }
 0xc8c   :  { %9724 = vmatpush1.bf16.msra.mxu1 %v9723_v15  ;;  %v4412_v15 = vld [vmem:[#allocation15 + $0x140] sm:$0xff] }
 0xc8d   :  { %9725 = vmatprep.subr.bf16.mxu1 %v11200_v1  ;;  %v9750_v12 = vpack.c.bf16 %v4413_v16, %v4412_v15  ;;  %v4536_v15 = vld [vmem:[#allocation15 + $0x218] sm:$0xff] }
 0xc8e   :  { %v4423_v16 = vld [vmem:[#allocation15 + $0x198] sm:$0xff] }
 0xc8f   :  { %v9765_v6 = vpack.c.bf16 %v4423_v16, %v4422_v24  ;;  %v4652_v24 = vld [vmem:[#allocation15 + $0x300] sm:$0xff]  ;;  %v4653_v16 = vld [vmem:[#allocation15 + $0x308] sm:$0xff] }
 0xc90   :  { %9727 = vmatpush1.bf16.msra.mxu1 %v9726_v17 }
 0xc91   :  { %9728 = vmatprep.subr.bf16.mxu1 %v11200_v1 }
 0xc94   :  { %9730 = vmatpush1.bf16.msra.mxu1 %v9729_v25 }
 0xc95   :  { %9731 = vmatprep.subr.bf16.mxu1 %v11200_v1 }
 0xc98   :  { %9733 = vmatpush1.bf16.msra.mxu1 %v9732_v32 }
 0xc99   :  { %9734 = vmatprep.subr.bf16.mxu1 %v11200_v1 }
 0xc9c   :  { %9736 = vmatpush1.bf16.msra.mxu1 %v9735_v40 }
 0xc9d   :  { %9737 = vmatprep.subr.bf16.mxu1 %v11200_v1 }
 0xca0   :  { %9739 = vmatpush1.bf16.msra.mxu1 %v9738_v46 }
 0xca1   :  { %9740 = vmatprep.subr.bf16.mxu1 %v11200_v1 }
 0xca4   :  { %9742 = vmatpush1.bf16.msra.mxu1 %v9741_v5 }
 0xca5   :  { %9743 = vmatprep.subr.bf16.mxu1 %v11200_v1 }
 0xca8   :  { %9745 = vmatpush1.bf16.msra.mxu1 %v9744_v60  ;;  %v4533_v60 = vld [vmem:[#allocation15 + $0x200] sm:$0xff] }
 0xca9   :  { %9746 = vmatprep.subr.bf16.mxu1 %v11200_v1 }
 0xcac   :  { %9748 = vmatpush1.bf16.msra.mxu1 %v9747_v11 }
 0xcad   :  { %9779 = vmatprep.subr.bf16.mxu1 %v11200_v1 }
 0xd5a   :  { %v4142_v53 = vpop.f32.mrb[12].mxu1 }
 0xd5b   :  { %v10531_v56 = vadd.f32 %v8484_v51, %v4142_v53  ;;  %v4144_v57 = vpop.f32.mrb[13].mxu1 }
 0xd5d   :  { %v4147_v59 = vmax.f32 %v10531_v56, 0.0 }
 0xd5f   :  { %v4149_v7 = vcombine.high %v4147_v59, %v4147_v59  ;;  %v4150_v8 = vrot.slane %v4147_v59, 6  ;;  %v9759_v59 = vpack.c.bf16 %v4419_v50, %v4418_v63  ;;  %v4547_v63 = vld [vmem:[#allocation15 + $0x270] sm:$0xff]  ;;  %v4548_v50 = vld [vmem:[#allocation15 + $0x278] sm:$0xff] }
 0xd61   :  { %v4151_v62 = vrot.slane %v4149_v7, 6  ;;  %4152 = vrot.lane.b32.xlu0 %v4150_v8, %s11203_s1  ;;  %v4534_v7 = vld [vmem:[#allocation15 + $0x208] sm:$0xff] }
 0xd62   :  { %v9786_v11 = vpack.c.bf16 %v4534_v7, %v4533_v60  ;;  %v4645_v60 = vld [vmem:[#allocation15 + $0x2c8] sm:$0xff] }
 0xd63   :  { %4154 = vrot.lane.b32.xlu1 %v4151_v62, %s11203_s1 }
 0xdd3   :  { %v4153_v13 = vpop.permute.xlu0 %4152 }
 0xdd4   :  { %4158 = vst.msk [vmem:[#allocation2] sm:$0x3c] %vm1232_vm2, %v4153_v13  ;;  %v9762_v13 = vpack.c.bf16 %v4421_v10, %v4420_v9  ;;  %v4646_v9 = vld [vmem:[#allocation15 + $0x2d0] sm:$0xff]  ;;  %v4648_v10 = vld [vmem:[#allocation15 + $0x2e0] sm:$0xff] }
 0xdd5   :  { %v4155_v0 = vpop.permute.xlu1 %4154 }
 0xdd6   :  { %4159 = vst.msk [vmem:[#allocation2 + $0x10] sm:$0x3c] %vm1232_vm2, %v4155_v0  ;;  %v4535_v0 = vld [vmem:[#allocation15 + $0x210] sm:$0xff] }
 0xdd7   :  { %v9789_v21 = vpack.c.bf16 %v4536_v15, %v4535_v0  ;;  %v4651_v0 = vld [vmem:[#allocation15 + $0x2f8] sm:$0xff] }
 0xddb   :  { %v10801_v14 = vld [vmem:[#allocation2] ss:$8 sps:$4 sm:$0xee]   ;;  %v10803_v17 = vld [vmem:[#allocation2 + $0x4] ss:$8 sps:$4 sm:$0x11]  }
 0xddc   :  { %v8504_v25 = vrot.slane %v10801_v14, 9  ;;  %v4288_v26 = vrot.slane %v10803_v17, 5  ;;  %v10807_v32 = vld [vmem:[#allocation2] ss:$8 sps:$4 sm:$0xcc]   ;;  %v4538_v14 = vld [vmem:[#allocation15 + $0x228] sm:$0xff] }
 0xddd   :  { %v10800_v18 = vld [vmem:[#allocation2] ss:$16 sps:$4 sm:$0xff]   ;;  %v10806_v23 = vld [vmem:[#allocation2 + $0x14] ss:$8 sps:$4 sm:$0x11]   ;;  %v8507_v41 = vrot.slane %v10807_v32, 10 }
 0xdde   :  { %v10804_v22 = vld [vmem:[#allocation2 + $0x10] ss:$8 sps:$4 sm:$0xee]   ;;  %4268 = vmatmul.mubr.f32.vlgmr.msra.gmra.mrb[6].mxu0 %v10800_v18  ;;  %v4292_v31 = vrot.slane %v10806_v23, 5  ;;  %v4289_v37 = vsel %vm11725_vm12, %v8504_v25, %v4288_v26  ;;  %v4540_v23 = vld [vmem:[#allocation15 + $0x238] sm:$0xff]  ;;  %v4426_v25 = vld [vmem:[#allocation15 + $0x1b0] sm:$0xff] }
 0xddf   :  { %9751 = vmatpush1.bf16.msra.mxu0 %v9750_v12  ;;  %v8505_v29 = vrot.slane %v10804_v22, 9  ;;  %v10809_v34 = vld [vmem:[#allocation2 + $0x4] ss:$8 sps:$4 sm:$0x33]   ;;  %v4537_v12 = vld [vmem:[#allocation15 + $0x220] sm:$0xff]  ;;  %v4425_v18 = vld [vmem:[#allocation15 + $0x1a8] sm:$0xff] }
 0xde0   :  { %9752 = vmatprep.subr.bf16.mxu0 %v11200_v1  ;;  %v10810_v35 = vld [vmem:[#allocation2 + $0x10] ss:$8 sps:$4 sm:$0xcc]   ;;  %v10812_v40 = vld [vmem:[#allocation2 + $0x14] ss:$8 sps:$4 sm:$0x33]   ;;  %v9792_v19 = vpack.c.bf16 %v4538_v14, %v4537_v12 }
 0xde1   :  { %v4293_v39 = vsel %vm11725_vm12, %v8505_v29, %v4292_v31  ;;  %v4405_v45 = vrot.slane %v10809_v34, 6  ;;  %v8508_v48 = vrot.slane %v10810_v35, 10  ;;  %v10813_v49 = vld [vmem:[#allocation2] ss:$8 sps:$4 sm:$0x88]   ;;  %v4409_v51 = vrot.slane %v10812_v40, 6 }
 0xde2   :  { %v4316_v44 = vcombine.high %v4289_v37, %v4293_v39  ;;  %v4315_v46 = vcombine.low %v4289_v37, %v4293_v39  ;;  %v10815_v2 = vld [vmem:[#allocation2 + $0x4] ss:$8 sps:$4 sm:$0x77]   ;;  %v10816_v61 = vld [vmem:[#allocation2 + $0x10] ss:$8 sps:$4 sm:$0x88]  }
 0xde3   :  { %9754 = vmatpush1.bf16.msra.mxu0 %v9753_v28  ;;  %v10818_v4 = vld [vmem:[#allocation2 + $0x14] ss:$8 sps:$4 sm:$0x77]   ;;  %v12281_v5 = vsel %vm11748_vm15, %v8507_v41, %v4405_v45  ;;  %v12285_v52 = vsel %vm11748_vm15, %v8508_v48, %v4409_v51  ;;  %v8510_v53 = vrot.slane %v10813_v49, 11  ;;  %v4522_v54 = vrot.slane %v10815_v2, 7  ;;  %v4539_v22 = vld [vmem:[#allocation15 + $0x230] sm:$0xff]  ;;  %vm5018_vm15 = vmor %vm1007_vm0, %vm5017_vm14 }
 0xde4   :  { %8506 = vmatprep.mubr.msk.f32.mxu1 %vm538_vm5, %v4316_v44  ;;  %9755 = vmatprep.subr.bf16.mxu0 %v11200_v1  ;;  %v4433_v55 = vcombine.high %v12281_v5, %v12285_v52  ;;  %v8511_v56 = vrot.slane %v10816_v61, 11  ;;  %v4526_v57 = vrot.slane %v10818_v4, 7  ;;  %v4424_v17 = vld [vmem:[#allocation15 + $0x1a0] sm:$0xff]  ;;  %v4427_v26 = vld [vmem:[#allocation15 + $0x1b8] sm:$0xff]  ;;  %v9795_v27 = vpack.c.bf16 %v4540_v23, %v4539_v22  ;;  %v4542_v31 = vld [vmem:[#allocation15 + $0x248] sm:$0xff] }
 0xde5   :  { %4385 = vmatmul.mubr.f32.vlgmr.msra.gmra.mrb[14].mxu1 %v4315_v46  ;;  %v12293_v47 = vsel %vm11777_vm1, %v8510_v53, %v4522_v54  ;;  %v9768_v20 = vpack.c.bf16 %v4425_v18, %v4424_v17  ;;  %v9771_v28 = vpack.c.bf16 %v4427_v26, %v4426_v25  ;;  %v4541_v29 = vld [vmem:[#allocation15 + $0x240] sm:$0xff]  ;;  %v4543_v37 = vld [vmem:[#allocation15 + $0x250] sm:$0xff]  ;;  %v4544_v39 = vld [vmem:[#allocation15 + $0x258] sm:$0xff]  ;;  %v4432_v51 = vcombine.low %v12281_v5, %v12285_v52 }
 0xde6   :  { %9781 = vmatpush1.bf16.msra.mxu1 %v9780_v42  ;;  %8509 = vmatprep.mubr.msk.f32.mxu0 %vm538_vm5, %v4433_v55  ;;  %v12297_v8 = vsel %vm11777_vm1, %v8511_v56, %v4526_v57  ;;  %v4428_v32 = vld [vmem:[#allocation15 + $0x1c0] sm:$0xff]  ;;  %v9798_v34 = vpack.c.bf16 %v4542_v31, %v4541_v29  ;;  %v4430_v40 = vld [vmem:[#allocation15 + $0x1d0] sm:$0xff]  ;;  %v4431_v41 = vld [vmem:[#allocation15 + $0x1d8] sm:$0xff]  ;;  %v9801_v42 = vpack.c.bf16 %v4544_v39, %v4543_v37  ;;  %vm4777_vm12 = vcmask 483648  }
 0xde7   :  { %9757 = vmatpush1.bf16.msra.mxu0 %v9756_v3  ;;  %9782 = vmatprep.subr.bf16.mxu1 %v11200_v1  ;;  %v4550_v62 = vcombine.high %v12293_v47, %v12297_v8  ;;  %v9774_v35 = vpack.c.bf16 %v4429_v33, %v4428_v32  ;;  %v9777_v36 = vpack.c.bf16 %v4431_v41, %v4430_v40  ;;  %v4546_v44 = vld [vmem:[#allocation15 + $0x268] sm:$0xff]  ;;  %v4636_v45 = vld [vmem:[#allocation15 + $0x280] sm:$0xff]  ;;  %v4638_v2 = vld [vmem:[#allocation15 + $0x290] sm:$0xff]  ;;  %vm7831_vm0 = vcmask 1041409  }
 0xde8   :  { %9758 = vmatprep.subr.bf16.mxu0 %v11200_v1  ;;  %v4637_v48 = vld [vmem:[#allocation15 + $0x288] sm:$0xff]  ;;  %v9804_v46 = vpack.c.bf16 %v4546_v44, %v4545_v43  ;;  %v4639_v3 = vld [vmem:[#allocation15 + $0x298] sm:$0xff]  ;;  %v9807_v4 = vpack.c.bf16 %v4548_v50, %v4547_v63  ;;  %v4640_v54 = vld [vmem:[#allocation15 + $0x2a0] sm:$0xff]  ;;  %v4549_v5 = vcombine.low %v12293_v47, %v12297_v8 }
 0xde9   :  { %8512 = vmatprep.mubr.msk.f32.mxu1 %vm538_vm5, %v4550_v62  ;;  %v9810_v49 = vpack.c.bf16 %v4637_v48, %v4636_v45  ;;  %v10819_v61 = vld [vmem:[#allocation2 + $0xc] ss:$16 sps:$4 sm:$0xff]   ;;  %v9813_v53 = vpack.c.bf16 %v4639_v3, %v4638_v2  ;;  %v4642_v56 = vld [vmem:[#allocation15 + $0x2b0] sm:$0xff]  ;;  %v4902_v3 = vld [vmem:[#allocation16 + $0x40] sm:$0xff] }
 0xdea   :  { %9784 = vmatpush1.bf16.msra.mxu1 %v9783_v58  ;;  %v4641_v55 = vld [vmem:[#allocation15 + $0x2a8] sm:$0xff]  ;;  %v4643_v57 = vld [vmem:[#allocation15 + $0x2b8] sm:$0xff]  ;;  %v10820_v17 = vld [vmem:[#allocation2 + $0x4] ss:$16 sps:$4 sm:$0xff]  }
 0xdeb   :  { %9760 = vmatpush1.bf16.msra.mxu0 %v9759_v59  ;;  %9785 = vmatprep.subr.bf16.mxu1 %v11200_v1  ;;  %v9816_v52 = vpack.c.bf16 %v4641_v55, %v4640_v54  ;;  %v9819_v58 = vpack.c.bf16 %v4643_v57, %v4642_v56  ;;  %v4644_v59 = vld [vmem:[#allocation15 + $0x2c0] sm:$0xff]  ;;  %v4647_v47 = vld [vmem:[#allocation15 + $0x2d8] sm:$0xff]  ;;  %v4649_v62 = vld [vmem:[#allocation15 + $0x2e8] sm:$0xff] }
 0xdec   :  { %9761 = vmatprep.subr.bf16.mxu0 %v11200_v1  ;;  %v9822_v7 = vpack.c.bf16 %v4645_v60, %v4644_v59  ;;  %v9825_v8 = vpack.c.bf16 %v4647_v47, %v4646_v9  ;;  %v4655_v12 = vld [vmem:[#allocation15 + $0x318] sm:$0xff]  ;;  %v4895_v43 = vld [vmem:[#allocation16 + $0x8] sm:$0xff]  ;;  %v4896_v44 = vld [vmem:[#allocation16 + $0x10] sm:$0xff] }
 0xded   :  { %v4897_v48 = vld [vmem:[#allocation16 + $0x18] sm:$0xff]  ;;  %v4900_v50 = vld [vmem:[#allocation16 + $0x30] sm:$0xff]  ;;  %vm5019_vm1 = vmor %vm5018_vm15, %vm555_vm3  ;;  %vm5289_vm3 = vcmask 977217  }
 0xdee   :  { %9787 = vmatpush1.bf16.msra.mxu1 %v9786_v11  ;;  %v9828_v11 = vpack.c.bf16 %v4649_v62, %v4648_v10 }
 0xdef   :  { %9763 = vmatpush1.bf16.msra.mxu0 %v9762_v13  ;;  %9788 = vmatprep.subr.bf16.mxu1 %v11200_v1  ;;  %v4650_v13 = vld [vmem:[#allocation15 + $0x2f0] sm:$0xff] }
 0xdf0   :  { %9764 = vmatprep.subr.bf16.mxu0 %v11200_v1  ;;  %v9831_v15 = vpack.c.bf16 %v4651_v0, %v4650_v13 }
 0xdf2   :  { %9790 = vmatpush1.bf16.msra.mxu1 %v9789_v21  ;;  %v9834_v21 = vpack.c.bf16 %v4653_v16, %v4652_v24 }
 0xdf3   :  { %9766 = vmatpush1.bf16.msra.mxu0 %v9765_v6  ;;  %9791 = vmatprep.subr.bf16.mxu1 %v11200_v1  ;;  %v4654_v6 = vld [vmem:[#allocation15 + $0x310] sm:$0xff] }
 0xdf4   :  { %9767 = vmatprep.subr.bf16.mxu0 %v11200_v1  ;;  %v9837_v14 = vpack.c.bf16 %v4655_v12, %v4654_v6 }
 0xdf6   :  { %9793 = vmatpush1.bf16.msra.mxu1 %v9792_v19 }
 0xdf7   :  { %9769 = vmatpush1.bf16.msra.mxu0 %v9768_v20  ;;  %9794 = vmatprep.subr.bf16.mxu1 %v11200_v1  ;;  %v8500_v20 = vld [vmem:[%s12841_s0] ss:$0 sm:$0xff] }
 0xdf8   :  { %9770 = vmatprep.subr.bf16.mxu0 %v11200_v1 }
 0xdfa   :  { %9796 = vmatpush1.bf16.msra.mxu1 %v9795_v27 }
 0xdfb   :  { %9772 = vmatpush1.bf16.msra.mxu0 %v9771_v28  ;;  %9797 = vmatprep.subr.bf16.mxu1 %v11200_v1 }
 0xdfc   :  { %9773 = vmatprep.subr.bf16.mxu0 %v11200_v1 }
 0xdfe   :  { %9799 = vmatpush1.bf16.msra.mxu1 %v9798_v34 }
 0xdff   :  { %9775 = vmatpush1.bf16.msra.mxu0 %v9774_v35  ;;  %9800 = vmatprep.subr.bf16.mxu1 %v11200_v1 }
 0xe00   :  { %9776 = vmatprep.subr.bf16.mxu0 %v11200_v1 }
 0xe02   :  { %9802 = vmatpush1.bf16.msra.mxu1 %v9801_v42 }
 0xe03   :  { %9778 = vmatpush1.bf16.msra.mxu0 %v9777_v36  ;;  %9803 = vmatprep.subr.bf16.mxu1 %v11200_v1  ;;  %v4894_v36 = vld [vmem:[#allocation16] sm:$0xff] }
 0xe04   :  { %9809 = vmatprep.subr.bf16.mxu0 %v11200_v1  ;;  %v9840_v45 = vpack.c.bf16 %v4895_v43, %v4894_v36  ;;  %v4905_v36 = vld [vmem:[#allocation16 + $0x58] sm:$0xff] }
 0xe06   :  { %9805 = vmatpush1.bf16.msra.mxu1 %v9804_v46  ;;  %4502 = vmatmul.mubr.f32.vlgmr.msra.gmra.mrb[8].mxu0 %v4432_v51  ;;  %v9843_v46 = vpack.c.bf16 %v4897_v48, %v4896_v44  ;;  %v4901_v51 = vld [vmem:[#allocation16 + $0x38] sm:$0xff] }
 0xe07   :  { %9811 = vmatpush1.bf16.msra.mxu0 %v9810_v49  ;;  %9806 = vmatprep.subr.bf16.mxu1 %v11200_v1  ;;  %v4899_v49 = vld [vmem:[#allocation16 + $0x28] sm:$0xff]  ;;  %v9849_v2 = vpack.c.bf16 %v4901_v51, %v4900_v50 }
 0xe08   :  { %9812 = vmatprep.subr.bf16.mxu0 %v11200_v1  ;;  %8515 = vmatprep.mubr.msk.f32.mxu0 %vm538_vm5, %v10819_v61  ;;  %v4903_v61 = vld [vmem:[#allocation16 + $0x48] sm:$0xff] }
 0xe0a   :  { %9808 = vmatpush1.bf16.msra.mxu1 %v9807_v4  ;;  %v9852_v4 = vpack.c.bf16 %v4903_v61, %v4902_v3 }
 0xe0b   :  { %9814 = vmatpush1.bf16.msra.mxu0 %v9813_v53  ;;  %9839 = vmatprep.subr.bf16.mxu1 %v11200_v1 }
 0xe0c   :  { %9815 = vmatprep.subr.bf16.mxu0 %v11200_v1 }
 0xe0d   :  { %4619 = vmatmul.mubr.f32.vlgmr.msra.gmra.mrb[16].mxu1 %v4549_v5 }
 0xe0e   :  { %9841 = vmatpush1.bf16.msra.mxu1 %v9840_v45 }
 0xe0f   :  { %9817 = vmatpush1.bf16.msra.mxu0 %v9816_v52  ;;  %9842 = vmatprep.subr.bf16.mxu1 %v11200_v1 }
 0xe10   :  { %9818 = vmatprep.subr.bf16.mxu0 %v11200_v1 }
 0xe12   :  { %9844 = vmatpush1.bf16.msra.mxu1 %v9843_v46 }
 0xe13   :  { %9820 = vmatpush1.bf16.msra.mxu0 %v9819_v58  ;;  %9845 = vmatprep.subr.bf16.mxu1 %v11200_v1 }
 0xe14   :  { %9821 = vmatprep.subr.bf16.mxu0 %v11200_v1 }
 0xe17   :  { %9823 = vmatpush1.bf16.msra.mxu0 %v9822_v7 }
 0xe18   :  { %9824 = vmatprep.subr.bf16.mxu0 %v11200_v1 }
 0xe1b   :  { %9826 = vmatpush1.bf16.msra.mxu0 %v9825_v8 }
 0xe1c   :  { %9827 = vmatprep.subr.bf16.mxu0 %v11200_v1 }
 0xe1f   :  { %9829 = vmatpush1.bf16.msra.mxu0 %v9828_v11 }
 0xe20   :  { %9830 = vmatprep.subr.bf16.mxu0 %v11200_v1 }
 0xe23   :  { %9832 = vmatpush1.bf16.msra.mxu0 %v9831_v15 }
 0xe24   :  { %9833 = vmatprep.subr.bf16.mxu0 %v11200_v1 }
 0xe27   :  { %9835 = vmatpush1.bf16.msra.mxu0 %v9834_v21 }
 0xe28   :  { %9836 = vmatprep.subr.bf16.mxu0 %v11200_v1 }
 0xe2b   :  { %9838 = vmatpush1.bf16.msra.mxu0 %v9837_v14 }
 0xe2c   :  { %9929 = vmatprep.subr.bf16.mxu0 %v11200_v1 }
 0xe2e   :  { %4726 = vmatmul.mubr.f32.vlgmr.msra.gmra.mrb[10].mxu0 %v10820_v17 }
 0xeb1   :  { %v4269_v18 = vpop.f32.mrb[6].mxu0 }
 0xeb2   :  { %v4271_v19 = vpop.f32.mrb[7].mxu0  ;;  %v4273_v22 = vadd.f32 %v8500_v20, %v4269_v18 }
 0xeb8   :  { %v4386_v23 = vpop.f32.mrb[14].mxu1 }
 0xeb9   :  { %v4390_v25 = vadd.f32 %v4386_v23, %v4273_v22  ;;  %v4388_v26 = vpop.f32.mrb[15].mxu1 }
 0xed9   :  { %v4503_v27 = vpop.f32.mrb[8].mxu0 }
 0xeda   :  { %v4507_v28 = vadd.f32 %v4503_v27, %v4390_v25  ;;  %v4505_v29 = vpop.f32.mrb[9].mxu0 }
 0xee0   :  { %v4620_v31 = vpop.f32.mrb[16].mxu1 }
 0xee1   :  { %v4624_v32 = vadd.f32 %v4620_v31, %v4507_v28  ;;  %v4622_v33 = vpop.f32.mrb[17].mxu1 }
 0xf01   :  { %v4727_v34 = vpop.f32.mrb[10].mxu0 }
 0xf02   :  { %v4731_v35 = vadd.f32 %v4727_v34, %v4624_v32  ;;  %v4729_v37 = vpop.f32.mrb[11].mxu0 }
 0xf04   :  { %v4732_v39 = vadd.f32 %v4731_v35, %v12084_v38  ;;  %v4898_v38 = vld [vmem:[#allocation16 + $0x20] sm:$0xff] }
 0xf05   :  { %v9846_v63 = vpack.c.bf16 %v4899_v49, %v4898_v38  ;;  %v4906_v38 = vld [vmem:[#allocation16 + $0x60] sm:$0xff]  ;;  %v4907_v49 = vld [vmem:[#allocation16 + $0x68] sm:$0xff] }
 0xf06   :  { %v4735_v40 = vrot.slane %v4732_v39, 6  ;;  %v4734_v41 = vcombine.high %v4732_v39, %v4732_v39 }
 0xf07   :  { %9847 = vmatpush1.bf16.msra.mxu1 %v9846_v63 }
 0xf08   :  { %4737 = vrot.lane.b32.xlu0 %v4735_v40, %s11203_s1  ;;  %v4736_v42 = vrot.slane %v4734_v41, 6  ;;  %9848 = vmatprep.subr.bf16.mxu1 %v11200_v1 }
 0xf0a   :  { %4739 = vrot.lane.b32.xlu1 %v4736_v42, %s11203_s1  ;;  %v4904_v42 = vld [vmem:[#allocation16 + $0x50] sm:$0xff] }
 0xf0b   :  { %9850 = vmatpush1.bf16.msra.mxu1 %v9849_v2  ;;  %v9855_v2 = vpack.c.bf16 %v4905_v36, %v4904_v42 }
 0xf0c   :  { %9851 = vmatprep.subr.bf16.mxu1 %v11200_v1 }
 0xf0f   :  { %9853 = vmatpush1.bf16.msra.mxu1 %v9852_v4 }
 0xf10   :  { %9854 = vmatprep.subr.bf16.mxu1 %v11200_v1 }
 0xf13   :  { %9856 = vmatpush1.bf16.msra.mxu1 %v9855_v2  ;;  %v5035_v2 = vld [vmem:[#allocation16 + $0xc0] sm:$0xff] }
 0xf14   :  { %9857 = vmatprep.subr.bf16.mxu1 %v11200_v1 }
 0xf7a   :  { %v4738_v53 = vpop.permute.xlu0 %4737 }
 0xf7b   :  { %4743 = vst.msk [vmem:[#allocation2] sm:$0x3c] %vm1232_vm2, %v4738_v53  ;;  %v9858_v53 = vpack.c.bf16 %v4907_v49, %v4906_v38 }
 0xf7c   :  { %v4740_v54 = vpop.permute.xlu1 %4739 }
 0xf7d   :  { %4744 = vst.msk [vmem:[#allocation2 + $0x10] sm:$0x3c] %vm1232_vm2, %v4740_v54  ;;  %v4908_v54 = vld [vmem:[#allocation16 + $0x70] sm:$0xff]  ;;  %9859 = vmatpush1.bf16.msra.mxu1 %v9858_v53  ;;  %vm5020_vm2 = vcmask 1046534  }
 0xf7e   :  { %9860 = vmatprep.subr.bf16.mxu1 %v11200_v1  ;;  %vm12379_vm6 = vmor %vm5019_vm1, %vm5020_vm2 }
 0xf82   :  { %v4750_v55 = vld [vmem:[#allocation2] sm:$0xc]  ;;  %v4810_v52 = vld [vmem:[#allocation2] sm:$0x30] }
 0xf83   :  { %v4780_v5 = vld [vmem:[#allocation2] sm:$0xc]  ;;  %v4753_v56 = vsel %vm4752_vm8, %v4750_v55, -inf  ;;  %v4813_v58 = vsel %vm4812_vm10, %v4810_v52, -inf  ;;  %v4839_v59 = vld [vmem:[#allocation2] sm:$0x30] }
 0xf84   :  { %v4783_v57 = vsel %vm4782_vm9, %v4780_v5, -inf  ;;  %v4754_v60 = vrot.slane %v4753_v56, 4  ;;  %v4751_v7 = vld [vmem:[#allocation2 + $0x10] sm:$0xc]  ;;  %v4814_v62 = vrot.slane %v4813_v58, 4  ;;  %v4842_v13 = vsel %vm4841_vm11, %v4839_v59, -inf }
 0xf85   :  { %v4784_v9 = vrot.slane %v4783_v57, 4  ;;  %v4781_v47 = vld [vmem:[#allocation2 + $0x10] sm:$0xc]  ;;  %v4760_v8 = vsel %vm4752_vm8, %v4751_v7, -inf  ;;  %v4811_v11 = vld [vmem:[#allocation2 + $0x10] sm:$0x30] }
 0xf86   :  { %v4790_v10 = vsel %vm4782_vm9, %v4781_v47, -inf  ;;  %v4755_v0 = vmax.f32 %v4753_v56, %v4754_v60  ;;  %v4761_v15 = vrot.slane %v4760_v8, 4  ;;  %v4840_v21 = vld [vmem:[#allocation2 + $0x10] sm:$0x30]  ;;  %v4815_v6 = vmax.f32 %v4813_v58, %v4814_v62  ;;  %v4909_v55 = vld [vmem:[#allocation16 + $0x78] sm:$0xff]  ;;  %v4911_v7 = vld [vmem:[#allocation16 + $0x88] sm:$0xff] }
 0xf87   :  { %v4785_v24 = vmax.f32 %v4783_v57, %v4784_v9  ;;  %v4791_v16 = vrot.slane %v4790_v10, 4  ;;  %v4820_v12 = vsel %vm4812_vm10, %v4811_v11, -inf  ;;  %v4843_v14 = vrot.slane %v4842_v13, 4  ;;  %v4910_v60 = vld [vmem:[#allocation16 + $0x80] sm:$0xff]  ;;  %v4912_v62 = vld [vmem:[#allocation16 + $0x90] sm:$0xff]  ;;  %v4913_v11 = vld [vmem:[#allocation16 + $0x98] sm:$0xff] }
 0xf88   :  { %v4849_v17 = vsel %vm4841_vm11, %v4840_v21, -inf  ;;  %v4756_v18 = vrot.slane %v4755_v0, 2  ;;  %v4762_v19 = vmax.f32 %v4760_v8, %v4761_v15  ;;  %v4816_v23 = vrot.slane %v4815_v6, 2 }
 0xf89   :  { %v4786_v20 = vrot.slane %v4785_v24, 2  ;;  %v4792_v22 = vmax.f32 %v4790_v10, %v4791_v16  ;;  %v4821_v25 = vrot.slane %v4820_v12, 4  ;;  %v4844_v26 = vmax.f32 %v4842_v13, %v4843_v14 }
 0xf8a   :  { %v4850_v27 = vrot.slane %v4849_v17, 4  ;;  %v4757_v28 = vmax.f32 %v4755_v0, %v4756_v18  ;;  %v4763_v29 = vrot.slane %v4762_v19, 2  ;;  %v4817_v40 = vmax.f32 %v4815_v6, %v4816_v23 }
 0xf8b   :  { %v4787_v31 = vmax.f32 %v4785_v24, %v4786_v20  ;;  %v4793_v32 = vrot.slane %v4792_v22, 2  ;;  %v4822_v33 = vmax.f32 %v4820_v12, %v4821_v25  ;;  %v4845_v48 = vrot.slane %v4844_v26, 2 }
 0xf8c   :  { %v4851_v34 = vmax.f32 %v4849_v17, %v4850_v27  ;;  %v4758_v35 = vrot.slane %v4757_v28, 1  ;;  %v4764_v37 = vmax.f32 %v4762_v19, %v4763_v29  ;;  %v4818_v61 = vrot.slane %v4817_v40, 1 }
 0xf8d   :  { %v4794_v39 = vmax.f32 %v4792_v22, %v4793_v32  ;;  %v4823_v41 = vrot.slane %v4822_v33, 2  ;;  %v4788_v45 = vrot.slane %v4787_v31, 1  ;;  %v4846_v4 = vmax.f32 %v4844_v26, %v4845_v48 }
 0xf8e   :  { %v4759_v43 = vmax.f32 %v4757_v28, %v4758_v35  ;;  %v4765_v44 = vrot.slane %v4764_v37, 1  ;;  %v4852_v46 = vrot.slane %v4851_v34, 2  ;;  %v4819_v57 = vmax.f32 %v4817_v40, %v4818_v61  ;;  %v5031_v40 = vld [vmem:[#allocation16 + $0xa0] sm:$0xff] }
 0xf8f   :  { %v4795_v50 = vrot.slane %v4794_v39, 1  ;;  %v4824_v51 = vmax.f32 %v4822_v33, %v4823_v41  ;;  %v4789_v3 = vmax.f32 %v4787_v31, %v4788_v45  ;;  %v4847_v58 = vrot.slane %v4846_v4, 1  ;;  %v5032_v41 = vld [vmem:[#allocation16 + $0xa8] sm:$0xff]  ;;  %v5034_v45 = vld [vmem:[#allocation16 + $0xb8] sm:$0xff] }
 0xf90   :  { %4769 = vrot.lane.b32.xlu0 %v4759_v43, %s11206_s25  ;;  %v4766_v63 = vmax.f32 %v4764_v37, %v4765_v44  ;;  %v4853_v56 = vmax.f32 %v4851_v34, %v4852_v46  ;;  %v9861_v59 = vpack.c.bf16 %v4909_v55, %v4908_v54  ;;  %v9864_v10 = vpack.c.bf16 %v4911_v7, %v4910_v60  ;;  %v5033_v44 = vld [vmem:[#allocation16 + $0xb0] sm:$0xff]  ;;  %v5039_v7 = vld [vmem:[#allocation16 + $0xe0] sm:$0xff] }
 0xf91   :  { %v4796_v5 = vmax.f32 %v4794_v39, %v4795_v50  ;;  %v4825_v52 = vrot.slane %v4824_v51, 1  ;;  %v4848_v8 = vmax.f32 %v4846_v4, %v4847_v58  ;;  %v9867_v0 = vpack.c.bf16 %v4913_v11, %v4912_v62  ;;  %v5043_v11 = vld [vmem:[#allocation16 + $0x100] sm:$0xff] }
 0xf92   :  { %4771 = vrot.lane.b32.xlu1 %v4766_v63, %s11206_s25  ;;  %v4854_v47 = vrot.slane %v4853_v56, 1  ;;  %9862 = vmatpush1.bf16.msra.mxu1 %v9861_v59  ;;  %v11207_v18 = vmov 1983009808   ;;  %v4918_v20 = vlaneseq  ;;  %v9873_v49 = vpack.c.bf16 %v5034_v45, %v5033_v44  ;;  %v5165_v44 = vld [vmem:[#allocation16 + $0x190] sm:$0xff]  ;;  %v5166_v45 = vld [vmem:[#allocation16 + $0x198] sm:$0xff] }
 0xf93   :  { %v4826_v9 = vmax.f32 %v4824_v51, %v4825_v52  ;;  %9863 = vmatprep.subr.bf16.mxu1 %v11200_v1  ;;  %v4916_v19 = vunpack.c.l.s4 %v11207_v18  ;;  %v5037_v52 = vld [vmem:[#allocation16 + $0xd0] sm:$0xff]  ;;  %v5050_v18 = vld [vmem:[#allocation16 + $0x138] sm:$0xff]  ;;  %vm8188_vm8 = vcmask 982016   ;;  %vm11211_vm9 = vmmov 1  }
 0xf94   :  { %4799 = vrot.lane.b32.xlu0 %v4789_v3, %s11206_s25  ;;  %v4855_v13 = vmax.f32 %v4853_v56, %v4854_v47  ;;  %v4919_v28 = vshrl.u32 %v4918_v20, 7  ;;  %v5038_v56 = vld [vmem:[#allocation16 + $0xd8] sm:$0xff]  ;;  %vm10525_vm10 = vmpackc.low %vm4745_vm4, %vm11211_vm9  ;;  %vm8278_vm11 = vcmask 490496  }
 0xf95   :  { %v4917_v27 = vunpack.c.0.s8 %v4916_v19  ;;  %v9879_v59 = vpack.c.bf16 %v5038_v56, %v5037_v52  ;;  %v5319_v52 = vld [vmem:[#allocation18 + $0x8] sm:$0xff]  ;;  %v5320_v56 = vld [vmem:[#allocation18 + $0x10] sm:$0xff] }
 0xf96   :  { %4801 = vrot.lane.b32.xlu1 %v4796_v5, %s11206_s25  ;;  %9865 = vmatpush1.bf16.msra.mxu1 %v9864_v10  ;;  %v5042_v10 = vld [vmem:[#allocation16 + $0xf8] sm:$0xff] }
 0xf97   :  { %9866 = vmatprep.subr.bf16.mxu1 %v11200_v1  ;;  %v12372_v35 = vsub.s32 %v4917_v27, %v4919_v28  ;;  %v5157_v28 = vld [vmem:[#allocation16 + $0x150] sm:$0xff] }
 0xf98   :  { %4829 = vrot.lane.b32.xlu0 %v4819_v57, %s11206_s25 }
 0xf9a   :  { %4831 = vrot.lane.b32.xlu1 %v4826_v9, %s11206_s25  ;;  %9868 = vmatpush1.bf16.msra.mxu1 %v9867_v0 }
 0xf9b   :  { %9869 = vmatprep.subr.bf16.mxu1 %v11200_v1 }
 0xf9c   :  { %4858 = vrot.lane.b32.xlu0 %v4848_v8, %s11206_s25 }
 0xf9e   :  { %4860 = vrot.lane.b32.xlu1 %v4855_v13, %s11206_s25 }
0x1002   :  { %v4770_v15 = vpop.permute.xlu0 %4769 }
0x1003   :  { %v4775_v24 = vmax.f32 %v4759_v43, %v4770_v15  ;;  %v9870_v43 = vpack.c.bf16 %v5032_v41, %v5031_v40  ;;  %v5045_v15 = vld [vmem:[#allocation16 + $0x110] sm:$0xff]  ;;  %v5162_v40 = vld [vmem:[#allocation16 + $0x178] sm:$0xff] }
0x1004   :  { %v4772_v16 = vpop.permute.xlu1 %4771 }
0x1005   :  { %4778 = vst.msk [vmem:[#allocation3 + $0x1] sm:$0x1] %vm4777_vm12, %v4775_v24  ;;  %v4776_v21 = vmax.f32 %v4766_v63, %v4772_v16  ;;  %v5046_v24 = vld [vmem:[#allocation16 + $0x118] sm:$0xff] }
0x1006   :  { %v4800_v6 = vpop.permute.xlu0 %4799  ;;  %v9891_v16 = vpack.c.bf16 %v5046_v24, %v5045_v15  ;;  %v5329_v15 = vld [vmem:[#allocation18 + $0x58] sm:$0xff] }
0x1007   :  { %4779 = vst.msk [vmem:[#allocation3 + $0x9] sm:$0x1] %vm4777_vm12, %v4776_v21  ;;  %v4805_v12 = vmax.f32 %v4789_v3, %v4800_v6  ;;  %v5036_v3 = vld [vmem:[#allocation16 + $0xc8] sm:$0xff]  ;;  %v5047_v21 = vld [vmem:[#allocation16 + $0x120] sm:$0xff] }
0x1008   :  { %v4802_v14 = vpop.permute.xlu1 %4801  ;;  %v9876_v54 = vpack.c.bf16 %v5036_v3, %v5035_v2  ;;  %v5048_v6 = vld [vmem:[#allocation16 + $0x128] sm:$0xff]  ;;  %v5171_v3 = vld [vmem:[#allocation16 + $0x1c0] sm:$0xff] }
0x1009   :  { %4808 = vst.msk [vmem:[#allocation3 + $0x1] sm:$0x1] %vm4807_vm13, %v4805_v12  ;;  %v4806_v17 = vmax.f32 %v4796_v5, %v4802_v14  ;;  %v9894_v14 = vpack.c.bf16 %v5048_v6, %v5047_v21  ;;  %v5331_v21 = vld [vmem:[#allocation18 + $0x68] sm:$0xff] }
0x100a   :  { %v4830_v22 = vpop.permute.xlu0 %4829 }
0x100b   :  { %4809 = vst.msk [vmem:[#allocation3 + $0x9] sm:$0x1] %vm4807_vm13, %v4806_v17  ;;  %v4835_v23 = vmax.f32 %v4819_v57, %v4830_v22  ;;  %v5049_v17 = vld [vmem:[#allocation16 + $0x130] sm:$0xff] }
0x100c   :  { %v4832_v25 = vpop.permute.xlu1 %4831  ;;  %v9897_v22 = vpack.c.bf16 %v5050_v18, %v5049_v17  ;;  %v5333_v17 = vld [vmem:[#allocation18 + $0x78] sm:$0xff] }
0x100d   :  { %4837 = vst.msk [vmem:[#allocation3 + $0x2] sm:$0x1] %vm4777_vm12, %v4835_v23  ;;  %v4836_v26 = vmax.f32 %v4826_v9, %v4832_v25  ;;  %v5040_v9 = vld [vmem:[#allocation16 + $0xe8] sm:$0xff]  ;;  %v5155_v23 = vld [vmem:[#allocation16 + $0x140] sm:$0xff] }
0x100e   :  { %v4859_v29 = vpop.permute.xlu0 %4858  ;;  %v9882_v47 = vpack.c.bf16 %v5040_v9, %v5039_v7  ;;  %v5156_v25 = vld [vmem:[#allocation16 + $0x148] sm:$0xff] }
0x100f   :  { %4838 = vst.msk [vmem:[#allocation3 + $0xa] sm:$0x1] %vm4777_vm12, %v4836_v26  ;;  %v4864_v31 = vmax.f32 %v4848_v8, %v4859_v29  ;;  %v5041_v8 = vld [vmem:[#allocation16 + $0xf0] sm:$0xff]  ;;  %v9900_v27 = vpack.c.bf16 %v5156_v25, %v5155_v23  ;;  %v5158_v29 = vld [vmem:[#allocation16 + $0x158] sm:$0xff]  ;;  %v5323_v7 = vld [vmem:[#allocation18 + $0x28] sm:$0xff]  ;;  %vm8355_vm12 = vcmask 1024  }
0x1010   :  { %v4861_v32 = vpop.permute.xlu1 %4860  ;;  %v8517_v34 = vld.sshfl [vmem:[#allocation3] sm:$0xf pattern:$0x76325410]  ;;  %v9885_v62 = vpack.c.bf16 %v5042_v10, %v5041_v8  ;;  %v5325_v8 = vld [vmem:[#allocation18 + $0x38] sm:$0xff] }
0x1011   :  { %4866 = vst.msk [vmem:[#allocation3 + $0x2] sm:$0x1] %vm4807_vm13, %v4864_v31  ;;  %v4865_v33 = vmax.f32 %v4855_v13, %v4861_v32  ;;  %v5044_v13 = vld [vmem:[#allocation16 + $0x108] sm:$0xff]  ;;  %v9903_v32 = vpack.c.bf16 %v5158_v29, %v5157_v28  ;;  %v5336_v28 = vld [vmem:[#allocation18 + $0x90] sm:$0xff]  ;;  %v5337_v29 = vld [vmem:[#allocation18 + $0x98] sm:$0xff] }
0x1012   :  { %v8518_v37 = vld.sshfl [vmem:[#allocation3 + $0x8] sm:$0xf pattern:$0x76325410]  ;;  %v9888_v0 = vpack.c.bf16 %v5044_v13, %v5043_v11  ;;  %v5327_v11 = vld [vmem:[#allocation18 + $0x48] sm:$0xff] }
0x1013   :  { %4867 = vst.msk [vmem:[#allocation3 + $0xa] sm:$0x1] %vm4807_vm13, %v4865_v33  ;;  %v4914_v39 = vcombine.low %v8517_v34, %v8518_v37  ;;  %v5159_v33 = vld [vmem:[#allocation16 + $0x160] sm:$0xff]  ;;  %v5160_v34 = vld [vmem:[#allocation16 + $0x168] sm:$0xff] }
0x1014   :  { %v9906_v37 = vpack.c.bf16 %v5160_v34, %v5159_v33 }
0x1015   :  { %v4921_v42 = vrot.slane %v4914_v39, %v12372_v35  ;;  %v5161_v39 = vld [vmem:[#allocation16 + $0x170] sm:$0xff] }
0x1016   :  { %v9909_v41 = vpack.c.bf16 %v5162_v40, %v5161_v39 }
0x1017   :  { %v4922_v36 = vcombine.high %v4921_v42, %v4921_v42 }
0x1018   :  { %v8520_v48 = vld.sshfl [vmem:[#allocation3] sm:$0x5a pattern:$0x76325410] }
0x1019   :  { %8519 = vmatprep.mubr.msk.f32.mxu1 %vm538_vm5, %v4922_v36  ;;  %v5008_v46 = vcombine.high %v8520_v48, %v8520_v48  ;;  %v8522_v61 = vrot.slane %v8520_v48, 9  ;;  %v8525_v19 = vld.sshfl [vmem:[#allocation3] sm:$0xf0 pattern:$0x76325410]  ;;  %v5164_v36 = vld [vmem:[#allocation16 + $0x188] sm:$0xff]  ;;  %v9915_v48 = vpack.c.bf16 %v5166_v45, %v5165_v44 }
0x101a   :  { %4991 = vmatmul.mubr.f32.vlgmr.msra.gmra.mrb[18].mxu1 %v4921_v42  ;;  %v8521_v38 = vld.sshfl [vmem:[#allocation3 + $0x8] sm:$0x5a pattern:$0x76325410]  ;;  %v5163_v42 = vld [vmem:[#allocation16 + $0x180] sm:$0xff] }
0x101b   :  { %9871 = vmatpush1.bf16.msra.mxu1 %v9870_v43  ;;  %v5016_v63 = vcombine.high %v8521_v38, %v8521_v38  ;;  %v5024_v50 = vrot.slane %v5008_v46, 7  ;;  %v8523_v4 = vrot.slane %v8521_v38, 9  ;;  %v8526_v12 = vld.sshfl [vmem:[#allocation3 + $0x8] sm:$0xf0 pattern:$0x76325410]  ;;  %v9912_v43 = vpack.c.bf16 %v5164_v36, %v5163_v42 }
0x101c   :  { %9872 = vmatprep.subr.bf16.mxu1 %v11200_v1  ;;  %v8527_v20 = vcombine.high %v8525_v19, %v8526_v12  ;;  %v5167_v46 = vld [vmem:[#allocation16 + $0x1a0] sm:$0xff]  ;;  %v5168_v38 = vld [vmem:[#allocation16 + $0x1a8] sm:$0xff] }
0x101d   :  { %v5028_v53 = vrot.slane %v5016_v63, 7  ;;  %v5025_v55 = vsel %vm12379_vm6, %v8522_v61, %v5024_v50  ;;  %v5169_v63 = vld [vmem:[#allocation16 + $0x1b0] sm:$0xff]  ;;  %v5170_v50 = vld [vmem:[#allocation16 + $0x1b8] sm:$0xff]  ;;  %v5172_v61 = vld [vmem:[#allocation16 + $0x1c8] sm:$0xff] }
0x101e   :  { %v5182_v26 = vrot.slane %v8527_v20, %v12372_v35  ;;  %v9921_v2 = vpack.c.bf16 %v5170_v50, %v5169_v63  ;;  %v8516_v12 = vld [vmem:[%s12844_s19] ss:$0 sm:$0xff]  ;;  %v5334_v20 = vld [vmem:[#allocation18 + $0x80] sm:$0xff] }
0x101f   :  { %9874 = vmatpush1.bf16.msra.mxu1 %v9873_v49  ;;  %v5029_v5 = vsel %vm12379_vm6, %v8523_v4, %v5028_v53  ;;  %v9918_v49 = vpack.c.bf16 %v5168_v38, %v5167_v46  ;;  %v9924_v4 = vpack.c.bf16 %v5172_v61, %v5171_v3  ;;  %v5173_v53 = vld [vmem:[#allocation16 + $0x1d0] sm:$0xff]  ;;  %v5450_v46 = vld [vmem:[#allocation18 + $0xa0] sm:$0xff]  ;;  %v5451_v38 = vld [vmem:[#allocation18 + $0xa8] sm:$0xff] }
0x1020   :  { %9875 = vmatprep.subr.bf16.mxu1 %v11200_v1  ;;  %v5051_v57 = vcombine.low %v5025_v55, %v5029_v5  ;;  %v5183_v31 = vcombine.high %v5182_v26, %v5182_v26  ;;  %v5318_v5 = vld [vmem:[#allocation18] sm:$0xff] }
0x1022   :  { %v5058_v58 = vrot.slane %v5051_v57, %v12372_v35  ;;  %v9930_v57 = vpack.c.bf16 %v5319_v52, %v5318_v5 }
0x1023   :  { %9877 = vmatpush1.bf16.msra.mxu1 %v9876_v54  ;;  %v5174_v54 = vld [vmem:[#allocation16 + $0x1d8] sm:$0xff] }
0x1024   :  { %9878 = vmatprep.subr.bf16.mxu1 %v11200_v1  ;;  %v5059_v60 = vcombine.high %v5058_v58, %v5058_v58  ;;  %v9927_v55 = vpack.c.bf16 %v5174_v54, %v5173_v53  ;;  %9931 = vmatpush1.bf16.msra.mxu0 %v9930_v57  ;;  %v9960_v53 = vpack.c.bf16 %v5451_v38, %v5450_v46  ;;  %v5452_v54 = vld [vmem:[#allocation18 + $0xb0] sm:$0xff]  ;;  %v5582_v46 = vld [vmem:[#allocation18 + $0x180] sm:$0xff]  ;;  %v5583_v38 = vld [vmem:[#allocation18 + $0x188] sm:$0xff] }
0x1025   :  { %9932 = vmatprep.subr.bf16.mxu0 %v11200_v1 }
0x1026   :  { %8524 = vmatprep.mubr.msk.f32.mxu1 %vm538_vm5, %v5059_v60  ;;  %v5322_v60 = vld [vmem:[#allocation18 + $0x20] sm:$0xff] }
0x1027   :  { %9880 = vmatpush1.bf16.msra.mxu1 %v9879_v59  ;;  %v9936_v9 = vpack.c.bf16 %v5323_v7, %v5322_v60  ;;  %v5455_v60 = vld [vmem:[#allocation18 + $0xc8] sm:$0xff] }
0x1028   :  { %9881 = vmatprep.subr.bf16.mxu1 %v11200_v1 }
0x102b   :  { %9883 = vmatpush1.bf16.msra.mxu1 %v9882_v47  ;;  %v5324_v47 = vld [vmem:[#allocation18 + $0x30] sm:$0xff] }
0x102c   :  { %9884 = vmatprep.subr.bf16.mxu1 %v11200_v1  ;;  %v9939_v10 = vpack.c.bf16 %v5325_v8, %v5324_v47  ;;  %v5456_v47 = vld [vmem:[#allocation18 + $0xd0] sm:$0xff]  ;;  %v5457_v8 = vld [vmem:[#allocation18 + $0xd8] sm:$0xff] }
0x102f   :  { %9886 = vmatpush1.bf16.msra.mxu1 %v9885_v62  ;;  %v5326_v62 = vld [vmem:[#allocation18 + $0x40] sm:$0xff] }
0x1030   :  { %9887 = vmatprep.subr.bf16.mxu1 %v11200_v1  ;;  %v9942_v13 = vpack.c.bf16 %v5327_v11, %v5326_v62  ;;  %v5458_v62 = vld [vmem:[#allocation18 + $0xe0] sm:$0xff]  ;;  %v5459_v11 = vld [vmem:[#allocation18 + $0xe8] sm:$0xff] }
0x1033   :  { %9889 = vmatpush1.bf16.msra.mxu1 %v9888_v0  ;;  %v5328_v0 = vld [vmem:[#allocation18 + $0x50] sm:$0xff] }
0x1034   :  { %9890 = vmatprep.subr.bf16.mxu1 %v11200_v1  ;;  %v9945_v24 = vpack.c.bf16 %v5329_v15, %v5328_v0  ;;  %v5460_v0 = vld [vmem:[#allocation18 + $0xf0] sm:$0xff]  ;;  %v5461_v15 = vld [vmem:[#allocation18 + $0xf8] sm:$0xff] }
0x1037   :  { %9892 = vmatpush1.bf16.msra.mxu1 %v9891_v16  ;;  %v5330_v16 = vld [vmem:[#allocation18 + $0x60] sm:$0xff] }
0x1038   :  { %9893 = vmatprep.subr.bf16.mxu1 %v11200_v1  ;;  %v9948_v6 = vpack.c.bf16 %v5331_v21, %v5330_v16  ;;  %v5462_v16 = vld [vmem:[#allocation18 + $0x100] sm:$0xff]  ;;  %v5463_v21 = vld [vmem:[#allocation18 + $0x108] sm:$0xff] }
0x103b   :  { %9895 = vmatpush1.bf16.msra.mxu1 %v9894_v14  ;;  %v5332_v14 = vld [vmem:[#allocation18 + $0x70] sm:$0xff] }
0x103c   :  { %9896 = vmatprep.subr.bf16.mxu1 %v11200_v1  ;;  %v9951_v18 = vpack.c.bf16 %v5333_v17, %v5332_v14  ;;  %v5465_v14 = vld [vmem:[#allocation18 + $0x118] sm:$0xff] }
0x103f   :  { %9898 = vmatpush1.bf16.msra.mxu1 %v9897_v22  ;;  %v5335_v22 = vld [vmem:[#allocation18 + $0x88] sm:$0xff] }
0x1040   :  { %9899 = vmatprep.subr.bf16.mxu1 %v11200_v1 }
0x1042   :  { %5128 = vmatmul.mubr.f32.vlgmr.msra.gmra.mrb[18].mxu1 %v5058_v58  ;;  %v5321_v58 = vld [vmem:[#allocation18 + $0x18] sm:$0xff] }
0x1043   :  { %9901 = vmatpush1.bf16.msra.mxu1 %v9900_v27  ;;  %8528 = vmatprep.mubr.msk.f32.mxu1 %vm538_vm5, %v5183_v31  ;;  %v9933_v59 = vpack.c.bf16 %v5321_v58, %v5320_v56  ;;  %v9954_v27 = vpack.c.bf16 %v5335_v22, %v5334_v20 }
0x1044   :  { %9902 = vmatprep.subr.bf16.mxu1 %v11200_v1 }
0x1045   :  { %9934 = vmatpush1.bf16.msra.mxu0 %v9933_v59  ;;  %v5454_v59 = vld [vmem:[#allocation18 + $0xc0] sm:$0xff] }
0x1046   :  { %9935 = vmatprep.subr.bf16.mxu0 %v11200_v1 }
0x1047   :  { %9904 = vmatpush1.bf16.msra.mxu1 %v9903_v32 }
0x1048   :  { %9905 = vmatprep.subr.bf16.mxu1 %v11200_v1 }
0x1049   :  { %9937 = vmatpush1.bf16.msra.mxu0 %v9936_v9  ;;  %v9966_v9 = vpack.c.bf16 %v5455_v60, %v5454_v59  ;;  %v5737_v60 = vld [vmem:[#allocation19] sm:$0xff] }
0x104a   :  { %9938 = vmatprep.subr.bf16.mxu0 %v11200_v1 }
0x104b   :  { %9907 = vmatpush1.bf16.msra.mxu1 %v9906_v37  ;;  %v9957_v37 = vpack.c.bf16 %v5337_v29, %v5336_v28 }
0x104c   :  { %9908 = vmatprep.subr.bf16.mxu1 %v11200_v1 }
0x104d   :  { %9940 = vmatpush1.bf16.msra.mxu0 %v9939_v10  ;;  %v9969_v10 = vpack.c.bf16 %v5457_v8, %v5456_v47  ;;  %v5740_v8 = vld [vmem:[#allocation19 + $0x18] sm:$0xff] }
0x104e   :  { %9941 = vmatprep.subr.bf16.mxu0 %v11200_v1 }
0x104f   :  { %9910 = vmatpush1.bf16.msra.mxu1 %v9909_v41 }
0x1050   :  { %9911 = vmatprep.subr.bf16.mxu1 %v11200_v1 }
0x1051   :  { %9943 = vmatpush1.bf16.msra.mxu0 %v9942_v13  ;;  %v9972_v13 = vpack.c.bf16 %v5459_v11, %v5458_v62  ;;  %v5741_v62 = vld [vmem:[#allocation19 + $0x20] sm:$0xff]  ;;  %v5742_v11 = vld [vmem:[#allocation19 + $0x28] sm:$0xff] }
0x1052   :  { %9944 = vmatprep.subr.bf16.mxu0 %v11200_v1 }
0x1053   :  { %9913 = vmatpush1.bf16.msra.mxu1 %v9912_v43 }
0x1054   :  { %9914 = vmatprep.subr.bf16.mxu1 %v11200_v1 }
0x1055   :  { %9946 = vmatpush1.bf16.msra.mxu0 %v9945_v24  ;;  %v9975_v24 = vpack.c.bf16 %v5461_v15, %v5460_v0  ;;  %v5743_v0 = vld [vmem:[#allocation19 + $0x30] sm:$0xff]  ;;  %v5744_v15 = vld [vmem:[#allocation19 + $0x38] sm:$0xff] }
0x1056   :  { %9947 = vmatprep.subr.bf16.mxu0 %v11200_v1 }
0x1057   :  { %9916 = vmatpush1.bf16.msra.mxu1 %v9915_v48 }
0x1058   :  { %9917 = vmatprep.subr.bf16.mxu1 %v11200_v1 }
0x1059   :  { %9949 = vmatpush1.bf16.msra.mxu0 %v9948_v6  ;;  %v9978_v6 = vpack.c.bf16 %v5463_v21, %v5462_v16  ;;  %v5745_v16 = vld [vmem:[#allocation19 + $0x40] sm:$0xff]  ;;  %v5746_v21 = vld [vmem:[#allocation19 + $0x48] sm:$0xff] }
0x105a   :  { %9950 = vmatprep.subr.bf16.mxu0 %v11200_v1 }
0x105b   :  { %9919 = vmatpush1.bf16.msra.mxu1 %v9918_v49 }
0x105c   :  { %9920 = vmatprep.subr.bf16.mxu1 %v11200_v1 }
0x105d   :  { %9952 = vmatpush1.bf16.msra.mxu0 %v9951_v18  ;;  %v5466_v18 = vld [vmem:[#allocation18 + $0x120] sm:$0xff] }
0x105e   :  { %9953 = vmatprep.subr.bf16.mxu0 %v11200_v1 }
0x105f   :  { %9922 = vmatpush1.bf16.msra.mxu1 %v9921_v2 }
0x1060   :  { %9923 = vmatprep.subr.bf16.mxu1 %v11200_v1 }
0x1061   :  { %9955 = vmatpush1.bf16.msra.mxu0 %v9954_v27 }
0x1062   :  { %9956 = vmatprep.subr.bf16.mxu0 %v11200_v1 }
0x1063   :  { %9925 = vmatpush1.bf16.msra.mxu1 %v9924_v4 }
0x1064   :  { %9926 = vmatprep.subr.bf16.mxu1 %v11200_v1 }
0x1065   :  { %9958 = vmatpush1.bf16.msra.mxu0 %v9957_v37  ;;  %v5576_v37 = vld [vmem:[#allocation18 + $0x150] sm:$0xff] }
0x1066   :  { %9959 = vmatprep.subr.bf16.mxu0 %v11200_v1 }
0x1067   :  { %9928 = vmatpush1.bf16.msra.mxu1 %v9927_v55  ;;  %v5453_v55 = vld [vmem:[#allocation18 + $0xb8] sm:$0xff] }
0x1068   :  { %10019 = vmatprep.subr.bf16.mxu1 %v11200_v1  ;;  %v9963_v57 = vpack.c.bf16 %v5453_v55, %v5452_v54  ;;  %v5589_v54 = vld [vmem:[#allocation18 + $0x1b8] sm:$0xff] }
0x106a   :  { %5252 = vmatmul.mubr.f32.vlgmr.msra.gmra.mrb[18].mxu1 %v5182_v26 }
0x113d   :  { %v5253_v19 = vpop.f32.mrb[18].mxu1 }
0x113e   :  { %v12419_v23 = vadd.f32 %v8516_v12, %v5253_v19  ;;  %v5255_v25 = vpop.f32.mrb[19].mxu1  ;;  %v5464_v12 = vld [vmem:[#allocation18 + $0x110] sm:$0xff]  ;;  %v5467_v19 = vld [vmem:[#allocation18 + $0x128] sm:$0xff] }
0x113f   :  { %v9981_v17 = vpack.c.bf16 %v5465_v14, %v5464_v12  ;;  %v9984_v22 = vpack.c.bf16 %v5467_v19, %v5466_v18  ;;  %v5468_v25 = vld [vmem:[#allocation18 + $0x130] sm:$0xff]  ;;  %v5748_v14 = vld [vmem:[#allocation19 + $0x58] sm:$0xff]  ;;  %v8529_v18 = vld [vmem:[%s12845_s7] ss:$0 sm:$0xff] }
0x1140   :  { %v5265_v26 = vrot.slane %v12419_v23, %v12372_v35  ;;  %v5747_v12 = vld [vmem:[#allocation19 + $0x50] sm:$0xff]  ;;  %v5749_v19 = vld [vmem:[#allocation19 + $0x60] sm:$0xff] }
0x1142   :  { %v5266_v31 = vcombine.high %v5265_v26, %v5265_v26  ;;  %v5273_v32 = vrot.slane %v5265_v26, %v12372_v35  ;;  %v5469_v26 = vld [vmem:[#allocation18 + $0x138] sm:$0xff] }
0x1143   :  { %v9987_v29 = vpack.c.bf16 %v5469_v26, %v5468_v25  ;;  %v5751_v26 = vld [vmem:[#allocation19 + $0x70] sm:$0xff] }
0x1144   :  { %v5281_v33 = vrot.slane %v5273_v32, 7  ;;  %v5280_v34 = vrot.slane %v5266_v31, %v12372_v35  ;;  %v5574_v31 = vld [vmem:[#allocation18 + $0x140] sm:$0xff]  ;;  %v5575_v32 = vld [vmem:[#allocation18 + $0x148] sm:$0xff] }
0x1146   :  { %5283 = vrot.lane.b32.xlu0 %v5281_v33, %s11203_s1  ;;  %v5282_v39 = vrot.slane %v5280_v34, 7  ;;  %v9990_v34 = vpack.c.bf16 %v5575_v32, %v5574_v31  ;;  %v5753_v32 = vld [vmem:[#allocation19 + $0x80] sm:$0xff] }
0x1148   :  { %5285 = vrot.lane.b32.xlu1 %v5282_v39, %s11203_s1  ;;  %v5577_v39 = vld [vmem:[#allocation18 + $0x158] sm:$0xff] }
0x11b8   :  { %v5284_v40 = vpop.permute.xlu0 %5283 }
0x11b9   :  { %5290 = vst.msk [vmem:[#allocation3] sm:$0x6] %vm5289_vm3, %v5284_v40 }
0x11ba   :  { %v5286_v41 = vpop.permute.xlu1 %5285 }
0x11bb   :  { %5291 = vst.msk [vmem:[#allocation3 + $0x8] sm:$0x6] %vm5289_vm3, %v5286_v41  ;;  %v9993_v41 = vpack.c.bf16 %v5577_v39, %v5576_v37 }
0x11c0   :  { %v8530_v42 = vld.sshfl [vmem:[#allocation3] sm:$0xf pattern:$0x76325410] }
0x11c1   :  { %v8533_v36 = vld.sshfl [vmem:[#allocation3] sm:$0x5a pattern:$0x76325410] }
0x11c2   :  { %v8531_v43 = vld.sshfl [vmem:[#allocation3 + $0x8] sm:$0xf pattern:$0x76325410]  ;;  %v5432_v44 = vcombine.high %v8533_v36, %v8533_v36  ;;  %v8535_v2 = vrot.slane %v8533_v36, 9  ;;  %v5579_v36 = vld [vmem:[#allocation18 + $0x168] sm:$0xff] }
0x11c3   :  { %v5338_v45 = vcombine.low %v8530_v42, %v8531_v43  ;;  %v8534_v48 = vld.sshfl [vmem:[#allocation3 + $0x8] sm:$0x5a pattern:$0x76325410]  ;;  %v5578_v42 = vld [vmem:[#allocation18 + $0x160] sm:$0xff] }
0x11c4   :  { %v5440_v49 = vcombine.high %v8534_v48, %v8534_v48  ;;  %v5443_v63 = vrot.slane %v5432_v44, 7  ;;  %v8536_v3 = vrot.slane %v8534_v48, 9  ;;  %v8539_v20 = vld.sshfl [vmem:[#allocation3 + $0x8] sm:$0xf0 pattern:$0x76325410]  ;;  %v9996_v43 = vpack.c.bf16 %v5579_v36, %v5578_v42 }
0x11c5   :  { %v5345_v50 = vrot.slane %v5338_v45, %v12372_v35  ;;  %v8538_v27 = vld.sshfl [vmem:[#allocation3] sm:$0xf0 pattern:$0x76325410]  ;;  %v5581_v45 = vld [vmem:[#allocation18 + $0x178] sm:$0xff] }
0x11c6   :  { %v5447_v61 = vrot.slane %v5440_v49, 7  ;;  %v5444_v5 = vsel %vm12379_vm6, %v8535_v2, %v5443_v63  ;;  %v8540_v28 = vcombine.high %v8538_v27, %v8539_v20  ;;  %v5580_v44 = vld [vmem:[#allocation18 + $0x170] sm:$0xff]  ;;  %v10002_v49 = vpack.c.bf16 %v5583_v38, %v5582_v46  ;;  %v5750_v20 = vld [vmem:[#allocation19 + $0x68] sm:$0xff]  ;;  %v5752_v27 = vld [vmem:[#allocation19 + $0x78] sm:$0xff] }
0x11c7   :  { %v5346_v4 = vcombine.high %v5345_v50, %v5345_v50  ;;  %v9999_v48 = vpack.c.bf16 %v5581_v45, %v5580_v44  ;;  %v5584_v63 = vld [vmem:[#allocation18 + $0x190] sm:$0xff]  ;;  %v10041_v31 = vpack.c.bf16 %v5752_v27, %v5751_v26  ;;  %v5884_v27 = vld [vmem:[#allocation19 + $0x118] sm:$0xff] }
0x11c8   :  { %v5448_v52 = vsel %vm12379_vm6, %v8536_v3, %v5447_v61  ;;  %v5601_v33 = vrot.slane %v8540_v28, %v12372_v35  ;;  %v5586_v3 = vld [vmem:[#allocation18 + $0x1a0] sm:$0xff]  ;;  %v5587_v61 = vld [vmem:[#allocation18 + $0x1a8] sm:$0xff]  ;;  %v5883_v26 = vld [vmem:[#allocation19 + $0x110] sm:$0xff] }
0x11c9   :  { %8532 = vmatprep.mubr.msk.f32.mxu0 %vm538_vm5, %v5346_v4  ;;  %v5470_v56 = vcombine.low %v5444_v5, %v5448_v52  ;;  %v10008_v4 = vpack.c.bf16 %v5587_v61, %v5586_v3  ;;  %v5590_v5 = vld [vmem:[#allocation18 + $0x1c0] sm:$0xff]  ;;  %v5591_v52 = vld [vmem:[#allocation18 + $0x1c8] sm:$0xff] }
0x11ca   :  { %5415 = vmatmul.mubr.f32.vlgmr.msra.gmra.mrb[12].mxu0 %v5345_v50  ;;  %v5602_v40 = vcombine.high %v5601_v33, %v5601_v33  ;;  %v5585_v50 = vld [vmem:[#allocation18 + $0x198] sm:$0xff] }
0x11cb   :  { %9961 = vmatpush1.bf16.msra.mxu0 %v9960_v53  ;;  %v5477_v58 = vrot.slane %v5470_v56, %v12372_v35  ;;  %v10005_v2 = vpack.c.bf16 %v5585_v50, %v5584_v63  ;;  %v5588_v53 = vld [vmem:[#allocation18 + $0x1b0] sm:$0xff]  ;;  %v10014_v56 = vpack.c.bf16 %v5591_v52, %v5590_v5 }
0x11cc   :  { %9962 = vmatprep.subr.bf16.mxu0 %v11200_v1  ;;  %v10011_v55 = vpack.c.bf16 %v5589_v54, %v5588_v53  ;;  %v5870_v53 = vld [vmem:[#allocation19 + $0xa8] sm:$0xff] }
0x11cd   :  { %v5478_v7 = vcombine.high %v5477_v58, %v5477_v58 }
0x11cf   :  { %9964 = vmatpush1.bf16.msra.mxu0 %v9963_v57  ;;  %8537 = vmatprep.mubr.msk.f32.mxu0 %vm538_vm5, %v5478_v7  ;;  %v5592_v57 = vld [vmem:[#allocation18 + $0x1d0] sm:$0xff]  ;;  %v5738_v7 = vld [vmem:[#allocation19 + $0x8] sm:$0xff] }
0x11d0   :  { %9965 = vmatprep.subr.bf16.mxu0 %v11200_v1  ;;  %v10020_v47 = vpack.c.bf16 %v5738_v7, %v5737_v60  ;;  %v5871_v60 = vld [vmem:[#allocation19 + $0xb0] sm:$0xff]  ;;  %v5872_v7 = vld [vmem:[#allocation19 + $0xb8] sm:$0xff] }
0x11d2   :  { %10021 = vmatpush1.bf16.msra.mxu1 %v10020_v47 }
0x11d3   :  { %9967 = vmatpush1.bf16.msra.mxu0 %v9966_v9  ;;  %v5739_v9 = vld [vmem:[#allocation19 + $0x10] sm:$0xff]  ;;  %10022 = vmatprep.subr.bf16.mxu1 %v11200_v1 }
0x11d4   :  { %9968 = vmatprep.subr.bf16.mxu0 %v11200_v1 }
0x11d7   :  { %9970 = vmatpush1.bf16.msra.mxu0 %v9969_v10  ;;  %v10023_v10 = vpack.c.bf16 %v5740_v8, %v5739_v9 }
0x11d8   :  { %9971 = vmatprep.subr.bf16.mxu0 %v11200_v1 }
0x11d9   :  { %10024 = vmatpush1.bf16.msra.mxu1 %v10023_v10  ;;  %v10053_v10 = vpack.c.bf16 %v5872_v7, %v5871_v60  ;;  %v6008_v60 = vld [vmem:[#allocation19 + $0x1b8] sm:$0xff] }
0x11da   :  { %10025 = vmatprep.subr.bf16.mxu1 %v11200_v1 }
0x11db   :  { %9973 = vmatpush1.bf16.msra.mxu0 %v9972_v13  ;;  %v10026_v13 = vpack.c.bf16 %v5742_v11, %v5741_v62  ;;  %v5873_v11 = vld [vmem:[#allocation19 + $0xc0] sm:$0xff] }
0x11dc   :  { %9974 = vmatprep.subr.bf16.mxu0 %v11200_v1 }
0x11dd   :  { %10027 = vmatpush1.bf16.msra.mxu1 %v10026_v13  ;;  %v5874_v13 = vld [vmem:[#allocation19 + $0xc8] sm:$0xff] }
0x11de   :  { %10028 = vmatprep.subr.bf16.mxu1 %v11200_v1 }
0x11df   :  { %9976 = vmatpush1.bf16.msra.mxu0 %v9975_v24  ;;  %v10029_v24 = vpack.c.bf16 %v5744_v15, %v5743_v0  ;;  %v10056_v15 = vpack.c.bf16 %v5874_v13, %v5873_v11  ;;  %v6156_v13 = vld [vmem:[#allocation21] sm:$0xff] }
0x11e0   :  { %9977 = vmatprep.subr.bf16.mxu0 %v11200_v1 }
0x11e1   :  { %10030 = vmatpush1.bf16.msra.mxu1 %v10029_v24  ;;  %v5875_v24 = vld [vmem:[#allocation19 + $0xd0] sm:$0xff] }
0x11e2   :  { %10031 = vmatprep.subr.bf16.mxu1 %v11200_v1 }
0x11e3   :  { %9979 = vmatpush1.bf16.msra.mxu0 %v9978_v6  ;;  %v10032_v6 = vpack.c.bf16 %v5746_v21, %v5745_v16  ;;  %v5876_v16 = vld [vmem:[#allocation19 + $0xd8] sm:$0xff] }
0x11e4   :  { %9980 = vmatprep.subr.bf16.mxu0 %v11200_v1  ;;  %v10059_v21 = vpack.c.bf16 %v5876_v16, %v5875_v24  ;;  %v6159_v16 = vld [vmem:[#allocation21 + $0x18] sm:$0xff] }
0x11e5   :  { %10033 = vmatpush1.bf16.msra.mxu1 %v10032_v6  ;;  %v5877_v6 = vld [vmem:[#allocation19 + $0xe0] sm:$0xff] }
0x11e6   :  { %10034 = vmatprep.subr.bf16.mxu1 %v11200_v1 }
0x11e7   :  { %9982 = vmatpush1.bf16.msra.mxu0 %v9981_v17  ;;  %v10035_v17 = vpack.c.bf16 %v5748_v14, %v5747_v12  ;;  %v5878_v12 = vld [vmem:[#allocation19 + $0xe8] sm:$0xff] }
0x11e8   :  { %9983 = vmatprep.subr.bf16.mxu0 %v11200_v1  ;;  %v10062_v14 = vpack.c.bf16 %v5878_v12, %v5877_v6  ;;  %v6160_v6 = vld [vmem:[#allocation21 + $0x20] sm:$0xff]  ;;  %v6161_v12 = vld [vmem:[#allocation21 + $0x28] sm:$0xff] }
0x11e9   :  { %10036 = vmatpush1.bf16.msra.mxu1 %v10035_v17  ;;  %v5879_v17 = vld [vmem:[#allocation19 + $0xf0] sm:$0xff] }
0x11ea   :  { %10037 = vmatprep.subr.bf16.mxu1 %v11200_v1 }
0x11eb   :  { %9985 = vmatpush1.bf16.msra.mxu0 %v9984_v22  ;;  %v10038_v22 = vpack.c.bf16 %v5750_v20, %v5749_v19  ;;  %v5881_v20 = vld [vmem:[#allocation19 + $0x100] sm:$0xff] }
0x11ec   :  { %9986 = vmatprep.subr.bf16.mxu0 %v11200_v1 }
0x11ed   :  { %10039 = vmatpush1.bf16.msra.mxu1 %v10038_v22  ;;  %v5882_v22 = vld [vmem:[#allocation19 + $0x108] sm:$0xff] }
0x11ee   :  { %10040 = vmatprep.subr.bf16.mxu1 %v11200_v1 }
0x11ef   :  { %9988 = vmatpush1.bf16.msra.mxu0 %v9987_v29 }
0x11f0   :  { %9989 = vmatprep.subr.bf16.mxu0 %v11200_v1 }
0x11f1   :  { %10042 = vmatpush1.bf16.msra.mxu1 %v10041_v31  ;;  %v5886_v31 = vld [vmem:[#allocation19 + $0x128] sm:$0xff] }
0x11f2   :  { %5547 = vmatmul.mubr.f32.vlgmr.msra.gmra.mrb[12].mxu0 %v5477_v58  ;;  %v5593_v58 = vld [vmem:[#allocation18 + $0x1d8] sm:$0xff]  ;;  %10043 = vmatprep.subr.bf16.mxu1 %v11200_v1 }
0x11f3   :  { %9991 = vmatpush1.bf16.msra.mxu0 %v9990_v34  ;;  %8541 = vmatprep.mubr.msk.f32.mxu0 %vm538_vm5, %v5602_v40  ;;  %v10017_v59 = vpack.c.bf16 %v5593_v58, %v5592_v57  ;;  %v5755_v40 = vld [vmem:[#allocation19 + $0x90] sm:$0xff] }
0x11f4   :  { %9992 = vmatprep.subr.bf16.mxu0 %v11200_v1 }
0x11f7   :  { %9994 = vmatpush1.bf16.msra.mxu0 %v9993_v41  ;;  %v5756_v41 = vld [vmem:[#allocation19 + $0x98] sm:$0xff] }
0x11f8   :  { %9995 = vmatprep.subr.bf16.mxu0 %v11200_v1  ;;  %v10047_v45 = vpack.c.bf16 %v5756_v41, %v5755_v40 }
0x11fb   :  { %9997 = vmatpush1.bf16.msra.mxu0 %v9996_v43 }
0x11fc   :  { %9998 = vmatprep.subr.bf16.mxu0 %v11200_v1 }
0x11ff   :  { %10000 = vmatpush1.bf16.msra.mxu0 %v9999_v48 }
0x1200   :  { %10001 = vmatprep.subr.bf16.mxu0 %v11200_v1 }
0x1203   :  { %10003 = vmatpush1.bf16.msra.mxu0 %v10002_v49 }
0x1204   :  { %10004 = vmatprep.subr.bf16.mxu0 %v11200_v1 }
0x1207   :  { %10006 = vmatpush1.bf16.msra.mxu0 %v10005_v2 }
0x1208   :  { %10007 = vmatprep.subr.bf16.mxu0 %v11200_v1 }
0x120b   :  { %10009 = vmatpush1.bf16.msra.mxu0 %v10008_v4  ;;  %v5869_v4 = vld [vmem:[#allocation19 + $0xa0] sm:$0xff] }
0x120c   :  { %10010 = vmatprep.subr.bf16.mxu0 %v11200_v1 }
0x120f   :  { %10012 = vmatpush1.bf16.msra.mxu0 %v10011_v55 }
0x1210   :  { %10013 = vmatprep.subr.bf16.mxu0 %v11200_v1 }
0x1213   :  { %10015 = vmatpush1.bf16.msra.mxu0 %v10014_v56 }
0x1214   :  { %10016 = vmatprep.subr.bf16.mxu0 %v11200_v1 }
0x1217   :  { %10018 = vmatpush1.bf16.msra.mxu0 %v10017_v59  ;;  %v10050_v59 = vpack.c.bf16 %v5870_v53, %v5869_v4  ;;  %v6001_v4 = vld [vmem:[#allocation19 + $0x180] sm:$0xff]  ;;  %v6002_v53 = vld [vmem:[#allocation19 + $0x188] sm:$0xff] }
0x1218   :  { %10109 = vmatprep.subr.bf16.mxu0 %v11200_v1 }
0x121a   :  { %5671 = vmatmul.mubr.f32.vlgmr.msra.gmra.mrb[12].mxu0 %v5601_v33  ;;  %v5754_v33 = vld [vmem:[#allocation19 + $0x88] sm:$0xff] }
0x121b   :  { %v10044_v39 = vpack.c.bf16 %v5754_v33, %v5753_v32 }
0x121d   :  { %10045 = vmatpush1.bf16.msra.mxu1 %v10044_v39 }
0x121e   :  { %10046 = vmatprep.subr.bf16.mxu1 %v11200_v1 }
0x1221   :  { %10048 = vmatpush1.bf16.msra.mxu1 %v10047_v45  ;;  %v5995_v45 = vld [vmem:[#allocation19 + $0x150] sm:$0xff] }
0x1222   :  { %10049 = vmatprep.subr.bf16.mxu1 %v11200_v1 }
0x12ed   :  { %v5672_v25 = vpop.f32.mrb[12].mxu0 }
0x12ee   :  { %v10533_v28 = vadd.f32 %v8529_v18, %v5672_v25  ;;  %v5674_v29 = vpop.f32.mrb[13].mxu0  ;;  %v5880_v18 = vld [vmem:[#allocation19 + $0xf8] sm:$0xff]  ;;  %v10068_v25 = vpack.c.bf16 %v5882_v22, %v5881_v20  ;;  %v6164_v20 = vld [vmem:[#allocation21 + $0x40] sm:$0xff]  ;;  %v6165_v22 = vld [vmem:[#allocation21 + $0x48] sm:$0xff] }
0x12ef   :  { %v10065_v19 = vpack.c.bf16 %v5880_v18, %v5879_v17  ;;  %v5885_v29 = vld [vmem:[#allocation19 + $0x120] sm:$0xff]  ;;  %v6162_v17 = vld [vmem:[#allocation21 + $0x30] sm:$0xff]  ;;  %v6163_v18 = vld [vmem:[#allocation21 + $0x38] sm:$0xff] }
0x12f0   :  { %v5677_v34 = vmax.f32 %v10533_v28, 0.0  ;;  %v10071_v28 = vpack.c.bf16 %v5884_v27, %v5883_v26  ;;  %v10074_v33 = vpack.c.bf16 %v5886_v31, %v5885_v29  ;;  %v6166_v26 = vld [vmem:[#allocation21 + $0x50] sm:$0xff]  ;;  %v6167_v27 = vld [vmem:[#allocation21 + $0x58] sm:$0xff]  ;;  %v8542_v29 = vld [vmem:[%s12846_s20] ss:$0 sm:$0xff] }
0x12f1   :  { %v6168_v31 = vld [vmem:[#allocation21 + $0x60] sm:$0xff] }
0x12f2   :  { %v5685_v37 = vrot.slane %v5677_v34, %v12372_v35  ;;  %v5887_v34 = vld [vmem:[#allocation19 + $0x130] sm:$0xff] }
0x12f4   :  { %v5686_v42 = vcombine.high %v5685_v37, %v5685_v37  ;;  %v5693_v36 = vrot.slane %v5685_v37, %v12372_v35  ;;  %v5888_v37 = vld [vmem:[#allocation19 + $0x138] sm:$0xff] }
0x12f5   :  { %v10077_v41 = vpack.c.bf16 %v5888_v37, %v5887_v34  ;;  %v6170_v37 = vld [vmem:[#allocation21 + $0x70] sm:$0xff] }
0x12f6   :  { %v5701_v43 = vrot.slane %v5693_v36, 7  ;;  %v5700_v44 = vrot.slane %v5686_v42, %v12372_v35  ;;  %v5993_v42 = vld [vmem:[#allocation19 + $0x140] sm:$0xff]  ;;  %v5994_v36 = vld [vmem:[#allocation19 + $0x148] sm:$0xff] }
0x12f8   :  { %5703 = vrot.lane.b32.xlu0 %v5701_v43, %s11203_s1  ;;  %v5702_v48 = vrot.slane %v5700_v44, 7  ;;  %v10080_v44 = vpack.c.bf16 %v5994_v36, %v5993_v42  ;;  %v6172_v36 = vld [vmem:[#allocation21 + $0x80] sm:$0xff] }
0x12fa   :  { %5705 = vrot.lane.b32.xlu1 %v5702_v48, %s11203_s1  ;;  %v5996_v48 = vld [vmem:[#allocation19 + $0x158] sm:$0xff] }
0x136a   :  { %v5704_v46 = vpop.permute.xlu0 %5703 }
0x136b   :  { %5709 = vst.msk [vmem:[#allocation3] sm:$0x6] %vm5289_vm3, %v5704_v46 }
0x136c   :  { %v5706_v38 = vpop.permute.xlu1 %5705 }
0x136d   :  { %5710 = vst.msk [vmem:[#allocation3 + $0x8] sm:$0x6] %vm5289_vm3, %v5706_v38  ;;  %v10083_v38 = vpack.c.bf16 %v5996_v48, %v5995_v45 }
0x1372   :  { %v8543_v49 = vld.sshfl [vmem:[#allocation3] sm:$0xf pattern:$0x76325410] }
0x1373   :  { %v8546_v63 = vld.sshfl [vmem:[#allocation3] sm:$0x5a pattern:$0x76325410] }
0x1374   :  { %v8544_v50 = vld.sshfl [vmem:[#allocation3 + $0x8] sm:$0xf pattern:$0x76325410]  ;;  %v5851_v2 = vcombine.high %v8546_v63, %v8546_v63  ;;  %v8548_v52 = vrot.slane %v8546_v63, 9  ;;  %v5998_v63 = vld [vmem:[#allocation19 + $0x168] sm:$0xff] }
0x1375   :  { %v5757_v3 = vcombine.low %v8543_v49, %v8544_v50  ;;  %v8547_v61 = vld.sshfl [vmem:[#allocation3 + $0x8] sm:$0x5a pattern:$0x76325410]  ;;  %v5997_v49 = vld [vmem:[#allocation19 + $0x160] sm:$0xff] }
0x1376   :  { %v5859_v54 = vcombine.high %v8547_v61, %v8547_v61  ;;  %v5862_v55 = vrot.slane %v5851_v2, 7  ;;  %v8549_v56 = vrot.slane %v8547_v61, 9  ;;  %v8552_v32 = vld.sshfl [vmem:[#allocation3 + $0x8] sm:$0xf0 pattern:$0x76325410]  ;;  %v10086_v50 = vpack.c.bf16 %v5998_v63, %v5997_v49 }
0x1377   :  { %v5764_v5 = vrot.slane %v5757_v3, %v12372_v35  ;;  %v8551_v39 = vld.sshfl [vmem:[#allocation3] sm:$0xf0 pattern:$0x76325410]  ;;  %v6000_v3 = vld [vmem:[#allocation19 + $0x178] sm:$0xff] }
0x1378   :  { %v5866_v57 = vrot.slane %v5859_v54, 7  ;;  %v5863_v9 = vsel %vm12379_vm6, %v8548_v52, %v5862_v55  ;;  %v8553_v40 = vcombine.high %v8551_v39, %v8552_v32  ;;  %v5999_v2 = vld [vmem:[#allocation19 + $0x170] sm:$0xff]  ;;  %v10092_v54 = vpack.c.bf16 %v6002_v53, %v6001_v4  ;;  %v6169_v32 = vld [vmem:[#allocation21 + $0x68] sm:$0xff]  ;;  %v6171_v39 = vld [vmem:[#allocation21 + $0x78] sm:$0xff] }
0x1379   :  { %v5765_v58 = vcombine.high %v5764_v5, %v5764_v5  ;;  %v10089_v61 = vpack.c.bf16 %v6000_v3, %v5999_v2  ;;  %v6003_v55 = vld [vmem:[#allocation19 + $0x190] sm:$0xff]  ;;  %v10131_v42 = vpack.c.bf16 %v6171_v39, %v6170_v37  ;;  %v6303_v39 = vld [vmem:[#allocation21 + $0x118] sm:$0xff] }
0x137a   :  { %v5867_v47 = vsel %vm12379_vm6, %v8549_v56, %v5866_v57  ;;  %v6020_v43 = vrot.slane %v8553_v40, %v12372_v35  ;;  %v6005_v56 = vld [vmem:[#allocation19 + $0x1a0] sm:$0xff]  ;;  %v6006_v57 = vld [vmem:[#allocation19 + $0x1a8] sm:$0xff]  ;;  %v6302_v37 = vld [vmem:[#allocation21 + $0x110] sm:$0xff] }
0x137b   :  { %8545 = vmatprep.mubr.msk.f32.mxu1 %vm538_vm5, %v5765_v58  ;;  %v5889_v8 = vcombine.low %v5863_v9, %v5867_v47  ;;  %v10098_v58 = vpack.c.bf16 %v6006_v57, %v6005_v56  ;;  %v6009_v9 = vld [vmem:[#allocation19 + $0x1c0] sm:$0xff]  ;;  %v6010_v47 = vld [vmem:[#allocation19 + $0x1c8] sm:$0xff] }
0x137c   :  { %5834 = vmatmul.mubr.f32.vlgmr.msra.gmra.mrb[20].mxu1 %v5764_v5  ;;  %v6021_v46 = vcombine.high %v6020_v43, %v6020_v43  ;;  %v6004_v5 = vld [vmem:[#allocation19 + $0x198] sm:$0xff] }
0x137d   :  { %10051 = vmatpush1.bf16.msra.mxu1 %v10050_v59  ;;  %v5896_v62 = vrot.slane %v5889_v8, %v12372_v35  ;;  %v10095_v52 = vpack.c.bf16 %v6004_v5, %v6003_v55  ;;  %v6007_v59 = vld [vmem:[#allocation19 + $0x1b0] sm:$0xff]  ;;  %v10104_v8 = vpack.c.bf16 %v6010_v47, %v6009_v9 }
0x137e   :  { %10052 = vmatprep.subr.bf16.mxu1 %v11200_v1  ;;  %v10101_v7 = vpack.c.bf16 %v6008_v60, %v6007_v59  ;;  %v6289_v59 = vld [vmem:[#allocation21 + $0xa8] sm:$0xff] }
0x137f   :  { %v5897_v0 = vcombine.high %v5896_v62, %v5896_v62 }
0x1381   :  { %10054 = vmatpush1.bf16.msra.mxu1 %v10053_v10  ;;  %8550 = vmatprep.mubr.msk.f32.mxu1 %vm538_vm5, %v5897_v0  ;;  %v6011_v10 = vld [vmem:[#allocation19 + $0x1d0] sm:$0xff]  ;;  %v6157_v0 = vld [vmem:[#allocation21 + $0x8] sm:$0xff] }
0x1382   :  { %10055 = vmatprep.subr.bf16.mxu1 %v11200_v1  ;;  %v10110_v24 = vpack.c.bf16 %v6157_v0, %v6156_v13  ;;  %v6290_v13 = vld [vmem:[#allocation21 + $0xb0] sm:$0xff]  ;;  %v6291_v0 = vld [vmem:[#allocation21 + $0xb8] sm:$0xff] }
0x1384   :  { %10111 = vmatpush1.bf16.msra.mxu0 %v10110_v24 }
0x1385   :  { %10057 = vmatpush1.bf16.msra.mxu1 %v10056_v15  ;;  %v6158_v15 = vld [vmem:[#allocation21 + $0x10] sm:$0xff]  ;;  %10112 = vmatprep.subr.bf16.mxu0 %v11200_v1 }
0x1386   :  { %10058 = vmatprep.subr.bf16.mxu1 %v11200_v1 }
0x1389   :  { %10060 = vmatpush1.bf16.msra.mxu1 %v10059_v21  ;;  %v10113_v21 = vpack.c.bf16 %v6159_v16, %v6158_v15 }
0x138a   :  { %10061 = vmatprep.subr.bf16.mxu1 %v11200_v1 }
0x138b   :  { %10114 = vmatpush1.bf16.msra.mxu0 %v10113_v21  ;;  %v10143_v21 = vpack.c.bf16 %v6291_v0, %v6290_v13  ;;  %v6427_v13 = vld [vmem:[#allocation21 + $0x1b8] sm:$0xff] }
0x138c   :  { %10115 = vmatprep.subr.bf16.mxu0 %v11200_v1 }
0x138d   :  { %10063 = vmatpush1.bf16.msra.mxu1 %v10062_v14  ;;  %v10116_v14 = vpack.c.bf16 %v6161_v12, %v6160_v6  ;;  %v6292_v12 = vld [vmem:[#allocation21 + $0xc0] sm:$0xff] }
0x138e   :  { %10064 = vmatprep.subr.bf16.mxu1 %v11200_v1 }
0x138f   :  { %10117 = vmatpush1.bf16.msra.mxu0 %v10116_v14  ;;  %v6293_v14 = vld [vmem:[#allocation21 + $0xc8] sm:$0xff] }
0x1390   :  { %10118 = vmatprep.subr.bf16.mxu0 %v11200_v1 }
0x1391   :  { %10066 = vmatpush1.bf16.msra.mxu1 %v10065_v19  ;;  %v10119_v19 = vpack.c.bf16 %v6163_v18, %v6162_v17  ;;  %v10146_v18 = vpack.c.bf16 %v6293_v14, %v6292_v12  ;;  %v6575_v14 = vld [vmem:[#allocation22] sm:$0xff] }
0x1392   :  { %10067 = vmatprep.subr.bf16.mxu1 %v11200_v1 }
0x1393   :  { %10120 = vmatpush1.bf16.msra.mxu0 %v10119_v19  ;;  %v6294_v19 = vld [vmem:[#allocation21 + $0xd0] sm:$0xff] }
0x1394   :  { %10121 = vmatprep.subr.bf16.mxu0 %v11200_v1 }
0x1395   :  { %10069 = vmatpush1.bf16.msra.mxu1 %v10068_v25  ;;  %v10122_v25 = vpack.c.bf16 %v6165_v22, %v6164_v20  ;;  %v6295_v20 = vld [vmem:[#allocation21 + $0xd8] sm:$0xff] }
0x1396   :  { %10070 = vmatprep.subr.bf16.mxu1 %v11200_v1  ;;  %v10149_v22 = vpack.c.bf16 %v6295_v20, %v6294_v19  ;;  %v6578_v20 = vld [vmem:[#allocation22 + $0x18] sm:$0xff] }
0x1397   :  { %10123 = vmatpush1.bf16.msra.mxu0 %v10122_v25  ;;  %v6296_v25 = vld [vmem:[#allocation21 + $0xe0] sm:$0xff] }
0x1398   :  { %10124 = vmatprep.subr.bf16.mxu0 %v11200_v1 }
0x1399   :  { %10072 = vmatpush1.bf16.msra.mxu1 %v10071_v28  ;;  %v10125_v28 = vpack.c.bf16 %v6167_v27, %v6166_v26  ;;  %v6297_v26 = vld [vmem:[#allocation21 + $0xe8] sm:$0xff] }
0x139a   :  { %10073 = vmatprep.subr.bf16.mxu1 %v11200_v1  ;;  %v10152_v27 = vpack.c.bf16 %v6297_v26, %v6296_v25  ;;  %v6579_v25 = vld [vmem:[#allocation22 + $0x20] sm:$0xff]  ;;  %v6580_v26 = vld [vmem:[#allocation22 + $0x28] sm:$0xff] }
0x139b   :  { %10126 = vmatpush1.bf16.msra.mxu0 %v10125_v28  ;;  %v6298_v28 = vld [vmem:[#allocation21 + $0xf0] sm:$0xff] }
0x139c   :  { %10127 = vmatprep.subr.bf16.mxu0 %v11200_v1 }
0x139d   :  { %10075 = vmatpush1.bf16.msra.mxu1 %v10074_v33  ;;  %v10128_v33 = vpack.c.bf16 %v6169_v32, %v6168_v31  ;;  %v6300_v32 = vld [vmem:[#allocation21 + $0x100] sm:$0xff] }
0x139e   :  { %10076 = vmatprep.subr.bf16.mxu1 %v11200_v1 }
0x139f   :  { %10129 = vmatpush1.bf16.msra.mxu0 %v10128_v33  ;;  %v6301_v33 = vld [vmem:[#allocation21 + $0x108] sm:$0xff] }
0x13a0   :  { %10130 = vmatprep.subr.bf16.mxu0 %v11200_v1 }
0x13a1   :  { %10078 = vmatpush1.bf16.msra.mxu1 %v10077_v41 }
0x13a2   :  { %10079 = vmatprep.subr.bf16.mxu1 %v11200_v1 }
0x13a3   :  { %10132 = vmatpush1.bf16.msra.mxu0 %v10131_v42  ;;  %v6305_v42 = vld [vmem:[#allocation21 + $0x128] sm:$0xff] }
0x13a4   :  { %5966 = vmatmul.mubr.f32.vlgmr.msra.gmra.mrb[20].mxu1 %v5896_v62  ;;  %v6012_v62 = vld [vmem:[#allocation19 + $0x1d8] sm:$0xff]  ;;  %10133 = vmatprep.subr.bf16.mxu0 %v11200_v1 }
0x13a5   :  { %10081 = vmatpush1.bf16.msra.mxu1 %v10080_v44  ;;  %8554 = vmatprep.mubr.msk.f32.mxu1 %vm538_vm5, %v6021_v46  ;;  %v10107_v11 = vpack.c.bf16 %v6012_v62, %v6011_v10  ;;  %v6174_v46 = vld [vmem:[#allocation21 + $0x90] sm:$0xff] }
0x13a6   :  { %10082 = vmatprep.subr.bf16.mxu1 %v11200_v1 }
0x13a9   :  { %10084 = vmatpush1.bf16.msra.mxu1 %v10083_v38  ;;  %v6175_v38 = vld [vmem:[#allocation21 + $0x98] sm:$0xff] }
0x13aa   :  { %10085 = vmatprep.subr.bf16.mxu1 %v11200_v1  ;;  %v10137_v3 = vpack.c.bf16 %v6175_v38, %v6174_v46 }
0x13ad   :  { %10087 = vmatpush1.bf16.msra.mxu1 %v10086_v50 }
0x13ae   :  { %10088 = vmatprep.subr.bf16.mxu1 %v11200_v1 }
0x13b1   :  { %10090 = vmatpush1.bf16.msra.mxu1 %v10089_v61 }
0x13b2   :  { %10091 = vmatprep.subr.bf16.mxu1 %v11200_v1 }
0x13b5   :  { %10093 = vmatpush1.bf16.msra.mxu1 %v10092_v54 }
0x13b6   :  { %10094 = vmatprep.subr.bf16.mxu1 %v11200_v1 }
0x13b9   :  { %10096 = vmatpush1.bf16.msra.mxu1 %v10095_v52 }
0x13ba   :  { %10097 = vmatprep.subr.bf16.mxu1 %v11200_v1 }
0x13bd   :  { %10099 = vmatpush1.bf16.msra.mxu1 %v10098_v58  ;;  %v6288_v58 = vld [vmem:[#allocation21 + $0xa0] sm:$0xff] }
0x13be   :  { %10100 = vmatprep.subr.bf16.mxu1 %v11200_v1 }
0x13c1   :  { %10102 = vmatpush1.bf16.msra.mxu1 %v10101_v7 }
0x13c2   :  { %10103 = vmatprep.subr.bf16.mxu1 %v11200_v1 }
0x13c5   :  { %10105 = vmatpush1.bf16.msra.mxu1 %v10104_v8 }
0x13c6   :  { %10106 = vmatprep.subr.bf16.mxu1 %v11200_v1 }
0x13c9   :  { %10108 = vmatpush1.bf16.msra.mxu1 %v10107_v11  ;;  %v10140_v11 = vpack.c.bf16 %v6289_v59, %v6288_v58  ;;  %v6420_v58 = vld [vmem:[#allocation21 + $0x180] sm:$0xff]  ;;  %v6421_v59 = vld [vmem:[#allocation21 + $0x188] sm:$0xff] }
0x13ca   :  { %10199 = vmatprep.subr.bf16.mxu1 %v11200_v1 }
0x13cc   :  { %6090 = vmatmul.mubr.f32.vlgmr.msra.gmra.mrb[20].mxu1 %v6020_v43  ;;  %v6173_v43 = vld [vmem:[#allocation21 + $0x88] sm:$0xff] }
0x13cd   :  { %v10134_v48 = vpack.c.bf16 %v6173_v43, %v6172_v36 }
0x13cf   :  { %10135 = vmatpush1.bf16.msra.mxu0 %v10134_v48 }
0x13d0   :  { %10136 = vmatprep.subr.bf16.mxu0 %v11200_v1 }
0x13d3   :  { %10138 = vmatpush1.bf16.msra.mxu0 %v10137_v3  ;;  %v6414_v3 = vld [vmem:[#allocation21 + $0x150] sm:$0xff] }
0x13d4   :  { %10139 = vmatprep.subr.bf16.mxu0 %v11200_v1 }
0x149f   :  { %v6091_v34 = vpop.f32.mrb[20].mxu1 }
0x14a0   :  { %v10534_v40 = vadd.f32 %v8542_v29, %v6091_v34  ;;  %v6093_v41 = vpop.f32.mrb[21].mxu1  ;;  %v6299_v29 = vld [vmem:[#allocation21 + $0xf8] sm:$0xff]  ;;  %v10158_v34 = vpack.c.bf16 %v6301_v33, %v6300_v32  ;;  %v6583_v32 = vld [vmem:[#allocation22 + $0x40] sm:$0xff]  ;;  %v6584_v33 = vld [vmem:[#allocation22 + $0x48] sm:$0xff] }
0x14a1   :  { %v10155_v31 = vpack.c.bf16 %v6299_v29, %v6298_v28  ;;  %v6304_v41 = vld [vmem:[#allocation21 + $0x120] sm:$0xff]  ;;  %v6581_v28 = vld [vmem:[#allocation22 + $0x30] sm:$0xff]  ;;  %v6582_v29 = vld [vmem:[#allocation22 + $0x38] sm:$0xff] }
0x14a2   :  { %v6096_v44 = vmax.f32 %v10534_v40, 0.0  ;;  %v10161_v40 = vpack.c.bf16 %v6303_v39, %v6302_v37  ;;  %v10164_v43 = vpack.c.bf16 %v6305_v42, %v6304_v41  ;;  %v6585_v37 = vld [vmem:[#allocation22 + $0x50] sm:$0xff]  ;;  %v6586_v39 = vld [vmem:[#allocation22 + $0x58] sm:$0xff] }
0x14a4   :  { %v6104_v45 = vrot.slane %v6096_v44, %v12372_v35  ;;  %v6306_v44 = vld [vmem:[#allocation21 + $0x130] sm:$0xff] }
0x14a6   :  { %v6105_v49 = vcombine.high %v6104_v45, %v6104_v45  ;;  %v6112_v63 = vrot.slane %v6104_v45, %v12372_v35  ;;  %v6307_v45 = vld [vmem:[#allocation21 + $0x138] sm:$0xff] }
0x14a7   :  { %v10167_v38 = vpack.c.bf16 %v6307_v45, %v6306_v44 }
0x14a8   :  { %v6120_v50 = vrot.slane %v6112_v63, 7  ;;  %v6119_v2 = vrot.slane %v6105_v49, %v12372_v35  ;;  %v6412_v49 = vld [vmem:[#allocation21 + $0x140] sm:$0xff]  ;;  %v6413_v63 = vld [vmem:[#allocation21 + $0x148] sm:$0xff] }
0x14aa   :  { %6122 = vrot.lane.b32.xlu0 %v6120_v50, %s11203_s1  ;;  %v6121_v61 = vrot.slane %v6119_v2, 7  ;;  %v10170_v2 = vpack.c.bf16 %v6413_v63, %v6412_v49 }
0x14ac   :  { %6124 = vrot.lane.b32.xlu1 %v6121_v61, %s11203_s1  ;;  %v6415_v61 = vld [vmem:[#allocation21 + $0x158] sm:$0xff] }
0x151c   :  { %v6123_v4 = vpop.permute.xlu0 %6122 }
0x151d   :  { %6128 = vst.msk [vmem:[#allocation3] sm:$0x6] %vm5289_vm3, %v6123_v4 }
0x151e   :  { %v6125_v53 = vpop.permute.xlu1 %6124 }
0x151f   :  { %6129 = vst.msk [vmem:[#allocation3 + $0x8] sm:$0x6] %vm5289_vm3, %v6125_v53  ;;  %v10173_v53 = vpack.c.bf16 %v6415_v61, %v6414_v3 }
0x1524   :  { %v8556_v54 = vld.sshfl [vmem:[#allocation3] sm:$0xf pattern:$0x76325410] }
0x1525   :  { %v8559_v55 = vld.sshfl [vmem:[#allocation3] sm:$0x5a pattern:$0x76325410] }
0x1526   :  { %v8557_v5 = vld.sshfl [vmem:[#allocation3 + $0x8] sm:$0xf pattern:$0x76325410]  ;;  %v6270_v52 = vcombine.high %v8559_v55, %v8559_v55  ;;  %v8561_v47 = vrot.slane %v8559_v55, 9  ;;  %v6417_v55 = vld [vmem:[#allocation21 + $0x168] sm:$0xff] }
0x1527   :  { %v6176_v56 = vcombine.low %v8556_v54, %v8557_v5  ;;  %v8560_v57 = vld.sshfl [vmem:[#allocation3 + $0x8] sm:$0x5a pattern:$0x76325410]  ;;  %v6416_v54 = vld [vmem:[#allocation21 + $0x160] sm:$0xff] }
0x1528   :  { %v6278_v60 = vcombine.high %v8560_v57, %v8560_v57  ;;  %v6281_v7 = vrot.slane %v6270_v52, 7  ;;  %v8562_v8 = vrot.slane %v8560_v57, 9  ;;  %v8565_v36 = vld.sshfl [vmem:[#allocation3 + $0x8] sm:$0xf0 pattern:$0x76325410]  ;;  %v10176_v5 = vpack.c.bf16 %v6417_v55, %v6416_v54 }
0x1529   :  { %v6183_v9 = vrot.slane %v6176_v56, %v12372_v35  ;;  %v8564_v48 = vld.sshfl [vmem:[#allocation3] sm:$0xf0 pattern:$0x76325410]  ;;  %v6419_v56 = vld [vmem:[#allocation21 + $0x178] sm:$0xff]  ;;  %v6592_v54 = vld [vmem:[#allocation22 + $0x88] sm:$0xff] }
0x152a   :  { %v6285_v10 = vrot.slane %v6278_v60, 7  ;;  %v6282_v15 = vsel %vm12379_vm6, %v8561_v47, %v6281_v7  ;;  %v8566_v46 = vcombine.high %v8564_v48, %v8565_v36  ;;  %v6418_v52 = vld [vmem:[#allocation21 + $0x170] sm:$0xff]  ;;  %v10182_v60 = vpack.c.bf16 %v6421_v59, %v6420_v58  ;;  %v8555_v36 = vld [vmem:[%s12847_s10] ss:$0 sm:$0xff] }
0x152b   :  { %v6184_v62 = vcombine.high %v6183_v9, %v6183_v9  ;;  %v10179_v57 = vpack.c.bf16 %v6419_v56, %v6418_v52  ;;  %v6422_v7 = vld [vmem:[#allocation21 + $0x190] sm:$0xff] }
0x152c   :  { %v6286_v24 = vsel %vm12379_vm6, %v8562_v8, %v6285_v10  ;;  %v6439_v50 = vrot.slane %v8566_v46, %v12372_v35  ;;  %v6424_v8 = vld [vmem:[#allocation21 + $0x1a0] sm:$0xff]  ;;  %v6425_v10 = vld [vmem:[#allocation21 + $0x1a8] sm:$0xff]  ;;  %v6593_v56 = vld [vmem:[#allocation22 + $0x90] sm:$0xff] }
0x152d   :  { %8558 = vmatprep.mubr.msk.f32.mxu0 %vm538_vm5, %v6184_v62  ;;  %v6308_v16 = vcombine.low %v6282_v15, %v6286_v24  ;;  %v10188_v62 = vpack.c.bf16 %v6425_v10, %v6424_v8  ;;  %v6428_v15 = vld [vmem:[#allocation21 + $0x1c0] sm:$0xff]  ;;  %v6429_v24 = vld [vmem:[#allocation21 + $0x1c8] sm:$0xff] }
0x152e   :  { %6253 = vmatmul.mubr.f32.vlgmr.msra.gmra.mrb[14].mxu0 %v6183_v9  ;;  %v6440_v4 = vcombine.high %v6439_v50, %v6439_v50  ;;  %v6423_v9 = vld [vmem:[#allocation21 + $0x198] sm:$0xff]  ;;  %v6587_v46 = vld [vmem:[#allocation22 + $0x60] sm:$0xff] }
0x152f   :  { %10141 = vmatpush1.bf16.msra.mxu0 %v10140_v11  ;;  %v6315_v6 = vrot.slane %v6308_v16, %v12372_v35  ;;  %v10185_v47 = vpack.c.bf16 %v6423_v9, %v6422_v7  ;;  %v6426_v11 = vld [vmem:[#allocation21 + $0x1b0] sm:$0xff]  ;;  %v10194_v16 = vpack.c.bf16 %v6429_v24, %v6428_v15  ;;  %v6707_v24 = vld [vmem:[#allocation22 + $0xa0] sm:$0xff] }
0x1530   :  { %10142 = vmatprep.subr.bf16.mxu0 %v11200_v1  ;;  %v10191_v0 = vpack.c.bf16 %v6427_v13, %v6426_v11 }
0x1531   :  { %v6316_v17 = vcombine.high %v6315_v6, %v6315_v6 }
0x1533   :  { %10144 = vmatpush1.bf16.msra.mxu0 %v10143_v21  ;;  %8563 = vmatprep.mubr.msk.f32.mxu0 %vm538_vm5, %v6316_v17  ;;  %v6430_v21 = vld [vmem:[#allocation21 + $0x1d0] sm:$0xff]  ;;  %v6576_v17 = vld [vmem:[#allocation22 + $0x8] sm:$0xff] }
0x1534   :  { %10145 = vmatprep.subr.bf16.mxu0 %v11200_v1  ;;  %v10200_v19 = vpack.c.bf16 %v6576_v17, %v6575_v14 }
0x1536   :  { %10201 = vmatpush1.bf16.msra.mxu1 %v10200_v19 }
0x1537   :  { %10147 = vmatpush1.bf16.msra.mxu0 %v10146_v18  ;;  %v6577_v18 = vld [vmem:[#allocation22 + $0x10] sm:$0xff]  ;;  %10202 = vmatprep.subr.bf16.mxu1 %v11200_v1 }
0x1538   :  { %10148 = vmatprep.subr.bf16.mxu0 %v11200_v1 }
0x153b   :  { %10150 = vmatpush1.bf16.msra.mxu0 %v10149_v22  ;;  %v10203_v22 = vpack.c.bf16 %v6578_v20, %v6577_v18 }
0x153c   :  { %10151 = vmatprep.subr.bf16.mxu0 %v11200_v1 }
0x153d   :  { %10204 = vmatpush1.bf16.msra.mxu1 %v10203_v22  ;;  %v6709_v22 = vld [vmem:[#allocation22 + $0xb0] sm:$0xff] }
0x153e   :  { %10205 = vmatprep.subr.bf16.mxu1 %v11200_v1 }
0x153f   :  { %10153 = vmatpush1.bf16.msra.mxu0 %v10152_v27  ;;  %v10206_v27 = vpack.c.bf16 %v6580_v26, %v6579_v25  ;;  %v6710_v25 = vld [vmem:[#allocation22 + $0xb8] sm:$0xff] }
0x1540   :  { %10154 = vmatprep.subr.bf16.mxu0 %v11200_v1 }
0x1541   :  { %10207 = vmatpush1.bf16.msra.mxu1 %v10206_v27 }
0x1542   :  { %10208 = vmatprep.subr.bf16.mxu1 %v11200_v1 }
0x1543   :  { %10156 = vmatpush1.bf16.msra.mxu0 %v10155_v31  ;;  %v10209_v31 = vpack.c.bf16 %v6582_v29, %v6581_v28  ;;  %v10233_v29 = vpack.c.bf16 %v6710_v25, %v6709_v22  ;;  %v6846_v22 = vld [vmem:[#allocation22 + $0x1b8] sm:$0xff] }
0x1544   :  { %10157 = vmatprep.subr.bf16.mxu0 %v11200_v1 }
0x1545   :  { %10210 = vmatpush1.bf16.msra.mxu1 %v10209_v31 }
0x1546   :  { %10211 = vmatprep.subr.bf16.mxu1 %v11200_v1 }
0x1547   :  { %10159 = vmatpush1.bf16.msra.mxu0 %v10158_v34  ;;  %v10212_v34 = vpack.c.bf16 %v6584_v33, %v6583_v32  ;;  %v6711_v32 = vld [vmem:[#allocation22 + $0xc0] sm:$0xff]  ;;  %v6712_v33 = vld [vmem:[#allocation22 + $0xc8] sm:$0xff] }
0x1548   :  { %10160 = vmatprep.subr.bf16.mxu0 %v11200_v1 }
0x1549   :  { %10213 = vmatpush1.bf16.msra.mxu1 %v10212_v34 }
0x154a   :  { %10214 = vmatprep.subr.bf16.mxu1 %v11200_v1 }
0x154b   :  { %10162 = vmatpush1.bf16.msra.mxu0 %v10161_v40  ;;  %v10215_v40 = vpack.c.bf16 %v6586_v39, %v6585_v37  ;;  %v10236_v37 = vpack.c.bf16 %v6712_v33, %v6711_v32  ;;  %v6713_v39 = vld [vmem:[#allocation22 + $0xd0] sm:$0xff]  ;;  %v6994_v33 = vld [vmem:[#allocation24] sm:$0xff] }
0x154c   :  { %10163 = vmatprep.subr.bf16.mxu0 %v11200_v1 }
0x154d   :  { %10216 = vmatpush1.bf16.msra.mxu1 %v10215_v40  ;;  %v6714_v40 = vld [vmem:[#allocation22 + $0xd8] sm:$0xff] }
0x154e   :  { %10217 = vmatprep.subr.bf16.mxu1 %v11200_v1 }
0x154f   :  { %10165 = vmatpush1.bf16.msra.mxu0 %v10164_v43 }
0x1550   :  { %10166 = vmatprep.subr.bf16.mxu0 %v11200_v1 }
0x1553   :  { %10168 = vmatpush1.bf16.msra.mxu0 %v10167_v38  ;;  %v6588_v38 = vld [vmem:[#allocation22 + $0x68] sm:$0xff] }
0x1554   :  { %10169 = vmatprep.subr.bf16.mxu0 %v11200_v1  ;;  %v10218_v49 = vpack.c.bf16 %v6588_v38, %v6587_v46  ;;  %v6719_v46 = vld [vmem:[#allocation22 + $0x100] sm:$0xff]  ;;  %v6720_v38 = vld [vmem:[#allocation22 + $0x108] sm:$0xff] }
0x1556   :  { %6385 = vmatmul.mubr.f32.vlgmr.msra.gmra.mrb[16].mxu0 %v6315_v6  ;;  %v6431_v6 = vld [vmem:[#allocation21 + $0x1d8] sm:$0xff]  ;;  %10219 = vmatpush1.bf16.msra.mxu1 %v10218_v49  ;;  %v10248_v49 = vpack.c.bf16 %v6720_v38, %v6719_v46  ;;  %v7002_v46 = vld [vmem:[#allocation24 + $0x40] sm:$0xff]  ;;  %v7003_v38 = vld [vmem:[#allocation24 + $0x48] sm:$0xff] }
0x1557   :  { %10171 = vmatpush1.bf16.msra.mxu0 %v10170_v2  ;;  %8567 = vmatprep.mubr.msk.f32.mxu0 %vm538_vm5, %v6440_v4  ;;  %v10197_v12 = vpack.c.bf16 %v6431_v6, %v6430_v21  ;;  %v6590_v2 = vld [vmem:[#allocation22 + $0x78] sm:$0xff] }
0x1558   :  { %10172 = vmatprep.subr.bf16.mxu0 %v11200_v1  ;;  %10220 = vmatprep.subr.bf16.mxu1 %v11200_v1 }
0x155b   :  { %10174 = vmatpush1.bf16.msra.mxu0 %v10173_v53  ;;  %v6591_v53 = vld [vmem:[#allocation22 + $0x80] sm:$0xff] }
0x155c   :  { %10175 = vmatprep.subr.bf16.mxu0 %v11200_v1  ;;  %v10224_v52 = vpack.c.bf16 %v6592_v54, %v6591_v53  ;;  %v6725_v54 = vld [vmem:[#allocation22 + $0x130] sm:$0xff] }
0x155f   :  { %10177 = vmatpush1.bf16.msra.mxu0 %v10176_v5 }
0x1560   :  { %10178 = vmatprep.subr.bf16.mxu0 %v11200_v1 }
0x1563   :  { %10180 = vmatpush1.bf16.msra.mxu0 %v10179_v57  ;;  %v6594_v57 = vld [vmem:[#allocation22 + $0x98] sm:$0xff] }
0x1564   :  { %10181 = vmatprep.subr.bf16.mxu0 %v11200_v1  ;;  %v10227_v9 = vpack.c.bf16 %v6594_v57, %v6593_v56 }
0x1567   :  { %10183 = vmatpush1.bf16.msra.mxu0 %v10182_v60 }
0x1568   :  { %10184 = vmatprep.subr.bf16.mxu0 %v11200_v1 }
0x156b   :  { %10186 = vmatpush1.bf16.msra.mxu0 %v10185_v47 }
0x156c   :  { %10187 = vmatprep.subr.bf16.mxu0 %v11200_v1 }
0x156f   :  { %10189 = vmatpush1.bf16.msra.mxu0 %v10188_v62 }
0x1570   :  { %10190 = vmatprep.subr.bf16.mxu0 %v11200_v1 }
0x1573   :  { %10192 = vmatpush1.bf16.msra.mxu0 %v10191_v0 }
0x1574   :  { %10193 = vmatprep.subr.bf16.mxu0 %v11200_v1 }
0x1577   :  { %10195 = vmatpush1.bf16.msra.mxu0 %v10194_v16  ;;  %v6708_v16 = vld [vmem:[#allocation22 + $0xa8] sm:$0xff] }
0x1578   :  { %10196 = vmatprep.subr.bf16.mxu0 %v11200_v1  ;;  %v10230_v20 = vpack.c.bf16 %v6708_v16, %v6707_v24  ;;  %v6839_v24 = vld [vmem:[#allocation22 + $0x180] sm:$0xff]  ;;  %v6840_v16 = vld [vmem:[#allocation22 + $0x188] sm:$0xff] }
0x157b   :  { %10198 = vmatpush1.bf16.msra.mxu0 %v10197_v12 }
0x157c   :  { %10289 = vmatprep.subr.bf16.mxu0 %v11200_v1 }
0x157e   :  { %6509 = vmatmul.mubr.f32.vlgmr.msra.gmra.mrb[18].mxu0 %v6439_v50  ;;  %v6589_v50 = vld [vmem:[#allocation22 + $0x70] sm:$0xff] }
0x157f   :  { %v10221_v4 = vpack.c.bf16 %v6590_v2, %v6589_v50  ;;  %v6722_v50 = vld [vmem:[#allocation22 + $0x118] sm:$0xff] }
0x1581   :  { %10222 = vmatpush1.bf16.msra.mxu1 %v10221_v4 }
0x1582   :  { %10223 = vmatprep.subr.bf16.mxu1 %v11200_v1 }
0x1585   :  { %10225 = vmatpush1.bf16.msra.mxu1 %v10224_v52 }
0x1586   :  { %10226 = vmatprep.subr.bf16.mxu1 %v11200_v1 }
0x1589   :  { %10228 = vmatpush1.bf16.msra.mxu1 %v10227_v9  ;;  %v6833_v9 = vld [vmem:[#allocation22 + $0x150] sm:$0xff] }
0x158a   :  { %10229 = vmatprep.subr.bf16.mxu1 %v11200_v1 }
0x1601   :  { %v6254_v41 = vpop.f32.mrb[14].mxu0 }
0x1602   :  { %v6256_v42 = vpop.f32.mrb[15].mxu0  ;;  %v6258_v43 = vadd.f32 %v8555_v36, %v6254_v41  ;;  %v10239_v41 = vpack.c.bf16 %v6714_v40, %v6713_v39  ;;  %v6716_v36 = vld [vmem:[#allocation22 + $0xe8] sm:$0xff]  ;;  %v6997_v40 = vld [vmem:[#allocation24 + $0x18] sm:$0xff] }
0x1603   :  { %v6715_v42 = vld [vmem:[#allocation22 + $0xe0] sm:$0xff] }
0x1629   :  { %v6386_v44 = vpop.f32.mrb[16].mxu0 }
0x162a   :  { %v6390_v45 = vadd.f32 %v6386_v44, %v6258_v43  ;;  %v6388_v48 = vpop.f32.mrb[17].mxu0  ;;  %v10242_v43 = vpack.c.bf16 %v6716_v36, %v6715_v42  ;;  %v6717_v44 = vld [vmem:[#allocation22 + $0xf0] sm:$0xff]  ;;  %v6998_v42 = vld [vmem:[#allocation24 + $0x20] sm:$0xff]  ;;  %v6999_v36 = vld [vmem:[#allocation24 + $0x28] sm:$0xff] }
0x1651   :  { %v6510_v63 = vpop.f32.mrb[18].mxu0 }
0x1652   :  { %v6514_v3 = vadd.f32 %v6510_v63, %v6390_v45  ;;  %v6512_v61 = vpop.f32.mrb[19].mxu0  ;;  %v6718_v45 = vld [vmem:[#allocation22 + $0xf8] sm:$0xff]  ;;  %v6721_v63 = vld [vmem:[#allocation22 + $0x110] sm:$0xff] }
0x1653   :  { %v10245_v48 = vpack.c.bf16 %v6718_v45, %v6717_v44  ;;  %v10251_v2 = vpack.c.bf16 %v6722_v50, %v6721_v63  ;;  %v6724_v61 = vld [vmem:[#allocation22 + $0x128] sm:$0xff]  ;;  %v7000_v44 = vld [vmem:[#allocation24 + $0x30] sm:$0xff]  ;;  %v7001_v45 = vld [vmem:[#allocation24 + $0x38] sm:$0xff] }
0x1654   :  { %v12567_v55 = vadd.f32 %v12419_v23, %v6514_v3  ;;  %v6723_v3 = vld [vmem:[#allocation22 + $0x120] sm:$0xff]  ;;  %v7004_v63 = vld [vmem:[#allocation24 + $0x50] sm:$0xff]  ;;  %v7005_v50 = vld [vmem:[#allocation24 + $0x58] sm:$0xff] }
0x1655   :  { %v10254_v53 = vpack.c.bf16 %v6724_v61, %v6723_v3  ;;  %v8568_v3 = vld [vmem:[%s12848_s4] ss:$0 sm:$0xff]  ;;  %v7006_v61 = vld [vmem:[#allocation24 + $0x60] sm:$0xff] }
0x1656   :  { %v6523_v5 = vrot.slane %v12567_v55, %v12372_v35 }
0x1658   :  { %v6531_v58 = vrot.slane %v6523_v5, %v12372_v35  ;;  %v6524_v59 = vcombine.high %v6523_v5, %v6523_v5  ;;  %v6726_v5 = vld [vmem:[#allocation22 + $0x138] sm:$0xff] }
0x1659   :  { %v10257_v57 = vpack.c.bf16 %v6726_v5, %v6725_v54  ;;  %v7008_v5 = vld [vmem:[#allocation24 + $0x70] sm:$0xff] }
0x165a   :  { %v6539_v60 = vrot.slane %v6531_v58, 7  ;;  %v6538_v7 = vrot.slane %v6524_v59, %v12372_v35  ;;  %v6831_v58 = vld [vmem:[#allocation22 + $0x140] sm:$0xff]  ;;  %v6832_v59 = vld [vmem:[#allocation22 + $0x148] sm:$0xff] }
0x165c   :  { %6541 = vrot.lane.b32.xlu0 %v6539_v60, %s11203_s1  ;;  %v6540_v23 = vrot.slane %v6538_v7, 7  ;;  %v10260_v7 = vpack.c.bf16 %v6832_v59, %v6831_v58  ;;  %v7010_v59 = vld [vmem:[#allocation24 + $0x80] sm:$0xff] }
0x165e   :  { %6543 = vrot.lane.b32.xlu1 %v6540_v23, %s11203_s1  ;;  %v6834_v23 = vld [vmem:[#allocation22 + $0x158] sm:$0xff] }
0x16ce   :  { %v6542_v47 = vpop.permute.xlu0 %6541 }
0x16cf   :  { %6547 = vst.msk [vmem:[#allocation3] sm:$0x6] %vm5289_vm3, %v6542_v47 }
0x16d0   :  { %v6544_v8 = vpop.permute.xlu1 %6543 }
0x16d1   :  { %6548 = vst.msk [vmem:[#allocation3 + $0x8] sm:$0x6] %vm5289_vm3, %v6544_v8  ;;  %v10263_v8 = vpack.c.bf16 %v6834_v23, %v6833_v9 }
0x16d6   :  { %v8569_v10 = vld.sshfl [vmem:[#allocation3] sm:$0xf pattern:$0x76325410] }
0x16d7   :  { %v8572_v62 = vld.sshfl [vmem:[#allocation3] sm:$0x5a pattern:$0x76325410] }
0x16d8   :  { %v8570_v11 = vld.sshfl [vmem:[#allocation3 + $0x8] sm:$0xf pattern:$0x76325410]  ;;  %v6689_v13 = vcombine.high %v8572_v62, %v8572_v62  ;;  %v8574_v14 = vrot.slane %v8572_v62, 9  ;;  %v6836_v62 = vld [vmem:[#allocation22 + $0x168] sm:$0xff] }
0x16d9   :  { %v6595_v0 = vcombine.low %v8569_v10, %v8570_v11  ;;  %v8573_v15 = vld.sshfl [vmem:[#allocation3 + $0x8] sm:$0x5a pattern:$0x76325410]  ;;  %v6835_v10 = vld [vmem:[#allocation22 + $0x160] sm:$0xff] }
0x16da   :  { %v6697_v21 = vcombine.high %v8573_v15, %v8573_v15  ;;  %v6700_v6 = vrot.slane %v6689_v13, 7  ;;  %v8575_v17 = vrot.slane %v8573_v15, 9  ;;  %v8578_v4 = vld.sshfl [vmem:[#allocation3 + $0x8] sm:$0xf0 pattern:$0x76325410]  ;;  %v10266_v11 = vpack.c.bf16 %v6836_v62, %v6835_v10 }
0x16db   :  { %v6602_v12 = vrot.slane %v6595_v0, %v12372_v35  ;;  %v8577_v52 = vld.sshfl [vmem:[#allocation3] sm:$0xf0 pattern:$0x76325410]  ;;  %v6838_v0 = vld [vmem:[#allocation22 + $0x178] sm:$0xff] }
0x16dc   :  { %v6704_v18 = vrot.slane %v6697_v21, 7  ;;  %v6701_v26 = vsel %vm12379_vm6, %v8574_v14, %v6700_v6  ;;  %v8579_v56 = vcombine.high %v8577_v52, %v8578_v4  ;;  %v6837_v13 = vld [vmem:[#allocation22 + $0x170] sm:$0xff]  ;;  %v10272_v21 = vpack.c.bf16 %v6840_v16, %v6839_v24  ;;  %v7007_v4 = vld [vmem:[#allocation24 + $0x68] sm:$0xff]  ;;  %v7009_v52 = vld [vmem:[#allocation24 + $0x78] sm:$0xff] }
0x16dd   :  { %v6603_v19 = vcombine.high %v6602_v12, %v6602_v12  ;;  %v10269_v15 = vpack.c.bf16 %v6838_v0, %v6837_v13  ;;  %v6841_v6 = vld [vmem:[#allocation22 + $0x190] sm:$0xff]  ;;  %v10311_v58 = vpack.c.bf16 %v7009_v52, %v7008_v5  ;;  %v7141_v52 = vld [vmem:[#allocation24 + $0x118] sm:$0xff] }
0x16de   :  { %v6705_v27 = vsel %vm12379_vm6, %v8575_v17, %v6704_v18  ;;  %v6858_v60 = vrot.slane %v8579_v56, %v12372_v35  ;;  %v6843_v17 = vld [vmem:[#allocation22 + $0x1a0] sm:$0xff]  ;;  %v6844_v18 = vld [vmem:[#allocation22 + $0x1a8] sm:$0xff]  ;;  %v7140_v5 = vld [vmem:[#allocation24 + $0x110] sm:$0xff] }
0x16df   :  { %8571 = vmatprep.mubr.msk.f32.mxu1 %vm538_vm5, %v6603_v19  ;;  %v6727_v28 = vcombine.low %v6701_v26, %v6705_v27  ;;  %v10278_v19 = vpack.c.bf16 %v6844_v18, %v6843_v17  ;;  %v6847_v26 = vld [vmem:[#allocation22 + $0x1c0] sm:$0xff]  ;;  %v6848_v27 = vld [vmem:[#allocation22 + $0x1c8] sm:$0xff] }
0x16e0   :  { %6672 = vmatmul.mubr.f32.vlgmr.msra.gmra.mrb[22].mxu1 %v6602_v12  ;;  %v6859_v47 = vcombine.high %v6858_v60, %v6858_v60  ;;  %v6842_v12 = vld [vmem:[#allocation22 + $0x198] sm:$0xff] }
0x16e1   :  { %10231 = vmatpush1.bf16.msra.mxu1 %v10230_v20  ;;  %v6734_v31 = vrot.slane %v6727_v28, %v12372_v35  ;;  %v10275_v14 = vpack.c.bf16 %v6842_v12, %v6841_v6  ;;  %v6845_v20 = vld [vmem:[#allocation22 + $0x1b0] sm:$0xff]  ;;  %v10284_v28 = vpack.c.bf16 %v6848_v27, %v6847_v26 }
0x16e2   :  { %10232 = vmatprep.subr.bf16.mxu1 %v11200_v1  ;;  %v10281_v25 = vpack.c.bf16 %v6846_v22, %v6845_v20  ;;  %v7127_v20 = vld [vmem:[#allocation24 + $0xa8] sm:$0xff] }
0x16e3   :  { %v6735_v34 = vcombine.high %v6734_v31, %v6734_v31 }
0x16e5   :  { %10234 = vmatpush1.bf16.msra.mxu1 %v10233_v29  ;;  %8576 = vmatprep.mubr.msk.f32.mxu1 %vm538_vm5, %v6735_v34  ;;  %v6849_v29 = vld [vmem:[#allocation22 + $0x1d0] sm:$0xff]  ;;  %v6995_v34 = vld [vmem:[#allocation24 + $0x8] sm:$0xff] }
0x16e6   :  { %10235 = vmatprep.subr.bf16.mxu1 %v11200_v1  ;;  %v10290_v39 = vpack.c.bf16 %v6995_v34, %v6994_v33  ;;  %v7128_v33 = vld [vmem:[#allocation24 + $0xb0] sm:$0xff]  ;;  %v7129_v34 = vld [vmem:[#allocation24 + $0xb8] sm:$0xff] }
0x16e8   :  { %10291 = vmatpush1.bf16.msra.mxu0 %v10290_v39 }
0x16e9   :  { %10237 = vmatpush1.bf16.msra.mxu1 %v10236_v37  ;;  %v6996_v37 = vld [vmem:[#allocation24 + $0x10] sm:$0xff]  ;;  %10292 = vmatprep.subr.bf16.mxu0 %v11200_v1 }
0x16ea   :  { %10238 = vmatprep.subr.bf16.mxu1 %v11200_v1 }
0x16ed   :  { %10240 = vmatpush1.bf16.msra.mxu1 %v10239_v41  ;;  %v10293_v41 = vpack.c.bf16 %v6997_v40, %v6996_v37 }
0x16ee   :  { %10241 = vmatprep.subr.bf16.mxu1 %v11200_v1 }
0x16ef   :  { %10294 = vmatpush1.bf16.msra.mxu0 %v10293_v41  ;;  %v10323_v41 = vpack.c.bf16 %v7129_v34, %v7128_v33  ;;  %v7265_v33 = vld [vmem:[#allocation24 + $0x1b8] sm:$0xff] }
0x16f0   :  { %10295 = vmatprep.subr.bf16.mxu0 %v11200_v1 }
0x16f1   :  { %10243 = vmatpush1.bf16.msra.mxu1 %v10242_v43  ;;  %v10296_v43 = vpack.c.bf16 %v6999_v36, %v6998_v42  ;;  %v7130_v36 = vld [vmem:[#allocation24 + $0xc0] sm:$0xff] }
0x16f2   :  { %10244 = vmatprep.subr.bf16.mxu1 %v11200_v1 }
0x16f3   :  { %10297 = vmatpush1.bf16.msra.mxu0 %v10296_v43  ;;  %v7131_v43 = vld [vmem:[#allocation24 + $0xc8] sm:$0xff] }
0x16f4   :  { %10298 = vmatprep.subr.bf16.mxu0 %v11200_v1 }
0x16f5   :  { %10246 = vmatpush1.bf16.msra.mxu1 %v10245_v48  ;;  %v10299_v48 = vpack.c.bf16 %v7001_v45, %v7000_v44  ;;  %v10326_v45 = vpack.c.bf16 %v7131_v43, %v7130_v36  ;;  %v7413_v43 = vld [vmem:[#allocation25] sm:$0xff] }
0x16f6   :  { %10247 = vmatprep.subr.bf16.mxu1 %v11200_v1 }
0x16f7   :  { %10300 = vmatpush1.bf16.msra.mxu0 %v10299_v48  ;;  %v7132_v48 = vld [vmem:[#allocation24 + $0xd0] sm:$0xff] }
0x16f8   :  { %10301 = vmatprep.subr.bf16.mxu0 %v11200_v1 }
0x16f9   :  { %10249 = vmatpush1.bf16.msra.mxu1 %v10248_v49  ;;  %v10302_v49 = vpack.c.bf16 %v7003_v38, %v7002_v46  ;;  %v7133_v46 = vld [vmem:[#allocation24 + $0xd8] sm:$0xff] }
0x16fa   :  { %10250 = vmatprep.subr.bf16.mxu1 %v11200_v1  ;;  %v10329_v38 = vpack.c.bf16 %v7133_v46, %v7132_v48  ;;  %v7416_v46 = vld [vmem:[#allocation25 + $0x18] sm:$0xff] }
0x16fb   :  { %10303 = vmatpush1.bf16.msra.mxu0 %v10302_v49  ;;  %v7134_v49 = vld [vmem:[#allocation24 + $0xe0] sm:$0xff] }
0x16fc   :  { %10304 = vmatprep.subr.bf16.mxu0 %v11200_v1 }
0x16fd   :  { %10252 = vmatpush1.bf16.msra.mxu1 %v10251_v2  ;;  %v10305_v2 = vpack.c.bf16 %v7005_v50, %v7004_v63  ;;  %v7135_v63 = vld [vmem:[#allocation24 + $0xe8] sm:$0xff] }
0x16fe   :  { %10253 = vmatprep.subr.bf16.mxu1 %v11200_v1  ;;  %v10332_v50 = vpack.c.bf16 %v7135_v63, %v7134_v49  ;;  %v7546_v49 = vld [vmem:[#allocation25 + $0xa8] sm:$0xff] }
0x16ff   :  { %10306 = vmatpush1.bf16.msra.mxu0 %v10305_v2  ;;  %v7136_v2 = vld [vmem:[#allocation24 + $0xf0] sm:$0xff] }
0x1700   :  { %10307 = vmatprep.subr.bf16.mxu0 %v11200_v1 }
0x1701   :  { %10255 = vmatpush1.bf16.msra.mxu1 %v10254_v53  ;;  %v10308_v53 = vpack.c.bf16 %v7007_v4, %v7006_v61  ;;  %v7138_v4 = vld [vmem:[#allocation24 + $0x100] sm:$0xff] }
0x1702   :  { %10256 = vmatprep.subr.bf16.mxu1 %v11200_v1 }
0x1703   :  { %10309 = vmatpush1.bf16.msra.mxu0 %v10308_v53  ;;  %v7139_v53 = vld [vmem:[#allocation24 + $0x108] sm:$0xff] }
0x1704   :  { %10310 = vmatprep.subr.bf16.mxu0 %v11200_v1 }
0x1705   :  { %10258 = vmatpush1.bf16.msra.mxu1 %v10257_v57 }
0x1706   :  { %10259 = vmatprep.subr.bf16.mxu1 %v11200_v1 }
0x1707   :  { %10312 = vmatpush1.bf16.msra.mxu0 %v10311_v58  ;;  %v7143_v58 = vld [vmem:[#allocation24 + $0x128] sm:$0xff] }
0x1708   :  { %6804 = vmatmul.mubr.f32.vlgmr.msra.gmra.mrb[22].mxu1 %v6734_v31  ;;  %v6850_v31 = vld [vmem:[#allocation22 + $0x1d8] sm:$0xff]  ;;  %10313 = vmatprep.subr.bf16.mxu0 %v11200_v1 }
0x1709   :  { %10261 = vmatpush1.bf16.msra.mxu1 %v10260_v7  ;;  %8580 = vmatprep.mubr.msk.f32.mxu1 %vm538_vm5, %v6859_v47  ;;  %v10287_v32 = vpack.c.bf16 %v6850_v31, %v6849_v29  ;;  %v7012_v47 = vld [vmem:[#allocation24 + $0x90] sm:$0xff] }
0x170a   :  { %10262 = vmatprep.subr.bf16.mxu1 %v11200_v1 }
0x170d   :  { %10264 = vmatpush1.bf16.msra.mxu1 %v10263_v8  ;;  %v7013_v8 = vld [vmem:[#allocation24 + $0x98] sm:$0xff] }
0x170e   :  { %10265 = vmatprep.subr.bf16.mxu1 %v11200_v1  ;;  %v10317_v0 = vpack.c.bf16 %v7013_v8, %v7012_v47 }
0x1711   :  { %10267 = vmatpush1.bf16.msra.mxu1 %v10266_v11 }
0x1712   :  { %10268 = vmatprep.subr.bf16.mxu1 %v11200_v1 }
0x1715   :  { %10270 = vmatpush1.bf16.msra.mxu1 %v10269_v15 }
0x1716   :  { %10271 = vmatprep.subr.bf16.mxu1 %v11200_v1 }
0x1719   :  { %10273 = vmatpush1.bf16.msra.mxu1 %v10272_v21 }
0x171a   :  { %10274 = vmatprep.subr.bf16.mxu1 %v11200_v1 }
0x171d   :  { %10276 = vmatpush1.bf16.msra.mxu1 %v10275_v14 }
0x171e   :  { %10277 = vmatprep.subr.bf16.mxu1 %v11200_v1 }
0x1721   :  { %10279 = vmatpush1.bf16.msra.mxu1 %v10278_v19  ;;  %v7126_v19 = vld [vmem:[#allocation24 + $0xa0] sm:$0xff] }
0x1722   :  { %10280 = vmatprep.subr.bf16.mxu1 %v11200_v1 }
0x1725   :  { %10282 = vmatpush1.bf16.msra.mxu1 %v10281_v25 }
0x1726   :  { %10283 = vmatprep.subr.bf16.mxu1 %v11200_v1 }
0x1729   :  { %10285 = vmatpush1.bf16.msra.mxu1 %v10284_v28 }
0x172a   :  { %10286 = vmatprep.subr.bf16.mxu1 %v11200_v1 }
0x172d   :  { %10288 = vmatpush1.bf16.msra.mxu1 %v10287_v32  ;;  %v10320_v32 = vpack.c.bf16 %v7127_v20, %v7126_v19  ;;  %v7258_v19 = vld [vmem:[#allocation24 + $0x180] sm:$0xff]  ;;  %v7259_v20 = vld [vmem:[#allocation24 + $0x188] sm:$0xff] }
0x172e   :  { %10379 = vmatprep.subr.bf16.mxu1 %v11200_v1 }
0x1730   :  { %6928 = vmatmul.mubr.f32.vlgmr.msra.gmra.mrb[22].mxu1 %v6858_v60  ;;  %v7011_v60 = vld [vmem:[#allocation24 + $0x88] sm:$0xff] }
0x1731   :  { %v10314_v23 = vpack.c.bf16 %v7011_v60, %v7010_v59 }
0x1733   :  { %10315 = vmatpush1.bf16.msra.mxu0 %v10314_v23 }
0x1734   :  { %10316 = vmatprep.subr.bf16.mxu0 %v11200_v1 }
0x1737   :  { %10318 = vmatpush1.bf16.msra.mxu0 %v10317_v0  ;;  %v7252_v0 = vld [vmem:[#allocation24 + $0x150] sm:$0xff] }
0x1738   :  { %10319 = vmatprep.subr.bf16.mxu0 %v11200_v1 }
0x1803   :  { %v6929_v54 = vpop.f32.mrb[22].mxu1 }
0x1804   :  { %v10535_v56 = vadd.f32 %v8568_v3, %v6929_v54  ;;  %v6931_v57 = vpop.f32.mrb[23].mxu1  ;;  %v7137_v3 = vld [vmem:[#allocation24 + $0xf8] sm:$0xff]  ;;  %v10338_v54 = vpack.c.bf16 %v7139_v53, %v7138_v4  ;;  %v7418_v4 = vld [vmem:[#allocation25 + $0x28] sm:$0xff] }
0x1805   :  { %v10335_v61 = vpack.c.bf16 %v7137_v3, %v7136_v2  ;;  %v7142_v57 = vld [vmem:[#allocation24 + $0x120] sm:$0xff]  ;;  %v7548_v3 = vld [vmem:[#allocation25 + $0xb8] sm:$0xff] }
0x1806   :  { %v6934_v7 = vmax.f32 %v10535_v56, 0.0  ;;  %v10341_v56 = vpack.c.bf16 %v7141_v52, %v7140_v5  ;;  %v10344_v60 = vpack.c.bf16 %v7143_v58, %v7142_v57  ;;  %v7550_v5 = vld [vmem:[#allocation25 + $0xc8] sm:$0xff]  ;;  %v7420_v57 = vld [vmem:[#allocation25 + $0x38] sm:$0xff] }
0x1808   :  { %v6942_v9 = vrot.slane %v6934_v7, %v12372_v35  ;;  %v7144_v7 = vld [vmem:[#allocation24 + $0x130] sm:$0xff] }
0x180a   :  { %v6943_v10 = vcombine.high %v6942_v9, %v6942_v9  ;;  %v6950_v62 = vrot.slane %v6942_v9, %v12372_v35  ;;  %v7145_v9 = vld [vmem:[#allocation24 + $0x138] sm:$0xff] }
0x180b   :  { %v10347_v8 = vpack.c.bf16 %v7145_v9, %v7144_v7  ;;  %v7421_v9 = vld [vmem:[#allocation25 + $0x40] sm:$0xff] }
0x180c   :  { %v6958_v11 = vrot.slane %v6950_v62, 7  ;;  %v6957_v13 = vrot.slane %v6943_v10, %v12372_v35  ;;  %v7250_v10 = vld [vmem:[#allocation24 + $0x140] sm:$0xff]  ;;  %v7251_v62 = vld [vmem:[#allocation24 + $0x148] sm:$0xff] }
0x180e   :  { %6960 = vrot.lane.b32.xlu0 %v6958_v11, %s11203_s1  ;;  %v6959_v15 = vrot.slane %v6957_v13, 7  ;;  %v10350_v13 = vpack.c.bf16 %v7251_v62, %v7250_v10  ;;  %v7554_v10 = vld [vmem:[#allocation25 + $0xe8] sm:$0xff] }
0x1810   :  { %6962 = vrot.lane.b32.xlu1 %v6959_v15, %s11203_s1  ;;  %v7253_v15 = vld [vmem:[#allocation24 + $0x158] sm:$0xff] }
0x1880   :  { %v6961_v24 = vpop.permute.xlu0 %6960 }
0x1881   :  { %6966 = vst.msk [vmem:[#allocation3] sm:$0x6] %vm5289_vm3, %v6961_v24 }
0x1882   :  { %v6963_v16 = vpop.permute.xlu1 %6962 }
0x1883   :  { %6967 = vst.msk [vmem:[#allocation3 + $0x8] sm:$0x6] %vm5289_vm3, %v6963_v16  ;;  %v10353_v16 = vpack.c.bf16 %v7253_v15, %v7252_v0 }
0x1888   :  { %v8582_v21 = vld.sshfl [vmem:[#allocation3] sm:$0xf pattern:$0x76325410] }
0x1889   :  { %v8585_v6 = vld.sshfl [vmem:[#allocation3] sm:$0x5a pattern:$0x76325410] }
0x188a   :  { %v8583_v12 = vld.sshfl [vmem:[#allocation3 + $0x8] sm:$0xf pattern:$0x76325410]  ;;  %v7108_v14 = vcombine.high %v8585_v6, %v8585_v6  ;;  %v8587_v27 = vrot.slane %v8585_v6, 9  ;;  %v7255_v6 = vld [vmem:[#allocation24 + $0x168] sm:$0xff] }
0x188b   :  { %v7014_v17 = vcombine.low %v8582_v21, %v8583_v12  ;;  %v8586_v18 = vld.sshfl [vmem:[#allocation3 + $0x8] sm:$0x5a pattern:$0x76325410]  ;;  %v7254_v21 = vld [vmem:[#allocation24 + $0x160] sm:$0xff] }
0x188c   :  { %v7116_v22 = vcombine.high %v8586_v18, %v8586_v18  ;;  %v7119_v25 = vrot.slane %v7108_v14, 7  ;;  %v8588_v28 = vrot.slane %v8586_v18, 9  ;;  %v8591_v59 = vld.sshfl [vmem:[#allocation3 + $0x8] sm:$0xf0 pattern:$0x76325410]  ;;  %v10356_v12 = vpack.c.bf16 %v7255_v6, %v7254_v21 }
0x188d   :  { %v7021_v26 = vrot.slane %v7014_v17, %v12372_v35  ;;  %v8590_v23 = vld.sshfl [vmem:[#allocation3] sm:$0xf0 pattern:$0x76325410]  ;;  %v7257_v17 = vld [vmem:[#allocation24 + $0x178] sm:$0xff]  ;;  %v7426_v21 = vld [vmem:[#allocation25 + $0x68] sm:$0xff] }
0x188e   :  { %v7123_v29 = vrot.slane %v7116_v22, 7  ;;  %v7120_v37 = vsel %vm12379_vm6, %v8587_v27, %v7119_v25  ;;  %v8592_v47 = vcombine.high %v8590_v23, %v8591_v59  ;;  %v7256_v14 = vld [vmem:[#allocation24 + $0x170] sm:$0xff]  ;;  %v10362_v22 = vpack.c.bf16 %v7259_v20, %v7258_v19  ;;  %v7422_v23 = vld [vmem:[#allocation25 + $0x48] sm:$0xff] }
0x188f   :  { %v7022_v31 = vcombine.high %v7021_v26, %v7021_v26  ;;  %v10359_v18 = vpack.c.bf16 %v7257_v17, %v7256_v14  ;;  %v7260_v25 = vld [vmem:[#allocation24 + $0x190] sm:$0xff]  ;;  %v10392_v62 = vpack.c.bf16 %v7422_v23, %v7421_v9  ;;  %v7556_v17 = vld [vmem:[#allocation25 + $0xf8] sm:$0xff] }
0x1890   :  { %v7124_v39 = vsel %vm12379_vm6, %v8588_v28, %v7123_v29  ;;  %v7277_v11 = vrot.slane %v8592_v47, %v12372_v35  ;;  %v7262_v28 = vld [vmem:[#allocation24 + $0x1a0] sm:$0xff]  ;;  %v7263_v29 = vld [vmem:[#allocation24 + $0x1a8] sm:$0xff]  ;;  %v7551_v59 = vld [vmem:[#allocation25 + $0xd0] sm:$0xff] }
0x1891   :  { %8584 = vmatprep.mubr.msk.f32.mxu0 %vm538_vm5, %v7022_v31  ;;  %v7146_v40 = vcombine.low %v7120_v37, %v7124_v39  ;;  %v10368_v31 = vpack.c.bf16 %v7263_v29, %v7262_v28  ;;  %v7266_v37 = vld [vmem:[#allocation24 + $0x1c0] sm:$0xff]  ;;  %v7267_v39 = vld [vmem:[#allocation24 + $0x1c8] sm:$0xff]  ;;  %v7555_v14 = vld [vmem:[#allocation25 + $0xf0] sm:$0xff] }
0x1892   :  { %7091 = vmatmul.mubr.f32.vlgmr.msra.gmra.mrb[20].mxu0 %v7021_v26  ;;  %v7278_v24 = vcombine.high %v7277_v11, %v7277_v11  ;;  %v7261_v26 = vld [vmem:[#allocation24 + $0x198] sm:$0xff]  ;;  %v7429_v29 = vld [vmem:[#allocation25 + $0x80] sm:$0xff] }
0x1893   :  { %10321 = vmatpush1.bf16.msra.mxu0 %v10320_v32  ;;  %v7153_v42 = vrot.slane %v7146_v40, %v12372_v35  ;;  %v10365_v27 = vpack.c.bf16 %v7261_v26, %v7260_v25  ;;  %v7264_v32 = vld [vmem:[#allocation24 + $0x1b0] sm:$0xff]  ;;  %v10374_v40 = vpack.c.bf16 %v7267_v39, %v7266_v37  ;;  %v7428_v25 = vld [vmem:[#allocation25 + $0x78] sm:$0xff]  ;;  %v7557_v26 = vld [vmem:[#allocation25 + $0x100] sm:$0xff] }
0x1894   :  { %10322 = vmatprep.subr.bf16.mxu0 %v11200_v1  ;;  %v10371_v34 = vpack.c.bf16 %v7265_v33, %v7264_v32  ;;  %v7560_v37 = vld [vmem:[#allocation25 + $0x118] sm:$0xff] }
0x1895   :  { %v7154_v44 = vcombine.high %v7153_v42, %v7153_v42 }
0x1897   :  { %10324 = vmatpush1.bf16.msra.mxu0 %v10323_v41  ;;  %8589 = vmatprep.mubr.msk.f32.mxu0 %vm538_vm5, %v7154_v44  ;;  %v7268_v41 = vld [vmem:[#allocation24 + $0x1d0] sm:$0xff]  ;;  %v7414_v44 = vld [vmem:[#allocation25 + $0x8] sm:$0xff] }
0x1898   :  { %10325 = vmatprep.subr.bf16.mxu0 %v11200_v1  ;;  %v10380_v48 = vpack.c.bf16 %v7414_v44, %v7413_v43 }
0x189a   :  { %10381 = vmatpush1.bf16.msra.mxu1 %v10380_v48  ;;  %v7562_v48 = vld [vmem:[#allocation25 + $0x128] sm:$0xff] }
0x189b   :  { %10327 = vmatpush1.bf16.msra.mxu0 %v10326_v45  ;;  %v7415_v45 = vld [vmem:[#allocation25 + $0x10] sm:$0xff]  ;;  %10382 = vmatprep.subr.bf16.mxu1 %v11200_v1 }
0x189c   :  { %10328 = vmatprep.subr.bf16.mxu0 %v11200_v1  ;;  %v10383_v2 = vpack.c.bf16 %v7416_v46, %v7415_v45  ;;  %v7561_v45 = vld [vmem:[#allocation25 + $0x120] sm:$0xff] }
0x189e   :  { %10384 = vmatpush1.bf16.msra.mxu1 %v10383_v2  ;;  %v7563_v2 = vld [vmem:[#allocation25 + $0x130] sm:$0xff] }
0x189f   :  { %10330 = vmatpush1.bf16.msra.mxu0 %v10329_v38  ;;  %v7545_v38 = vld [vmem:[#allocation25 + $0xa0] sm:$0xff]  ;;  %10385 = vmatprep.subr.bf16.mxu1 %v11200_v1 }
0x18a0   :  { %10331 = vmatprep.subr.bf16.mxu0 %v11200_v1  ;;  %v10410_v63 = vpack.c.bf16 %v7546_v49, %v7545_v38 }
0x18a3   :  { %10333 = vmatpush1.bf16.msra.mxu0 %v10332_v50  ;;  %v7547_v50 = vld [vmem:[#allocation25 + $0xb0] sm:$0xff] }
0x18a4   :  { %10334 = vmatprep.subr.bf16.mxu0 %v11200_v1  ;;  %v10413_v53 = vpack.c.bf16 %v7548_v3, %v7547_v50  ;;  %v10434_v50 = vpack.c.bf16 %v7562_v48, %v7561_v45  ;;  %v7564_v3 = vld [vmem:[#allocation25 + $0x138] sm:$0xff]  ;;  %v7686_v45 = vld [vmem:[#allocation25 + $0x1c8] sm:$0xff] }
0x18a7   :  { %10336 = vmatpush1.bf16.msra.mxu0 %v10335_v61  ;;  %v7417_v61 = vld [vmem:[#allocation25 + $0x20] sm:$0xff] }
0x18a8   :  { %10337 = vmatprep.subr.bf16.mxu0 %v11200_v1  ;;  %v10386_v52 = vpack.c.bf16 %v7418_v4, %v7417_v61  ;;  %v10437_v61 = vpack.c.bf16 %v7564_v3, %v7563_v2  ;;  %v8594_v2 = vld [vmem:[%s12850_s13] ss:$0 sm:$0xff] }
0x18aa   :  { %10387 = vmatpush1.bf16.msra.mxu1 %v10386_v52 }
0x18ab   :  { %10339 = vmatpush1.bf16.msra.mxu0 %v10338_v54  ;;  %v7549_v54 = vld [vmem:[#allocation25 + $0xc0] sm:$0xff]  ;;  %10388 = vmatprep.subr.bf16.mxu1 %v11200_v1 }
0x18ac   :  { %10340 = vmatprep.subr.bf16.mxu0 %v11200_v1  ;;  %v10416_v58 = vpack.c.bf16 %v7550_v5, %v7549_v54 }
0x18af   :  { %10342 = vmatpush1.bf16.msra.mxu0 %v10341_v56  ;;  %v7419_v56 = vld [vmem:[#allocation25 + $0x30] sm:$0xff] }
0x18b0   :  { %10343 = vmatprep.subr.bf16.mxu0 %v11200_v1  ;;  %v10389_v7 = vpack.c.bf16 %v7420_v57, %v7419_v56 }
0x18b2   :  { %10390 = vmatpush1.bf16.msra.mxu1 %v10389_v7 }
0x18b3   :  { %10345 = vmatpush1.bf16.msra.mxu0 %v10344_v60  ;;  %v7552_v60 = vld [vmem:[#allocation25 + $0xd8] sm:$0xff]  ;;  %10391 = vmatprep.subr.bf16.mxu1 %v11200_v1 }
0x18b4   :  { %10346 = vmatprep.subr.bf16.mxu0 %v11200_v1  ;;  %v10419_v47 = vpack.c.bf16 %v7552_v60, %v7551_v59  ;;  %v7670_v59 = vld [vmem:[#allocation25 + $0x148] sm:$0xff] }
0x18b6   :  { %10393 = vmatpush1.bf16.msra.mxu1 %v10392_v62 }
0x18b7   :  { %10348 = vmatpush1.bf16.msra.mxu0 %v10347_v8  ;;  %v7553_v8 = vld [vmem:[#allocation25 + $0xe0] sm:$0xff]  ;;  %10394 = vmatprep.subr.bf16.mxu1 %v11200_v1 }
0x18b8   :  { %10349 = vmatprep.subr.bf16.mxu0 %v11200_v1  ;;  %v10422_v0 = vpack.c.bf16 %v7554_v10, %v7553_v8 }
0x18ba   :  { %7223 = vmatmul.mubr.f32.vlgmr.msra.gmra.mrb[20].mxu0 %v7153_v42  ;;  %v7269_v42 = vld [vmem:[#allocation24 + $0x1d8] sm:$0xff] }
0x18bb   :  { %10351 = vmatpush1.bf16.msra.mxu0 %v10350_v13  ;;  %8593 = vmatprep.mubr.msk.f32.mxu0 %vm538_vm5, %v7278_v24  ;;  %v10377_v36 = vpack.c.bf16 %v7269_v42, %v7268_v41  ;;  %v7424_v13 = vld [vmem:[#allocation25 + $0x58] sm:$0xff]  ;;  %v8581_v24 = vld [vmem:[%s12849_s3] ss:$0 sm:$0xff]  ;;  %v7431_v41 = vld [vmem:[#allocation25 + $0x90] sm:$0xff] }
0x18bc   :  { %10352 = vmatprep.subr.bf16.mxu0 %v11200_v1  ;;  %v7432_v42 = vld [vmem:[#allocation25 + $0x98] sm:$0xff] }
0x18bd   :  { %v10407_v49 = vpack.c.bf16 %v7432_v42, %v7431_v41  ;;  %v7683_v42 = vld [vmem:[#allocation25 + $0x1b0] sm:$0xff] }
0x18bf   :  { %10354 = vmatpush1.bf16.msra.mxu0 %v10353_v16  ;;  %v7425_v16 = vld [vmem:[#allocation25 + $0x60] sm:$0xff] }
0x18c0   :  { %10355 = vmatprep.subr.bf16.mxu0 %v11200_v1  ;;  %v10398_v6 = vpack.c.bf16 %v7426_v21, %v7425_v16  ;;  %v7671_v16 = vld [vmem:[#allocation25 + $0x150] sm:$0xff]  ;;  %v7672_v21 = vld [vmem:[#allocation25 + $0x158] sm:$0xff] }
0x18c3   :  { %10357 = vmatpush1.bf16.msra.mxu0 %v10356_v12 }
0x18c4   :  { %10358 = vmatprep.subr.bf16.mxu0 %v11200_v1 }
0x18c7   :  { %10360 = vmatpush1.bf16.msra.mxu0 %v10359_v18  ;;  %v7427_v18 = vld [vmem:[#allocation25 + $0x70] sm:$0xff] }
0x18c8   :  { %10361 = vmatprep.subr.bf16.mxu0 %v11200_v1  ;;  %v10401_v28 = vpack.c.bf16 %v7428_v25, %v7427_v18  ;;  %v10443_v18 = vpack.c.bf16 %v7672_v21, %v7671_v16 }
0x18cb   :  { %10363 = vmatpush1.bf16.msra.mxu0 %v10362_v22  ;;  %v10425_v22 = vpack.c.bf16 %v7556_v17, %v7555_v14 }
0x18cc   :  { %10364 = vmatprep.subr.bf16.mxu0 %v11200_v1 }
0x18cf   :  { %10366 = vmatpush1.bf16.msra.mxu0 %v10365_v27  ;;  %v7558_v27 = vld [vmem:[#allocation25 + $0x108] sm:$0xff] }
0x18d0   :  { %10367 = vmatprep.subr.bf16.mxu0 %v11200_v1  ;;  %v10428_v33 = vpack.c.bf16 %v7558_v27, %v7557_v26  ;;  %v7675_v27 = vld [vmem:[#allocation25 + $0x170] sm:$0xff] }
0x18d3   :  { %10369 = vmatpush1.bf16.msra.mxu0 %v10368_v31  ;;  %v7430_v31 = vld [vmem:[#allocation25 + $0x88] sm:$0xff] }
0x18d4   :  { %10370 = vmatprep.subr.bf16.mxu0 %v11200_v1 }
0x18d7   :  { %10372 = vmatpush1.bf16.msra.mxu0 %v10371_v34  ;;  %v7559_v34 = vld [vmem:[#allocation25 + $0x110] sm:$0xff] }
0x18d8   :  { %10373 = vmatprep.subr.bf16.mxu0 %v11200_v1  ;;  %v10431_v44 = vpack.c.bf16 %v7560_v37, %v7559_v34  ;;  %v7680_v34 = vld [vmem:[#allocation25 + $0x198] sm:$0xff] }
0x18db   :  { %10375 = vmatpush1.bf16.msra.mxu0 %v10374_v40  ;;  %v10404_v40 = vpack.c.bf16 %v7430_v31, %v7429_v29  ;;  %v7677_v29 = vld [vmem:[#allocation25 + $0x180] sm:$0xff]  ;;  %v7678_v31 = vld [vmem:[#allocation25 + $0x188] sm:$0xff] }
0x18dc   :  { %10376 = vmatprep.subr.bf16.mxu0 %v11200_v1 }
0x18df   :  { %10378 = vmatpush1.bf16.msra.mxu0 %v10377_v36 }
0x18e0   :  { %10409 = vmatprep.subr.bf16.mxu0 %v11200_v1 }
0x18e2   :  { %7347 = vmatmul.mubr.f32.vlgmr.msra.gmra.mrb[20].mxu0 %v7277_v11  ;;  %v7423_v11 = vld [vmem:[#allocation25 + $0x50] sm:$0xff] }
0x18e3   :  { %10411 = vmatpush1.bf16.msra.mxu0 %v10410_v63  ;;  %v10395_v15 = vpack.c.bf16 %v7424_v13, %v7423_v11 }
0x18e4   :  { %10412 = vmatprep.subr.bf16.mxu0 %v11200_v1 }
0x18e5   :  { %10396 = vmatpush1.bf16.msra.mxu1 %v10395_v15 }
0x18e6   :  { %10397 = vmatprep.subr.bf16.mxu1 %v11200_v1 }
0x18e7   :  { %10414 = vmatpush1.bf16.msra.mxu0 %v10413_v53 }
0x18e8   :  { %10415 = vmatprep.subr.bf16.mxu0 %v11200_v1 }
0x18e9   :  { %10399 = vmatpush1.bf16.msra.mxu1 %v10398_v6 }
0x18ea   :  { %10400 = vmatprep.subr.bf16.mxu1 %v11200_v1 }
0x18eb   :  { %10417 = vmatpush1.bf16.msra.mxu0 %v10416_v58  ;;  %v7669_v58 = vld [vmem:[#allocation25 + $0x140] sm:$0xff] }
0x18ec   :  { %10418 = vmatprep.subr.bf16.mxu0 %v11200_v1  ;;  %v10440_v11 = vpack.c.bf16 %v7670_v59, %v7669_v58 }
0x18ed   :  { %10402 = vmatpush1.bf16.msra.mxu1 %v10401_v28  ;;  %v7676_v28 = vld [vmem:[#allocation25 + $0x178] sm:$0xff] }
0x18ee   :  { %10403 = vmatprep.subr.bf16.mxu1 %v11200_v1  ;;  %v10449_v51 = vpack.c.bf16 %v7676_v28, %v7675_v27  ;;  %v8172_v27 = vld [vmem:[%s12852_s11 + $0x30] sm:$0xff]  ;;  %v8173_v28 = vld [vmem:[%s12852_s11 + $0x38] sm:$0xff] }
0x18ef   :  { %10420 = vmatpush1.bf16.msra.mxu0 %v10419_v47 }
0x18f0   :  { %10421 = vmatprep.subr.bf16.mxu0 %v11200_v1 }
0x18f1   :  { %10405 = vmatpush1.bf16.msra.mxu1 %v10404_v40  ;;  %v7682_v40 = vld [vmem:[#allocation25 + $0x1a8] sm:$0xff] }
0x18f2   :  { %10406 = vmatprep.subr.bf16.mxu1 %v11200_v1 }
0x18f3   :  { %10423 = vmatpush1.bf16.msra.mxu0 %v10422_v0 }
0x18f4   :  { %10424 = vmatprep.subr.bf16.mxu0 %v11200_v1 }
0x18f5   :  { %10408 = vmatpush1.bf16.msra.mxu1 %v10407_v49 }
0x18f6   :  { %10439 = vmatprep.subr.bf16.mxu1 %v11200_v1 }
0x18f7   :  { %10426 = vmatpush1.bf16.msra.mxu0 %v10425_v22 }
0x18f8   :  { %10427 = vmatprep.subr.bf16.mxu0 %v11200_v1 }
0x18fb   :  { %10429 = vmatpush1.bf16.msra.mxu0 %v10428_v33  ;;  %v7679_v33 = vld [vmem:[#allocation25 + $0x190] sm:$0xff] }
0x18fc   :  { %10430 = vmatprep.subr.bf16.mxu0 %v11200_v1  ;;  %v10455_v37 = vpack.c.bf16 %v7680_v34, %v7679_v33  ;;  %v8176_v33 = vld [vmem:[%s12852_s11 + $0x50] sm:$0xff]  ;;  %v8177_v34 = vld [vmem:[%s12852_s11 + $0x58] sm:$0xff] }
0x18ff   :  { %10432 = vmatpush1.bf16.msra.mxu0 %v10431_v44  ;;  %v7685_v44 = vld [vmem:[#allocation25 + $0x1c0] sm:$0xff] }
0x1900   :  { %10433 = vmatprep.subr.bf16.mxu0 %v11200_v1  ;;  %v10464_v48 = vpack.c.bf16 %v7686_v45, %v7685_v44  ;;  %v8617_v45 = vld [vmem:[%s12851_s27 + $0x50] sm:$0xff] }
0x1903   :  { %10435 = vmatpush1.bf16.msra.mxu0 %v10434_v50 }
0x1904   :  { %10436 = vmatprep.subr.bf16.mxu0 %v11200_v1 }
0x1907   :  { %10438 = vmatpush1.bf16.msra.mxu0 %v10437_v61 }
0x1908   :  { %10469 = vmatprep.subr.bf16.mxu0 %v11200_v1 }
0x19b5   :  { %v7348_v12 = vpop.f32.mrb[20].mxu0 }
0x19b6   :  { %v10536_v19 = vadd.f32 %v8581_v24, %v7348_v12  ;;  %v7350_v20 = vpop.f32.mrb[21].mxu0 }
0x19b7   :  { %v7674_v20 = vld [vmem:[#allocation25 + $0x168] sm:$0xff] }
0x19b8   :  { %v7353_v32 = vmax.f32 %v10536_v19, 0.0  ;;  %v7673_v19 = vld [vmem:[#allocation25 + $0x160] sm:$0xff] }
0x19b9   :  { %v10446_v26 = vpack.c.bf16 %v7674_v20, %v7673_v19  ;;  %v8169_v19 = vld [vmem:[%s12852_s11 + $0x18] sm:$0xff] }
0x19ba   :  { %v7361_v39 = vrot.slane %v7353_v32, %v12372_v35  ;;  %v10452_v32 = vpack.c.bf16 %v7678_v31, %v7677_v29  ;;  %v8174_v29 = vld [vmem:[%s12852_s11 + $0x40] sm:$0xff]  ;;  %v8175_v31 = vld [vmem:[%s12852_s11 + $0x48] sm:$0xff] }
0x19bc   :  { %v7362_v36 = vcombine.high %v7361_v39, %v7361_v39  ;;  %v7369_v43 = vrot.slane %v7361_v39, %v12372_v35  ;;  %v7681_v39 = vld [vmem:[#allocation25 + $0x1a0] sm:$0xff] }
0x19bd   :  { %v10458_v41 = vpack.c.bf16 %v7682_v40, %v7681_v39  ;;  %v8611_v39 = vld [vmem:[%s12851_s27 + $0x28] sm:$0xff]  ;;  %v8612_v40 = vld [vmem:[%s12851_s27 + $0x30] sm:$0xff] }
0x19be   :  { %v7377_v46 = vrot.slane %v7369_v43, 7  ;;  %v7376_v38 = vrot.slane %v7362_v36, %v12372_v35  ;;  %v7684_v36 = vld [vmem:[#allocation25 + $0x1b8] sm:$0xff] }
0x19bf   :  { %v10461_v43 = vpack.c.bf16 %v7684_v36, %v7683_v42  ;;  %v8613_v42 = vld [vmem:[%s12851_s27 + $0x38] sm:$0xff]  ;;  %v8614_v36 = vld [vmem:[%s12851_s27 + $0x40] sm:$0xff] }
0x19c0   :  { %7379 = vrot.lane.b32.xlu0 %v7377_v46, %s11203_s1  ;;  %v7378_v63 = vrot.slane %v7376_v38, 7  ;;  %v7687_v46 = vld [vmem:[#allocation25 + $0x1d0] sm:$0xff]  ;;  %v7688_v38 = vld [vmem:[#allocation25 + $0x1d8] sm:$0xff]  ;;  %v10479_v44 = vpack.c.bf16 %v8614_v36, %v8613_v42 }
0x19c1   :  { %v10467_v49 = vpack.c.bf16 %v7688_v38, %v7687_v46  ;;  %v8615_v46 = vld [vmem:[%s12851_s27 + $0x48] sm:$0xff] }
0x19c2   :  { %7381 = vrot.lane.b32.xlu1 %v7378_v63, %s11203_s1 }
0x1a32   :  { %v7380_v4 = vpop.permute.xlu0 %7379 }
0x1a33   :  { %7385 = vst.msk [vmem:[#allocation3] sm:$0x6] %vm5289_vm3, %v7380_v4 }
0x1a34   :  { %v7382_v53 = vpop.permute.xlu1 %7381 }
0x1a35   :  { %7386 = vst.msk [vmem:[#allocation3 + $0x8] sm:$0x6] %vm5289_vm3, %v7382_v53 }
0x1a3a   :  { %v8595_v54 = vld.sshfl [vmem:[#allocation3] sm:$0xf pattern:$0x76325410] }
0x1a3b   :  { %v8603_v5 = vld.sshfl [vmem:[#allocation3] sm:$0xf0 pattern:$0x76325410] }
0x1a3c   :  { %v8596_v52 = vld.sshfl [vmem:[#allocation3 + $0x8] sm:$0xf pattern:$0x76325410] }
0x1a3d   :  { %v7433_v56 = vcombine.low %v8595_v54, %v8596_v52  ;;  %v8604_v57 = vld.sshfl [vmem:[#allocation3 + $0x8] sm:$0xf0 pattern:$0x76325410] }
0x1a3e   :  { %v8605_v60 = vcombine.high %v8603_v5, %v8604_v57  ;;  %v8598_v7 = vld.sshfl [vmem:[#allocation3] sm:$0x5a pattern:$0x76325410] }
0x1a3f   :  { %v7440_v9 = vrot.slane %v7433_v56, %v12372_v35  ;;  %v8599_v23 = vld.sshfl [vmem:[#allocation3 + $0x8] sm:$0x5a pattern:$0x76325410]  ;;  %v7527_v47 = vcombine.high %v8598_v7, %v8598_v7  ;;  %v8600_v0 = vrot.slane %v8598_v7, 9 }
0x1a40   :  { %v12688_v8 = vrot.slane %v8605_v60, %v12372_v35  ;;  %v7535_v10 = vcombine.high %v8599_v23, %v8599_v23  ;;  %v8601_v15 = vrot.slane %v8599_v23, 9  ;;  %v7816_v23 = vld [vmem:[%s12851_s27] sm:$0xff] }
0x1a41   :  { %v7441_v62 = vcombine.high %v7440_v9, %v7440_v9  ;;  %v7538_v13 = vrot.slane %v7527_v47, 7  ;;  %v7817_v47 = vld [vmem:[%s12851_s27 + $0x8] sm:$0xff] }
0x1a42   :  { %v7542_v24 = vrot.slane %v7535_v10, 7  ;;  %v7697_v6 = vcombine.high %v12688_v8, %v12688_v8  ;;  %v10470_v10 = vpack.c.bf16 %v7817_v47, %v7816_v23  ;;  %v8607_v23 = vld [vmem:[%s11380_s8] ss:$0 sm:$0xff] }
0x1a43   :  { %8597 = vmatprep.mubr.msk.f32.mxu1 %vm538_vm5, %v7441_v62  ;;  %v7539_v12 = vsel %vm12379_vm6, %v8600_v0, %v7538_v13  ;;  %v7819_v62 = vld [vmem:[%s12851_s27 + $0x18] sm:$0xff]  ;;  %v8263_v47 = vld [vmem:[%s12853_s18] sm:$0xff] }
0x1a44   :  { %7510 = vmatmul.mubr.f32.vlgmr.msra.gmra.mrb[24].mxu1 %v7440_v9  ;;  %v7543_v14 = vsel %vm12379_vm6, %v8601_v15, %v7542_v24 }
0x1a45   :  { %10441 = vmatpush1.bf16.msra.mxu1 %v10440_v11  ;;  %8606 = vmatprep.mubr.msk.f32.mxu1 %vm538_vm5, %v7697_v6  ;;  %v7565_v17 = vcombine.low %v7539_v12, %v7543_v14  ;;  %v8166_v12 = vld [vmem:[%s12852_s11] sm:$0xff]  ;;  %v8167_v14 = vld [vmem:[%s12852_s11 + $0x8] sm:$0xff] }
0x1a46   :  { %10442 = vmatprep.subr.bf16.mxu1 %v11200_v1 }
0x1a47   :  { %v7572_v22 = vrot.slane %v7565_v17, %v12372_v35  ;;  %v8168_v17 = vld [vmem:[%s12852_s11 + $0x10] sm:$0xff] }
0x1a48   :  { %v10497_v20 = vpack.c.bf16 %v8169_v19, %v8168_v17 }
0x1a49   :  { %v7573_v25 = vcombine.high %v7572_v22, %v7572_v22  ;;  %10444 = vmatpush1.bf16.msra.mxu1 %v10443_v18  ;;  %v10494_v18 = vpack.c.bf16 %v8167_v14, %v8166_v12  ;;  %v8270_v12 = vld [vmem:[%s12853_s18 + $0x38] sm:$0xf] }
0x1a4a   :  { %10445 = vmatprep.subr.bf16.mxu1 %v11200_v1 }
0x1a4b   :  { %8602 = vmatprep.mubr.msk.f32.mxu0 %vm538_vm5, %v7573_v25  ;;  %vm11208_vm5 = vmmov 0   ;;  %v8171_v25 = vld [vmem:[%s12852_s11 + $0x28] sm:$0xff] }
0x1a4c   :  { %7642 = vmatmul.mubr.f32.vlgmr.msra.gmra.mrb[22].mxu0 %v7572_v22  ;;  %v8170_v22 = vld [vmem:[%s12852_s11 + $0x20] sm:$0xff] }
0x1a4d   :  { %10447 = vmatpush1.bf16.msra.mxu1 %v10446_v26  ;;  %8695 = vmatprep.mubr.msk.f32.mxu0 %vm11208_vm5, %v11201_v30  ;;  %v10500_v26 = vpack.c.bf16 %v8171_v25, %v8170_v22  ;;  %v8633_v22 = vld [vmem:[#allocation4] ss:$0 sm:$0xff] }
0x1a4e   :  { %10448 = vmatprep.subr.bf16.mxu1 %v11200_v1  ;;  %10471 = vmatpush3.bf16.msra.mxu0 %v10470_v10 }
0x1a4f   :  { %10472 = vmatprep.subr.bf16.mxu0 %v11200_v1 }
0x1a51   :  { %10450 = vmatpush1.bf16.msra.mxu1 %v10449_v51  ;;  %v10503_v51 = vpack.c.bf16 %v8173_v28, %v8172_v27 }
0x1a52   :  { %10451 = vmatprep.subr.bf16.mxu1 %v11200_v1 }
0x1a55   :  { %10453 = vmatpush1.bf16.msra.mxu1 %v10452_v32  ;;  %v10506_v32 = vpack.c.bf16 %v8175_v31, %v8174_v29 }
0x1a56   :  { %10454 = vmatprep.subr.bf16.mxu1 %v11200_v1 }
0x1a59   :  { %10456 = vmatpush1.bf16.msra.mxu1 %v10455_v37  ;;  %v10509_v37 = vpack.c.bf16 %v8177_v34, %v8176_v33 }
0x1a5a   :  { %10457 = vmatprep.subr.bf16.mxu1 %v11200_v1 }
0x1a5d   :  { %10459 = vmatpush1.bf16.msra.mxu1 %v10458_v41  ;;  %v10476_v41 = vpack.c.bf16 %v8612_v40, %v8611_v39 }
0x1a5e   :  { %10460 = vmatprep.subr.bf16.mxu1 %v11200_v1 }
0x1a61   :  { %10462 = vmatpush1.bf16.msra.mxu1 %v10461_v43 }
0x1a62   :  { %10463 = vmatprep.subr.bf16.mxu1 %v11200_v1 }
0x1a65   :  { %10465 = vmatpush1.bf16.msra.mxu1 %v10464_v48  ;;  %v8618_v48 = vld [vmem:[%s12851_s27 + $0x58] sm:$0xff] }
0x1a66   :  { %10466 = vmatprep.subr.bf16.mxu1 %v11200_v1  ;;  %v10482_v38 = vpack.c.bf16 %v8618_v48, %v8617_v45 }
0x1a69   :  { %10468 = vmatpush1.bf16.msra.mxu1 %v10467_v49  ;;  %v8619_v49 = vld [vmem:[%s12851_s27 + $0x60] sm:$0xff] }
0x1a6a   :  { %10493 = vmatprep.subr.bf16.mxu1 %v11200_v1 }
0x1a6c   :  { %7766 = vmatmul.mubr.f32.vlgmr.msra.gmra.mrb[26].mxu1 %v12688_v8  ;;  %v7818_v8 = vld [vmem:[%s12851_s27 + $0x10] sm:$0xff] }
0x1a6d   :  { %8767 = vmatprep.mubr.msk.f32.mxu1 %vm11208_vm5, %v11201_v30  ;;  %10495 = vmatpush3.bf16.msra.mxu1 %v10494_v18 }
0x1a6e   :  { %10496 = vmatprep.subr.bf16.mxu1 %v11200_v1 }
0x1a71   :  { %10498 = vmatpush3.bf16.msra.mxu1 %v10497_v20 }
0x1a72   :  { %10499 = vmatprep.subr.bf16.mxu1 %v11200_v1 }
0x1a75   :  { %10501 = vmatpush3.bf16.msra.mxu1 %v10500_v26 }
0x1a76   :  { %10502 = vmatprep.subr.bf16.mxu1 %v11200_v1 }
0x1a79   :  { %10504 = vmatpush3.bf16.msra.mxu1 %v10503_v51 }
0x1a7a   :  { %10505 = vmatprep.subr.bf16.mxu1 %v11200_v1 }
0x1a7d   :  { %10507 = vmatpush3.bf16.msra.mxu1 %v10506_v32 }
0x1a7e   :  { %10508 = vmatprep.subr.bf16.mxu1 %v11200_v1 }
0x1a81   :  { %10510 = vmatpush3.bf16.msra.mxu1 %v10509_v37 }
0x1a82   :  { %10511 = vmatprep.subr.bf16.mxu1 %v11200_v1 }
0x1b17   :  { %v7511_v63 = vpop.f32.mrb[24].mxu1 }
0x1b18   :  { %v7513_v50 = vpop.f32.mrb[25].mxu1  ;;  %v7515_v3 = vadd.f32 %v8594_v2, %v7511_v63  ;;  %v8620_v63 = vld [vmem:[%s12851_s27 + $0x68] sm:$0xff] }
0x1b19   :  { %v10485_v2 = vpack.c.bf16 %v8620_v63, %v8619_v49 }
0x1b1f   :  { %v7643_v61 = vpop.f32.mrb[22].mxu0 }
0x1b20   :  { %v7647_v4 = vadd.f32 %v7643_v61, %v7515_v3  ;;  %v7645_v53 = vpop.f32.mrb[23].mxu0  ;;  %v8625_v3 = vld [vmem:[%s12851_s27 + $0x78] sm:$0xff]  ;;  %v8626_v61 = vld [vmem:[%s12851_s27 + $0x80] sm:$0xff] }
0x1b21   :  { %v10488_v53 = vpack.c.bf16 %v8626_v61, %v8625_v3 }
0x1b3f   :  { %v7767_v54 = vpop.f32.mrb[26].mxu1 }
0x1b40   :  { %v7771_v5 = vadd.f32 %v7767_v54, %v7647_v4  ;;  %v7769_v52 = vpop.f32.mrb[27].mxu1  ;;  %v8621_v4 = vld [vmem:[%s12851_s27 + $0x70] sm:$0xff]  ;;  %v8627_v54 = vld [vmem:[%s12851_s27 + $0x88] sm:$0xff] }
0x1b42   :  { %v7772_v56 = vadd.f32 %v7771_v5, %v12567_v55  ;;  %v7820_v55 = vld [vmem:[%s12851_s27 + $0x20] sm:$0xff]  ;;  %v8628_v5 = vld [vmem:[%s12851_s27 + $0x90] sm:$0xff] }
0x1b44   :  { %v7780_v57 = vrot.slane %v7772_v56, %v12372_v35  ;;  %v10491_v56 = vpack.c.bf16 %v8628_v5, %v8627_v54 }
0x1b46   :  { %v7788_v58 = vrot.slane %v7780_v57, %v12372_v35  ;;  %v7781_v59 = vcombine.high %v7780_v57, %v7780_v57  ;;  %v8629_v57 = vld [vmem:[%s12851_s27 + $0x98] sm:$0xff] }
0x1b48   :  { %v7796_v60 = vrot.slane %v7788_v58, 7  ;;  %v7795_v7 = vrot.slane %v7781_v59, %v12372_v35  ;;  %v10473_v35 = vpack.c.bf16 %v7819_v62, %v7818_v8  ;;  %v8178_v59 = vld [vmem:[%s12852_s11 + $0x60] sm:$0xff]  ;;  %v8264_v8 = vld [vmem:[%s12853_s18 + $0x8] sm:$0xff] }
0x1b4a   :  { %7798 = vrot.lane.b32.xlu0 %v7796_v60, %s11203_s1  ;;  %v7797_v9 = vrot.slane %v7795_v7, 7  ;;  %10474 = vmatpush3.bf16.msra.mxu0 %v10473_v35  ;;  %v8179_v60 = vld [vmem:[%s12852_s11 + $0x68] sm:$0xff] }
0x1b4b   :  { %8693 = vmatprep.subr.mxu0 %v11201_v30  ;;  %v10512_v7 = vpack.c.bf16 %v8179_v60, %v8178_v59 }
0x1b4c   :  { %7800 = vrot.lane.b32.xlu1 %v7797_v9, %s11203_s1  ;;  %v8180_v9 = vld [vmem:[%s12852_s11 + $0x70] sm:$0xff] }
0x1b4d   :  { %10513 = vmatpush3.bf16.msra.mxu1 %v10512_v7 }
0x1b4e   :  { %8694 = vmatpush3.msra.mxu0 %v7820_v55  ;;  %8765 = vmatprep.subr.mxu1 %v11201_v30  ;;  %v10515_v55 = vpack.c.bf16 %v8264_v8, %v8263_v47 }
0x1b4f   :  { %10475 = vmatprep.subr.bf16.mxu0 %v11200_v1 }
0x1b51   :  { %8766 = vmatpush3.msra.mxu1 %v8180_v9 }
0x1b52   :  { %10514 = vmatprep.subr.bf16.mxu1 %v11200_v1 }
0x1bbc   :  { %v7799_v11 = vpop.permute.xlu0 %7798 }
0x1bbd   :  { %7804 = vst.msk [vmem:[#allocation3] sm:$0x6] %vm5289_vm3, %v7799_v11 }
0x1bbe   :  { %v7801_v13 = vpop.permute.xlu1 %7800 }
0x1bbf   :  { %7805 = vst.msk [vmem:[#allocation3 + $0x8] sm:$0x6] %vm5289_vm3, %v7801_v13  ;;  %v8265_v13 = vld [vmem:[%s12853_s18 + $0x10] sm:$0xff] }
0x1bc4   :  { %v8608_v0 = vld [vmem:[#allocation3 + $0x1] ss:$0 sm:$0xff]  ;;  %v8622_v21 = vld [vmem:[#allocation3 + $0x2] ss:$0 sm:$0xff] }
0x1bc6   :  { %v8609_v15 = vld [vmem:[#allocation3 + $0x9] ss:$0 sm:$0xff]  ;;  %v8623_v16 = vld [vmem:[#allocation3 + $0xa] ss:$0 sm:$0xff] }
0x1bc7   :  { %v7832_v24 = vsel %vm7831_vm0, %v8609_v15, %v8608_v0  ;;  %v8008_v6 = vsel %vm7831_vm0, %v8623_v16, %v8622_v21  ;;  %v8266_v0 = vld [vmem:[%s12853_s18 + $0x18] sm:$0xff]  ;;  %v8268_v16 = vld [vmem:[%s12853_s18 + $0x28] sm:$0xff] }
0x1bc8   :  { %7915 = vrot.lane.b32.xlu1 %v7832_v24, %s11209_s16  ;;  %7833 = vrot.lane.b32.xlu0 %v7832_v24, %s11210_s15  ;;  %v10518_v15 = vpack.c.bf16 %v8266_v0, %v8265_v13  ;;  %v8267_v24 = vld [vmem:[%s12853_s18 + $0x20] sm:$0xff] }
0x1bc9   :  { %v10521_v21 = vpack.c.bf16 %v8268_v16, %v8267_v24 }
0x1bcc   :  { %8090 = vrot.lane.b32.xlu1 %v8008_v6, %s11209_s16  ;;  %8009 = vrot.lane.b32.xlu0 %v8008_v6, %s11210_s15  ;;  %v8269_v6 = vld [vmem:[%s12853_s18 + $0x30] sm:$0xff] }
0x1bcd   :  { %v10524_v14 = vpack.c.bf16 %v8270_v12, %v8269_v6 }
0x1c3a   :  { %v7834_v43 = vpop.permute.xlu0 %7833  ;;  %v7916_v50 = vpop.permute.xlu1 %7915 }
0x1c3b   :  { %8696 = vmatmul.mubr.msk.f32.vlgmr.msra.gmra.mrb[24].mxu0 %vm7835_vm7, %v7834_v43 }
0x1c3c   :  { %10477 = vmatpush3.bf16.msra.mxu0 %v10476_v41  ;;  %8708 = vmatprep.mubr.msk.f32.mxu0 %vm11208_vm5, %v11201_v30 }
0x1c3d   :  { %10478 = vmatprep.subr.bf16.mxu0 %v11200_v1 }
0x1c3e   :  { %v8010_v52 = vpop.permute.xlu0 %8009  ;;  %v8091_v58 = vpop.permute.xlu1 %8090 }
0x1c40   :  { %10480 = vmatpush3.bf16.msra.mxu0 %v10479_v44 }
0x1c41   :  { %8706 = vmatprep.subr.mxu0 %v11201_v30 }
0x1c44   :  { %8707 = vmatpush3.msra.mxu0 %v8615_v46 }
0x1c45   :  { %8709 = vmatmul.mubr.msk.f32.vlgmr.msra.gmra.mrb[24].mxu0 %vm7835_vm7, %v7916_v50  ;;  %10481 = vmatprep.subr.bf16.mxu0 %v11200_v1 }
0x1c46   :  { %10483 = vmatpush3.bf16.msra.mxu0 %v10482_v38  ;;  %8721 = vmatprep.mubr.msk.f32.mxu0 %vm11208_vm5, %v11201_v30 }
0x1c47   :  { %10484 = vmatprep.subr.bf16.mxu0 %v11200_v1 }
0x1c4a   :  { %10486 = vmatpush3.bf16.msra.mxu0 %v10485_v2 }
0x1c4b   :  { %8719 = vmatprep.subr.mxu0 %v11201_v30 }
0x1c4e   :  { %8720 = vmatpush3.msra.mxu0 %v8621_v4 }
0x1c4f   :  { %8722 = vmatmul.mubr.msk.f32.vlgmr.msra.gmra.mrb[24].mxu0 %vm7835_vm7, %v8010_v52  ;;  %10487 = vmatprep.subr.bf16.mxu0 %v11200_v1 }
0x1c50   :  { %10489 = vmatpush3.bf16.msra.mxu0 %v10488_v53  ;;  %8734 = vmatprep.mubr.msk.f32.mxu0 %vm11208_vm5, %v11201_v30 }
0x1c51   :  { %10490 = vmatprep.subr.bf16.mxu0 %v11200_v1 }
0x1c54   :  { %10492 = vmatpush3.bf16.msra.mxu0 %v10491_v56 }
0x1c55   :  { %8732 = vmatprep.subr.mxu0 %v11201_v30 }
0x1c58   :  { %8733 = vmatpush3.msra.mxu0 %v8629_v57 }
0x1c59   :  { %8735 = vmatmul.mubr.msk.f32.vlgmr.msra.gmra.mrb[24].mxu0 %vm7835_vm7, %v8091_v58 }
0x1d2c   :  { %v8160_v10 = vpop.f32.mrb[24].mxu0 }
0x1d2d   :  { %v10537_v62 = vadd.f32 %v8607_v23, %v8160_v10  ;;  %v8736_v35 = vpop.f32.mrb[25].mxu0 }
0x1d2f   :  { %v8165_v11 = vmax.f32 %v10537_v62, 0.0 }
0x1d31   :  { %8768 = vmatmul.mubr.msk.f32.vlgmr.msra.gmra.mrb[28].mxu1 %vm8188_vm8, %v8165_v11 }
0x1d32   :  { %10516 = vmatpush3.bf16.msra.mxu1 %v10515_v55  ;;  %8786 = vmatprep.mubr.msk.f32.mxu1 %vm11208_vm5, %v11201_v30  ;;  %v8631_v30 = vld [vmem:[%s11385_s5] ss:$0 sm:$0xff] }
0x1d33   :  { %10517 = vmatprep.subr.bf16.mxu1 %v11200_v1 }
0x1d36   :  { %10519 = vmatpush3.bf16.msra.mxu1 %v10518_v15 }
0x1d37   :  { %10520 = vmatprep.subr.bf16.mxu1 %v11200_v1 }
0x1d3a   :  { %10522 = vmatpush3.bf16.msra.mxu1 %v10521_v21 }
0x1d3b   :  { %10523 = vmatprep.subr.bf16.mxu1 %v11200_v1 }
0x1d3e   :  { %10526 = vmatpush3.bf16.msk.msra.mxu1 %vm10525_vm10, %v10524_v14 }
0x1e04   :  { %v8258_v17 = vpop.f32.mrb[28].mxu1 }
0x1e05   :  { %v8259_v18 = vadd.f32 %v8631_v30, %v8258_v17  ;;  %v8769_v19 = vpop.f32.mrb[29].mxu1 }
0x1e07   :  { %v8262_v20 = vmax.f32 %v8259_v18, 0.0 }
0x1e09   :  { %8787 = vmatmul.mubr.msk.f32.vlgmr.msra.gmra.mrb[30].mxu1 %vm8278_vm11, %v8262_v20 }
0x1edc   :  { %v8351_v25 = vpop.f32.mrb[30].mxu1 }
0x1edd   :  { %v8352_v26 = vadd.f32 %v8633_v22, %v8351_v25  ;;  %v8788_v1 = vpop.f32.mrb[31].mxu1 }
0x1edf   :  { %8356 = vst.msk [vmem:[%s11393_s14] sm:$0x3] %vm8355_vm12, %v8352_v26 }
0x1ee0   :  { %8361 = vsyncpa [#allocation6], 1 }
0x1ee1   :  { %8362 = vsyncpa [#allocation8], 1 }
0x1ee2   :  { %8363 = vsyncpa [#allocation11], 1 }
0x1ee3   :  { %8364 = vsyncpa [#allocation14], 1 }
0x1ee4   :  { %8365 = vsyncpa [#allocation17], 1 }
0x1ee5   :  { %8366 = vsyncpa [#allocation20], 1 }
0x1ee6   :  { %8367 = vsyncpa [#allocation23], 1 }
0x1ee7   :  { %8368 = vsyncpa [#allocation26], 1 }

</bundles_post_ra>
